<compile_context>
chip_gen: v7x
topology: tpu7x:2x2x1
jax: 0.10.0
libtpu: 0.0.40
codegen_flags: <defaults>
</compile_context>

<pallas_src>
import functools

import numpy as np
import jax
import jax.numpy as jnp
from jax import lax
from jax.experimental import pallas as pl
from jax.experimental.pallas import tpu as pltpu


def _round_up(n, m):
    return ((n + m - 1) // m) * m


# PyTorch nn.LSTM gate order is [i, f, g, o]; the kernel uses [i, f, o, g] so a
# single sigmoid covers a contiguous 3*Hp slab and a single tanh covers g.
_GATE_PERM = np.array([0, 1, 3, 2])


# ----------------------------------------------------------------------------
# In-kernel LSTM recurrence (input projection is pre-hoisted into xp_ref)
# ----------------------------------------------------------------------------
def _lstm_recurrence(xp_ref, whh_ref, T, Bp, Hp, h_all_ref=None):
    """Serial part of one LSTM layer.

    xp_ref    : VMEM scratch with x_t @ W_ih + (b_ih + b_hh) for all steps,
                time-major flattened (T*Bp rows); lanes [0, 4*Hp) are valid.
    whh_ref   : (Hp, 4*Hp) hidden->gate weights, gate order [i, f, o, g],
                padded rows/cols exactly zero.
    h_all_ref : optional VMEM scratch storing every h_t in lanes [0, Hp).
    Returns the final hidden state (Bp, Hp); padded lanes stay exactly 0.
    """

    def step(t, carry):
        h, c = carry
        off = pl.multiple_of(t * Bp, Bp)
        gates = (xp_ref[pl.ds(off, Bp), 0:4 * Hp]
                 + jnp.dot(h, whh_ref[...], preferred_element_type=jnp.float32))
        ifo = jax.nn.sigmoid(gates[:, 0:3 * Hp])          # [i | f | o], one EUP slab
        g = jnp.tanh(gates[:, 3 * Hp:4 * Hp])
        c_new = ifo[:, Hp:2 * Hp] * c + ifo[:, 0:Hp] * g
        h_new = ifo[:, 2 * Hp:3 * Hp] * jnp.tanh(c_new)
        if h_all_ref is not None:
            h_all_ref[pl.ds(off, Bp), 0:Hp] = h_new
        return (h_new, c_new)

    init = (jnp.zeros((Bp, Hp), jnp.float32), jnp.zeros((Bp, Hp), jnp.float32))
    h_last, _ = lax.fori_loop(0, T, step, init, unroll=True)
    return h_last


# ----------------------------------------------------------------------------
# Fused autoencoder kernel: encoder LSTM x2 -> latent repeat -> decoder LSTM x2
# -> output Linear, all VMEM-resident, one launch.
# ----------------------------------------------------------------------------
def _fused_ae_kernel(x_ref, s_ref,
                     wih1_ref, whh1_ref, b1_ref,
                     wih2_ref, whh2_ref, b2_ref,
                     wih3_ref, whh3_ref, b3_ref,
                     wih4_ref, whh4_ref, b4_ref,
                     wout_ref, bout_ref,
                     y_ref,
                     xp_sc, h_sc,
                     *, T, Bp):
    f32 = jnp.float32
    H1p = whh1_ref.shape[0]        # padded hidden of enc rnn1 / dec rnn2 (2E -> 128)
    Ep = whh2_ref.shape[0]         # padded hidden of enc rnn2 / dec rnn1 (E -> 128)

    # ---- encoder LSTM 1 : F -> H1p --------------------------------------
    xp_sc[:, 0:4 * H1p] = (
        jnp.dot(x_ref[...], wih1_ref[...], preferred_element_type=f32) + b1_ref[...])
    _lstm_recurrence(xp_sc, whh1_ref, T, Bp, H1p, h_all_ref=h_sc)

    # ---- encoder LSTM 2 : H1p -> Ep (only the last hidden = latent) -----
    xp_sc[:, 0:4 * Ep] = (
        jnp.dot(h_sc[:, 0:H1p], wih2_ref[...], preferred_element_type=f32) + b2_ref[...])
    latent = _lstm_recurrence(xp_sc, whh2_ref, T, Bp, Ep)          # (Bp, Ep)

    # ---- decoder input: project the Bp distinct latents once, then replicate
    # rows with the one-hot repeat matrix (exact torch repeat/reshape interleave).
    lat_proj = (jnp.dot(latent, wih3_ref[...], preferred_element_type=f32)
                + b3_ref[...])                                      # (Bp, 4*Ep)
    xp_sc[:, 0:4 * Ep] = jnp.dot(s_ref[...], lat_proj,
                                 preferred_element_type=f32)        # (T*Bp, 4*Ep)

    # ---- decoder LSTM 1 : Ep -> Ep ---------------------------------------
    _lstm_recurrence(xp_sc, whh3_ref, T, Bp, Ep, h_all_ref=h_sc)

    # ---- decoder LSTM 2 : Ep -> H1p --------------------------------------
    xp_sc[:, 0:4 * H1p] = (
        jnp.dot(h_sc[:, 0:Ep], wih4_ref[...], preferred_element_type=f32) + b4_ref[...])
    _lstm_recurrence(xp_sc, whh4_ref, T, Bp, H1p, h_all_ref=h_sc)

    # ---- output Linear: single lane-dense (128-multiple) store -----------
    y_ref[...] = (jnp.dot(h_sc[:, 0:H1p], wout_ref[...], preferred_element_type=f32)
                  + bout_ref[...])


# ----------------------------------------------------------------------------
# pallas_call wrapper
# ----------------------------------------------------------------------------
def _full_spec(arr):
    nd = arr.ndim
    return pl.BlockSpec(arr.shape, lambda i, _nd=nd: (0,) * _nd)


def _fused_ae_call(x_flat, S, p, *, T, Bp):
    wih1, whh1, b1 = p["enc_rnn1"]
    wih2, whh2, b2 = p["enc_rnn2"]
    wih3, whh3, b3 = p["dec_rnn1"]
    wih4, whh4, b4 = p["dec_rnn2"]
    w_out, b_out = p["out_w"], p["out_b"]

    TB = T * Bp
    H1p = whh1.shape[0]
    Ep = whh2.shape[0]
    Fp = w_out.shape[1]
    Wmax = max(H1p, Ep)

    inputs = (x_flat, S, wih1, whh1, b1, wih2, whh2, b2,
              wih3, whh3, b3, wih4, whh4, b4, w_out, b_out)

    return pl.pallas_call(
        functools.partial(_fused_ae_kernel, T=T, Bp=Bp),
        out_shape=jax.ShapeDtypeStruct((TB, Fp), jnp.float32),
        grid_spec=pltpu.PrefetchScalarGridSpec(
            num_scalar_prefetch=0,
            grid=(1,),
            in_specs=[_full_spec(a) for a in inputs],
            out_specs=pl.BlockSpec((TB, Fp), lambda i: (0, 0)),
            scratch_shapes=[
                pltpu.VMEM((TB, 4 * Wmax), jnp.float32),   # xp scratch (reused per layer)
                pltpu.VMEM((TB, Wmax), jnp.float32),       # h_all scratch (reused per layer)
            ],
        ),
        compiler_params=pltpu.CompilerParams(
            dimension_semantics=("arbitrary",)),
    )(*inputs)


# ----------------------------------------------------------------------------
# Parameter construction / packing (mirrors PyTorch nn.LSTM / nn.Linear)
# ----------------------------------------------------------------------------
def make_torch_params(key, n_features, embedding_dim):
    """Raw PyTorch-layout parameters (gate order [i, f, g, o])."""
    E, H1 = embedding_dim, 2 * embedding_dim

    def lstm(k, din, h):
        ks = jax.random.split(k, 4)
        bound = 1.0 / np.sqrt(h)
        return dict(
            w_ih=jax.random.uniform(ks[0], (4 * h, din), jnp.float32, -bound, bound),
            w_hh=jax.random.uniform(ks[1], (4 * h, h), jnp.float32, -bound, bound),
            b_ih=jax.random.uniform(ks[2], (4 * h,), jnp.float32, -bound, bound),
            b_hh=jax.random.uniform(ks[3], (4 * h,), jnp.float32, -bound, bound))

    keys = jax.random.split(key, 5)
    raw = {
        "enc_rnn1": lstm(keys[0], n_features, H1),
        "enc_rnn2": lstm(keys[1], H1, E),
        "dec_rnn1": lstm(keys[2], E, E),
        "dec_rnn2": lstm(keys[3], E, H1),
    }
    kw, kb = jax.random.split(keys[4])
    bound = 1.0 / np.sqrt(H1)
    raw["out_w"] = jax.random.uniform(kw, (n_features, H1), jnp.float32, -bound, bound)
    raw["out_b"] = jax.random.uniform(kb, (n_features,), jnp.float32, -bound, bound)
    return raw


def _pack_gate_cols(w, H, Hp):
    """(4H, K) torch rows [i|f|g|o] -> (K, 4*Hp) cols [i|f|o|g], gate-padded."""
    K = w.shape[1]
    g4 = w.reshape(4, H, K)[_GATE_PERM]                  # reorder gates
    g4 = jnp.pad(g4, ((0, 0), (0, Hp - H), (0, 0)))      # pad each gate to Hp
    return jnp.transpose(g4.reshape(4 * Hp, K))          # (K, 4*Hp)


def _pack_lstm(p, in_pad, hid_pad):
    H = p["w_hh"].shape[1]
    Din = p["w_ih"].shape[1]
    wih = _pack_gate_cols(p["w_ih"], H, hid_pad)                     # (Din, 4Hp)
    wih = jnp.pad(wih, ((0, in_pad - Din), (0, 0)))                  # (in_pad, 4Hp)
    whh = _pack_gate_cols(p["w_hh"], H, hid_pad)                     # (H, 4Hp)
    whh = jnp.pad(whh, ((0, hid_pad - H), (0, 0)))                   # (Hp, 4Hp)
    b = (p["b_ih"] + p["b_hh"]).reshape(4, H)[_GATE_PERM]
    b = jnp.pad(b, ((0, 0), (0, hid_pad - H))).reshape(1, 4 * hid_pad)
    return wih, whh, b


def pack_params(raw, n_features, embedding_dim):
    """Pack raw torch params into the lane-dense (128-padded) kernel layout."""
    E, H1 = embedding_dim, 2 * embedding_dim
    Ep = _round_up(E, 128)
    H1p = _round_up(H1, 128)
    Fp = _round_up(n_features, 128)
    p = {
        "enc_rnn1": _pack_lstm(raw["enc_rnn1"], in_pad=n_features, hid_pad=H1p),
        "enc_rnn2": _pack_lstm(raw["enc_rnn2"], in_pad=H1p, hid_pad=Ep),
        "dec_rnn1": _pack_lstm(raw["dec_rnn1"], in_pad=Ep, hid_pad=Ep),
        "dec_rnn2": _pack_lstm(raw["dec_rnn2"], in_pad=Ep, hid_pad=H1p),
        "out_w": jnp.zeros((H1p, Fp), jnp.float32).at[:H1, :n_features].set(raw["out_w"].T),
        "out_b": jnp.zeros((1, Fp), jnp.float32).at[0, :n_features].set(raw["out_b"]),
    }
    return p


# ----------------------------------------------------------------------------
# Full forward pass (Pallas)
# ----------------------------------------------------------------------------
@jax.jit
def recurrent_autoencoder_forward(x, kparams):
    """x: (B, T, F) batch-first, like the PyTorch module. Returns (B, T, F)."""
    B, T, F = x.shape
    Bp = _round_up(B, 8)                     # sublane-pad the batch
    Fp = kparams["out_w"].shape[1]

    # time-major, batch-padded, flattened input (T*Bp, F)
    x_tm = jnp.transpose(x, (1, 0, 2))
    x_tm = jnp.pad(x_tm, ((0, 0), (0, Bp - B), (0, 0)))
    x_flat = x_tm.reshape(T * Bp, F)

    # Compile-time-constant one-hot repeat matrix reproducing PyTorch's
    # x.repeat(seq_len, 1).reshape(batch, seq_len, dim) row interleave.
    r = np.arange(T * Bp)
    t_idx, b_idx = r // Bp, r % Bp
    tgt = (b_idx * T + t_idx) % B
    S = np.zeros((T * Bp, Bp), np.float32)
    S[r, tgt] = 1.0

    y = _fused_ae_call(x_flat, jnp.asarray(S), kparams, T=T, Bp=Bp)   # (T*Bp, Fp)
    y = y.reshape(T, Bp, Fp)[:, :B, :F]                               # drop padding
    return jnp.transpose(y, (1, 0, 2))                                # (B, T, F)


# ----------------------------------------------------------------------------
# Pure-JAX reference (PyTorch semantics, raw params) for the correctness check
# ----------------------------------------------------------------------------
def _lstm_ref(x_tm, p):
    H = p["w_hh"].shape[1]
    wih_t, whh_t = p["w_ih"].T, p["w_hh"].T
    b = p["b_ih"] + p["b_hh"]

    def step(carry, x_t):
        h, c = carry
        gates = x_t @ wih_t + h @ whh_t + b
        i = jax.nn.sigmoid(gates[:, 0:H])
        f = jax.nn.sigmoid(gates[:, H:2 * H])
        g = jnp.tanh(gates[:, 2 * H:3 * H])
        o = jax.nn.sigmoid(gates[:, 3 * H:4 * H])
        c_new = f * c + i * g
        h_new = o * jnp.tanh(c_new)
        return (h_new, c_new), h_new

    B = x_tm.shape[1]
    init = (jnp.zeros((B, H), jnp.float32), jnp.zeros((B, H), jnp.float32))
    _, hs = lax.scan(step, init, x_tm)
    return hs


def _forward_ref(x, raw):
    B, T, F = x.shape
    E = raw["enc_rnn2"]["w_hh"].shape[1]
    x_tm = jnp.transpose(x, (1, 0, 2))
    h1 = _lstm_ref(x_tm, raw["enc_rnn1"])
    h2 = _lstm_ref(h1, raw["enc_rnn2"])
    latent = h2[-1]                                           # (B, E)
    rep = jnp.tile(latent, (T, 1)).reshape(B, T, E)           # torch repeat semantics
    d1 = _lstm_ref(jnp.transpose(rep, (1, 0, 2)), raw["dec_rnn1"])
    d2 = _lstm_ref(d1, raw["dec_rnn2"])                        # (T, B, 2E)
    y = d2 @ raw["out_w"].T + raw["out_b"]                     # (T, B, F)
    return jnp.transpose(y, (1, 0, 2))


# ----------------------------------------------------------------------------
if __name__ == "__main__":
    batch, seq_len, n_features, embedding_dim = 2, 8, 4, 32

    key = jax.random.PRNGKey(0)
    kx, kp = jax.random.split(key)
    x = jax.random.normal(kx, (batch, seq_len, n_features), jnp.float32)

    raw_params = make_torch_params(kp, n_features, embedding_dim)
    kernel_params = pack_params(raw_params, n_features, embedding_dim)

    out = recurrent_autoencoder_forward(x, kernel_params)
    out = jax.block_until_ready(out)

    ref = _forward_ref(x, raw_params)
    assert out.shape == (batch, seq_len, n_features)
    assert jnp.allclose(out, ref, rtol=1e-4, atol=1e-4), "mismatch vs reference"

    print("KERNEL_OK")
</pallas_src>

<mosaic_0001>
module attributes {stable_mosaic.version = 11 : i64} {
  func.func @_fused_ae_kernel(%arg0: i32, %arg1: memref<64x4xf32, #tpu.memory_space<vmem>>, %arg2: memref<64x8xf32, #tpu.memory_space<vmem>>, %arg3: memref<4x512xf32, #tpu.memory_space<vmem>>, %arg4: memref<128x512xf32, #tpu.memory_space<vmem>>, %arg5: memref<1x512xf32, #tpu.memory_space<vmem>>, %arg6: memref<128x512xf32, #tpu.memory_space<vmem>>, %arg7: memref<128x512xf32, #tpu.memory_space<vmem>>, %arg8: memref<1x512xf32, #tpu.memory_space<vmem>>, %arg9: memref<128x512xf32, #tpu.memory_space<vmem>>, %arg10: memref<128x512xf32, #tpu.memory_space<vmem>>, %arg11: memref<1x512xf32, #tpu.memory_space<vmem>>, %arg12: memref<128x512xf32, #tpu.memory_space<vmem>>, %arg13: memref<128x512xf32, #tpu.memory_space<vmem>>, %arg14: memref<1x512xf32, #tpu.memory_space<vmem>>, %arg15: memref<128x128xf32, #tpu.memory_space<vmem>>, %arg16: memref<1x128xf32, #tpu.memory_space<vmem>>, %arg17: memref<64x128xf32, #tpu.memory_space<vmem>>, %arg18: memref<64x512xf32, #tpu.memory_space<vmem>>, %arg19: memref<64x128xf32, #tpu.memory_space<vmem>>) attributes {dimension_semantics = [#tpu.dimension_semantics<arbitrary>], iteration_bounds = array<i64: 1>, scalar_prefetch = 0 : i64, scratch_operands = 2 : i64, tpu.core_type = #tpu.core_type<tc>, window_params = [{pipeline_mode = #tpu.pipeline_mode<synchronous>, transform_indices = @transform_0, window_bounds = array<i64: 64, 4>}, {pipeline_mode = #tpu.pipeline_mode<synchronous>, transform_indices = @transform_1, window_bounds = array<i64: 64, 8>}, {pipeline_mode = #tpu.pipeline_mode<synchronous>, transform_indices = @transform_2, window_bounds = array<i64: 4, 512>}, {pipeline_mode = #tpu.pipeline_mode<synchronous>, transform_indices = @transform_3, window_bounds = array<i64: 128, 512>}, {pipeline_mode = #tpu.pipeline_mode<synchronous>, transform_indices = @transform_4, window_bounds = array<i64: 1, 512>}, {pipeline_mode = #tpu.pipeline_mode<synchronous>, transform_indices = @transform_5, window_bounds = array<i64: 128, 512>}, {pipeline_mode = #tpu.pipeline_mode<synchronous>, transform_indices = @transform_6, window_bounds = array<i64: 128, 512>}, {pipeline_mode = #tpu.pipeline_mode<synchronous>, transform_indices = @transform_7, window_bounds = array<i64: 1, 512>}, {pipeline_mode = #tpu.pipeline_mode<synchronous>, transform_indices = @transform_8, window_bounds = array<i64: 128, 512>}, {pipeline_mode = #tpu.pipeline_mode<synchronous>, transform_indices = @transform_9, window_bounds = array<i64: 128, 512>}, {pipeline_mode = #tpu.pipeline_mode<synchronous>, transform_indices = @transform_10, window_bounds = array<i64: 1, 512>}, {pipeline_mode = #tpu.pipeline_mode<synchronous>, transform_indices = @transform_11, window_bounds = array<i64: 128, 512>}, {pipeline_mode = #tpu.pipeline_mode<synchronous>, transform_indices = @transform_12, window_bounds = array<i64: 128, 512>}, {pipeline_mode = #tpu.pipeline_mode<synchronous>, transform_indices = @transform_13, window_bounds = array<i64: 1, 512>}, {pipeline_mode = #tpu.pipeline_mode<synchronous>, transform_indices = @transform_14, window_bounds = array<i64: 128, 128>}, {pipeline_mode = #tpu.pipeline_mode<synchronous>, transform_indices = @transform_15, window_bounds = array<i64: 1, 128>}, {pipeline_mode = #tpu.pipeline_mode<synchronous>, transform_indices = @transform_16, window_bounds = array<i64: 64, 128>}]} {
    %c0 = arith.constant 0 : index
    %c0_0 = arith.constant 0 : index
    %0 = vector.load %arg1[%c0, %c0_0] : memref<64x4xf32, #tpu.memory_space<vmem>>, vector<64x4xf32>
    %c0_1 = arith.constant 0 : index
    %c0_2 = arith.constant 0 : index
    %1 = vector.load %arg3[%c0_1, %c0_2] : memref<4x512xf32, #tpu.memory_space<vmem>>, vector<4x512xf32>
    %cst = arith.constant dense<0.000000e+00> : vector<64x512xf32>
    %2 = tpu.matmul %0, %1, %cst {dimension_numbers = #tpu.dot_dimension_numbers<[1], [0], [0], [1], [0, 0, 1, 1], [], []>} : vector<64x4xf32>, vector<4x512xf32>, vector<64x512xf32> -> vector<64x512xf32>
    %c0_3 = arith.constant 0 : index
    %c0_4 = arith.constant 0 : index
    %3 = vector.load %arg5[%c0_3, %c0_4] : memref<1x512xf32, #tpu.memory_space<vmem>>, vector<1x512xf32>
    %4 = vector.broadcast %3 : vector<1x512xf32> to vector<64x512xf32>
    %5 = arith.addf %2, %4 : vector<64x512xf32>
    %c0_5 = arith.constant 0 : index
    %c0_6 = arith.constant 0 : index
    %6 = vector.load %arg18[%c0_5, %c0_6] : memref<64x512xf32, #tpu.memory_space<vmem>>, vector<64x512xf32>
    tpu.vector_store %arg18[%c0_5, %c0_6], %5 {strides = array<i32>} : memref<64x512xf32, #tpu.memory_space<vmem>>, vector<64x512xf32>,
    %cst_7 = arith.constant 0.000000e+00 : f32
    %7 = vector.broadcast %cst_7 : f32 to vector<8x128xf32>
    %cst_8 = arith.constant 0.000000e+00 : f32
    %8 = vector.broadcast %cst_8 : f32 to vector<8x128xf32>
    %c0_i32 = arith.constant 0 : i32
    %c8_i32 = arith.constant 8 : i32
    %9 = arith.muli %c0_i32, %c8_i32 : i32
    %10 = tpu.assume_multiple %9, 8 : i32
    %11 = arith.index_cast %10 : i32 to index
    %c0_9 = arith.constant 0 : index
    %12 = vector.load %arg18[%11, %c0_9] : memref<64x512xf32, #tpu.memory_space<vmem>>, vector<8x512xf32>
    %c0_10 = arith.constant 0 : index
    %c0_11 = arith.constant 0 : index
    %13 = vector.load %arg4[%c0_10, %c0_11] : memref<128x512xf32, #tpu.memory_space<vmem>>, vector<128x512xf32>
    %cst_12 = arith.constant dense<0.000000e+00> : vector<8x512xf32>
    %14 = tpu.matmul %7, %13, %cst_12 {dimension_numbers = #tpu.dot_dimension_numbers<[1], [0], [0], [1], [0, 0, 1, 1], [], []>} : vector<8x128xf32>, vector<128x512xf32>, vector<8x512xf32> -> vector<8x512xf32>
    %15 = arith.addf %12, %14 : vector<8x512xf32>
    %16 = vector.extract_strided_slice %15 {offsets = [0, 0], sizes = [8, 384], strides = [1, 1]} : vector<8x512xf32> to vector<8x384xf32>
    %17 = arith.negf %16 : vector<8x384xf32>
    %18 = math.exp %17 : vector<8x384xf32>
    %cst_13 = arith.constant 1.000000e+00 : f32
    %19 = vector.broadcast %cst_13 : f32 to vector<8x384xf32>
    %20 = arith.addf %19, %18 : vector<8x384xf32>
    %21 = arith.divf %19, %20 : vector<8x384xf32>
    %22 = vector.extract_strided_slice %15 {offsets = [0, 384], sizes = [8, 128], strides = [1, 1]} : vector<8x512xf32> to vector<8x128xf32>
    %23 = math.tanh %22 : vector<8x128xf32>
    %24 = vector.extract_strided_slice %21 {offsets = [0, 128], sizes = [8, 128], strides = [1, 1]} : vector<8x384xf32> to vector<8x128xf32>
    %25 = arith.mulf %24, %8 : vector<8x128xf32>
    %26 = vector.extract_strided_slice %21 {offsets = [0, 0], sizes = [8, 128], strides = [1, 1]} : vector<8x384xf32> to vector<8x128xf32>
    %27 = arith.mulf %26, %23 : vector<8x128xf32>
    %28 = arith.addf %25, %27 : vector<8x128xf32>
    %29 = vector.extract_strided_slice %21 {offsets = [0, 256], sizes = [8, 128], strides = [1, 1]} : vector<8x384xf32> to vector<8x128xf32>
    %30 = math.tanh %28 : vector<8x128xf32>
    %31 = arith.mulf %29, %30 : vector<8x128xf32>
    %32 = arith.index_cast %10 : i32 to index
    %c0_14 = arith.constant 0 : index
    %33 = vector.load %arg19[%32, %c0_14] : memref<64x128xf32, #tpu.memory_space<vmem>>, vector<8x128xf32>
    tpu.vector_store %arg19[%32, %c0_14], %31 {strides = array<i32>} : memref<64x128xf32, #tpu.memory_space<vmem>>, vector<8x128xf32>,
    %c1_i32 = arith.constant 1 : i32
    %c8_i32_15 = arith.constant 8 : i32
    %34 = arith.muli %c1_i32, %c8_i32_15 : i32
    %35 = tpu.assume_multiple %34, 8 : i32
    %36 = arith.index_cast %35 : i32 to index
    %c0_16 = arith.constant 0 : index
    %37 = vector.load %arg18[%36, %c0_16] : memref<64x512xf32, #tpu.memory_space<vmem>>, vector<8x512xf32>
    %c0_17 = arith.constant 0 : index
    %c0_18 = arith.constant 0 : index
    %38 = vector.load %arg4[%c0_17, %c0_18] : memref<128x512xf32, #tpu.memory_space<vmem>>, vector<128x512xf32>
    %cst_19 = arith.constant dense<0.000000e+00> : vector<8x512xf32>
    %39 = tpu.matmul %31, %38, %cst_19 {dimension_numbers = #tpu.dot_dimension_numbers<[1], [0], [0], [1], [0, 0, 1, 1], [], []>} : vector<8x128xf32>, vector<128x512xf32>, vector<8x512xf32> -> vector<8x512xf32>
    %40 = arith.addf %37, %39 : vector<8x512xf32>
    %41 = vector.extract_strided_slice %40 {offsets = [0, 0], sizes = [8, 384], strides = [1, 1]} : vector<8x512xf32> to vector<8x384xf32>
    %42 = arith.negf %41 : vector<8x384xf32>
    %43 = math.exp %42 : vector<8x384xf32>
    %cst_20 = arith.constant 1.000000e+00 : f32
    %44 = vector.broadcast %cst_20 : f32 to vector<8x384xf32>
    %45 = arith.addf %44, %43 : vector<8x384xf32>
    %46 = arith.divf %44, %45 : vector<8x384xf32>
    %47 = vector.extract_strided_slice %40 {offsets = [0, 384], sizes = [8, 128], strides = [1, 1]} : vector<8x512xf32> to vector<8x128xf32>
    %48 = math.tanh %47 : vector<8x128xf32>
    %49 = vector.extract_strided_slice %46 {offsets = [0, 128], sizes = [8, 128], strides = [1, 1]} : vector<8x384xf32> to vector<8x128xf32>
    %50 = arith.mulf %49, %28 : vector<8x128xf32>
    %51 = vector.extract_strided_slice %46 {offsets = [0, 0], sizes = [8, 128], strides = [1, 1]} : vector<8x384xf32> to vector<8x128xf32>
    %52 = arith.mulf %51, %48 : vector<8x128xf32>
    %53 = arith.addf %50, %52 : vector<8x128xf32>
    %54 = vector.extract_strided_slice %46 {offsets = [0, 256], sizes = [8, 128], strides = [1, 1]} : vector<8x384xf32> to vector<8x128xf32>
    %55 = math.tanh %53 : vector<8x128xf32>
    %56 = arith.mulf %54, %55 : vector<8x128xf32>
    %57 = arith.index_cast %35 : i32 to index
    %c0_21 = arith.constant 0 : index
    %58 = vector.load %arg19[%57, %c0_21] : memref<64x128xf32, #tpu.memory_space<vmem>>, vector<8x128xf32>
    tpu.vector_store %arg19[%57, %c0_21], %56 {strides = array<i32>} : memref<64x128xf32, #tpu.memory_space<vmem>>, vector<8x128xf32>,
    %c2_i32 = arith.constant 2 : i32
    %c8_i32_22 = arith.constant 8 : i32
    %59 = arith.muli %c2_i32, %c8_i32_22 : i32
    %60 = tpu.assume_multiple %59, 8 : i32
    %61 = arith.index_cast %60 : i32 to index
    %c0_23 = arith.constant 0 : index
    %62 = vector.load %arg18[%61, %c0_23] : memref<64x512xf32, #tpu.memory_space<vmem>>, vector<8x512xf32>
    %c0_24 = arith.constant 0 : index
    %c0_25 = arith.constant 0 : index
    %63 = vector.load %arg4[%c0_24, %c0_25] : memref<128x512xf32, #tpu.memory_space<vmem>>, vector<128x512xf32>
    %cst_26 = arith.constant dense<0.000000e+00> : vector<8x512xf32>
    %64 = tpu.matmul %56, %63, %cst_26 {dimension_numbers = #tpu.dot_dimension_numbers<[1], [0], [0], [1], [0, 0, 1, 1], [], []>} : vector<8x128xf32>, vector<128x512xf32>, vector<8x512xf32> -> vector<8x512xf32>
    %65 = arith.addf %62, %64 : vector<8x512xf32>
    %66 = vector.extract_strided_slice %65 {offsets = [0, 0], sizes = [8, 384], strides = [1, 1]} : vector<8x512xf32> to vector<8x384xf32>
    %67 = arith.negf %66 : vector<8x384xf32>
    %68 = math.exp %67 : vector<8x384xf32>
    %cst_27 = arith.constant 1.000000e+00 : f32
    %69 = vector.broadcast %cst_27 : f32 to vector<8x384xf32>
    %70 = arith.addf %69, %68 : vector<8x384xf32>
    %71 = arith.divf %69, %70 : vector<8x384xf32>
    %72 = vector.extract_strided_slice %65 {offsets = [0, 384], sizes = [8, 128], strides = [1, 1]} : vector<8x512xf32> to vector<8x128xf32>
    %73 = math.tanh %72 : vector<8x128xf32>
    %74 = vector.extract_strided_slice %71 {offsets = [0, 128], sizes = [8, 128], strides = [1, 1]} : vector<8x384xf32> to vector<8x128xf32>
    %75 = arith.mulf %74, %53 : vector<8x128xf32>
    %76 = vector.extract_strided_slice %71 {offsets = [0, 0], sizes = [8, 128], strides = [1, 1]} : vector<8x384xf32> to vector<8x128xf32>
    %77 = arith.mulf %76, %73 : vector<8x128xf32>
    %78 = arith.addf %75, %77 : vector<8x128xf32>
    %79 = vector.extract_strided_slice %71 {offsets = [0, 256], sizes = [8, 128], strides = [1, 1]} : vector<8x384xf32> to vector<8x128xf32>
    %80 = math.tanh %78 : vector<8x128xf32>
    %81 = arith.mulf %79, %80 : vector<8x128xf32>
    %82 = arith.index_cast %60 : i32 to index
    %c0_28 = arith.constant 0 : index
    %83 = vector.load %arg19[%82, %c0_28] : memref<64x128xf32, #tpu.memory_space<vmem>>, vector<8x128xf32>
    tpu.vector_store %arg19[%82, %c0_28], %81 {strides = array<i32>} : memref<64x128xf32, #tpu.memory_space<vmem>>, vector<8x128xf32>,
    %c3_i32 = arith.constant 3 : i32
    %c8_i32_29 = arith.constant 8 : i32
    %84 = arith.muli %c3_i32, %c8_i32_29 : i32
    %85 = tpu.assume_multiple %84, 8 : i32
    %86 = arith.index_cast %85 : i32 to index
    %c0_30 = arith.constant 0 : index
    %87 = vector.load %arg18[%86, %c0_30] : memref<64x512xf32, #tpu.memory_space<vmem>>, vector<8x512xf32>
    %c0_31 = arith.constant 0 : index
    %c0_32 = arith.constant 0 : index
    %88 = vector.load %arg4[%c0_31, %c0_32] : memref<128x512xf32, #tpu.memory_space<vmem>>, vector<128x512xf32>
    %cst_33 = arith.constant dense<0.000000e+00> : vector<8x512xf32>
    %89 = tpu.matmul %81, %88, %cst_33 {dimension_numbers = #tpu.dot_dimension_numbers<[1], [0], [0], [1], [0, 0, 1, 1], [], []>} : vector<8x128xf32>, vector<128x512xf32>, vector<8x512xf32> -> vector<8x512xf32>
    %90 = arith.addf %87, %89 : vector<8x512xf32>
    %91 = vector.extract_strided_slice %90 {offsets = [0, 0], sizes = [8, 384], strides = [1, 1]} : vector<8x512xf32> to vector<8x384xf32>
    %92 = arith.negf %91 : vector<8x384xf32>
    %93 = math.exp %92 : vector<8x384xf32>
    %cst_34 = arith.constant 1.000000e+00 : f32
    %94 = vector.broadcast %cst_34 : f32 to vector<8x384xf32>
    %95 = arith.addf %94, %93 : vector<8x384xf32>
    %96 = arith.divf %94, %95 : vector<8x384xf32>
    %97 = vector.extract_strided_slice %90 {offsets = [0, 384], sizes = [8, 128], strides = [1, 1]} : vector<8x512xf32> to vector<8x128xf32>
    %98 = math.tanh %97 : vector<8x128xf32>
    %99 = vector.extract_strided_slice %96 {offsets = [0, 128], sizes = [8, 128], strides = [1, 1]} : vector<8x384xf32> to vector<8x128xf32>
    %100 = arith.mulf %99, %78 : vector<8x128xf32>
    %101 = vector.extract_strided_slice %96 {offsets = [0, 0], sizes = [8, 128], strides = [1, 1]} : vector<8x384xf32> to vector<8x128xf32>
    %102 = arith.mulf %101, %98 : vector<8x128xf32>
    %103 = arith.addf %100, %102 : vector<8x128xf32>
    %104 = vector.extract_strided_slice %96 {offsets = [0, 256], sizes = [8, 128], strides = [1, 1]} : vector<8x384xf32> to vector<8x128xf32>
    %105 = math.tanh %103 : vector<8x128xf32>
    %106 = arith.mulf %104, %105 : vector<8x128xf32>
    %107 = arith.index_cast %85 : i32 to index
    %c0_35 = arith.constant 0 : index
    %108 = vector.load %arg19[%107, %c0_35] : memref<64x128xf32, #tpu.memory_space<vmem>>, vector<8x128xf32>
    tpu.vector_store %arg19[%107, %c0_35], %106 {strides = array<i32>} : memref<64x128xf32, #tpu.memory_space<vmem>>, vector<8x128xf32>,
    %c4_i32 = arith.constant 4 : i32
    %c8_i32_36 = arith.constant 8 : i32
    %109 = arith.muli %c4_i32, %c8_i32_36 : i32
    %110 = tpu.assume_multiple %109, 8 : i32
    %111 = arith.index_cast %110 : i32 to index
    %c0_37 = arith.constant 0 : index
    %112 = vector.load %arg18[%111, %c0_37] : memref<64x512xf32, #tpu.memory_space<vmem>>, vector<8x512xf32>
    %c0_38 = arith.constant 0 : index
    %c0_39 = arith.constant 0 : index
    %113 = vector.load %arg4[%c0_38, %c0_39] : memref<128x512xf32, #tpu.memory_space<vmem>>, vector<128x512xf32>
    %cst_40 = arith.constant dense<0.000000e+00> : vector<8x512xf32>
    %114 = tpu.matmul %106, %113, %cst_40 {dimension_numbers = #tpu.dot_dimension_numbers<[1], [0], [0], [1], [0, 0, 1, 1], [], []>} : vector<8x128xf32>, vector<128x512xf32>, vector<8x512xf32> -> vector<8x512xf32>
    %115 = arith.addf %112, %114 : vector<8x512xf32>
    %116 = vector.extract_strided_slice %115 {offsets = [0, 0], sizes = [8, 384], strides = [1, 1]} : vector<8x512xf32> to vector<8x384xf32>
    %117 = arith.negf %116 : vector<8x384xf32>
    %118 = math.exp %117 : vector<8x384xf32>
    %cst_41 = arith.constant 1.000000e+00 : f32
    %119 = vector.broadcast %cst_41 : f32 to vector<8x384xf32>
    %120 = arith.addf %119, %118 : vector<8x384xf32>
    %121 = arith.divf %119, %120 : vector<8x384xf32>
    %122 = vector.extract_strided_slice %115 {offsets = [0, 384], sizes = [8, 128], strides = [1, 1]} : vector<8x512xf32> to vector<8x128xf32>
    %123 = math.tanh %122 : vector<8x128xf32>
    %124 = vector.extract_strided_slice %121 {offsets = [0, 128], sizes = [8, 128], strides = [1, 1]} : vector<8x384xf32> to vector<8x128xf32>
    %125 = arith.mulf %124, %103 : vector<8x128xf32>
    %126 = vector.extract_strided_slice %121 {offsets = [0, 0], sizes = [8, 128], strides = [1, 1]} : vector<8x384xf32> to vector<8x128xf32>
    %127 = arith.mulf %126, %123 : vector<8x128xf32>
    %128 = arith.addf %125, %127 : vector<8x128xf32>
    %129 = vector.extract_strided_slice %121 {offsets = [0, 256], sizes = [8, 128], strides = [1, 1]} : vector<8x384xf32> to vector<8x128xf32>
    %130 = math.tanh %128 : vector<8x128xf32>
    %131 = arith.mulf %129, %130 : vector<8x128xf32>
    %132 = arith.index_cast %110 : i32 to index
    %c0_42 = arith.constant 0 : index
    %133 = vector.load %arg19[%132, %c0_42] : memref<64x128xf32, #tpu.memory_space<vmem>>, vector<8x128xf32>
    tpu.vector_store %arg19[%132, %c0_42], %131 {strides = array<i32>} : memref<64x128xf32, #tpu.memory_space<vmem>>, vector<8x128xf32>,
    %c5_i32 = arith.constant 5 : i32
    %c8_i32_43 = arith.constant 8 : i32
    %134 = arith.muli %c5_i32, %c8_i32_43 : i32
    %135 = tpu.assume_multiple %134, 8 : i32
    %136 = arith.index_cast %135 : i32 to index
    %c0_44 = arith.constant 0 : index
    %137 = vector.load %arg18[%136, %c0_44] : memref<64x512xf32, #tpu.memory_space<vmem>>, vector<8x512xf32>
    %c0_45 = arith.constant 0 : index
    %c0_46 = arith.constant 0 : index
    %138 = vector.load %arg4[%c0_45, %c0_46] : memref<128x512xf32, #tpu.memory_space<vmem>>, vector<128x512xf32>
    %cst_47 = arith.constant dense<0.000000e+00> : vector<8x512xf32>
    %139 = tpu.matmul %131, %138, %cst_47 {dimension_numbers = #tpu.dot_dimension_numbers<[1], [0], [0], [1], [0, 0, 1, 1], [], []>} : vector<8x128xf32>, vector<128x512xf32>, vector<8x512xf32> -> vector<8x512xf32>
    %140 = arith.addf %137, %139 : vector<8x512xf32>
    %141 = vector.extract_strided_slice %140 {offsets = [0, 0], sizes = [8, 384], strides = [1, 1]} : vector<8x512xf32> to vector<8x384xf32>
    %142 = arith.negf %141 : vector<8x384xf32>
    %143 = math.exp %142 : vector<8x384xf32>
    %cst_48 = arith.constant 1.000000e+00 : f32
    %144 = vector.broadcast %cst_48 : f32 to vector<8x384xf32>
    %145 = arith.addf %144, %143 : vector<8x384xf32>
    %146 = arith.divf %144, %145 : vector<8x384xf32>
    %147 = vector.extract_strided_slice %140 {offsets = [0, 384], sizes = [8, 128], strides = [1, 1]} : vector<8x512xf32> to vector<8x128xf32>
    %148 = math.tanh %147 : vector<8x128xf32>
    %149 = vector.extract_strided_slice %146 {offsets = [0, 128], sizes = [8, 128], strides = [1, 1]} : vector<8x384xf32> to vector<8x128xf32>
    %150 = arith.mulf %149, %128 : vector<8x128xf32>
    %151 = vector.extract_strided_slice %146 {offsets = [0, 0], sizes = [8, 128], strides = [1, 1]} : vector<8x384xf32> to vector<8x128xf32>
    %152 = arith.mulf %151, %148 : vector<8x128xf32>
    %153 = arith.addf %150, %152 : vector<8x128xf32>
    %154 = vector.extract_strided_slice %146 {offsets = [0, 256], sizes = [8, 128], strides = [1, 1]} : vector<8x384xf32> to vector<8x128xf32>
    %155 = math.tanh %153 : vector<8x128xf32>
    %156 = arith.mulf %154, %155 : vector<8x128xf32>
    %157 = arith.index_cast %135 : i32 to index
    %c0_49 = arith.constant 0 : index
    %158 = vector.load %arg19[%157, %c0_49] : memref<64x128xf32, #tpu.memory_space<vmem>>, vector<8x128xf32>
    tpu.vector_store %arg19[%157, %c0_49], %156 {strides = array<i32>} : memref<64x128xf32, #tpu.memory_space<vmem>>, vector<8x128xf32>,
    %c6_i32 = arith.constant 6 : i32
    %c8_i32_50 = arith.constant 8 : i32
    %159 = arith.muli %c6_i32, %c8_i32_50 : i32
    %160 = tpu.assume_multiple %159, 8 : i32
    %161 = arith.index_cast %160 : i32 to index
    %c0_51 = arith.constant 0 : index
    %162 = vector.load %arg18[%161, %c0_51] : memref<64x512xf32, #tpu.memory_space<vmem>>, vector<8x512xf32>
    %c0_52 = arith.constant 0 : index
    %c0_53 = arith.constant 0 : index
    %163 = vector.load %arg4[%c0_52, %c0_53] : memref<128x512xf32, #tpu.memory_space<vmem>>, vector<128x512xf32>
    %cst_54 = arith.constant dense<0.000000e+00> : vector<8x512xf32>
    %164 = tpu.matmul %156, %163, %cst_54 {dimension_numbers = #tpu.dot_dimension_numbers<[1], [0], [0], [1], [0, 0, 1, 1], [], []>} : vector<8x128xf32>, vector<128x512xf32>, vector<8x512xf32> -> vector<8x512xf32>
    %165 = arith.addf %162, %164 : vector<8x512xf32>
    %166 = vector.extract_strided_slice %165 {offsets = [0, 0], sizes = [8, 384], strides = [1, 1]} : vector<8x512xf32> to vector<8x384xf32>
    %167 = arith.negf %166 : vector<8x384xf32>
    %168 = math.exp %167 : vector<8x384xf32>
    %cst_55 = arith.constant 1.000000e+00 : f32
    %169 = vector.broadcast %cst_55 : f32 to vector<8x384xf32>
    %170 = arith.addf %169, %168 : vector<8x384xf32>
    %171 = arith.divf %169, %170 : vector<8x384xf32>
    %172 = vector.extract_strided_slice %165 {offsets = [0, 384], sizes = [8, 128], strides = [1, 1]} : vector<8x512xf32> to vector<8x128xf32>
    %173 = math.tanh %172 : vector<8x128xf32>
    %174 = vector.extract_strided_slice %171 {offsets = [0, 128], sizes = [8, 128], strides = [1, 1]} : vector<8x384xf32> to vector<8x128xf32>
    %175 = arith.mulf %174, %153 : vector<8x128xf32>
    %176 = vector.extract_strided_slice %171 {offsets = [0, 0], sizes = [8, 128], strides = [1, 1]} : vector<8x384xf32> to vector<8x128xf32>
    %177 = arith.mulf %176, %173 : vector<8x128xf32>
    %178 = arith.addf %175, %177 : vector<8x128xf32>
    %179 = vector.extract_strided_slice %171 {offsets = [0, 256], sizes = [8, 128], strides = [1, 1]} : vector<8x384xf32> to vector<8x128xf32>
    %180 = math.tanh %178 : vector<8x128xf32>
    %181 = arith.mulf %179, %180 : vector<8x128xf32>
    %182 = arith.index_cast %160 : i32 to index
    %c0_56 = arith.constant 0 : index
    %183 = vector.load %arg19[%182, %c0_56] : memref<64x128xf32, #tpu.memory_space<vmem>>, vector<8x128xf32>
    tpu.vector_store %arg19[%182, %c0_56], %181 {strides = array<i32>} : memref<64x128xf32, #tpu.memory_space<vmem>>, vector<8x128xf32>,
    %c7_i32 = arith.constant 7 : i32
    %c8_i32_57 = arith.constant 8 : i32
    %184 = arith.muli %c7_i32, %c8_i32_57 : i32
    %185 = tpu.assume_multiple %184, 8 : i32
    %186 = arith.index_cast %185 : i32 to index
    %c0_58 = arith.constant 0 : index
    %187 = vector.load %arg18[%186, %c0_58] : memref<64x512xf32, #tpu.memory_space<vmem>>, vector<8x512xf32>
    %c0_59 = arith.constant 0 : index
    %c0_60 = arith.constant 0 : index
    %188 = vector.load %arg4[%c0_59, %c0_60] : memref<128x512xf32, #tpu.memory_space<vmem>>, vector<128x512xf32>
    %cst_61 = arith.constant dense<0.000000e+00> : vector<8x512xf32>
    %189 = tpu.matmul %181, %188, %cst_61 {dimension_numbers = #tpu.dot_dimension_numbers<[1], [0], [0], [1], [0, 0, 1, 1], [], []>} : vector<8x128xf32>, vector<128x512xf32>, vector<8x512xf32> -> vector<8x512xf32>
    %190 = arith.addf %187, %189 : vector<8x512xf32>
    %191 = vector.extract_strided_slice %190 {offsets = [0, 0], sizes = [8, 384], strides = [1, 1]} : vector<8x512xf32> to vector<8x384xf32>
    %192 = arith.negf %191 : vector<8x384xf32>
    %193 = math.exp %192 : vector<8x384xf32>
    %cst_62 = arith.constant 1.000000e+00 : f32
    %194 = vector.broadcast %cst_62 : f32 to vector<8x384xf32>
    %195 = arith.addf %194, %193 : vector<8x384xf32>
    %196 = arith.divf %194, %195 : vector<8x384xf32>
    %197 = vector.extract_strided_slice %190 {offsets = [0, 384], sizes = [8, 128], strides = [1, 1]} : vector<8x512xf32> to vector<8x128xf32>
    %198 = math.tanh %197 : vector<8x128xf32>
    %199 = vector.extract_strided_slice %196 {offsets = [0, 128], sizes = [8, 128], strides = [1, 1]} : vector<8x384xf32> to vector<8x128xf32>
    %200 = arith.mulf %199, %178 : vector<8x128xf32>
    %201 = vector.extract_strided_slice %196 {offsets = [0, 0], sizes = [8, 128], strides = [1, 1]} : vector<8x384xf32> to vector<8x128xf32>
    %202 = arith.mulf %201, %198 : vector<8x128xf32>
    %203 = arith.addf %200, %202 : vector<8x128xf32>
    %204 = vector.extract_strided_slice %196 {offsets = [0, 256], sizes = [8, 128], strides = [1, 1]} : vector<8x384xf32> to vector<8x128xf32>
    %205 = math.tanh %203 : vector<8x128xf32>
    %206 = arith.mulf %204, %205 : vector<8x128xf32>
    %207 = arith.index_cast %185 : i32 to index
    %c0_63 = arith.constant 0 : index
    %208 = vector.load %arg19[%207, %c0_63] : memref<64x128xf32, #tpu.memory_space<vmem>>, vector<8x128xf32>
    tpu.vector_store %arg19[%207, %c0_63], %206 {strides = array<i32>} : memref<64x128xf32, #tpu.memory_space<vmem>>, vector<8x128xf32>,
    %c8_i32_64 = arith.constant 8 : i32
    %c0_65 = arith.constant 0 : index
    %c0_66 = arith.constant 0 : index
    %209 = vector.load %arg19[%c0_65, %c0_66] : memref<64x128xf32, #tpu.memory_space<vmem>>, vector<64x128xf32>
    %c0_67 = arith.constant 0 : index
    %c0_68 = arith.constant 0 : index
    %210 = vector.load %arg6[%c0_67, %c0_68] : memref<128x512xf32, #tpu.memory_space<vmem>>, vector<128x512xf32>
    %cst_69 = arith.constant dense<0.000000e+00> : vector<64x512xf32>
    %211 = tpu.matmul %209, %210, %cst_69 {dimension_numbers = #tpu.dot_dimension_numbers<[1], [0], [0], [1], [0, 0, 1, 1], [], []>} : vector<64x128xf32>, vector<128x512xf32>, vector<64x512xf32> -> vector<64x512xf32>
    %c0_70 = arith.constant 0 : index
    %c0_71 = arith.constant 0 : index
    %212 = vector.load %arg8[%c0_70, %c0_71] : memref<1x512xf32, #tpu.memory_space<vmem>>, vector<1x512xf32>
    %213 = vector.broadcast %212 : vector<1x512xf32> to vector<64x512xf32>
    %214 = arith.addf %211, %213 : vector<64x512xf32>
    %c0_72 = arith.constant 0 : index
    %c0_73 = arith.constant 0 : index
    %215 = vector.load %arg18[%c0_72, %c0_73] : memref<64x512xf32, #tpu.memory_space<vmem>>, vector<64x512xf32>
    tpu.vector_store %arg18[%c0_72, %c0_73], %214 {strides = array<i32>} : memref<64x512xf32, #tpu.memory_space<vmem>>, vector<64x512xf32>,
    %cst_74 = arith.constant 0.000000e+00 : f32
    %216 = vector.broadcast %cst_74 : f32 to vector<8x128xf32>
    %cst_75 = arith.constant 0.000000e+00 : f32
    %217 = vector.broadcast %cst_75 : f32 to vector<8x128xf32>
    %c0_i32_76 = arith.constant 0 : i32
    %c8_i32_77 = arith.constant 8 : i32
    %218 = arith.muli %c0_i32_76, %c8_i32_77 : i32
    %219 = tpu.assume_multiple %218, 8 : i32
    %220 = arith.index_cast %219 : i32 to index
    %c0_78 = arith.constant 0 : index
    %221 = vector.load %arg18[%220, %c0_78] : memref<64x512xf32, #tpu.memory_space<vmem>>, vector<8x512xf32>
    %c0_79 = arith.constant 0 : index
    %c0_80 = arith.constant 0 : index
    %222 = vector.load %arg7[%c0_79, %c0_80] : memref<128x512xf32, #tpu.memory_space<vmem>>, vector<128x512xf32>
    %cst_81 = arith.constant dense<0.000000e+00> : vector<8x512xf32>
    %223 = tpu.matmul %216, %222, %cst_81 {dimension_numbers = #tpu.dot_dimension_numbers<[1], [0], [0], [1], [0, 0, 1, 1], [], []>} : vector<8x128xf32>, vector<128x512xf32>, vector<8x512xf32> -> vector<8x512xf32>
    %224 = arith.addf %221, %223 : vector<8x512xf32>
    %225 = vector.extract_strided_slice %224 {offsets = [0, 0], sizes = [8, 384], strides = [1, 1]} : vector<8x512xf32> to vector<8x384xf32>
    %226 = arith.negf %225 : vector<8x384xf32>
    %227 = math.exp %226 : vector<8x384xf32>
    %cst_82 = arith.constant 1.000000e+00 : f32
    %228 = vector.broadcast %cst_82 : f32 to vector<8x384xf32>
    %229 = arith.addf %228, %227 : vector<8x384xf32>
    %230 = arith.divf %228, %229 : vector<8x384xf32>
    %231 = vector.extract_strided_slice %224 {offsets = [0, 384], sizes = [8, 128], strides = [1, 1]} : vector<8x512xf32> to vector<8x128xf32>
    %232 = math.tanh %231 : vector<8x128xf32>
    %233 = vector.extract_strided_slice %230 {offsets = [0, 128], sizes = [8, 128], strides = [1, 1]} : vector<8x384xf32> to vector<8x128xf32>
    %234 = arith.mulf %233, %217 : vector<8x128xf32>
    %235 = vector.extract_strided_slice %230 {offsets = [0, 0], sizes = [8, 128], strides = [1, 1]} : vector<8x384xf32> to vector<8x128xf32>
    %236 = arith.mulf %235, %232 : vector<8x128xf32>
    %237 = arith.addf %234, %236 : vector<8x128xf32>
    %238 = vector.extract_strided_slice %230 {offsets = [0, 256], sizes = [8, 128], strides = [1, 1]} : vector<8x384xf32> to vector<8x128xf32>
    %239 = math.tanh %237 : vector<8x128xf32>
    %240 = arith.mulf %238, %239 : vector<8x128xf32>
    %c1_i32_83 = arith.constant 1 : i32
    %c8_i32_84 = arith.constant 8 : i32
    %241 = arith.muli %c1_i32_83, %c8_i32_84 : i32
    %242 = tpu.assume_multiple %241, 8 : i32
    %243 = arith.index_cast %242 : i32 to index
    %c0_85 = arith.constant 0 : index
    %244 = vector.load %arg18[%243, %c0_85] : memref<64x512xf32, #tpu.memory_space<vmem>>, vector<8x512xf32>
    %c0_86 = arith.constant 0 : index
    %c0_87 = arith.constant 0 : index
    %245 = vector.load %arg7[%c0_86, %c0_87] : memref<128x512xf32, #tpu.memory_space<vmem>>, vector<128x512xf32>
    %cst_88 = arith.constant dense<0.000000e+00> : vector<8x512xf32>
    %246 = tpu.matmul %240, %245, %cst_88 {dimension_numbers = #tpu.dot_dimension_numbers<[1], [0], [0], [1], [0, 0, 1, 1], [], []>} : vector<8x128xf32>, vector<128x512xf32>, vector<8x512xf32> -> vector<8x512xf32>
    %247 = arith.addf %244, %246 : vector<8x512xf32>
    %248 = vector.extract_strided_slice %247 {offsets = [0, 0], sizes = [8, 384], strides = [1, 1]} : vector<8x512xf32> to vector<8x384xf32>
    %249 = arith.negf %248 : vector<8x384xf32>
    %250 = math.exp %249 : vector<8x384xf32>
    %cst_89 = arith.constant 1.000000e+00 : f32
    %251 = vector.broadcast %cst_89 : f32 to vector<8x384xf32>
    %252 = arith.addf %251, %250 : vector<8x384xf32>
    %253 = arith.divf %251, %252 : vector<8x384xf32>
    %254 = vector.extract_strided_slice %247 {offsets = [0, 384], sizes = [8, 128], strides = [1, 1]} : vector<8x512xf32> to vector<8x128xf32>
    %255 = math.tanh %254 : vector<8x128xf32>
    %256 = vector.extract_strided_slice %253 {offsets = [0, 128], sizes = [8, 128], strides = [1, 1]} : vector<8x384xf32> to vector<8x128xf32>
    %257 = arith.mulf %256, %237 : vector<8x128xf32>
    %258 = vector.extract_strided_slice %253 {offsets = [0, 0], sizes = [8, 128], strides = [1, 1]} : vector<8x384xf32> to vector<8x128xf32>
    %259 = arith.mulf %258, %255 : vector<8x128xf32>
    %260 = arith.addf %257, %259 : vector<8x128xf32>
    %261 = vector.extract_strided_slice %253 {offsets = [0, 256], sizes = [8, 128], strides = [1, 1]} : vector<8x384xf32> to vector<8x128xf32>
    %262 = math.tanh %260 : vector<8x128xf32>
    %263 = arith.mulf %261, %262 : vector<8x128xf32>
    %c2_i32_90 = arith.constant 2 : i32
    %c8_i32_91 = arith.constant 8 : i32
    %264 = arith.muli %c2_i32_90, %c8_i32_91 : i32
    %265 = tpu.assume_multiple %264, 8 : i32
    %266 = arith.index_cast %265 : i32 to index
    %c0_92 = arith.constant 0 : index
    %267 = vector.load %arg18[%266, %c0_92] : memref<64x512xf32, #tpu.memory_space<vmem>>, vector<8x512xf32>
    %c0_93 = arith.constant 0 : index
    %c0_94 = arith.constant 0 : index
    %268 = vector.load %arg7[%c0_93, %c0_94] : memref<128x512xf32, #tpu.memory_space<vmem>>, vector<128x512xf32>
    %cst_95 = arith.constant dense<0.000000e+00> : vector<8x512xf32>
    %269 = tpu.matmul %263, %268, %cst_95 {dimension_numbers = #tpu.dot_dimension_numbers<[1], [0], [0], [1], [0, 0, 1, 1], [], []>} : vector<8x128xf32>, vector<128x512xf32>, vector<8x512xf32> -> vector<8x512xf32>
    %270 = arith.addf %267, %269 : vector<8x512xf32>
    %271 = vector.extract_strided_slice %270 {offsets = [0, 0], sizes = [8, 384], strides = [1, 1]} : vector<8x512xf32> to vector<8x384xf32>
    %272 = arith.negf %271 : vector<8x384xf32>
    %273 = math.exp %272 : vector<8x384xf32>
    %cst_96 = arith.constant 1.000000e+00 : f32
    %274 = vector.broadcast %cst_96 : f32 to vector<8x384xf32>
    %275 = arith.addf %274, %273 : vector<8x384xf32>
    %276 = arith.divf %274, %275 : vector<8x384xf32>
    %277 = vector.extract_strided_slice %270 {offsets = [0, 384], sizes = [8, 128], strides = [1, 1]} : vector<8x512xf32> to vector<8x128xf32>
    %278 = math.tanh %277 : vector<8x128xf32>
    %279 = vector.extract_strided_slice %276 {offsets = [0, 128], sizes = [8, 128], strides = [1, 1]} : vector<8x384xf32> to vector<8x128xf32>
    %280 = arith.mulf %279, %260 : vector<8x128xf32>
    %281 = vector.extract_strided_slice %276 {offsets = [0, 0], sizes = [8, 128], strides = [1, 1]} : vector<8x384xf32> to vector<8x128xf32>
    %282 = arith.mulf %281, %278 : vector<8x128xf32>
    %283 = arith.addf %280, %282 : vector<8x128xf32>
    %284 = vector.extract_strided_slice %276 {offsets = [0, 256], sizes = [8, 128], strides = [1, 1]} : vector<8x384xf32> to vector<8x128xf32>
    %285 = math.tanh %283 : vector<8x128xf32>
    %286 = arith.mulf %284, %285 : vector<8x128xf32>
    %c3_i32_97 = arith.constant 3 : i32
    %c8_i32_98 = arith.constant 8 : i32
    %287 = arith.muli %c3_i32_97, %c8_i32_98 : i32
    %288 = tpu.assume_multiple %287, 8 : i32
    %289 = arith.index_cast %288 : i32 to index
    %c0_99 = arith.constant 0 : index
    %290 = vector.load %arg18[%289, %c0_99] : memref<64x512xf32, #tpu.memory_space<vmem>>, vector<8x512xf32>
    %c0_100 = arith.constant 0 : index
    %c0_101 = arith.constant 0 : index
    %291 = vector.load %arg7[%c0_100, %c0_101] : memref<128x512xf32, #tpu.memory_space<vmem>>, vector<128x512xf32>
    %cst_102 = arith.constant dense<0.000000e+00> : vector<8x512xf32>
    %292 = tpu.matmul %286, %291, %cst_102 {dimension_numbers = #tpu.dot_dimension_numbers<[1], [0], [0], [1], [0, 0, 1, 1], [], []>} : vector<8x128xf32>, vector<128x512xf32>, vector<8x512xf32> -> vector<8x512xf32>
    %293 = arith.addf %290, %292 : vector<8x512xf32>
    %294 = vector.extract_strided_slice %293 {offsets = [0, 0], sizes = [8, 384], strides = [1, 1]} : vector<8x512xf32> to vector<8x384xf32>
    %295 = arith.negf %294 : vector<8x384xf32>
    %296 = math.exp %295 : vector<8x384xf32>
    %cst_103 = arith.constant 1.000000e+00 : f32
    %297 = vector.broadcast %cst_103 : f32 to vector<8x384xf32>
    %298 = arith.addf %297, %296 : vector<8x384xf32>
    %299 = arith.divf %297, %298 : vector<8x384xf32>
    %300 = vector.extract_strided_slice %293 {offsets = [0, 384], sizes = [8, 128], strides = [1, 1]} : vector<8x512xf32> to vector<8x128xf32>
    %301 = math.tanh %300 : vector<8x128xf32>
    %302 = vector.extract_strided_slice %299 {offsets = [0, 128], sizes = [8, 128], strides = [1, 1]} : vector<8x384xf32> to vector<8x128xf32>
    %303 = arith.mulf %302, %283 : vector<8x128xf32>
    %304 = vector.extract_strided_slice %299 {offsets = [0, 0], sizes = [8, 128], strides = [1, 1]} : vector<8x384xf32> to vector<8x128xf32>
    %305 = arith.mulf %304, %301 : vector<8x128xf32>
    %306 = arith.addf %303, %305 : vector<8x128xf32>
    %307 = vector.extract_strided_slice %299 {offsets = [0, 256], sizes = [8, 128], strides = [1, 1]} : vector<8x384xf32> to vector<8x128xf32>
    %308 = math.tanh %306 : vector<8x128xf32>
    %309 = arith.mulf %307, %308 : vector<8x128xf32>
    %c4_i32_104 = arith.constant 4 : i32
    %c8_i32_105 = arith.constant 8 : i32
    %310 = arith.muli %c4_i32_104, %c8_i32_105 : i32
    %311 = tpu.assume_multiple %310, 8 : i32
    %312 = arith.index_cast %311 : i32 to index
    %c0_106 = arith.constant 0 : index
    %313 = vector.load %arg18[%312, %c0_106] : memref<64x512xf32, #tpu.memory_space<vmem>>, vector<8x512xf32>
    %c0_107 = arith.constant 0 : index
    %c0_108 = arith.constant 0 : index
    %314 = vector.load %arg7[%c0_107, %c0_108] : memref<128x512xf32, #tpu.memory_space<vmem>>, vector<128x512xf32>
    %cst_109 = arith.constant dense<0.000000e+00> : vector<8x512xf32>
    %315 = tpu.matmul %309, %314, %cst_109 {dimension_numbers = #tpu.dot_dimension_numbers<[1], [0], [0], [1], [0, 0, 1, 1], [], []>} : vector<8x128xf32>, vector<128x512xf32>, vector<8x512xf32> -> vector<8x512xf32>
    %316 = arith.addf %313, %315 : vector<8x512xf32>
    %317 = vector.extract_strided_slice %316 {offsets = [0, 0], sizes = [8, 384], strides = [1, 1]} : vector<8x512xf32> to vector<8x384xf32>
    %318 = arith.negf %317 : vector<8x384xf32>
    %319 = math.exp %318 : vector<8x384xf32>
    %cst_110 = arith.constant 1.000000e+00 : f32
    %320 = vector.broadcast %cst_110 : f32 to vector<8x384xf32>
    %321 = arith.addf %320, %319 : vector<8x384xf32>
    %322 = arith.divf %320, %321 : vector<8x384xf32>
    %323 = vector.extract_strided_slice %316 {offsets = [0, 384], sizes = [8, 128], strides = [1, 1]} : vector<8x512xf32> to vector<8x128xf32>
    %324 = math.tanh %323 : vector<8x128xf32>
    %325 = vector.extract_strided_slice %322 {offsets = [0, 128], sizes = [8, 128], strides = [1, 1]} : vector<8x384xf32> to vector<8x128xf32>
    %326 = arith.mulf %325, %306 : vector<8x128xf32>
    %327 = vector.extract_strided_slice %322 {offsets = [0, 0], sizes = [8, 128], strides = [1, 1]} : vector<8x384xf32> to vector<8x128xf32>
    %328 = arith.mulf %327, %324 : vector<8x128xf32>
    %329 = arith.addf %326, %328 : vector<8x128xf32>
    %330 = vector.extract_strided_slice %322 {offsets = [0, 256], sizes = [8, 128], strides = [1, 1]} : vector<8x384xf32> to vector<8x128xf32>
    %331 = math.tanh %329 : vector<8x128xf32>
    %332 = arith.mulf %330, %331 : vector<8x128xf32>
    %c5_i32_111 = arith.constant 5 : i32
    %c8_i32_112 = arith.constant 8 : i32
    %333 = arith.muli %c5_i32_111, %c8_i32_112 : i32
    %334 = tpu.assume_multiple %333, 8 : i32
    %335 = arith.index_cast %334 : i32 to index
    %c0_113 = arith.constant 0 : index
    %336 = vector.load %arg18[%335, %c0_113] : memref<64x512xf32, #tpu.memory_space<vmem>>, vector<8x512xf32>
    %c0_114 = arith.constant 0 : index
    %c0_115 = arith.constant 0 : index
    %337 = vector.load %arg7[%c0_114, %c0_115] : memref<128x512xf32, #tpu.memory_space<vmem>>, vector<128x512xf32>
    %cst_116 = arith.constant dense<0.000000e+00> : vector<8x512xf32>
    %338 = tpu.matmul %332, %337, %cst_116 {dimension_numbers = #tpu.dot_dimension_numbers<[1], [0], [0], [1], [0, 0, 1, 1], [], []>} : vector<8x128xf32>, vector<128x512xf32>, vector<8x512xf32> -> vector<8x512xf32>
    %339 = arith.addf %336, %338 : vector<8x512xf32>
    %340 = vector.extract_strided_slice %339 {offsets = [0, 0], sizes = [8, 384], strides = [1, 1]} : vector<8x512xf32> to vector<8x384xf32>
    %341 = arith.negf %340 : vector<8x384xf32>
    %342 = math.exp %341 : vector<8x384xf32>
    %cst_117 = arith.constant 1.000000e+00 : f32
    %343 = vector.broadcast %cst_117 : f32 to vector<8x384xf32>
    %344 = arith.addf %343, %342 : vector<8x384xf32>
    %345 = arith.divf %343, %344 : vector<8x384xf32>
    %346 = vector.extract_strided_slice %339 {offsets = [0, 384], sizes = [8, 128], strides = [1, 1]} : vector<8x512xf32> to vector<8x128xf32>
    %347 = math.tanh %346 : vector<8x128xf32>
    %348 = vector.extract_strided_slice %345 {offsets = [0, 128], sizes = [8, 128], strides = [1, 1]} : vector<8x384xf32> to vector<8x128xf32>
    %349 = arith.mulf %348, %329 : vector<8x128xf32>
    %350 = vector.extract_strided_slice %345 {offsets = [0, 0], sizes = [8, 128], strides = [1, 1]} : vector<8x384xf32> to vector<8x128xf32>
    %351 = arith.mulf %350, %347 : vector<8x128xf32>
    %352 = arith.addf %349, %351 : vector<8x128xf32>
    %353 = vector.extract_strided_slice %345 {offsets = [0, 256], sizes = [8, 128], strides = [1, 1]} : vector<8x384xf32> to vector<8x128xf32>
    %354 = math.tanh %352 : vector<8x128xf32>
    %355 = arith.mulf %353, %354 : vector<8x128xf32>
    %c6_i32_118 = arith.constant 6 : i32
    %c8_i32_119 = arith.constant 8 : i32
    %356 = arith.muli %c6_i32_118, %c8_i32_119 : i32
    %357 = tpu.assume_multiple %356, 8 : i32
    %358 = arith.index_cast %357 : i32 to index
    %c0_120 = arith.constant 0 : index
    %359 = vector.load %arg18[%358, %c0_120] : memref<64x512xf32, #tpu.memory_space<vmem>>, vector<8x512xf32>
    %c0_121 = arith.constant 0 : index
    %c0_122 = arith.constant 0 : index
    %360 = vector.load %arg7[%c0_121, %c0_122] : memref<128x512xf32, #tpu.memory_space<vmem>>, vector<128x512xf32>
    %cst_123 = arith.constant dense<0.000000e+00> : vector<8x512xf32>
    %361 = tpu.matmul %355, %360, %cst_123 {dimension_numbers = #tpu.dot_dimension_numbers<[1], [0], [0], [1], [0, 0, 1, 1], [], []>} : vector<8x128xf32>, vector<128x512xf32>, vector<8x512xf32> -> vector<8x512xf32>
    %362 = arith.addf %359, %361 : vector<8x512xf32>
    %363 = vector.extract_strided_slice %362 {offsets = [0, 0], sizes = [8, 384], strides = [1, 1]} : vector<8x512xf32> to vector<8x384xf32>
    %364 = arith.negf %363 : vector<8x384xf32>
    %365 = math.exp %364 : vector<8x384xf32>
    %cst_124 = arith.constant 1.000000e+00 : f32
    %366 = vector.broadcast %cst_124 : f32 to vector<8x384xf32>
    %367 = arith.addf %366, %365 : vector<8x384xf32>
    %368 = arith.divf %366, %367 : vector<8x384xf32>
    %369 = vector.extract_strided_slice %362 {offsets = [0, 384], sizes = [8, 128], strides = [1, 1]} : vector<8x512xf32> to vector<8x128xf32>
    %370 = math.tanh %369 : vector<8x128xf32>
    %371 = vector.extract_strided_slice %368 {offsets = [0, 128], sizes = [8, 128], strides = [1, 1]} : vector<8x384xf32> to vector<8x128xf32>
    %372 = arith.mulf %371, %352 : vector<8x128xf32>
    %373 = vector.extract_strided_slice %368 {offsets = [0, 0], sizes = [8, 128], strides = [1, 1]} : vector<8x384xf32> to vector<8x128xf32>
    %374 = arith.mulf %373, %370 : vector<8x128xf32>
    %375 = arith.addf %372, %374 : vector<8x128xf32>
    %376 = vector.extract_strided_slice %368 {offsets = [0, 256], sizes = [8, 128], strides = [1, 1]} : vector<8x384xf32> to vector<8x128xf32>
    %377 = math.tanh %375 : vector<8x128xf32>
    %378 = arith.mulf %376, %377 : vector<8x128xf32>
    %c7_i32_125 = arith.constant 7 : i32
    %c8_i32_126 = arith.constant 8 : i32
    %379 = arith.muli %c7_i32_125, %c8_i32_126 : i32
    %380 = tpu.assume_multiple %379, 8 : i32
    %381 = arith.index_cast %380 : i32 to index
    %c0_127 = arith.constant 0 : index
    %382 = vector.load %arg18[%381, %c0_127] : memref<64x512xf32, #tpu.memory_space<vmem>>, vector<8x512xf32>
    %c0_128 = arith.constant 0 : index
    %c0_129 = arith.constant 0 : index
    %383 = vector.load %arg7[%c0_128, %c0_129] : memref<128x512xf32, #tpu.memory_space<vmem>>, vector<128x512xf32>
    %cst_130 = arith.constant dense<0.000000e+00> : vector<8x512xf32>
    %384 = tpu.matmul %378, %383, %cst_130 {dimension_numbers = #tpu.dot_dimension_numbers<[1], [0], [0], [1], [0, 0, 1, 1], [], []>} : vector<8x128xf32>, vector<128x512xf32>, vector<8x512xf32> -> vector<8x512xf32>
    %385 = arith.addf %382, %384 : vector<8x512xf32>
    %386 = vector.extract_strided_slice %385 {offsets = [0, 0], sizes = [8, 384], strides = [1, 1]} : vector<8x512xf32> to vector<8x384xf32>
    %387 = arith.negf %386 : vector<8x384xf32>
    %388 = math.exp %387 : vector<8x384xf32>
    %cst_131 = arith.constant 1.000000e+00 : f32
    %389 = vector.broadcast %cst_131 : f32 to vector<8x384xf32>
    %390 = arith.addf %389, %388 : vector<8x384xf32>
    %391 = arith.divf %389, %390 : vector<8x384xf32>
    %392 = vector.extract_strided_slice %385 {offsets = [0, 384], sizes = [8, 128], strides = [1, 1]} : vector<8x512xf32> to vector<8x128xf32>
    %393 = math.tanh %392 : vector<8x128xf32>
    %394 = vector.extract_strided_slice %391 {offsets = [0, 128], sizes = [8, 128], strides = [1, 1]} : vector<8x384xf32> to vector<8x128xf32>
    %395 = arith.mulf %394, %375 : vector<8x128xf32>
    %396 = vector.extract_strided_slice %391 {offsets = [0, 0], sizes = [8, 128], strides = [1, 1]} : vector<8x384xf32> to vector<8x128xf32>
    %397 = arith.mulf %396, %393 : vector<8x128xf32>
    %398 = arith.addf %395, %397 : vector<8x128xf32>
    %399 = vector.extract_strided_slice %391 {offsets = [0, 256], sizes = [8, 128], strides = [1, 1]} : vector<8x384xf32> to vector<8x128xf32>
    %400 = math.tanh %398 : vector<8x128xf32>
    %401 = arith.mulf %399, %400 : vector<8x128xf32>
    %c8_i32_132 = arith.constant 8 : i32
    %c0_133 = arith.constant 0 : index
    %c0_134 = arith.constant 0 : index
    %402 = vector.load %arg9[%c0_133, %c0_134] : memref<128x512xf32, #tpu.memory_space<vmem>>, vector<128x512xf32>
    %cst_135 = arith.constant dense<0.000000e+00> : vector<8x512xf32>
    %403 = tpu.matmul %401, %402, %cst_135 {dimension_numbers = #tpu.dot_dimension_numbers<[1], [0], [0], [1], [0, 0, 1, 1], [], []>} : vector<8x128xf32>, vector<128x512xf32>, vector<8x512xf32> -> vector<8x512xf32>
    %c0_136 = arith.constant 0 : index
    %c0_137 = arith.constant 0 : index
    %404 = vector.load %arg11[%c0_136, %c0_137] : memref<1x512xf32, #tpu.memory_space<vmem>>, vector<1x512xf32>
    %405 = vector.broadcast %404 : vector<1x512xf32> to vector<8x512xf32>
    %406 = arith.addf %403, %405 : vector<8x512xf32>
    %c0_138 = arith.constant 0 : index
    %c0_139 = arith.constant 0 : index
    %407 = vector.load %arg2[%c0_138, %c0_139] : memref<64x8xf32, #tpu.memory_space<vmem>>, vector<64x8xf32>
    %cst_140 = arith.constant dense<0.000000e+00> : vector<64x512xf32>
    %408 = tpu.matmul %407, %406, %cst_140 {dimension_numbers = #tpu.dot_dimension_numbers<[1], [0], [0], [1], [0, 0, 1, 1], [], []>} : vector<64x8xf32>, vector<8x512xf32>, vector<64x512xf32> -> vector<64x512xf32>
    %c0_141 = arith.constant 0 : index
    %c0_142 = arith.constant 0 : index
    %409 = vector.load %arg18[%c0_141, %c0_142] : memref<64x512xf32, #tpu.memory_space<vmem>>, vector<64x512xf32>
    tpu.vector_store %arg18[%c0_141, %c0_142], %408 {strides = array<i32>} : memref<64x512xf32, #tpu.memory_space<vmem>>, vector<64x512xf32>,
    %cst_143 = arith.constant 0.000000e+00 : f32
    %410 = vector.broadcast %cst_143 : f32 to vector<8x128xf32>
    %cst_144 = arith.constant 0.000000e+00 : f32
    %411 = vector.broadcast %cst_144 : f32 to vector<8x128xf32>
    %c0_i32_145 = arith.constant 0 : i32
    %c8_i32_146 = arith.constant 8 : i32
    %412 = arith.muli %c0_i32_145, %c8_i32_146 : i32
    %413 = tpu.assume_multiple %412, 8 : i32
    %414 = arith.index_cast %413 : i32 to index
    %c0_147 = arith.constant 0 : index
    %415 = vector.load %arg18[%414, %c0_147] : memref<64x512xf32, #tpu.memory_space<vmem>>, vector<8x512xf32>
    %c0_148 = arith.constant 0 : index
    %c0_149 = arith.constant 0 : index
    %416 = vector.load %arg10[%c0_148, %c0_149] : memref<128x512xf32, #tpu.memory_space<vmem>>, vector<128x512xf32>
    %cst_150 = arith.constant dense<0.000000e+00> : vector<8x512xf32>
    %417 = tpu.matmul %410, %416, %cst_150 {dimension_numbers = #tpu.dot_dimension_numbers<[1], [0], [0], [1], [0, 0, 1, 1], [], []>} : vector<8x128xf32>, vector<128x512xf32>, vector<8x512xf32> -> vector<8x512xf32>
    %418 = arith.addf %415, %417 : vector<8x512xf32>
    %419 = vector.extract_strided_slice %418 {offsets = [0, 0], sizes = [8, 384], strides = [1, 1]} : vector<8x512xf32> to vector<8x384xf32>
    %420 = arith.negf %419 : vector<8x384xf32>
    %421 = math.exp %420 : vector<8x384xf32>
    %cst_151 = arith.constant 1.000000e+00 : f32
    %422 = vector.broadcast %cst_151 : f32 to vector<8x384xf32>
    %423 = arith.addf %422, %421 : vector<8x384xf32>
    %424 = arith.divf %422, %423 : vector<8x384xf32>
    %425 = vector.extract_strided_slice %418 {offsets = [0, 384], sizes = [8, 128], strides = [1, 1]} : vector<8x512xf32> to vector<8x128xf32>
    %426 = math.tanh %425 : vector<8x128xf32>
    %427 = vector.extract_strided_slice %424 {offsets = [0, 128], sizes = [8, 128], strides = [1, 1]} : vector<8x384xf32> to vector<8x128xf32>
    %428 = arith.mulf %427, %411 : vector<8x128xf32>
    %429 = vector.extract_strided_slice %424 {offsets = [0, 0], sizes = [8, 128], strides = [1, 1]} : vector<8x384xf32> to vector<8x128xf32>
    %430 = arith.mulf %429, %426 : vector<8x128xf32>
    %431 = arith.addf %428, %430 : vector<8x128xf32>
    %432 = vector.extract_strided_slice %424 {offsets = [0, 256], sizes = [8, 128], strides = [1, 1]} : vector<8x384xf32> to vector<8x128xf32>
    %433 = math.tanh %431 : vector<8x128xf32>
    %434 = arith.mulf %432, %433 : vector<8x128xf32>
    %435 = arith.index_cast %413 : i32 to index
    %c0_152 = arith.constant 0 : index
    %436 = vector.load %arg19[%435, %c0_152] : memref<64x128xf32, #tpu.memory_space<vmem>>, vector<8x128xf32>
    tpu.vector_store %arg19[%435, %c0_152], %434 {strides = array<i32>} : memref<64x128xf32, #tpu.memory_space<vmem>>, vector<8x128xf32>,
    %c1_i32_153 = arith.constant 1 : i32
    %c8_i32_154 = arith.constant 8 : i32
    %437 = arith.muli %c1_i32_153, %c8_i32_154 : i32
    %438 = tpu.assume_multiple %437, 8 : i32
    %439 = arith.index_cast %438 : i32 to index
    %c0_155 = arith.constant 0 : index
    %440 = vector.load %arg18[%439, %c0_155] : memref<64x512xf32, #tpu.memory_space<vmem>>, vector<8x512xf32>
    %c0_156 = arith.constant 0 : index
    %c0_157 = arith.constant 0 : index
    %441 = vector.load %arg10[%c0_156, %c0_157] : memref<128x512xf32, #tpu.memory_space<vmem>>, vector<128x512xf32>
    %cst_158 = arith.constant dense<0.000000e+00> : vector<8x512xf32>
    %442 = tpu.matmul %434, %441, %cst_158 {dimension_numbers = #tpu.dot_dimension_numbers<[1], [0], [0], [1], [0, 0, 1, 1], [], []>} : vector<8x128xf32>, vector<128x512xf32>, vector<8x512xf32> -> vector<8x512xf32>
    %443 = arith.addf %440, %442 : vector<8x512xf32>
    %444 = vector.extract_strided_slice %443 {offsets = [0, 0], sizes = [8, 384], strides = [1, 1]} : vector<8x512xf32> to vector<8x384xf32>
    %445 = arith.negf %444 : vector<8x384xf32>
    %446 = math.exp %445 : vector<8x384xf32>
    %cst_159 = arith.constant 1.000000e+00 : f32
    %447 = vector.broadcast %cst_159 : f32 to vector<8x384xf32>
    %448 = arith.addf %447, %446 : vector<8x384xf32>
    %449 = arith.divf %447, %448 : vector<8x384xf32>
    %450 = vector.extract_strided_slice %443 {offsets = [0, 384], sizes = [8, 128], strides = [1, 1]} : vector<8x512xf32> to vector<8x128xf32>
    %451 = math.tanh %450 : vector<8x128xf32>
    %452 = vector.extract_strided_slice %449 {offsets = [0, 128], sizes = [8, 128], strides = [1, 1]} : vector<8x384xf32> to vector<8x128xf32>
    %453 = arith.mulf %452, %431 : vector<8x128xf32>
    %454 = vector.extract_strided_slice %449 {offsets = [0, 0], sizes = [8, 128], strides = [1, 1]} : vector<8x384xf32> to vector<8x128xf32>
    %455 = arith.mulf %454, %451 : vector<8x128xf32>
    %456 = arith.addf %453, %455 : vector<8x128xf32>
    %457 = vector.extract_strided_slice %449 {offsets = [0, 256], sizes = [8, 128], strides = [1, 1]} : vector<8x384xf32> to vector<8x128xf32>
    %458 = math.tanh %456 : vector<8x128xf32>
    %459 = arith.mulf %457, %458 : vector<8x128xf32>
    %460 = arith.index_cast %438 : i32 to index
    %c0_160 = arith.constant 0 : index
    %461 = vector.load %arg19[%460, %c0_160] : memref<64x128xf32, #tpu.memory_space<vmem>>, vector<8x128xf32>
    tpu.vector_store %arg19[%460, %c0_160], %459 {strides = array<i32>} : memref<64x128xf32, #tpu.memory_space<vmem>>, vector<8x128xf32>,
    %c2_i32_161 = arith.constant 2 : i32
    %c8_i32_162 = arith.constant 8 : i32
    %462 = arith.muli %c2_i32_161, %c8_i32_162 : i32
    %463 = tpu.assume_multiple %462, 8 : i32
    %464 = arith.index_cast %463 : i32 to index
    %c0_163 = arith.constant 0 : index
    %465 = vector.load %arg18[%464, %c0_163] : memref<64x512xf32, #tpu.memory_space<vmem>>, vector<8x512xf32>
    %c0_164 = arith.constant 0 : index
    %c0_165 = arith.constant 0 : index
    %466 = vector.load %arg10[%c0_164, %c0_165] : memref<128x512xf32, #tpu.memory_space<vmem>>, vector<128x512xf32>
    %cst_166 = arith.constant dense<0.000000e+00> : vector<8x512xf32>
    %467 = tpu.matmul %459, %466, %cst_166 {dimension_numbers = #tpu.dot_dimension_numbers<[1], [0], [0], [1], [0, 0, 1, 1], [], []>} : vector<8x128xf32>, vector<128x512xf32>, vector<8x512xf32> -> vector<8x512xf32>
    %468 = arith.addf %465, %467 : vector<8x512xf32>
    %469 = vector.extract_strided_slice %468 {offsets = [0, 0], sizes = [8, 384], strides = [1, 1]} : vector<8x512xf32> to vector<8x384xf32>
    %470 = arith.negf %469 : vector<8x384xf32>
    %471 = math.exp %470 : vector<8x384xf32>
    %cst_167 = arith.constant 1.000000e+00 : f32
    %472 = vector.broadcast %cst_167 : f32 to vector<8x384xf32>
    %473 = arith.addf %472, %471 : vector<8x384xf32>
    %474 = arith.divf %472, %473 : vector<8x384xf32>
    %475 = vector.extract_strided_slice %468 {offsets = [0, 384], sizes = [8, 128], strides = [1, 1]} : vector<8x512xf32> to vector<8x128xf32>
    %476 = math.tanh %475 : vector<8x128xf32>
    %477 = vector.extract_strided_slice %474 {offsets = [0, 128], sizes = [8, 128], strides = [1, 1]} : vector<8x384xf32> to vector<8x128xf32>
    %478 = arith.mulf %477, %456 : vector<8x128xf32>
    %479 = vector.extract_strided_slice %474 {offsets = [0, 0], sizes = [8, 128], strides = [1, 1]} : vector<8x384xf32> to vector<8x128xf32>
    %480 = arith.mulf %479, %476 : vector<8x128xf32>
    %481 = arith.addf %478, %480 : vector<8x128xf32>
    %482 = vector.extract_strided_slice %474 {offsets = [0, 256], sizes = [8, 128], strides = [1, 1]} : vector<8x384xf32> to vector<8x128xf32>
    %483 = math.tanh %481 : vector<8x128xf32>
    %484 = arith.mulf %482, %483 : vector<8x128xf32>
    %485 = arith.index_cast %463 : i32 to index
    %c0_168 = arith.constant 0 : index
    %486 = vector.load %arg19[%485, %c0_168] : memref<64x128xf32, #tpu.memory_space<vmem>>, vector<8x128xf32>
    tpu.vector_store %arg19[%485, %c0_168], %484 {strides = array<i32>} : memref<64x128xf32, #tpu.memory_space<vmem>>, vector<8x128xf32>,
    %c3_i32_169 = arith.constant 3 : i32
    %c8_i32_170 = arith.constant 8 : i32
    %487 = arith.muli %c3_i32_169, %c8_i32_170 : i32
    %488 = tpu.assume_multiple %487, 8 : i32
    %489 = arith.index_cast %488 : i32 to index
    %c0_171 = arith.constant 0 : index
    %490 = vector.load %arg18[%489, %c0_171] : memref<64x512xf32, #tpu.memory_space<vmem>>, vector<8x512xf32>
    %c0_172 = arith.constant 0 : index
    %c0_173 = arith.constant 0 : index
    %491 = vector.load %arg10[%c0_172, %c0_173] : memref<128x512xf32, #tpu.memory_space<vmem>>, vector<128x512xf32>
    %cst_174 = arith.constant dense<0.000000e+00> : vector<8x512xf32>
    %492 = tpu.matmul %484, %491, %cst_174 {dimension_numbers = #tpu.dot_dimension_numbers<[1], [0], [0], [1], [0, 0, 1, 1], [], []>} : vector<8x128xf32>, vector<128x512xf32>, vector<8x512xf32> -> vector<8x512xf32>
    %493 = arith.addf %490, %492 : vector<8x512xf32>
    %494 = vector.extract_strided_slice %493 {offsets = [0, 0], sizes = [8, 384], strides = [1, 1]} : vector<8x512xf32> to vector<8x384xf32>
    %495 = arith.negf %494 : vector<8x384xf32>
    %496 = math.exp %495 : vector<8x384xf32>
    %cst_175 = arith.constant 1.000000e+00 : f32
    %497 = vector.broadcast %cst_175 : f32 to vector<8x384xf32>
    %498 = arith.addf %497, %496 : vector<8x384xf32>
    %499 = arith.divf %497, %498 : vector<8x384xf32>
    %500 = vector.extract_strided_slice %493 {offsets = [0, 384], sizes = [8, 128], strides = [1, 1]} : vector<8x512xf32> to vector<8x128xf32>
    %501 = math.tanh %500 : vector<8x128xf32>
    %502 = vector.extract_strided_slice %499 {offsets = [0, 128], sizes = [8, 128], strides = [1, 1]} : vector<8x384xf32> to vector<8x128xf32>
    %503 = arith.mulf %502, %481 : vector<8x128xf32>
    %504 = vector.extract_strided_slice %499 {offsets = [0, 0], sizes = [8, 128], strides = [1, 1]} : vector<8x384xf32> to vector<8x128xf32>
    %505 = arith.mulf %504, %501 : vector<8x128xf32>
    %506 = arith.addf %503, %505 : vector<8x128xf32>
    %507 = vector.extract_strided_slice %499 {offsets = [0, 256], sizes = [8, 128], strides = [1, 1]} : vector<8x384xf32> to vector<8x128xf32>
    %508 = math.tanh %506 : vector<8x128xf32>
    %509 = arith.mulf %507, %508 : vector<8x128xf32>
    %510 = arith.index_cast %488 : i32 to index
    %c0_176 = arith.constant 0 : index
    %511 = vector.load %arg19[%510, %c0_176] : memref<64x128xf32, #tpu.memory_space<vmem>>, vector<8x128xf32>
    tpu.vector_store %arg19[%510, %c0_176], %509 {strides = array<i32>} : memref<64x128xf32, #tpu.memory_space<vmem>>, vector<8x128xf32>,
    %c4_i32_177 = arith.constant 4 : i32
    %c8_i32_178 = arith.constant 8 : i32
    %512 = arith.muli %c4_i32_177, %c8_i32_178 : i32
    %513 = tpu.assume_multiple %512, 8 : i32
    %514 = arith.index_cast %513 : i32 to index
    %c0_179 = arith.constant 0 : index
    %515 = vector.load %arg18[%514, %c0_179] : memref<64x512xf32, #tpu.memory_space<vmem>>, vector<8x512xf32>
    %c0_180 = arith.constant 0 : index
    %c0_181 = arith.constant 0 : index
    %516 = vector.load %arg10[%c0_180, %c0_181] : memref<128x512xf32, #tpu.memory_space<vmem>>, vector<128x512xf32>
    %cst_182 = arith.constant dense<0.000000e+00> : vector<8x512xf32>
    %517 = tpu.matmul %509, %516, %cst_182 {dimension_numbers = #tpu.dot_dimension_numbers<[1], [0], [0], [1], [0, 0, 1, 1], [], []>} : vector<8x128xf32>, vector<128x512xf32>, vector<8x512xf32> -> vector<8x512xf32>
    %518 = arith.addf %515, %517 : vector<8x512xf32>
    %519 = vector.extract_strided_slice %518 {offsets = [0, 0], sizes = [8, 384], strides = [1, 1]} : vector<8x512xf32> to vector<8x384xf32>
    %520 = arith.negf %519 : vector<8x384xf32>
    %521 = math.exp %520 : vector<8x384xf32>
    %cst_183 = arith.constant 1.000000e+00 : f32
    %522 = vector.broadcast %cst_183 : f32 to vector<8x384xf32>
    %523 = arith.addf %522, %521 : vector<8x384xf32>
    %524 = arith.divf %522, %523 : vector<8x384xf32>
    %525 = vector.extract_strided_slice %518 {offsets = [0, 384], sizes = [8, 128], strides = [1, 1]} : vector<8x512xf32> to vector<8x128xf32>
    %526 = math.tanh %525 : vector<8x128xf32>
    %527 = vector.extract_strided_slice %524 {offsets = [0, 128], sizes = [8, 128], strides = [1, 1]} : vector<8x384xf32> to vector<8x128xf32>
    %528 = arith.mulf %527, %506 : vector<8x128xf32>
    %529 = vector.extract_strided_slice %524 {offsets = [0, 0], sizes = [8, 128], strides = [1, 1]} : vector<8x384xf32> to vector<8x128xf32>
    %530 = arith.mulf %529, %526 : vector<8x128xf32>
    %531 = arith.addf %528, %530 : vector<8x128xf32>
    %532 = vector.extract_strided_slice %524 {offsets = [0, 256], sizes = [8, 128], strides = [1, 1]} : vector<8x384xf32> to vector<8x128xf32>
    %533 = math.tanh %531 : vector<8x128xf32>
    %534 = arith.mulf %532, %533 : vector<8x128xf32>
    %535 = arith.index_cast %513 : i32 to index
    %c0_184 = arith.constant 0 : index
    %536 = vector.load %arg19[%535, %c0_184] : memref<64x128xf32, #tpu.memory_space<vmem>>, vector<8x128xf32>
    tpu.vector_store %arg19[%535, %c0_184], %534 {strides = array<i32>} : memref<64x128xf32, #tpu.memory_space<vmem>>, vector<8x128xf32>,
    %c5_i32_185 = arith.constant 5 : i32
    %c8_i32_186 = arith.constant 8 : i32
    %537 = arith.muli %c5_i32_185, %c8_i32_186 : i32
    %538 = tpu.assume_multiple %537, 8 : i32
    %539 = arith.index_cast %538 : i32 to index
    %c0_187 = arith.constant 0 : index
    %540 = vector.load %arg18[%539, %c0_187] : memref<64x512xf32, #tpu.memory_space<vmem>>, vector<8x512xf32>
    %c0_188 = arith.constant 0 : index
    %c0_189 = arith.constant 0 : index
    %541 = vector.load %arg10[%c0_188, %c0_189] : memref<128x512xf32, #tpu.memory_space<vmem>>, vector<128x512xf32>
    %cst_190 = arith.constant dense<0.000000e+00> : vector<8x512xf32>
    %542 = tpu.matmul %534, %541, %cst_190 {dimension_numbers = #tpu.dot_dimension_numbers<[1], [0], [0], [1], [0, 0, 1, 1], [], []>} : vector<8x128xf32>, vector<128x512xf32>, vector<8x512xf32> -> vector<8x512xf32>
    %543 = arith.addf %540, %542 : vector<8x512xf32>
    %544 = vector.extract_strided_slice %543 {offsets = [0, 0], sizes = [8, 384], strides = [1, 1]} : vector<8x512xf32> to vector<8x384xf32>
    %545 = arith.negf %544 : vector<8x384xf32>
    %546 = math.exp %545 : vector<8x384xf32>
    %cst_191 = arith.constant 1.000000e+00 : f32
    %547 = vector.broadcast %cst_191 : f32 to vector<8x384xf32>
    %548 = arith.addf %547, %546 : vector<8x384xf32>
    %549 = arith.divf %547, %548 : vector<8x384xf32>
    %550 = vector.extract_strided_slice %543 {offsets = [0, 384], sizes = [8, 128], strides = [1, 1]} : vector<8x512xf32> to vector<8x128xf32>
    %551 = math.tanh %550 : vector<8x128xf32>
    %552 = vector.extract_strided_slice %549 {offsets = [0, 128], sizes = [8, 128], strides = [1, 1]} : vector<8x384xf32> to vector<8x128xf32>
    %553 = arith.mulf %552, %531 : vector<8x128xf32>
    %554 = vector.extract_strided_slice %549 {offsets = [0, 0], sizes = [8, 128], strides = [1, 1]} : vector<8x384xf32> to vector<8x128xf32>
    %555 = arith.mulf %554, %551 : vector<8x128xf32>
    %556 = arith.addf %553, %555 : vector<8x128xf32>
    %557 = vector.extract_strided_slice %549 {offsets = [0, 256], sizes = [8, 128], strides = [1, 1]} : vector<8x384xf32> to vector<8x128xf32>
    %558 = math.tanh %556 : vector<8x128xf32>
    %559 = arith.mulf %557, %558 : vector<8x128xf32>
    %560 = arith.index_cast %538 : i32 to index
    %c0_192 = arith.constant 0 : index
    %561 = vector.load %arg19[%560, %c0_192] : memref<64x128xf32, #tpu.memory_space<vmem>>, vector<8x128xf32>
    tpu.vector_store %arg19[%560, %c0_192], %559 {strides = array<i32>} : memref<64x128xf32, #tpu.memory_space<vmem>>, vector<8x128xf32>,
    %c6_i32_193 = arith.constant 6 : i32
    %c8_i32_194 = arith.constant 8 : i32
    %562 = arith.muli %c6_i32_193, %c8_i32_194 : i32
    %563 = tpu.assume_multiple %562, 8 : i32
    %564 = arith.index_cast %563 : i32 to index
    %c0_195 = arith.constant 0 : index
    %565 = vector.load %arg18[%564, %c0_195] : memref<64x512xf32, #tpu.memory_space<vmem>>, vector<8x512xf32>
    %c0_196 = arith.constant 0 : index
    %c0_197 = arith.constant 0 : index
    %566 = vector.load %arg10[%c0_196, %c0_197] : memref<128x512xf32, #tpu.memory_space<vmem>>, vector<128x512xf32>
    %cst_198 = arith.constant dense<0.000000e+00> : vector<8x512xf32>
    %567 = tpu.matmul %559, %566, %cst_198 {dimension_numbers = #tpu.dot_dimension_numbers<[1], [0], [0], [1], [0, 0, 1, 1], [], []>} : vector<8x128xf32>, vector<128x512xf32>, vector<8x512xf32> -> vector<8x512xf32>
    %568 = arith.addf %565, %567 : vector<8x512xf32>
    %569 = vector.extract_strided_slice %568 {offsets = [0, 0], sizes = [8, 384], strides = [1, 1]} : vector<8x512xf32> to vector<8x384xf32>
    %570 = arith.negf %569 : vector<8x384xf32>
    %571 = math.exp %570 : vector<8x384xf32>
    %cst_199 = arith.constant 1.000000e+00 : f32
    %572 = vector.broadcast %cst_199 : f32 to vector<8x384xf32>
    %573 = arith.addf %572, %571 : vector<8x384xf32>
    %574 = arith.divf %572, %573 : vector<8x384xf32>
    %575 = vector.extract_strided_slice %568 {offsets = [0, 384], sizes = [8, 128], strides = [1, 1]} : vector<8x512xf32> to vector<8x128xf32>
    %576 = math.tanh %575 : vector<8x128xf32>
    %577 = vector.extract_strided_slice %574 {offsets = [0, 128], sizes = [8, 128], strides = [1, 1]} : vector<8x384xf32> to vector<8x128xf32>
    %578 = arith.mulf %577, %556 : vector<8x128xf32>
    %579 = vector.extract_strided_slice %574 {offsets = [0, 0], sizes = [8, 128], strides = [1, 1]} : vector<8x384xf32> to vector<8x128xf32>
    %580 = arith.mulf %579, %576 : vector<8x128xf32>
    %581 = arith.addf %578, %580 : vector<8x128xf32>
    %582 = vector.extract_strided_slice %574 {offsets = [0, 256], sizes = [8, 128], strides = [1, 1]} : vector<8x384xf32> to vector<8x128xf32>
    %583 = math.tanh %581 : vector<8x128xf32>
    %584 = arith.mulf %582, %583 : vector<8x128xf32>
    %585 = arith.index_cast %563 : i32 to index
    %c0_200 = arith.constant 0 : index
    %586 = vector.load %arg19[%585, %c0_200] : memref<64x128xf32, #tpu.memory_space<vmem>>, vector<8x128xf32>
    tpu.vector_store %arg19[%585, %c0_200], %584 {strides = array<i32>} : memref<64x128xf32, #tpu.memory_space<vmem>>, vector<8x128xf32>,
    %c7_i32_201 = arith.constant 7 : i32
    %c8_i32_202 = arith.constant 8 : i32
    %587 = arith.muli %c7_i32_201, %c8_i32_202 : i32
    %588 = tpu.assume_multiple %587, 8 : i32
    %589 = arith.index_cast %588 : i32 to index
    %c0_203 = arith.constant 0 : index
    %590 = vector.load %arg18[%589, %c0_203] : memref<64x512xf32, #tpu.memory_space<vmem>>, vector<8x512xf32>
    %c0_204 = arith.constant 0 : index
    %c0_205 = arith.constant 0 : index
    %591 = vector.load %arg10[%c0_204, %c0_205] : memref<128x512xf32, #tpu.memory_space<vmem>>, vector<128x512xf32>
    %cst_206 = arith.constant dense<0.000000e+00> : vector<8x512xf32>
    %592 = tpu.matmul %584, %591, %cst_206 {dimension_numbers = #tpu.dot_dimension_numbers<[1], [0], [0], [1], [0, 0, 1, 1], [], []>} : vector<8x128xf32>, vector<128x512xf32>, vector<8x512xf32> -> vector<8x512xf32>
    %593 = arith.addf %590, %592 : vector<8x512xf32>
    %594 = vector.extract_strided_slice %593 {offsets = [0, 0], sizes = [8, 384], strides = [1, 1]} : vector<8x512xf32> to vector<8x384xf32>
    %595 = arith.negf %594 : vector<8x384xf32>
    %596 = math.exp %595 : vector<8x384xf32>
    %cst_207 = arith.constant 1.000000e+00 : f32
    %597 = vector.broadcast %cst_207 : f32 to vector<8x384xf32>
    %598 = arith.addf %597, %596 : vector<8x384xf32>
    %599 = arith.divf %597, %598 : vector<8x384xf32>
    %600 = vector.extract_strided_slice %593 {offsets = [0, 384], sizes = [8, 128], strides = [1, 1]} : vector<8x512xf32> to vector<8x128xf32>
    %601 = math.tanh %600 : vector<8x128xf32>
    %602 = vector.extract_strided_slice %599 {offsets = [0, 128], sizes = [8, 128], strides = [1, 1]} : vector<8x384xf32> to vector<8x128xf32>
    %603 = arith.mulf %602, %581 : vector<8x128xf32>
    %604 = vector.extract_strided_slice %599 {offsets = [0, 0], sizes = [8, 128], strides = [1, 1]} : vector<8x384xf32> to vector<8x128xf32>
    %605 = arith.mulf %604, %601 : vector<8x128xf32>
    %606 = arith.addf %603, %605 : vector<8x128xf32>
    %607 = vector.extract_strided_slice %599 {offsets = [0, 256], sizes = [8, 128], strides = [1, 1]} : vector<8x384xf32> to vector<8x128xf32>
    %608 = math.tanh %606 : vector<8x128xf32>
    %609 = arith.mulf %607, %608 : vector<8x128xf32>
    %610 = arith.index_cast %588 : i32 to index
    %c0_208 = arith.constant 0 : index
    %611 = vector.load %arg19[%610, %c0_208] : memref<64x128xf32, #tpu.memory_space<vmem>>, vector<8x128xf32>
    tpu.vector_store %arg19[%610, %c0_208], %609 {strides = array<i32>} : memref<64x128xf32, #tpu.memory_space<vmem>>, vector<8x128xf32>,
    %c8_i32_209 = arith.constant 8 : i32
    %c0_210 = arith.constant 0 : index
    %c0_211 = arith.constant 0 : index
    %612 = vector.load %arg19[%c0_210, %c0_211] : memref<64x128xf32, #tpu.memory_space<vmem>>, vector<64x128xf32>
    %c0_212 = arith.constant 0 : index
    %c0_213 = arith.constant 0 : index
    %613 = vector.load %arg12[%c0_212, %c0_213] : memref<128x512xf32, #tpu.memory_space<vmem>>, vector<128x512xf32>
    %cst_214 = arith.constant dense<0.000000e+00> : vector<64x512xf32>
    %614 = tpu.matmul %612, %613, %cst_214 {dimension_numbers = #tpu.dot_dimension_numbers<[1], [0], [0], [1], [0, 0, 1, 1], [], []>} : vector<64x128xf32>, vector<128x512xf32>, vector<64x512xf32> -> vector<64x512xf32>
    %c0_215 = arith.constant 0 : index
    %c0_216 = arith.constant 0 : index
    %615 = vector.load %arg14[%c0_215, %c0_216] : memref<1x512xf32, #tpu.memory_space<vmem>>, vector<1x512xf32>
    %616 = vector.broadcast %615 : vector<1x512xf32> to vector<64x512xf32>
    %617 = arith.addf %614, %616 : vector<64x512xf32>
    %c0_217 = arith.constant 0 : index
    %c0_218 = arith.constant 0 : index
    %618 = vector.load %arg18[%c0_217, %c0_218] : memref<64x512xf32, #tpu.memory_space<vmem>>, vector<64x512xf32>
    tpu.vector_store %arg18[%c0_217, %c0_218], %617 {strides = array<i32>} : memref<64x512xf32, #tpu.memory_space<vmem>>, vector<64x512xf32>,
    %cst_219 = arith.constant 0.000000e+00 : f32
    %619 = vector.broadcast %cst_219 : f32 to vector<8x128xf32>
    %cst_220 = arith.constant 0.000000e+00 : f32
    %620 = vector.broadcast %cst_220 : f32 to vector<8x128xf32>
    %c0_i32_221 = arith.constant 0 : i32
    %c8_i32_222 = arith.constant 8 : i32
    %621 = arith.muli %c0_i32_221, %c8_i32_222 : i32
    %622 = tpu.assume_multiple %621, 8 : i32
    %623 = arith.index_cast %622 : i32 to index
    %c0_223 = arith.constant 0 : index
    %624 = vector.load %arg18[%623, %c0_223] : memref<64x512xf32, #tpu.memory_space<vmem>>, vector<8x512xf32>
    %c0_224 = arith.constant 0 : index
    %c0_225 = arith.constant 0 : index
    %625 = vector.load %arg13[%c0_224, %c0_225] : memref<128x512xf32, #tpu.memory_space<vmem>>, vector<128x512xf32>
    %cst_226 = arith.constant dense<0.000000e+00> : vector<8x512xf32>
    %626 = tpu.matmul %619, %625, %cst_226 {dimension_numbers = #tpu.dot_dimension_numbers<[1], [0], [0], [1], [0, 0, 1, 1], [], []>} : vector<8x128xf32>, vector<128x512xf32>, vector<8x512xf32> -> vector<8x512xf32>
    %627 = arith.addf %624, %626 : vector<8x512xf32>
    %628 = vector.extract_strided_slice %627 {offsets = [0, 0], sizes = [8, 384], strides = [1, 1]} : vector<8x512xf32> to vector<8x384xf32>
    %629 = arith.negf %628 : vector<8x384xf32>
    %630 = math.exp %629 : vector<8x384xf32>
    %cst_227 = arith.constant 1.000000e+00 : f32
    %631 = vector.broadcast %cst_227 : f32 to vector<8x384xf32>
    %632 = arith.addf %631, %630 : vector<8x384xf32>
    %633 = arith.divf %631, %632 : vector<8x384xf32>
    %634 = vector.extract_strided_slice %627 {offsets = [0, 384], sizes = [8, 128], strides = [1, 1]} : vector<8x512xf32> to vector<8x128xf32>
    %635 = math.tanh %634 : vector<8x128xf32>
    %636 = vector.extract_strided_slice %633 {offsets = [0, 128], sizes = [8, 128], strides = [1, 1]} : vector<8x384xf32> to vector<8x128xf32>
    %637 = arith.mulf %636, %620 : vector<8x128xf32>
    %638 = vector.extract_strided_slice %633 {offsets = [0, 0], sizes = [8, 128], strides = [1, 1]} : vector<8x384xf32> to vector<8x128xf32>
    %639 = arith.mulf %638, %635 : vector<8x128xf32>
    %640 = arith.addf %637, %639 : vector<8x128xf32>
    %641 = vector.extract_strided_slice %633 {offsets = [0, 256], sizes = [8, 128], strides = [1, 1]} : vector<8x384xf32> to vector<8x128xf32>
    %642 = math.tanh %640 : vector<8x128xf32>
    %643 = arith.mulf %641, %642 : vector<8x128xf32>
    %644 = arith.index_cast %622 : i32 to index
    %c0_228 = arith.constant 0 : index
    %645 = vector.load %arg19[%644, %c0_228] : memref<64x128xf32, #tpu.memory_space<vmem>>, vector<8x128xf32>
    tpu.vector_store %arg19[%644, %c0_228], %643 {strides = array<i32>} : memref<64x128xf32, #tpu.memory_space<vmem>>, vector<8x128xf32>,
    %c1_i32_229 = arith.constant 1 : i32
    %c8_i32_230 = arith.constant 8 : i32
    %646 = arith.muli %c1_i32_229, %c8_i32_230 : i32
    %647 = tpu.assume_multiple %646, 8 : i32
    %648 = arith.index_cast %647 : i32 to index
    %c0_231 = arith.constant 0 : index
    %649 = vector.load %arg18[%648, %c0_231] : memref<64x512xf32, #tpu.memory_space<vmem>>, vector<8x512xf32>
    %c0_232 = arith.constant 0 : index
    %c0_233 = arith.constant 0 : index
    %650 = vector.load %arg13[%c0_232, %c0_233] : memref<128x512xf32, #tpu.memory_space<vmem>>, vector<128x512xf32>
    %cst_234 = arith.constant dense<0.000000e+00> : vector<8x512xf32>
    %651 = tpu.matmul %643, %650, %cst_234 {dimension_numbers = #tpu.dot_dimension_numbers<[1], [0], [0], [1], [0, 0, 1, 1], [], []>} : vector<8x128xf32>, vector<128x512xf32>, vector<8x512xf32> -> vector<8x512xf32>
    %652 = arith.addf %649, %651 : vector<8x512xf32>
    %653 = vector.extract_strided_slice %652 {offsets = [0, 0], sizes = [8, 384], strides = [1, 1]} : vector<8x512xf32> to vector<8x384xf32>
    %654 = arith.negf %653 : vector<8x384xf32>
    %655 = math.exp %654 : vector<8x384xf32>
    %cst_235 = arith.constant 1.000000e+00 : f32
    %656 = vector.broadcast %cst_235 : f32 to vector<8x384xf32>
    %657 = arith.addf %656, %655 : vector<8x384xf32>
    %658 = arith.divf %656, %657 : vector<8x384xf32>
    %659 = vector.extract_strided_slice %652 {offsets = [0, 384], sizes = [8, 128], strides = [1, 1]} : vector<8x512xf32> to vector<8x128xf32>
    %660 = math.tanh %659 : vector<8x128xf32>
    %661 = vector.extract_strided_slice %658 {offsets = [0, 128], sizes = [8, 128], strides = [1, 1]} : vector<8x384xf32> to vector<8x128xf32>
    %662 = arith.mulf %661, %640 : vector<8x128xf32>
    %663 = vector.extract_strided_slice %658 {offsets = [0, 0], sizes = [8, 128], strides = [1, 1]} : vector<8x384xf32> to vector<8x128xf32>
    %664 = arith.mulf %663, %660 : vector<8x128xf32>
    %665 = arith.addf %662, %664 : vector<8x128xf32>
    %666 = vector.extract_strided_slice %658 {offsets = [0, 256], sizes = [8, 128], strides = [1, 1]} : vector<8x384xf32> to vector<8x128xf32>
    %667 = math.tanh %665 : vector<8x128xf32>
    %668 = arith.mulf %666, %667 : vector<8x128xf32>
    %669 = arith.index_cast %647 : i32 to index
    %c0_236 = arith.constant 0 : index
    %670 = vector.load %arg19[%669, %c0_236] : memref<64x128xf32, #tpu.memory_space<vmem>>, vector<8x128xf32>
    tpu.vector_store %arg19[%669, %c0_236], %668 {strides = array<i32>} : memref<64x128xf32, #tpu.memory_space<vmem>>, vector<8x128xf32>,
    %c2_i32_237 = arith.constant 2 : i32
    %c8_i32_238 = arith.constant 8 : i32
    %671 = arith.muli %c2_i32_237, %c8_i32_238 : i32
    %672 = tpu.assume_multiple %671, 8 : i32
    %673 = arith.index_cast %672 : i32 to index
    %c0_239 = arith.constant 0 : index
    %674 = vector.load %arg18[%673, %c0_239] : memref<64x512xf32, #tpu.memory_space<vmem>>, vector<8x512xf32>
    %c0_240 = arith.constant 0 : index
    %c0_241 = arith.constant 0 : index
    %675 = vector.load %arg13[%c0_240, %c0_241] : memref<128x512xf32, #tpu.memory_space<vmem>>, vector<128x512xf32>
    %cst_242 = arith.constant dense<0.000000e+00> : vector<8x512xf32>
    %676 = tpu.matmul %668, %675, %cst_242 {dimension_numbers = #tpu.dot_dimension_numbers<[1], [0], [0], [1], [0, 0, 1, 1], [], []>} : vector<8x128xf32>, vector<128x512xf32>, vector<8x512xf32> -> vector<8x512xf32>
    %677 = arith.addf %674, %676 : vector<8x512xf32>
    %678 = vector.extract_strided_slice %677 {offsets = [0, 0], sizes = [8, 384], strides = [1, 1]} : vector<8x512xf32> to vector<8x384xf32>
    %679 = arith.negf %678 : vector<8x384xf32>
    %680 = math.exp %679 : vector<8x384xf32>
    %cst_243 = arith.constant 1.000000e+00 : f32
    %681 = vector.broadcast %cst_243 : f32 to vector<8x384xf32>
    %682 = arith.addf %681, %680 : vector<8x384xf32>
    %683 = arith.divf %681, %682 : vector<8x384xf32>
    %684 = vector.extract_strided_slice %677 {offsets = [0, 384], sizes = [8, 128], strides = [1, 1]} : vector<8x512xf32> to vector<8x128xf32>
    %685 = math.tanh %684 : vector<8x128xf32>
    %686 = vector.extract_strided_slice %683 {offsets = [0, 128], sizes = [8, 128], strides = [1, 1]} : vector<8x384xf32> to vector<8x128xf32>
    %687 = arith.mulf %686, %665 : vector<8x128xf32>
    %688 = vector.extract_strided_slice %683 {offsets = [0, 0], sizes = [8, 128], strides = [1, 1]} : vector<8x384xf32> to vector<8x128xf32>
    %689 = arith.mulf %688, %685 : vector<8x128xf32>
    %690 = arith.addf %687, %689 : vector<8x128xf32>
    %691 = vector.extract_strided_slice %683 {offsets = [0, 256], sizes = [8, 128], strides = [1, 1]} : vector<8x384xf32> to vector<8x128xf32>
    %692 = math.tanh %690 : vector<8x128xf32>
    %693 = arith.mulf %691, %692 : vector<8x128xf32>
    %694 = arith.index_cast %672 : i32 to index
    %c0_244 = arith.constant 0 : index
    %695 = vector.load %arg19[%694, %c0_244] : memref<64x128xf32, #tpu.memory_space<vmem>>, vector<8x128xf32>
    tpu.vector_store %arg19[%694, %c0_244], %693 {strides = array<i32>} : memref<64x128xf32, #tpu.memory_space<vmem>>, vector<8x128xf32>,
    %c3_i32_245 = arith.constant 3 : i32
    %c8_i32_246 = arith.constant 8 : i32
    %696 = arith.muli %c3_i32_245, %c8_i32_246 : i32
    %697 = tpu.assume_multiple %696, 8 : i32
    %698 = arith.index_cast %697 : i32 to index
    %c0_247 = arith.constant 0 : index
    %699 = vector.load %arg18[%698, %c0_247] : memref<64x512xf32, #tpu.memory_space<vmem>>, vector<8x512xf32>
    %c0_248 = arith.constant 0 : index
    %c0_249 = arith.constant 0 : index
    %700 = vector.load %arg13[%c0_248, %c0_249] : memref<128x512xf32, #tpu.memory_space<vmem>>, vector<128x512xf32>
    %cst_250 = arith.constant dense<0.000000e+00> : vector<8x512xf32>
    %701 = tpu.matmul %693, %700, %cst_250 {dimension_numbers = #tpu.dot_dimension_numbers<[1], [0], [0], [1], [0, 0, 1, 1], [], []>} : vector<8x128xf32>, vector<128x512xf32>, vector<8x512xf32> -> vector<8x512xf32>
    %702 = arith.addf %699, %701 : vector<8x512xf32>
    %703 = vector.extract_strided_slice %702 {offsets = [0, 0], sizes = [8, 384], strides = [1, 1]} : vector<8x512xf32> to vector<8x384xf32>
    %704 = arith.negf %703 : vector<8x384xf32>
    %705 = math.exp %704 : vector<8x384xf32>
    %cst_251 = arith.constant 1.000000e+00 : f32
    %706 = vector.broadcast %cst_251 : f32 to vector<8x384xf32>
    %707 = arith.addf %706, %705 : vector<8x384xf32>
    %708 = arith.divf %706, %707 : vector<8x384xf32>
    %709 = vector.extract_strided_slice %702 {offsets = [0, 384], sizes = [8, 128], strides = [1, 1]} : vector<8x512xf32> to vector<8x128xf32>
    %710 = math.tanh %709 : vector<8x128xf32>
    %711 = vector.extract_strided_slice %708 {offsets = [0, 128], sizes = [8, 128], strides = [1, 1]} : vector<8x384xf32> to vector<8x128xf32>
    %712 = arith.mulf %711, %690 : vector<8x128xf32>
    %713 = vector.extract_strided_slice %708 {offsets = [0, 0], sizes = [8, 128], strides = [1, 1]} : vector<8x384xf32> to vector<8x128xf32>
    %714 = arith.mulf %713, %710 : vector<8x128xf32>
    %715 = arith.addf %712, %714 : vector<8x128xf32>
    %716 = vector.extract_strided_slice %708 {offsets = [0, 256], sizes = [8, 128], strides = [1, 1]} : vector<8x384xf32> to vector<8x128xf32>
    %717 = math.tanh %715 : vector<8x128xf32>
    %718 = arith.mulf %716, %717 : vector<8x128xf32>
    %719 = arith.index_cast %697 : i32 to index
    %c0_252 = arith.constant 0 : index
    %720 = vector.load %arg19[%719, %c0_252] : memref<64x128xf32, #tpu.memory_space<vmem>>, vector<8x128xf32>
    tpu.vector_store %arg19[%719, %c0_252], %718 {strides = array<i32>} : memref<64x128xf32, #tpu.memory_space<vmem>>, vector<8x128xf32>,
    %c4_i32_253 = arith.constant 4 : i32
    %c8_i32_254 = arith.constant 8 : i32
    %721 = arith.muli %c4_i32_253, %c8_i32_254 : i32
    %722 = tpu.assume_multiple %721, 8 : i32
    %723 = arith.index_cast %722 : i32 to index
    %c0_255 = arith.constant 0 : index
    %724 = vector.load %arg18[%723, %c0_255] : memref<64x512xf32, #tpu.memory_space<vmem>>, vector<8x512xf32>
    %c0_256 = arith.constant 0 : index
    %c0_257 = arith.constant 0 : index
    %725 = vector.load %arg13[%c0_256, %c0_257] : memref<128x512xf32, #tpu.memory_space<vmem>>, vector<128x512xf32>
    %cst_258 = arith.constant dense<0.000000e+00> : vector<8x512xf32>
    %726 = tpu.matmul %718, %725, %cst_258 {dimension_numbers = #tpu.dot_dimension_numbers<[1], [0], [0], [1], [0, 0, 1, 1], [], []>} : vector<8x128xf32>, vector<128x512xf32>, vector<8x512xf32> -> vector<8x512xf32>
    %727 = arith.addf %724, %726 : vector<8x512xf32>
    %728 = vector.extract_strided_slice %727 {offsets = [0, 0], sizes = [8, 384], strides = [1, 1]} : vector<8x512xf32> to vector<8x384xf32>
    %729 = arith.negf %728 : vector<8x384xf32>
    %730 = math.exp %729 : vector<8x384xf32>
    %cst_259 = arith.constant 1.000000e+00 : f32
    %731 = vector.broadcast %cst_259 : f32 to vector<8x384xf32>
    %732 = arith.addf %731, %730 : vector<8x384xf32>
    %733 = arith.divf %731, %732 : vector<8x384xf32>
    %734 = vector.extract_strided_slice %727 {offsets = [0, 384], sizes = [8, 128], strides = [1, 1]} : vector<8x512xf32> to vector<8x128xf32>
    %735 = math.tanh %734 : vector<8x128xf32>
    %736 = vector.extract_strided_slice %733 {offsets = [0, 128], sizes = [8, 128], strides = [1, 1]} : vector<8x384xf32> to vector<8x128xf32>
    %737 = arith.mulf %736, %715 : vector<8x128xf32>
    %738 = vector.extract_strided_slice %733 {offsets = [0, 0], sizes = [8, 128], strides = [1, 1]} : vector<8x384xf32> to vector<8x128xf32>
    %739 = arith.mulf %738, %735 : vector<8x128xf32>
    %740 = arith.addf %737, %739 : vector<8x128xf32>
    %741 = vector.extract_strided_slice %733 {offsets = [0, 256], sizes = [8, 128], strides = [1, 1]} : vector<8x384xf32> to vector<8x128xf32>
    %742 = math.tanh %740 : vector<8x128xf32>
    %743 = arith.mulf %741, %742 : vector<8x128xf32>
    %744 = arith.index_cast %722 : i32 to index
    %c0_260 = arith.constant 0 : index
    %745 = vector.load %arg19[%744, %c0_260] : memref<64x128xf32, #tpu.memory_space<vmem>>, vector<8x128xf32>
    tpu.vector_store %arg19[%744, %c0_260], %743 {strides = array<i32>} : memref<64x128xf32, #tpu.memory_space<vmem>>, vector<8x128xf32>,
    %c5_i32_261 = arith.constant 5 : i32
    %c8_i32_262 = arith.constant 8 : i32
    %746 = arith.muli %c5_i32_261, %c8_i32_262 : i32
    %747 = tpu.assume_multiple %746, 8 : i32
    %748 = arith.index_cast %747 : i32 to index
    %c0_263 = arith.constant 0 : index
    %749 = vector.load %arg18[%748, %c0_263] : memref<64x512xf32, #tpu.memory_space<vmem>>, vector<8x512xf32>
    %c0_264 = arith.constant 0 : index
    %c0_265 = arith.constant 0 : index
    %750 = vector.load %arg13[%c0_264, %c0_265] : memref<128x512xf32, #tpu.memory_space<vmem>>, vector<128x512xf32>
    %cst_266 = arith.constant dense<0.000000e+00> : vector<8x512xf32>
    %751 = tpu.matmul %743, %750, %cst_266 {dimension_numbers = #tpu.dot_dimension_numbers<[1], [0], [0], [1], [0, 0, 1, 1], [], []>} : vector<8x128xf32>, vector<128x512xf32>, vector<8x512xf32> -> vector<8x512xf32>
    %752 = arith.addf %749, %751 : vector<8x512xf32>
    %753 = vector.extract_strided_slice %752 {offsets = [0, 0], sizes = [8, 384], strides = [1, 1]} : vector<8x512xf32> to vector<8x384xf32>
    %754 = arith.negf %753 : vector<8x384xf32>
    %755 = math.exp %754 : vector<8x384xf32>
    %cst_267 = arith.constant 1.000000e+00 : f32
    %756 = vector.broadcast %cst_267 : f32 to vector<8x384xf32>
    %757 = arith.addf %756, %755 : vector<8x384xf32>
    %758 = arith.divf %756, %757 : vector<8x384xf32>
    %759 = vector.extract_strided_slice %752 {offsets = [0, 384], sizes = [8, 128], strides = [1, 1]} : vector<8x512xf32> to vector<8x128xf32>
    %760 = math.tanh %759 : vector<8x128xf32>
    %761 = vector.extract_strided_slice %758 {offsets = [0, 128], sizes = [8, 128], strides = [1, 1]} : vector<8x384xf32> to vector<8x128xf32>
    %762 = arith.mulf %761, %740 : vector<8x128xf32>
    %763 = vector.extract_strided_slice %758 {offsets = [0, 0], sizes = [8, 128], strides = [1, 1]} : vector<8x384xf32> to vector<8x128xf32>
    %764 = arith.mulf %763, %760 : vector<8x128xf32>
    %765 = arith.addf %762, %764 : vector<8x128xf32>
    %766 = vector.extract_strided_slice %758 {offsets = [0, 256], sizes = [8, 128], strides = [1, 1]} : vector<8x384xf32> to vector<8x128xf32>
    %767 = math.tanh %765 : vector<8x128xf32>
    %768 = arith.mulf %766, %767 : vector<8x128xf32>
    %769 = arith.index_cast %747 : i32 to index
    %c0_268 = arith.constant 0 : index
    %770 = vector.load %arg19[%769, %c0_268] : memref<64x128xf32, #tpu.memory_space<vmem>>, vector<8x128xf32>
    tpu.vector_store %arg19[%769, %c0_268], %768 {strides = array<i32>} : memref<64x128xf32, #tpu.memory_space<vmem>>, vector<8x128xf32>,
    %c6_i32_269 = arith.constant 6 : i32
    %c8_i32_270 = arith.constant 8 : i32
    %771 = arith.muli %c6_i32_269, %c8_i32_270 : i32
    %772 = tpu.assume_multiple %771, 8 : i32
    %773 = arith.index_cast %772 : i32 to index
    %c0_271 = arith.constant 0 : index
    %774 = vector.load %arg18[%773, %c0_271] : memref<64x512xf32, #tpu.memory_space<vmem>>, vector<8x512xf32>
    %c0_272 = arith.constant 0 : index
    %c0_273 = arith.constant 0 : index
    %775 = vector.load %arg13[%c0_272, %c0_273] : memref<128x512xf32, #tpu.memory_space<vmem>>, vector<128x512xf32>
    %cst_274 = arith.constant dense<0.000000e+00> : vector<8x512xf32>
    %776 = tpu.matmul %768, %775, %cst_274 {dimension_numbers = #tpu.dot_dimension_numbers<[1], [0], [0], [1], [0, 0, 1, 1], [], []>} : vector<8x128xf32>, vector<128x512xf32>, vector<8x512xf32> -> vector<8x512xf32>
    %777 = arith.addf %774, %776 : vector<8x512xf32>
    %778 = vector.extract_strided_slice %777 {offsets = [0, 0], sizes = [8, 384], strides = [1, 1]} : vector<8x512xf32> to vector<8x384xf32>
    %779 = arith.negf %778 : vector<8x384xf32>
    %780 = math.exp %779 : vector<8x384xf32>
    %cst_275 = arith.constant 1.000000e+00 : f32
    %781 = vector.broadcast %cst_275 : f32 to vector<8x384xf32>
    %782 = arith.addf %781, %780 : vector<8x384xf32>
    %783 = arith.divf %781, %782 : vector<8x384xf32>
    %784 = vector.extract_strided_slice %777 {offsets = [0, 384], sizes = [8, 128], strides = [1, 1]} : vector<8x512xf32> to vector<8x128xf32>
    %785 = math.tanh %784 : vector<8x128xf32>
    %786 = vector.extract_strided_slice %783 {offsets = [0, 128], sizes = [8, 128], strides = [1, 1]} : vector<8x384xf32> to vector<8x128xf32>
    %787 = arith.mulf %786, %765 : vector<8x128xf32>
    %788 = vector.extract_strided_slice %783 {offsets = [0, 0], sizes = [8, 128], strides = [1, 1]} : vector<8x384xf32> to vector<8x128xf32>
    %789 = arith.mulf %788, %785 : vector<8x128xf32>
    %790 = arith.addf %787, %789 : vector<8x128xf32>
    %791 = vector.extract_strided_slice %783 {offsets = [0, 256], sizes = [8, 128], strides = [1, 1]} : vector<8x384xf32> to vector<8x128xf32>
    %792 = math.tanh %790 : vector<8x128xf32>
    %793 = arith.mulf %791, %792 : vector<8x128xf32>
    %794 = arith.index_cast %772 : i32 to index
    %c0_276 = arith.constant 0 : index
    %795 = vector.load %arg19[%794, %c0_276] : memref<64x128xf32, #tpu.memory_space<vmem>>, vector<8x128xf32>
    tpu.vector_store %arg19[%794, %c0_276], %793 {strides = array<i32>} : memref<64x128xf32, #tpu.memory_space<vmem>>, vector<8x128xf32>,
    %c7_i32_277 = arith.constant 7 : i32
    %c8_i32_278 = arith.constant 8 : i32
    %796 = arith.muli %c7_i32_277, %c8_i32_278 : i32
    %797 = tpu.assume_multiple %796, 8 : i32
    %798 = arith.index_cast %797 : i32 to index
    %c0_279 = arith.constant 0 : index
    %799 = vector.load %arg18[%798, %c0_279] : memref<64x512xf32, #tpu.memory_space<vmem>>, vector<8x512xf32>
    %c0_280 = arith.constant 0 : index
    %c0_281 = arith.constant 0 : index
    %800 = vector.load %arg13[%c0_280, %c0_281] : memref<128x512xf32, #tpu.memory_space<vmem>>, vector<128x512xf32>
    %cst_282 = arith.constant dense<0.000000e+00> : vector<8x512xf32>
    %801 = tpu.matmul %793, %800, %cst_282 {dimension_numbers = #tpu.dot_dimension_numbers<[1], [0], [0], [1], [0, 0, 1, 1], [], []>} : vector<8x128xf32>, vector<128x512xf32>, vector<8x512xf32> -> vector<8x512xf32>
    %802 = arith.addf %799, %801 : vector<8x512xf32>
    %803 = vector.extract_strided_slice %802 {offsets = [0, 0], sizes = [8, 384], strides = [1, 1]} : vector<8x512xf32> to vector<8x384xf32>
    %804 = arith.negf %803 : vector<8x384xf32>
    %805 = math.exp %804 : vector<8x384xf32>
    %cst_283 = arith.constant 1.000000e+00 : f32
    %806 = vector.broadcast %cst_283 : f32 to vector<8x384xf32>
    %807 = arith.addf %806, %805 : vector<8x384xf32>
    %808 = arith.divf %806, %807 : vector<8x384xf32>
    %809 = vector.extract_strided_slice %802 {offsets = [0, 384], sizes = [8, 128], strides = [1, 1]} : vector<8x512xf32> to vector<8x128xf32>
    %810 = math.tanh %809 : vector<8x128xf32>
    %811 = vector.extract_strided_slice %808 {offsets = [0, 128], sizes = [8, 128], strides = [1, 1]} : vector<8x384xf32> to vector<8x128xf32>
    %812 = arith.mulf %811, %790 : vector<8x128xf32>
    %813 = vector.extract_strided_slice %808 {offsets = [0, 0], sizes = [8, 128], strides = [1, 1]} : vector<8x384xf32> to vector<8x128xf32>
    %814 = arith.mulf %813, %810 : vector<8x128xf32>
    %815 = arith.addf %812, %814 : vector<8x128xf32>
    %816 = vector.extract_strided_slice %808 {offsets = [0, 256], sizes = [8, 128], strides = [1, 1]} : vector<8x384xf32> to vector<8x128xf32>
    %817 = math.tanh %815 : vector<8x128xf32>
    %818 = arith.mulf %816, %817 : vector<8x128xf32>
    %819 = arith.index_cast %797 : i32 to index
    %c0_284 = arith.constant 0 : index
    %820 = vector.load %arg19[%819, %c0_284] : memref<64x128xf32, #tpu.memory_space<vmem>>, vector<8x128xf32>
    tpu.vector_store %arg19[%819, %c0_284], %818 {strides = array<i32>} : memref<64x128xf32, #tpu.memory_space<vmem>>, vector<8x128xf32>,
    %c8_i32_285 = arith.constant 8 : i32
    %c0_286 = arith.constant 0 : index
    %c0_287 = arith.constant 0 : index
    %821 = vector.load %arg19[%c0_286, %c0_287] : memref<64x128xf32, #tpu.memory_space<vmem>>, vector<64x128xf32>
    %c0_288 = arith.constant 0 : index
    %c0_289 = arith.constant 0 : index
    %822 = vector.load %arg15[%c0_288, %c0_289] : memref<128x128xf32, #tpu.memory_space<vmem>>, vector<128x128xf32>
    %cst_290 = arith.constant dense<0.000000e+00> : vector<64x128xf32>
    %823 = tpu.matmul %821, %822, %cst_290 {dimension_numbers = #tpu.dot_dimension_numbers<[1], [0], [0], [1], [0, 0, 1, 1], [], []>} : vector<64x128xf32>, vector<128x128xf32>, vector<64x128xf32> -> vector<64x128xf32>
    %c0_291 = arith.constant 0 : index
    %c0_292 = arith.constant 0 : index
    %824 = vector.load %arg16[%c0_291, %c0_292] : memref<1x128xf32, #tpu.memory_space<vmem>>, vector<1x128xf32>
    %825 = vector.broadcast %824 : vector<1x128xf32> to vector<64x128xf32>
    %826 = arith.addf %823, %825 : vector<64x128xf32>
    %c0_293 = arith.constant 0 : index
    %c0_294 = arith.constant 0 : index
    %827 = vector.load %arg17[%c0_293, %c0_294] : memref<64x128xf32, #tpu.memory_space<vmem>>, vector<64x128xf32>
    tpu.vector_store %arg17[%c0_293, %c0_294], %826 {strides = array<i32>} : memref<64x128xf32, #tpu.memory_space<vmem>>, vector<64x128xf32>,
    return
  }
  func.func @transform_0(%arg0: i32) -> (i32, i32) {
    %c0_i32 = arith.constant 0 : i32
    %c0_i32_0 = arith.constant 0 : i32
    %c0_i32_1 = arith.constant 0 : i32
    return %c0_i32, %c0_i32_0 : i32, i32
  }
  func.func @transform_1(%arg0: i32) -> (i32, i32) {
    %c0_i32 = arith.constant 0 : i32
    %c0_i32_0 = arith.constant 0 : i32
    %c0_i32_1 = arith.constant 0 : i32
    return %c0_i32, %c0_i32_0 : i32, i32
  }
  func.func @transform_2(%arg0: i32) -> (i32, i32) {
    %c0_i32 = arith.constant 0 : i32
    %c0_i32_0 = arith.constant 0 : i32
    %c0_i32_1 = arith.constant 0 : i32
    return %c0_i32, %c0_i32_0 : i32, i32
  }
  func.func @transform_3(%arg0: i32) -> (i32, i32) {
    %c0_i32 = arith.constant 0 : i32
    %c0_i32_0 = arith.constant 0 : i32
    %c0_i32_1 = arith.constant 0 : i32
    return %c0_i32, %c0_i32_0 : i32, i32
  }
  func.func @transform_4(%arg0: i32) -> (i32, i32) {
    %c0_i32 = arith.constant 0 : i32
    %c0_i32_0 = arith.constant 0 : i32
    %c0_i32_1 = arith.constant 0 : i32
    return %c0_i32, %c0_i32_0 : i32, i32
  }
  func.func @transform_5(%arg0: i32) -> (i32, i32) {
    %c0_i32 = arith.constant 0 : i32
    %c0_i32_0 = arith.constant 0 : i32
    %c0_i32_1 = arith.constant 0 : i32
    return %c0_i32, %c0_i32_0 : i32, i32
  }
  func.func @transform_6(%arg0: i32) -> (i32, i32) {
    %c0_i32 = arith.constant 0 : i32
    %c0_i32_0 = arith.constant 0 : i32
    %c0_i32_1 = arith.constant 0 : i32
    return %c0_i32, %c0_i32_0 : i32, i32
  }
  func.func @transform_7(%arg0: i32) -> (i32, i32) {
    %c0_i32 = arith.constant 0 : i32
    %c0_i32_0 = arith.constant 0 : i32
    %c0_i32_1 = arith.constant 0 : i32
    return %c0_i32, %c0_i32_0 : i32, i32
  }
  func.func @transform_8(%arg0: i32) -> (i32, i32) {
    %c0_i32 = arith.constant 0 : i32
    %c0_i32_0 = arith.constant 0 : i32
    %c0_i32_1 = arith.constant 0 : i32
    return %c0_i32, %c0_i32_0 : i32, i32
  }
  func.func @transform_9(%arg0: i32) -> (i32, i32) {
    %c0_i32 = arith.constant 0 : i32
    %c0_i32_0 = arith.constant 0 : i32
    %c0_i32_1 = arith.constant 0 : i32
    return %c0_i32, %c0_i32_0 : i32, i32
  }
  func.func @transform_10(%arg0: i32) -> (i32, i32) {
    %c0_i32 = arith.constant 0 : i32
    %c0_i32_0 = arith.constant 0 : i32
    %c0_i32_1 = arith.constant 0 : i32
    return %c0_i32, %c0_i32_0 : i32, i32
  }
  func.func @transform_11(%arg0: i32) -> (i32, i32) {
    %c0_i32 = arith.constant 0 : i32
    %c0_i32_0 = arith.constant 0 : i32
    %c0_i32_1 = arith.constant 0 : i32
    return %c0_i32, %c0_i32_0 : i32, i32
  }
  func.func @transform_12(%arg0: i32) -> (i32, i32) {
    %c0_i32 = arith.constant 0 : i32
    %c0_i32_0 = arith.constant 0 : i32
    %c0_i32_1 = arith.constant 0 : i32
    return %c0_i32, %c0_i32_0 : i32, i32
  }
  func.func @transform_13(%arg0: i32) -> (i32, i32) {
    %c0_i32 = arith.constant 0 : i32
    %c0_i32_0 = arith.constant 0 : i32
    %c0_i32_1 = arith.constant 0 : i32
    return %c0_i32, %c0_i32_0 : i32, i32
  }
  func.func @transform_14(%arg0: i32) -> (i32, i32) {
    %c0_i32 = arith.constant 0 : i32
    %c0_i32_0 = arith.constant 0 : i32
    %c0_i32_1 = arith.constant 0 : i32
    return %c0_i32, %c0_i32_0 : i32, i32
  }
  func.func @transform_15(%arg0: i32) -> (i32, i32) {
    %c0_i32 = arith.constant 0 : i32
    %c0_i32_0 = arith.constant 0 : i32
    %c0_i32_1 = arith.constant 0 : i32
    return %c0_i32, %c0_i32_0 : i32, i32
  }
  func.func @transform_16(%arg0: i32) -> (i32, i32) {
    %c0_i32 = arith.constant 0 : i32
    %c0_i32_0 = arith.constant 0 : i32
    %c0_i32_1 = arith.constant 0 : i32
    return %c0_i32, %c0_i32_0 : i32, i32
  }
}

</mosaic_0001>

<bundles_post_ra>
// kernel: recurrent_autoencoder_forward.1
= control target key start
LH: loop header
LB: loop body
LE: loop exit
PB: predicated region body
PF: predicated region fallthrough
CT: control target
= control target key end

     0   :  { %s14882_s0 = inlined_call_operand.vmem [shape: f32[64,4], index: 0, kind: input, shape index: {}]   ;;  %s14883_s1 = inlined_call_operand.hbm [shape: f32[64,8], index: 1, kind: input, shape index: {}]   ;;  %s14884_s2 = inlined_call_operand.vmem [shape: f32[4,512], index: 2, kind: input, shape index: {}]   ;;  %s14885_s3 = inlined_call_operand.hbm [shape: f32[128,512], index: 3, kind: input, shape index: {}]   ;;  %s14886_s4 = inlined_call_operand.vmem [shape: f32[1,512], index: 4, kind: input, shape index: {}]   ;;  %s14887_s5 = inlined_call_operand.hbm [shape: f32[128,512], index: 5, kind: input, shape index: {}]   ;;  %s14888_s6 = inlined_call_operand.hbm [shape: f32[128,512], index: 6, kind: input, shape index: {}]   ;;  %s14889_s7 = inlined_call_operand.vmem [shape: f32[1,512], index: 7, kind: input, shape index: {}]   ;;  %s14890_s8 = inlined_call_operand.hbm [shape: f32[128,512], index: 8, kind: input, shape index: {}]   ;;  %s14891_s9 = inlined_call_operand.hbm [shape: f32[128,512], index: 9, kind: input, shape index: {}]   ;;  %s14892_s10 = inlined_call_operand.vmem [shape: f32[1,512], index: 10, kind: input, shape index: {}]   ;;  %s14893_s11 = inlined_call_operand.hbm [shape: f32[128,512], index: 11, kind: input, shape index: {}]   ;;  %s14894_s12 = inlined_call_operand.hbm [shape: f32[128,512], index: 12, kind: input, shape index: {}]   ;;  %s14895_s13 = inlined_call_operand.vmem [shape: f32[1,512], index: 13, kind: input, shape index: {}]   ;;  %s14896_s14 = inlined_call_operand.vmem [shape: f32[128,128], index: 14, kind: input, shape index: {}]   ;;  %s14897_s15 = inlined_call_operand.hbm [shape: f32[1,128], index: 15, kind: input, shape index: {}]   ;;  %s14898_s16 = inlined_call_operand.vmem [shape: f32[64,128], index: 16, kind: output, shape index: {}]  }
   0x1   :  { %14901 = sst [smem:[#allocation23_spill]] %s14882_s0 }
   0x2   :  { %14902 = sst [smem:[#allocation24_spill]] %s14898_s16 }
   0x3   :  { %21 = vsyncpa [#allocation5], 0 }
   0x4   :  { %22 = vsyncpa [#allocation7], 0 }
   0x5   :  { %23 = vsyncpa [#allocation10], 0 }
   0x6   :  { %24 = vsyncpa [#allocation13], 0 }
   0x7   :  { %25 = vsyncpa [#allocation16], 0  ;;  %s12540_s21 = smov [#allocation6]   ;;  %s12332_s25 = scalar_lea.hbm %s14885_s3, 8192 }
   0x8   :  { %s47_s22 = sshll.u32 %s12540_s21, 4  ;;  %p12333_p0 = scmp.ne.s32.totalorder %s14885_s3, %s12332_s25  ;;  %s48_s22 = int_to_ptr.vmem [resolvable:$true] %s47_s22 }
   0x9   :  { %p12336_p1 = scmp.lt.u32.totalorder %s12332_s25, %s14885_s3 }
   0xb   :  { %p12338_p2 = pnand %p12336_p1, %p12333_p0 }
   0xd   :  { %12341 = shalt.err (!%p12338_p2)
}
   0xe   :  { %s12342_s30 = scalar_lea.vmem %s48_s22, 8192  ;;  %p12347_p4 = scmp.lt.s32.totalorder %s48_s22, %s48_s22 }
   0xf   :  { %p12343_p3 = scmp.ne.s32.totalorder %s48_s22, %s12342_s30  ;;  %p12348_p5 = scmp.lt.s32.totalorder %s12342_s30, %s12342_s30 }
  0x11   :  { %p12349_p6 = por %p12348_p5, %p12347_p4 }
  0x13   :  { %p12350_p7 = pnand %p12349_p6, %p12343_p3 }
  0x15   :  { %12353 = shalt.err (!%p12350_p7)
}
  0x16   :  { %s12541_s0 = smov 512   ;;  %s12542_s17 = smov 32  }
  0x17   :  { %53 = dma.hbm_to_vmem [thread:$0]  %s14885_s3, 8192, %s48_s22, [#allocation7], %s12541_s0, %s12541_s0, %s12542_s17  }
  0x18   :  { %s12543_s20 = smov [#allocation9]   ;;  %s12544_s23 = smov [#allocation12]  }
  0x19   :  { %s73_s21 = sshll.u32 %s12543_s20, 4  ;;  %s99_s24 = sshll.u32 %s12544_s23, 4  ;;  %s74_s21 = int_to_ptr.vmem [resolvable:$true] %s73_s21  ;;  %s100_s24 = int_to_ptr.vmem [resolvable:$true] %s99_s24 }
  0x1a   :  { %s12354_s27 = scalar_lea.hbm %s14888_s6, 8192 }
  0x1b   :  { %p12355_p8 = scmp.ne.s32.totalorder %s14888_s6, %s12354_s27  ;;  %p12358_p9 = scmp.lt.u32.totalorder %s12354_s27, %s14888_s6 }
  0x1d   :  { %p12360_p10 = pnand %p12358_p9, %p12355_p8 }
  0x1f   :  { %12363 = shalt.err (!%p12360_p10)
}
  0x20   :  { %s12364_s3 = scalar_lea.vmem %s74_s21, 8192  ;;  %p12369_p12 = scmp.lt.s32.totalorder %s74_s21, %s74_s21 }
  0x21   :  { %p12365_p11 = scmp.ne.s32.totalorder %s74_s21, %s12364_s3  ;;  %p12370_p13 = scmp.lt.s32.totalorder %s12364_s3, %s12364_s3 }
  0x23   :  { %p12371_p0 = por %p12370_p13, %p12369_p12 }
  0x25   :  { %p12372_p1 = pnand %p12371_p0, %p12365_p11 }
  0x27   :  { %12375 = shalt.err (!%p12372_p1)
}
  0x28   :  { %79 = dma.hbm_to_vmem [thread:$0]  %s14888_s6, 8192, %s74_s21, [#allocation10], %s12541_s0, %s12541_s0, %s12542_s17  }
  0x29   :  { %s12376_s20 = scalar_lea.hbm %s14891_s9, 8192 }
  0x2a   :  { %p12377_p2 = scmp.ne.s32.totalorder %s14891_s9, %s12376_s20  ;;  %p12380_p3 = scmp.lt.u32.totalorder %s12376_s20, %s14891_s9 }
  0x2c   :  { %p12382_p4 = pnand %p12380_p3, %p12377_p2 }
  0x2e   :  { %12385 = shalt.err (!%p12382_p4)
}
  0x2f   :  { %s12386_s28 = scalar_lea.vmem %s100_s24, 8192  ;;  %p12391_p6 = scmp.lt.s32.totalorder %s100_s24, %s100_s24 }
  0x30   :  { %p12387_p5 = scmp.ne.s32.totalorder %s100_s24, %s12386_s28  ;;  %p12392_p7 = scmp.lt.s32.totalorder %s12386_s28, %s12386_s28 }
  0x32   :  { %p12393_p8 = por %p12392_p7, %p12391_p6 }
  0x34   :  { %p12394_p9 = pnand %p12393_p8, %p12387_p5 }
  0x36   :  { %12397 = shalt.err (!%p12394_p9)
}
  0x37   :  { %105 = dma.hbm_to_vmem [thread:$0]  %s14891_s9, 8192, %s100_s24, [#allocation13], %s12541_s0, %s12541_s0, %s12542_s17  }
  0x38   :  { %s12545_s29 = smov [#allocation15]   ;;  %s12546_s3 = smov [#allocation4]  }
  0x39   :  { %s125_s30 = sshll.u32 %s12545_s29, 4  ;;  %s33_s22 = sshll.u32 %s12546_s3, 4  ;;  %s126_s30 = int_to_ptr.vmem [resolvable:$true] %s125_s30  ;;  %s34_s22 = int_to_ptr.vmem [resolvable:$true] %s33_s22 }
  0x3a   :  { %s12398_s16 = scalar_lea.hbm %s14894_s12, 8192 }
  0x3b   :  { %p12399_p10 = scmp.ne.s32.totalorder %s14894_s12, %s12398_s16  ;;  %p12402_p11 = scmp.lt.u32.totalorder %s12398_s16, %s14894_s12 }
  0x3d   :  { %p12404_p12 = pnand %p12402_p11, %p12399_p10 }
  0x3f   :  { %12407 = shalt.err (!%p12404_p12)
}
  0x40   :  { %s12408_s9 = scalar_lea.vmem %s126_s30, 8192  ;;  %p12413_p0 = scmp.lt.s32.totalorder %s126_s30, %s126_s30 }
  0x41   :  { %p12409_p13 = scmp.ne.s32.totalorder %s126_s30, %s12408_s9  ;;  %p12414_p1 = scmp.lt.s32.totalorder %s12408_s9, %s12408_s9 }
  0x43   :  { %p12415_p2 = por %p12414_p1, %p12413_p0 }
  0x45   :  { %p12416_p3 = pnand %p12415_p2, %p12409_p13 }
  0x47   :  { %12419 = shalt.err (!%p12416_p3)
}
  0x48   :  { %131 = dma.hbm_to_vmem [thread:$0]  %s14894_s12, 8192, %s126_s30, [#allocation16], %s12541_s0, %s12541_s0, %s12542_s17  }
  0x49   :  { %s12420_s21 = scalar_lea.hbm %s14883_s1, 1024 }
  0x4a   :  { %p12421_p4 = scmp.ne.s32.totalorder %s14883_s1, %s12420_s21  ;;  %p12424_p5 = scmp.lt.u32.totalorder %s12420_s21, %s14883_s1 }
  0x4c   :  { %p12426_p6 = pnand %p12424_p5, %p12421_p4 }
  0x4e   :  { %12429 = shalt.err (!%p12426_p6)
}
  0x4f   :  { %s12430_s16 = scalar_lea.vmem %s34_s22, 1024  ;;  %p12435_p8 = scmp.lt.s32.totalorder %s34_s22, %s34_s22 }
  0x50   :  { %p12431_p7 = scmp.ne.s32.totalorder %s34_s22, %s12430_s16  ;;  %p12436_p9 = scmp.lt.s32.totalorder %s12430_s16, %s12430_s16 }
  0x52   :  { %p12437_p10 = por %p12436_p9, %p12435_p8 }
  0x54   :  { %p12438_p11 = pnand %p12437_p10, %p12431_p7 }
  0x56   :  { %12441 = shalt.err (!%p12438_p11)
}
  0x57   :  { %s12547_s12 = smov 128   ;;  %s12548_s30 = smov 8  }
  0x58   :  { %39 = dma.hbm_to_vmem [thread:$0]  %s14883_s1, 1024, %s34_s22, [#allocation5], %s12547_s12, %s12547_s12, %s12548_s30  }
  0x59   :  { %s12549_s25 = smov [#allocation8]   ;;  %s12550_s9 = smov [#allocation11]  }
  0x5a   :  { %s61_s26 = sshll.u32 %s12549_s25, 4  ;;  %s87_s24 = sshll.u32 %s12550_s9, 4  ;;  %s62_s26 = int_to_ptr.vmem [resolvable:$true] %s61_s26  ;;  %s88_s24 = int_to_ptr.vmem [resolvable:$true] %s87_s24 }
  0x5b   :  { %s12442_s6 = scalar_lea.hbm %s14887_s5, 8192 }
  0x5c   :  { %p12443_p12 = scmp.ne.s32.totalorder %s14887_s5, %s12442_s6  ;;  %p12446_p13 = scmp.lt.u32.totalorder %s12442_s6, %s14887_s5 }
  0x5e   :  { %p12448_p0 = pnand %p12446_p13, %p12443_p12 }
  0x60   :  { %12451 = shalt.err (!%p12448_p0)
}
  0x61   :  { %s12452_s1 = scalar_lea.vmem %s62_s26, 8192  ;;  %p12457_p2 = scmp.lt.s32.totalorder %s62_s26, %s62_s26 }
  0x62   :  { %p12453_p1 = scmp.ne.s32.totalorder %s62_s26, %s12452_s1  ;;  %p12458_p3 = scmp.lt.s32.totalorder %s12452_s1, %s12452_s1 }
  0x64   :  { %p12459_p4 = por %p12458_p3, %p12457_p2 }
  0x66   :  { %p12460_p5 = pnand %p12459_p4, %p12453_p1 }
  0x68   :  { %12463 = shalt.err (!%p12460_p5)
}
  0x69   :  { %67 = dma.hbm_to_vmem [thread:$0]  %s14887_s5, 8192, %s62_s26, [#allocation7], %s12541_s0, %s12541_s0, %s12542_s17  }
  0x6a   :  { %s12464_s30 = scalar_lea.hbm %s14890_s8, 8192 }
  0x6b   :  { %p12465_p6 = scmp.ne.s32.totalorder %s14890_s8, %s12464_s30  ;;  %p12468_p7 = scmp.lt.u32.totalorder %s12464_s30, %s14890_s8 }
  0x6d   :  { %p12470_p8 = pnand %p12468_p7, %p12465_p6 }
  0x6f   :  { %12473 = shalt.err (!%p12470_p8)
}
  0x70   :  { %s12474_s27 = scalar_lea.vmem %s88_s24, 8192  ;;  %p12479_p10 = scmp.lt.s32.totalorder %s88_s24, %s88_s24 }
  0x71   :  { %p12475_p9 = scmp.ne.s32.totalorder %s88_s24, %s12474_s27  ;;  %p12480_p11 = scmp.lt.s32.totalorder %s12474_s27, %s12474_s27 }
  0x73   :  { %p12481_p12 = por %p12480_p11, %p12479_p10 }
  0x75   :  { %p12482_p13 = pnand %p12481_p12, %p12475_p9 }
  0x77   :  { %12485 = shalt.err (!%p12482_p13)
}
  0x78   :  { %93 = dma.hbm_to_vmem [thread:$0]  %s14890_s8, 8192, %s88_s24, [#allocation10], %s12541_s0, %s12541_s0, %s12542_s17  }
  0x79   :  { %s12551_s28 = smov [#allocation14]   ;;  %s12552_s21 = smov [#allocation17]  }
  0x7a   :  { %s113_s6 = sshll.u32 %s12551_s28, 4  ;;  %s142_s29 = sshll.u32 %s12552_s21, 4  ;;  %s114_s6 = int_to_ptr.vmem [resolvable:$true] %s113_s6  ;;  %s143_s29 = int_to_ptr.vmem [resolvable:$true] %s142_s29 }
  0x7b   :  { %s12486_s1 = scalar_lea.hbm %s14893_s11, 8192 }
  0x7c   :  { %p12487_p0 = scmp.ne.s32.totalorder %s14893_s11, %s12486_s1  ;;  %p12490_p1 = scmp.lt.u32.totalorder %s12486_s1, %s14893_s11 }
  0x7e   :  { %p12492_p2 = pnand %p12490_p1, %p12487_p0 }
  0x80   :  { %12495 = shalt.err (!%p12492_p2)
}
  0x81   :  { %s12496_s8 = scalar_lea.vmem %s114_s6, 8192  ;;  %p12501_p4 = scmp.lt.s32.totalorder %s114_s6, %s114_s6 }
  0x82   :  { %p12497_p3 = scmp.ne.s32.totalorder %s114_s6, %s12496_s8  ;;  %p12502_p5 = scmp.lt.s32.totalorder %s12496_s8, %s12496_s8 }
  0x84   :  { %p12503_p6 = por %p12502_p5, %p12501_p4 }
  0x86   :  { %p12504_p7 = pnand %p12503_p6, %p12497_p3 }
  0x88   :  { %12507 = shalt.err (!%p12504_p7)
}
  0x89   :  { %119 = dma.hbm_to_vmem [thread:$0]  %s14893_s11, 8192, %s114_s6, [#allocation13], %s12541_s0, %s12541_s0, %s12542_s17  }
  0x8a   :  { %s12508_s25 = scalar_lea.hbm %s14897_s15, 16 }
  0x8b   :  { %p12509_p8 = scmp.ne.s32.totalorder %s14897_s15, %s12508_s25  ;;  %p12512_p9 = scmp.lt.u32.totalorder %s12508_s25, %s14897_s15 }
  0x8d   :  { %p12514_p10 = pnand %p12512_p9, %p12509_p8 }
  0x8f   :  { %12517 = shalt.err (!%p12514_p10)
}
  0x90   :  { %s12518_s28 = scalar_lea.vmem %s143_s29, 16  ;;  %s12522_s21 = scalar_lea.vmem %s143_s29, 32 }
  0x91   :  { %p12519_p11 = scmp.ne.s32.totalorder %s143_s29, %s12518_s28  ;;  %p12523_p12 = scmp.lt.s32.totalorder %s143_s29, %s143_s29 }
  0x92   :  { %p12524_p13 = scmp.lt.s32.totalorder %s12522_s21, %s12518_s28 }
  0x94   :  { %p12525_p0 = por %p12524_p13, %p12523_p12 }
  0x96   :  { %p12526_p1 = pnand %p12525_p0, %p12519_p11 }
  0x98   :  { %12529 = shalt.err (!%p12526_p1)
}
  0x99   :  { %145 = dma.hbm_to_vmem [thread:$0]  %s14897_s15, 16, %s143_s29, [#allocation16]  }
  0x9a   :  { %12530 = dma.done.wait [#allocation5], 1024  }
  0x9b   :  { %12531 = vsyncadd [#allocation5], 4294966272 }
  0x9c   :  { %12532 = dma.done.wait [#allocation7], 16384  }
  0x9d   :  { %12533 = vsyncadd [#allocation7], 4294950912 }
  0x9e   :  { %12534 = dma.done.wait [#allocation10], 16384  }
  0x9f   :  { %12535 = vsyncadd [#allocation10], 4294950912 }
  0xa0   :  { %12536 = dma.done.wait [#allocation13], 16384  }
  0xa1   :  { %12537 = vsyncadd [#allocation13], 4294950912 }
  0xa2   :  { %12538 = dma.done.wait [#allocation16], 8208  }
  0xa3   :  { %12539 = vsyncadd [#allocation16], 4294959088  ;;  %v12553_v0 = vmov 0.0   ;;  %v182_v1 = vld [vmem:[%s14884_s2 + $0x8] sm:$0xff]  ;;  %vm234_vm0 = vcmask 1043456   ;;  %v508_v5 = vld [vmem:[#allocation6] sm:$0xff] }
  0xa4   :  { %420 = vmatprep.mubr.f32.mxu1 %v12553_v0  ;;  %307 = vmatprep.mubr.f32.mxu0 %v12553_v0  ;;  %v509_v2 = vld [vmem:[#allocation6 + $0x8] sm:$0xff]  ;;  %v208_v3 = vcombine.high %v182_v1, %v182_v1  ;;  %v512_v6 = vld [vmem:[#allocation6 + $0x20] sm:$0xff]  ;;  %s14903_s3 = sld [smem:[#allocation23_spill]]  ;;  %vm209_vm1 = vcmask 31744   ;;  %v511_v59 = vld [vmem:[#allocation6 + $0x18] sm:$0xff]  ;;  %vm4488_vm2 = vcmask 64512  }
  0xa5   :  { %v513_v4 = vld [vmem:[#allocation6 + $0x28] sm:$0xff]  ;;  %v12778_v9 = vpack.c.bf16 %v512_v6, %v508_v5  ;;  %v516_v13 = vld [vmem:[#allocation6 + $0x40] sm:$0xff]  ;;  %v515_v60 = vld [vmem:[#allocation6 + $0x38] sm:$0xff]  ;;  %s14904_s15 = sld [smem:[#allocation24_spill]] }
  0xa6   :  { %v12776_v8 = vpack.c.bf16 %v513_v4, %v509_v2  ;;  %v517_v10 = vld [vmem:[#allocation6 + $0x48] sm:$0xff]  ;;  %9117 = vmatprep.subr.msk.mxu1 %vm234_vm0, %v208_v3  ;;  %v520_v14 = vld [vmem:[#allocation6 + $0x60] sm:$0xff]  ;;  %v12878_v63 = vpack.c.bf16 %v515_v60, %v511_v59  ;;  %v514_v2 = vld [vmem:[#allocation6 + $0x30] sm:$0xff] }
  0xa7   :  { %v521_v11 = vld [vmem:[#allocation6 + $0x68] sm:$0xff]  ;;  %9118 = vmatpush1.msk.msra.mxu1 %vm234_vm0, %v182_v1  ;;  %v12791_v18 = vpack.c.bf16 %v520_v14, %v516_v13  ;;  %v524_v20 = vld [vmem:[#allocation6 + $0x80] sm:$0xff]  ;;  %v510_v1 = vld [vmem:[#allocation6 + $0x10] sm:$0xff] }
  0xa8   :  { %v12781_v12 = vpack.c.bf16 %v521_v11, %v517_v10  ;;  %v525_v15 = vld [vmem:[#allocation6 + $0x88] sm:$0xff]  ;;  %9309 = vmatprep.subr.bf16.mxu1 %v12776_v8  ;;  %v528_v21 = vld [vmem:[#allocation6 + $0xa0] sm:$0xff]  ;;  %v519_v3 = vld [vmem:[#allocation6 + $0x58] sm:$0xff]  ;;  %v12887_v5 = vpack.c.bf16 %v514_v2, %v510_v1 }
  0xa9   :  { %v529_v16 = vld [vmem:[#allocation6 + $0xa8] sm:$0xff]  ;;  %v12802_v25 = vpack.c.bf16 %v528_v21, %v524_v20  ;;  %v532_v27 = vld [vmem:[#allocation6 + $0xc0] sm:$0xff]  ;;  %v523_v4 = vld [vmem:[#allocation6 + $0x78] sm:$0xff] }
  0xaa   :  { %v173_v7 = vld [vmem:[%s14903_s3] sm:$0xff]  ;;  %v174_v17 = vld [vmem:[%s14903_s3 + $0x8] sm:$0xff]  ;;  %v12794_v19 = vpack.c.bf16 %v529_v16, %v525_v15  ;;  %v175_v24 = vld [vmem:[%s14903_s3 + $0x10] sm:$0xff]  ;;  %v12890_v6 = vpack.c.bf16 %v523_v4, %v519_v3 }
  0xab   :  { %9119 = vmatmul.mubr.msk.f32.vlgmr.msra.gmra.mrb[0].mxu1 %vm209_vm1, %v173_v7  ;;  %v533_v22 = vld [vmem:[#allocation6 + $0xc8] sm:$0xff]  ;;  %v536_v28 = vld [vmem:[#allocation6 + $0xe0] sm:$0xff]  ;;  %v176_v33 = vld [vmem:[%s14903_s3 + $0x18] sm:$0xff] }
  0xac   :  { %9311 = vmatpush1.bf16.msra.mxu1 %v12778_v9  ;;  %426 = vmatprep.mubr.f32.mxu1 %v12553_v0  ;;  %v537_v23 = vld [vmem:[#allocation6 + $0xe8] sm:$0xff]  ;;  %v181_v31 = vld [vmem:[%s14884_s2] sm:$0xff]  ;;  %v12816_v34 = vpack.c.bf16 %v536_v28, %v532_v27  ;;  %v179_v54 = vld [vmem:[%s14903_s3 + $0x30] sm:$0xff] }
  0xad   :  { %9313 = vmatprep.subr.bf16.mxu1 %v12781_v12  ;;  %v12805_v26 = vpack.c.bf16 %v537_v23, %v533_v22  ;;  %v541_v29 = vld [vmem:[#allocation6 + $0x108] sm:$0xff]  ;;  %v207_v32 = vcombine.high %v181_v31, %v181_v31  ;;  %v540_v36 = vld [vmem:[#allocation6 + $0x100] sm:$0xff]  ;;  %v180_v61 = vld [vmem:[%s14903_s3 + $0x38] sm:$0xff] }
  0xae   :  { %v545_v30 = vld [vmem:[#allocation6 + $0x128] sm:$0xff]  ;;  %v544_v37 = vld [vmem:[#allocation6 + $0x120] sm:$0xff]  ;;  %v522_v10 = vld [vmem:[#allocation6 + $0x70] sm:$0xff] }
  0xaf   :  { %9120 = vmatmul.mubr.msk.f32.gmra.mrb[2].mxu1 %vm209_vm1, %v174_v17  ;;  %v12819_v35 = vpack.c.bf16 %v545_v30, %v541_v29  ;;  %9107 = vmatprep.subr.msk.mxu0 %vm234_vm0, %v207_v32  ;;  %v549_v38 = vld [vmem:[#allocation6 + $0x148] sm:$0xff]  ;;  %v177_v40 = vld [vmem:[%s14903_s3 + $0x20] sm:$0xff]  ;;  %v12830_v41 = vpack.c.bf16 %v544_v37, %v540_v36  ;;  %v527_v11 = vld [vmem:[#allocation6 + $0x98] sm:$0xff] }
  0xb0   :  { %9315 = vmatpush1.bf16.msra.mxu1 %v12791_v18  ;;  %432 = vmatprep.mubr.f32.mxu1 %v12553_v0  ;;  %v553_v39 = vld [vmem:[#allocation6 + $0x168] sm:$0xff]  ;;  %v548_v43 = vld [vmem:[#allocation6 + $0x140] sm:$0xff]  ;;  %v531_v13 = vld [vmem:[#allocation6 + $0xb8] sm:$0xff] }
  0xb1   :  { %9317 = vmatprep.subr.bf16.mxu1 %v12794_v19  ;;  %9108 = vmatpush1.msk.msra.mxu0 %vm234_vm0, %v181_v31  ;;  %v12833_v42 = vpack.c.bf16 %v553_v39, %v549_v38  ;;  %v552_v44 = vld [vmem:[#allocation6 + $0x160] sm:$0xff]  ;;  %v557_v45 = vld [vmem:[#allocation6 + $0x188] sm:$0xff]  ;;  %v12902_v15 = vpack.c.bf16 %v531_v13, %v527_v11  ;;  %v526_v16 = vld [vmem:[#allocation6 + $0x90] sm:$0xff] }
  0xb2   :  { %9109 = vmatmul.mubr.msk.f32.vlgmr.msra.gmra.mrb[0].mxu0 %vm209_vm1, %v173_v7  ;;  %9373 = vmatprep.subr.bf16.mxu0 %v12776_v8  ;;  %v561_v46 = vld [vmem:[#allocation6 + $0x1a8] sm:$0xff]  ;;  %v12845_v48 = vpack.c.bf16 %v552_v44, %v548_v43  ;;  %v556_v50 = vld [vmem:[#allocation6 + $0x180] sm:$0xff]  ;;  %v518_v7 = vld [vmem:[#allocation6 + $0x50] sm:$0xff] }
  0xb3   :  { %9121 = vmatmul.mubr.msk.f32.gmra.mrb[4].mxu1 %vm209_vm1, %v175_v24  ;;  %9375 = vmatpush1.bf16.msra.mxu0 %v12778_v9  ;;  %v178_v47 = vld [vmem:[%s14903_s3 + $0x28] sm:$0xff]  ;;  %v12848_v49 = vpack.c.bf16 %v561_v46, %v557_v45  ;;  %v560_v51 = vld [vmem:[#allocation6 + $0x1a0] sm:$0xff]  ;;  %v12898_v14 = vpack.c.bf16 %v522_v10, %v518_v7  ;;  %v535_v20 = vld [vmem:[#allocation6 + $0xd8] sm:$0xff] }
  0xb4   :  { %9319 = vmatpush1.bf16.msra.mxu1 %v12802_v25  ;;  %438 = vmatprep.mubr.f32.mxu1 %v12553_v0  ;;  %v565_v52 = vld [vmem:[#allocation6 + $0x1c8] sm:$0xff]  ;;  %v12860_v55 = vpack.c.bf16 %v560_v51, %v556_v50  ;;  %v564_v57 = vld [vmem:[#allocation6 + $0x1c0] sm:$0xff]  ;;  %v539_v21 = vld [vmem:[#allocation6 + $0xf8] sm:$0xff] }
  0xb5   :  { %9321 = vmatprep.subr.bf16.mxu1 %v12805_v26  ;;  %313 = vmatprep.mubr.f32.mxu0 %v12553_v0  ;;  %v569_v53 = vld [vmem:[#allocation6 + $0x1e8] sm:$0xff]  ;;  %v568_v58 = vld [vmem:[#allocation6 + $0x1e0] sm:$0xff]  ;;  %v12914_v23 = vpack.c.bf16 %v539_v21, %v535_v20  ;;  %v538_v27 = vld [vmem:[#allocation6 + $0xf0] sm:$0xff] }
  0xb6   :  { %9110 = vmatmul.mubr.msk.f32.gmra.mrb[2].mxu0 %vm209_vm1, %v174_v17  ;;  %9377 = vmatprep.subr.bf16.mxu0 %v12781_v12  ;;  %v12863_v56 = vpack.c.bf16 %v569_v53, %v565_v52  ;;  %v12875_v62 = vpack.c.bf16 %v568_v58, %v564_v57  ;;  %v530_v17 = vld [vmem:[#allocation6 + $0xb0] sm:$0xff]  ;;  %v543_v28 = vld [vmem:[#allocation6 + $0x118] sm:$0xff]  ;;  %v183_v4 = vld [vmem:[%s14886_s4] sm:$0xf] }
  0xb7   :  { %9122 = vmatmul.mubr.msk.f32.gmra.mrb[6].mxu1 %vm209_vm1, %v176_v33  ;;  %9379 = vmatpush1.bf16.msra.mxu0 %v12791_v18  ;;  %v12910_v22 = vpack.c.bf16 %v530_v17, %v526_v16  ;;  %v547_v29 = vld [vmem:[#allocation6 + $0x138] sm:$0xff]  ;;  %v542_v32 = vld [vmem:[#allocation6 + $0x110] sm:$0xff] }
  0xb8   :  { %9323 = vmatpush1.bf16.msra.mxu1 %v12816_v34  ;;  %444 = vmatprep.mubr.f32.mxu1 %v12553_v0  ;;  %v12924_v31 = vpack.c.bf16 %v547_v29, %v543_v28  ;;  %v551_v36 = vld [vmem:[#allocation6 + $0x158] sm:$0xff]  ;;  %v554_v43 = vld [vmem:[#allocation6 + $0x170] sm:$0xff] }
  0xb9   :  { %9325 = vmatprep.subr.bf16.mxu1 %v12819_v35  ;;  %319 = vmatprep.mubr.f32.mxu0 %v12553_v0  ;;  %v555_v37 = vld [vmem:[#allocation6 + $0x178] sm:$0xff]  ;;  %v562_v50 = vld [vmem:[#allocation6 + $0x1b0] sm:$0xff] }
  0xba   :  { %9111 = vmatmul.mubr.msk.f32.gmra.mrb[4].mxu0 %vm209_vm1, %v175_v24  ;;  %9381 = vmatprep.subr.bf16.mxu0 %v12794_v19  ;;  %v534_v24 = vld [vmem:[#allocation6 + $0xd0] sm:$0xff]  ;;  %v12932_v39 = vpack.c.bf16 %v555_v37, %v551_v36  ;;  %v559_v44 = vld [vmem:[#allocation6 + $0x198] sm:$0xff] }
  0xbb   :  { %9123 = vmatmul.mubr.msk.f32.gmra.mrb[8].mxu1 %vm209_vm1, %v177_v40  ;;  %9383 = vmatpush1.bf16.msra.mxu0 %v12802_v25  ;;  %v12920_v30 = vpack.c.bf16 %v538_v27, %v534_v24  ;;  %v563_v45 = vld [vmem:[#allocation6 + $0x1b8] sm:$0xff]  ;;  %v566_v57 = vld [vmem:[#allocation6 + $0x1d0] sm:$0xff] }
  0xbc   :  { %9327 = vmatpush1.bf16.msra.mxu1 %v12830_v41  ;;  %450 = vmatprep.mubr.f32.mxu1 %v12553_v0  ;;  %v567_v51 = vld [vmem:[#allocation6 + $0x1d8] sm:$0xff]  ;;  %v570_v58 = vld [vmem:[#allocation6 + $0x1f0] sm:$0xff] }
  0xbd   :  { %9329 = vmatprep.subr.bf16.mxu1 %v12833_v42  ;;  %325 = vmatprep.mubr.f32.mxu0 %v12553_v0  ;;  %v571_v52 = vld [vmem:[#allocation6 + $0x1f8] sm:$0xff]  ;;  %v12947_v59 = vpack.c.bf16 %v570_v58, %v566_v57 }
  0xbe   :  { %9112 = vmatmul.mubr.msk.f32.gmra.mrb[6].mxu0 %vm209_vm1, %v176_v33  ;;  %9385 = vmatprep.subr.bf16.mxu0 %v12805_v26  ;;  %v546_v33 = vld [vmem:[#allocation6 + $0x130] sm:$0xff] }
  0xbf   :  { %9124 = vmatmul.mubr.msk.f32.gmra.mrb[10].mxu1 %vm209_vm1, %v178_v47  ;;  %9387 = vmatpush1.bf16.msra.mxu0 %v12816_v34  ;;  %v12929_v38 = vpack.c.bf16 %v546_v33, %v542_v32 }
  0xc0   :  { %9331 = vmatpush1.bf16.msra.mxu1 %v12845_v48  ;;  %456 = vmatprep.mubr.f32.mxu1 %v12553_v0 }
  0xc1   :  { %9333 = vmatprep.subr.bf16.mxu1 %v12848_v49  ;;  %331 = vmatprep.mubr.f32.mxu0 %v12553_v0 }
  0xc2   :  { %9113 = vmatmul.mubr.msk.f32.gmra.mrb[8].mxu0 %vm209_vm1, %v177_v40  ;;  %9389 = vmatprep.subr.bf16.mxu0 %v12819_v35  ;;  %v550_v40 = vld [vmem:[#allocation6 + $0x150] sm:$0xff] }
  0xc3   :  { %9125 = vmatmul.mubr.msk.f32.gmra.mrb[12].mxu1 %vm209_vm1, %v179_v54  ;;  %9391 = vmatpush1.bf16.msra.mxu0 %v12830_v41  ;;  %v12935_v46 = vpack.c.bf16 %v554_v43, %v550_v40 }
  0xc4   :  { %9335 = vmatpush1.bf16.msra.mxu1 %v12860_v55  ;;  %462 = vmatprep.mubr.f32.mxu1 %v12553_v0 }
  0xc5   :  { %9337 = vmatprep.subr.bf16.mxu1 %v12863_v56  ;;  %337 = vmatprep.mubr.f32.mxu0 %v12553_v0 }
  0xc6   :  { %9114 = vmatmul.mubr.msk.f32.gmra.mrb[10].mxu0 %vm209_vm1, %v178_v47  ;;  %9393 = vmatprep.subr.bf16.mxu0 %v12833_v42  ;;  %v12938_v47 = vpack.c.bf16 %v563_v45, %v559_v44 }
  0xc7   :  { %9126 = vmatmul.mubr.msk.f32.gmra.mrb[14].mxu1 %vm209_vm1, %v180_v61  ;;  %9395 = vmatpush1.bf16.msra.mxu0 %v12845_v48 }
  0xc8   :  { %9339 = vmatpush1.bf16.msra.mxu1 %v12875_v62  ;;  %636 = vmatprep.mubr.f32.mxu1 %v12553_v0 }
  0xc9   :  { %9341 = vmatprep.subr.bf16.mxu1 %v12878_v63  ;;  %343 = vmatprep.mubr.f32.mxu0 %v12553_v0 }
  0xca   :  { %9115 = vmatmul.mubr.msk.f32.gmra.mrb[12].mxu0 %vm209_vm1, %v179_v54  ;;  %9397 = vmatprep.subr.bf16.mxu0 %v12848_v49  ;;  %v12944_v54 = vpack.c.bf16 %v571_v52, %v567_v51 }
  0xcb   :  { %637 = vmatmul.mubr.f32.vlgmr.msra.gmra.mrb[16].mxu1 %v12553_v0  ;;  %349 = vmatprep.mubr.f32.mxu0 %v12553_v0 }
  0xcc   :  { %9343 = vmatpush1.bf16.msra.mxu1 %v12887_v5  ;;  %707 = vmatprep.mubr.f32.mxu1 %v12553_v0 }
  0xcd   :  { %9345 = vmatprep.subr.bf16.mxu1 %v12890_v6  ;;  %9399 = vmatpush1.bf16.msra.mxu0 %v12860_v55 }
  0xce   :  { %9116 = vmatmul.mubr.msk.f32.gmra.mrb[14].mxu0 %vm209_vm1, %v180_v61  ;;  %9401 = vmatprep.subr.bf16.mxu0 %v12863_v56  ;;  %v185_v61 = vlaneseq }
  0xcf   :  { %878 = vmatprep.mubr.f32.mxu0 %v12553_v0 }
  0xd0   :  { %9347 = vmatpush1.bf16.msra.mxu1 %v12898_v14  ;;  %v186_v2 = vshrl.u32 %v185_v61, 7 }
  0xd1   :  { %9349 = vmatprep.subr.bf16.mxu1 %v12902_v15  ;;  %9403 = vmatpush1.bf16.msra.mxu0 %v12875_v62 }
  0xd2   :  { %9437 = vmatprep.subr.bf16.mxu0 %v12776_v8  ;;  %v558_v8 = vld [vmem:[#allocation6 + $0x190] sm:$0xff]  ;;  %v12970_v3 = vsub.s32 0, %v186_v2  ;;  %v12975_v7 = vsub.s32 1, %v186_v2  ;;  %v12985_v29 = vsub.s32 2, %v186_v2  ;;  %v12987_v32 = vsub.s32 3, %v186_v2 }
  0xd3   :  { %v12941_v53 = vpack.c.bf16 %v562_v50, %v558_v8 }
  0xd4   :  { %9351 = vmatpush1.bf16.msra.mxu1 %v12910_v22  ;;  %v12978_v10 = vrot.slane %v183_v4, %v12970_v3  ;;  %v12981_v11 = vrot.slane %v183_v4, %v12975_v7  ;;  %v12990_v37 = vrot.slane %v183_v4, %v12985_v29  ;;  %v12993_v43 = vrot.slane %v183_v4, %v12987_v32 }
  0xd5   :  { %9353 = vmatprep.subr.bf16.mxu1 %v12914_v23 }
  0xd8   :  { %9355 = vmatpush1.bf16.msra.mxu1 %v12920_v30 }
  0xd9   :  { %9357 = vmatprep.subr.bf16.mxu1 %v12924_v31 }
  0xdc   :  { %9359 = vmatpush1.bf16.msra.mxu1 %v12929_v38 }
  0xdd   :  { %9361 = vmatprep.subr.bf16.mxu1 %v12932_v39 }
  0xe0   :  { %9363 = vmatpush1.bf16.msra.mxu1 %v12935_v46 }
  0xe1   :  { %9365 = vmatprep.subr.bf16.mxu1 %v12938_v47 }
  0xe4   :  { %9367 = vmatpush1.bf16.msra.mxu1 %v12941_v53 }
  0xe5   :  { %9369 = vmatprep.subr.bf16.mxu1 %v12944_v54 }
  0xe8   :  { %9371 = vmatpush1.bf16.msra.mxu1 %v12947_v59 }
  0xe9   :  { %9405 = vmatprep.subr.bf16.mxu1 %v12878_v63 }
  0xeb   :  { %708 = vmatmul.mubr.f32.vlgmr.msra.gmra.mrb[0].mxu1 %v12553_v0 }
  0xec   :  { %9407 = vmatpush1.bf16.msra.mxu1 %v12887_v5  ;;  %949 = vmatprep.mubr.f32.mxu1 %v12553_v0 }
  0xed   :  { %9409 = vmatprep.subr.bf16.mxu1 %v12890_v6 }
  0xf0   :  { %9411 = vmatpush1.bf16.msra.mxu1 %v12898_v14 }
  0xf1   :  { %9413 = vmatprep.subr.bf16.mxu1 %v12902_v15 }
  0xf4   :  { %9415 = vmatpush1.bf16.msra.mxu1 %v12910_v22 }
  0xf5   :  { %9417 = vmatprep.subr.bf16.mxu1 %v12914_v23 }
  0xf8   :  { %9419 = vmatpush1.bf16.msra.mxu1 %v12920_v30 }
  0xf9   :  { %9421 = vmatprep.subr.bf16.mxu1 %v12924_v31 }
  0xfc   :  { %9423 = vmatpush1.bf16.msra.mxu1 %v12929_v38 }
  0xfd   :  { %9425 = vmatprep.subr.bf16.mxu1 %v12932_v39 }
 0x100   :  { %9427 = vmatpush1.bf16.msra.mxu1 %v12935_v46 }
 0x101   :  { %9429 = vmatprep.subr.bf16.mxu1 %v12938_v47 }
 0x104   :  { %9431 = vmatpush1.bf16.msra.mxu1 %v12941_v53 }
 0x105   :  { %9433 = vmatprep.subr.bf16.mxu1 %v12944_v54 }
 0x108   :  { %9435 = vmatpush1.bf16.msra.mxu1 %v12947_v59 }
 0x109   :  { %9469 = vmatprep.subr.bf16.mxu1 %v12878_v63 }
 0x185   :  { %v309_v60 = vpop.f32.mrb[0].mxu0 }
 0x186   :  { %v311_v1 = vpop.f32.mrb[1].mxu0  ;;  %v310_v13 = vadd.f32 %v309_v60, %v12978_v10 }
 0x187   :  { %v312_v16 = vadd.f32 %v311_v1, %v12981_v11 }
 0x19e   :  { %v638_v17 = vpop.f32.mrb[16].mxu1 }
 0x19f   :  { %v714_v20 = vadd.f32 %v638_v17, %v310_v13  ;;  %v640_v21 = vpop.f32.mrb[17].mxu1 }
 0x1a0   :  { %v715_v24 = vadd.f32 %v640_v21, %v312_v16 }
 0x1a1   :  { %v9127_v28 = vmul.f32 -1.442695, %v714_v20 }
 0x1a2   :  { %v9128_v27 = vmul.f32 -1.442695, %v715_v24 }
 0x1a4   :  { %11820 = vpow2.f32 %v9128_v27 }
 0x1a5   :  { %11822 = vpow2.f32 %v9127_v28 }
 0x1ae   :  { %v11821_v33 = vpop.eup %11820 }
 0x1af   :  { %v11823_v36 = vpop.eup %11822  ;;  %v728_v40 = vadd.f32 1.0, %v11821_v33 }
 0x1b0   :  { %v727_v44 = vadd.f32 1.0, %v11823_v36 }
 0x1b1   :  { %11824 = vrcp.f32 %v728_v40 }
 0x1b2   :  { %11826 = vrcp.f32 %v727_v44 }
 0x1bb   :  { %v11825_v57 = vpop.eup %11824 }
 0x1bc   :  { %v11827_v58 = vpop.eup %11826  ;;  %v737_v1 = vmul.f32 0.0, %v11825_v57  ;;  %v1261_v57 = vld [vmem:[#allocation6 + $0xc8] sm:$0xff] }
 0x1be   :  { %v709_v45 = vpop.f32.mrb[0].mxu1 }
 0x1bf   :  { %v11598_v8 = vadd.f32 %v709_v45, %v12990_v37  ;;  %v711_v50 = vpop.f32.mrb[1].mxu1 }
 0x1c0   :  { %v11599_v51 = vadd.f32 %v711_v50, %v12993_v43  ;;  %v1252_v50 = vld [vmem:[#allocation6 + $0x80] sm:$0xff] }
 0x1c1   :  { %v9129_v52 = vmul.f32 -1.442695, %v11598_v8 }
 0x1c2   :  { %11828 = vtanh.f32 %v11599_v51  ;;  %v1256_v51 = vld [vmem:[#allocation6 + $0xa0] sm:$0xff] }
 0x1c3   :  { %11830 = vpow2.f32 %v9129_v52  ;;  %v13080_v52 = vpack.c.bf16 %v1256_v51, %v1252_v50 }
 0x1cc   :  { %v11829_v60 = vpop.eup %11828 }
 0x1cd   :  { %v11831_v61 = vpop.eup %11830  ;;  %v738_v2 = vmul.f32 %v11829_v60, %v11827_v58  ;;  %v1265_v58 = vld [vmem:[#allocation6 + $0xe8] sm:$0xff] }
 0x1ce   :  { %v729_v4 = vadd.f32 1.0, %v11831_v61  ;;  %v13084_v60 = vpack.c.bf16 %v1265_v58, %v1261_v57  ;;  %v1260_v61 = vld [vmem:[#allocation6 + $0xc0] sm:$0xff] }
 0x1cf   :  { %v12997_v13 = vadd.f32 %v738_v2, %v737_v1  ;;  %v1264_v1 = vld [vmem:[#allocation6 + $0xe0] sm:$0xff] }
 0x1d0   :  { %11832 = vrcp.f32 %v729_v4  ;;  %v13086_v2 = vpack.c.bf16 %v1264_v1, %v1260_v61  ;;  %v1269_v4 = vld [vmem:[#allocation6 + $0x108] sm:$0xff] }
 0x1d1   :  { %11834 = vtanh.f32 %v12997_v13 }
 0x1da   :  { %v11833_v16 = vpop.eup %11832 }
 0x1db   :  { %v11835_v17 = vpop.eup %11834 }
 0x1dc   :  { %v13000_v20 = vmul.f32 %v11835_v17, %v11833_v16  ;;  %v1268_v17 = vld [vmem:[#allocation6 + $0x100] sm:$0xff] }
 0x1de   :  { %879 = vmatmul.mubr.f32.vlgmr.msra.gmra.mrb[2].mxu0 %v13000_v20  ;;  %950 = vmatmul.mubr.f32.vlgmr.msra.gmra.mrb[2].mxu1 %v13000_v20 }
 0x1df   :  { %9439 = vmatpush1.bf16.msra.mxu0 %v12778_v9  ;;  %9471 = vmatpush1.bf16.msra.mxu1 %v12887_v5 }
 0x1e0   :  { %9441 = vmatprep.subr.bf16.mxu0 %v12781_v12  ;;  %9473 = vmatprep.subr.bf16.mxu1 %v12890_v6 }
 0x1e1   :  { %1121 = vmatprep.mubr.f32.mxu0 %v12553_v0  ;;  %1192 = vmatprep.mubr.f32.mxu1 %v12553_v0 }
 0x1e3   :  { %9443 = vmatpush1.bf16.msra.mxu0 %v12791_v18  ;;  %9475 = vmatpush1.bf16.msra.mxu1 %v12898_v14 }
 0x1e4   :  { %9445 = vmatprep.subr.bf16.mxu0 %v12794_v19  ;;  %9477 = vmatprep.subr.bf16.mxu1 %v12902_v15 }
 0x1e7   :  { %9447 = vmatpush1.bf16.msra.mxu0 %v12802_v25  ;;  %9479 = vmatpush1.bf16.msra.mxu1 %v12910_v22 }
 0x1e8   :  { %9449 = vmatprep.subr.bf16.mxu0 %v12805_v26  ;;  %9481 = vmatprep.subr.bf16.mxu1 %v12914_v23 }
 0x1eb   :  { %9451 = vmatpush1.bf16.msra.mxu0 %v12816_v34  ;;  %9483 = vmatpush1.bf16.msra.mxu1 %v12920_v30 }
 0x1ec   :  { %9453 = vmatprep.subr.bf16.mxu0 %v12819_v35  ;;  %9485 = vmatprep.subr.bf16.mxu1 %v12924_v31 }
 0x1ef   :  { %9455 = vmatpush1.bf16.msra.mxu0 %v12830_v41  ;;  %9487 = vmatpush1.bf16.msra.mxu1 %v12929_v38 }
 0x1f0   :  { %9457 = vmatprep.subr.bf16.mxu0 %v12833_v42  ;;  %9489 = vmatprep.subr.bf16.mxu1 %v12932_v39 }
 0x1f3   :  { %9459 = vmatpush1.bf16.msra.mxu0 %v12845_v48  ;;  %9491 = vmatpush1.bf16.msra.mxu1 %v12935_v46 }
 0x1f4   :  { %9461 = vmatprep.subr.bf16.mxu0 %v12848_v49  ;;  %9493 = vmatprep.subr.bf16.mxu1 %v12938_v47 }
 0x1f7   :  { %9463 = vmatpush1.bf16.msra.mxu0 %v12860_v55  ;;  %9495 = vmatpush1.bf16.msra.mxu1 %v12941_v53 }
 0x1f8   :  { %9465 = vmatprep.subr.bf16.mxu0 %v12863_v56  ;;  %9497 = vmatprep.subr.bf16.mxu1 %v12944_v54 }
 0x1fb   :  { %9467 = vmatpush1.bf16.msra.mxu0 %v12875_v62  ;;  %9499 = vmatpush1.bf16.msra.mxu1 %v12947_v59 }
 0x1fc   :  { %9533 = vmatprep.subr.bf16.mxu1 %v12878_v63 }
 0x2b1   :  { %v880_v9 = vpop.f32.mrb[2].mxu0  ;;  %v951_v12 = vpop.f32.mrb[2].mxu1 }
 0x2b2   :  { %v11584_v18 = vadd.f32 %v880_v9, %v12978_v10  ;;  %v882_v19 = vpop.f32.mrb[3].mxu0  ;;  %v953_v25 = vpop.f32.mrb[3].mxu1  ;;  %v11600_v41 = vadd.f32 %v951_v12, %v12990_v37  ;;  %v1272_v9 = vld [vmem:[#allocation6 + $0x120] sm:$0xff] }
 0x2b3   :  { %v11585_v26 = vadd.f32 %v882_v19, %v12981_v11  ;;  %v11601_v42 = vadd.f32 %v953_v25, %v12993_v43  ;;  %v13092_v12 = vpack.c.bf16 %v1272_v9, %v1268_v17  ;;  %v1281_v19 = vld [vmem:[#allocation6 + $0x168] sm:$0xff] }
 0x2b4   :  { %v9130_v34 = vmul.f32 -1.442695, %v11584_v18  ;;  %v9132_v48 = vmul.f32 -1.442695, %v11600_v41  ;;  %v1277_v18 = vld [vmem:[#allocation6 + $0x148] sm:$0xff] }
 0x2b5   :  { %v9131_v35 = vmul.f32 -1.442695, %v11585_v26  ;;  %v13096_v25 = vpack.c.bf16 %v1281_v19, %v1277_v18  ;;  %v1276_v26 = vld [vmem:[#allocation6 + $0x140] sm:$0xff]  ;;  %v1285_v41 = vld [vmem:[#allocation6 + $0x188] sm:$0xff] }
 0x2b6   :  { %11836 = vpow2.f32 %v9130_v34  ;;  %v1280_v34 = vld [vmem:[#allocation6 + $0x160] sm:$0xff] }
 0x2b7   :  { %11838 = vpow2.f32 %v9131_v35  ;;  %v13098_v35 = vpack.c.bf16 %v1280_v34, %v1276_v26  ;;  %v1486_v26 = vld [vmem:[#allocation6 + $0x38] sm:$0xff] }
 0x2b8   :  { %11840 = vtanh.f32 %v11601_v42  ;;  %v1289_v42 = vld [vmem:[#allocation6 + $0x1a8] sm:$0xff] }
 0x2b9   :  { %11842 = vpow2.f32 %v9132_v48  ;;  %v1284_v48 = vld [vmem:[#allocation6 + $0x180] sm:$0xff] }
 0x2c0   :  { %v11837_v49 = vpop.eup %11836 }
 0x2c1   :  { %v969_v55 = vadd.f32 1.0, %v11837_v49  ;;  %v11839_v56 = vpop.eup %11838  ;;  %v13101_v49 = vpack.c.bf16 %v1289_v42, %v1285_v41  ;;  %v1481_v41 = vld [vmem:[#allocation6 + $0x10] sm:$0xff] }
 0x2c2   :  { %v970_v62 = vadd.f32 1.0, %v11839_v56  ;;  %v11841_v63 = vpop.eup %11840  ;;  %v1293_v56 = vld [vmem:[#allocation6 + $0x1c8] sm:$0xff]  ;;  %v1485_v42 = vld [vmem:[#allocation6 + $0x30] sm:$0xff] }
 0x2c3   :  { %11844 = vrcp.f32 %v969_v55  ;;  %v11843_v21 = vpop.eup %11842  ;;  %v1288_v55 = vld [vmem:[#allocation6 + $0x1a0] sm:$0xff] }
 0x2c4   :  { %11846 = vrcp.f32 %v970_v62  ;;  %v971_v33 = vadd.f32 1.0, %v11843_v21  ;;  %v1297_v62 = vld [vmem:[#allocation6 + $0x1e8] sm:$0xff] }
 0x2c5   :  { %v13107_v21 = vpack.c.bf16 %v1297_v62, %v1293_v56  ;;  %v1494_v56 = vld [vmem:[#allocation6 + $0x78] sm:$0xff] }
 0x2c6   :  { %11848 = vrcp.f32 %v971_v33 }
 0x2cd   :  { %v11845_v24 = vpop.eup %11844 }
 0x2ce   :  { %v980_v27 = vmul.f32 %v11845_v24, %v11841_v63  ;;  %v11847_v28 = vpop.eup %11846  ;;  %v13104_v63 = vpack.c.bf16 %v1288_v55, %v1284_v48  ;;  %v1292_v24 = vld [vmem:[#allocation6 + $0x1c0] sm:$0xff]  ;;  %v13147_v48 = vpack.c.bf16 %v1485_v42, %v1481_v41  ;;  %v1490_v55 = vld [vmem:[#allocation6 + $0x58] sm:$0xff]  ;;  %v1529_v42 = vld [vmem:[#allocation6 + $0x190] sm:$0xff] }
 0x2cf   :  { %v979_v36 = vmul.f32 %v11847_v28, %v12997_v13  ;;  %v1273_v13 = vld [vmem:[#allocation6 + $0x128] sm:$0xff]  ;;  %v13151_v62 = vpack.c.bf16 %v1494_v56, %v1490_v55  ;;  %v1534_v41 = vld [vmem:[#allocation6 + $0x1b8] sm:$0xff]  ;;  %v1533_v56 = vld [vmem:[#allocation6 + $0x1b0] sm:$0xff] }
 0x2d0   :  { %v11849_v44 = vpop.eup %11848  ;;  %v13090_v16 = vpack.c.bf16 %v1273_v13, %v1269_v4 }
 0x2d1   :  { %v13042_v40 = vadd.f32 %v980_v27, %v979_v36  ;;  %v1296_v27 = vld [vmem:[#allocation6 + $0x1e0] sm:$0xff] }
 0x2d2   :  { %v13110_v28 = vpack.c.bf16 %v1296_v27, %v1292_v24  ;;  %v1489_v24 = vld [vmem:[#allocation6 + $0x50] sm:$0xff] }
 0x2d3   :  { %11850 = vtanh.f32 %v13042_v40  ;;  %v1493_v27 = vld [vmem:[#allocation6 + $0x70] sm:$0xff] }
 0x2dd   :  { %v11851_v45 = vpop.eup %11850 }
 0x2de   :  { %v13045_v8 = vmul.f32 %v11851_v45, %v11849_v44 }
 0x2e0   :  { %1122 = vmatmul.mubr.f32.vlgmr.msra.gmra.mrb[4].mxu0 %v13045_v8  ;;  %1193 = vmatmul.mubr.f32.vlgmr.msra.gmra.mrb[4].mxu1 %v13045_v8 }
 0x2e1   :  { %9535 = vmatpush1.bf16.msra.mxu1 %v12887_v5  ;;  %1364 = vmatprep.mubr.f32.mxu0 %v12553_v0  ;;  %v1237_v5 = vld [vmem:[#allocation6 + $0x8] sm:$0xff] }
 0x2e2   :  { %9537 = vmatprep.subr.bf16.mxu1 %v12890_v6  ;;  %1435 = vmatprep.mubr.f32.mxu1 %v12553_v0  ;;  %v1241_v6 = vld [vmem:[#allocation6 + $0x28] sm:$0xff] }
 0x2e5   :  { %9539 = vmatpush1.bf16.msra.mxu1 %v12898_v14  ;;  %v13066_v14 = vpack.c.bf16 %v1241_v6, %v1237_v5 }
 0x2e6   :  { %9541 = vmatprep.subr.bf16.mxu1 %v12902_v15  ;;  %v1236_v15 = vld [vmem:[#allocation6] sm:$0xff] }
 0x2e7   :  { %9501 = vmatprep.subr.bf16.mxu0 %v13066_v14 }
 0x2e9   :  { %9543 = vmatpush1.bf16.msra.mxu1 %v12910_v22  ;;  %v1240_v22 = vld [vmem:[#allocation6 + $0x20] sm:$0xff] }
 0x2ea   :  { %9545 = vmatprep.subr.bf16.mxu1 %v12914_v23  ;;  %v13068_v23 = vpack.c.bf16 %v1240_v22, %v1236_v15 }
 0x2ec   :  { %9503 = vmatpush1.bf16.msra.mxu0 %v13068_v23 }
 0x2ed   :  { %9547 = vmatpush1.bf16.msra.mxu1 %v12920_v30  ;;  %v1245_v30 = vld [vmem:[#allocation6 + $0x48] sm:$0xff] }
 0x2ee   :  { %9549 = vmatprep.subr.bf16.mxu1 %v12924_v31  ;;  %v1249_v31 = vld [vmem:[#allocation6 + $0x68] sm:$0xff] }
 0x2f1   :  { %9551 = vmatpush1.bf16.msra.mxu1 %v12929_v38  ;;  %v13072_v38 = vpack.c.bf16 %v1249_v31, %v1245_v30 }
 0x2f2   :  { %9553 = vmatprep.subr.bf16.mxu1 %v12932_v39  ;;  %v1244_v39 = vld [vmem:[#allocation6 + $0x40] sm:$0xff] }
 0x2f3   :  { %9505 = vmatprep.subr.bf16.mxu0 %v13072_v38 }
 0x2f5   :  { %9555 = vmatpush1.bf16.msra.mxu1 %v12935_v46  ;;  %v1248_v46 = vld [vmem:[#allocation6 + $0x60] sm:$0xff] }
 0x2f6   :  { %9557 = vmatprep.subr.bf16.mxu1 %v12938_v47  ;;  %v13074_v47 = vpack.c.bf16 %v1248_v46, %v1244_v39 }
 0x2f8   :  { %9507 = vmatpush1.bf16.msra.mxu0 %v13074_v47 }
 0x2f9   :  { %9559 = vmatpush1.bf16.msra.mxu1 %v12941_v53  ;;  %v1253_v53 = vld [vmem:[#allocation6 + $0x88] sm:$0xff] }
 0x2fa   :  { %9561 = vmatprep.subr.bf16.mxu1 %v12944_v54  ;;  %v1257_v54 = vld [vmem:[#allocation6 + $0xa8] sm:$0xff] }
 0x2fd   :  { %9563 = vmatpush1.bf16.msra.mxu1 %v12947_v59  ;;  %v13078_v59 = vpack.c.bf16 %v1257_v54, %v1253_v53 }
 0x2ff   :  { %9509 = vmatprep.subr.bf16.mxu0 %v13078_v59 }
 0x300   :  { %9511 = vmatpush1.bf16.msra.mxu0 %v13080_v52 }
 0x301   :  { %9513 = vmatprep.subr.bf16.mxu0 %v13084_v60 }
 0x304   :  { %9515 = vmatpush1.bf16.msra.mxu0 %v13086_v2 }
 0x305   :  { %9517 = vmatprep.subr.bf16.mxu0 %v13090_v16 }
 0x308   :  { %9519 = vmatpush1.bf16.msra.mxu0 %v13092_v12 }
 0x309   :  { %9521 = vmatprep.subr.bf16.mxu0 %v13096_v25 }
 0x30c   :  { %9523 = vmatpush1.bf16.msra.mxu0 %v13098_v35 }
 0x30d   :  { %9525 = vmatprep.subr.bf16.mxu0 %v13101_v49 }
 0x310   :  { %9527 = vmatpush1.bf16.msra.mxu0 %v13104_v63 }
 0x311   :  { %9529 = vmatprep.subr.bf16.mxu0 %v13107_v21 }
 0x314   :  { %9531 = vmatpush1.bf16.msra.mxu0 %v13110_v28 }
 0x315   :  { %9565 = vmatprep.subr.bf16.mxu0 %v13066_v14 }
 0x3b3   :  { %v1123_v33 = vpop.f32.mrb[4].mxu0  ;;  %v1194_v36 = vpop.f32.mrb[4].mxu1 }
 0x3b4   :  { %v11586_v44 = vadd.f32 %v1123_v33, %v12978_v10  ;;  %v1125_v45 = vpop.f32.mrb[5].mxu0  ;;  %v1196_v5 = vpop.f32.mrb[5].mxu1  ;;  %v11602_v30 = vadd.f32 %v1194_v36, %v12990_v37  ;;  %v13153_v33 = vpack.c.bf16 %v1493_v27, %v1489_v24  ;;  %v1498_v36 = vld [vmem:[#allocation6 + $0x98] sm:$0xff] }
 0x3b5   :  { %v11587_v6 = vadd.f32 %v1125_v45, %v12981_v11  ;;  %v11603_v31 = vadd.f32 %v1196_v5, %v12993_v43  ;;  %v1497_v5 = vld [vmem:[#allocation6 + $0x90] sm:$0xff]  ;;  %v1538_v24 = vld [vmem:[#allocation6 + $0x1d8] sm:$0xff] }
 0x3b6   :  { %v9133_v15 = vmul.f32 -1.442695, %v11586_v44  ;;  %v9135_v39 = vmul.f32 -1.442695, %v11602_v30  ;;  %v1502_v44 = vld [vmem:[#allocation6 + $0xb8] sm:$0xff] }
 0x3b7   :  { %v9134_v22 = vmul.f32 -1.442695, %v11587_v6  ;;  %v13157_v45 = vpack.c.bf16 %v1502_v44, %v1498_v36  ;;  %v1501_v6 = vld [vmem:[#allocation6 + $0xb0] sm:$0xff]  ;;  %v1510_v30 = vld [vmem:[#allocation6 + $0xf8] sm:$0xff]  ;;  %v13183_v36 = vpack.c.bf16 %v1533_v56, %v1529_v42 }
 0x3b8   :  { %11852 = vpow2.f32 %v9133_v15  ;;  %v13159_v15 = vpack.c.bf16 %v1501_v6, %v1497_v5  ;;  %v1542_v27 = vld [vmem:[#allocation6 + $0x1f8] sm:$0xff]  ;;  %v1537_v5 = vld [vmem:[#allocation6 + $0x1d0] sm:$0xff] }
 0x3b9   :  { %11854 = vpow2.f32 %v9134_v22  ;;  %v1506_v22 = vld [vmem:[#allocation6 + $0xd8] sm:$0xff]  ;;  %v13186_v44 = vpack.c.bf16 %v1542_v27, %v1538_v24  ;;  %v1541_v6 = vld [vmem:[#allocation6 + $0x1f0] sm:$0xff] }
 0x3ba   :  { %11856 = vtanh.f32 %v11603_v31  ;;  %v13163_v31 = vpack.c.bf16 %v1510_v30, %v1506_v22  ;;  %v13189_v22 = vpack.c.bf16 %v1541_v6, %v1537_v5 }
 0x3bb   :  { %11858 = vpow2.f32 %v9135_v39  ;;  %v1505_v39 = vld [vmem:[#allocation6 + $0xd0] sm:$0xff] }
 0x3c2   :  { %v11853_v46 = vpop.eup %11852 }
 0x3c3   :  { %v1212_v53 = vadd.f32 1.0, %v11853_v46  ;;  %v11855_v54 = vpop.eup %11854  ;;  %v1509_v46 = vld [vmem:[#allocation6 + $0xf0] sm:$0xff] }
 0x3c4   :  { %v1213_v50 = vadd.f32 1.0, %v11855_v54  ;;  %v11857_v51 = vpop.eup %11856  ;;  %v1514_v54 = vld [vmem:[#allocation6 + $0x118] sm:$0xff] }
 0x3c5   :  { %11860 = vrcp.f32 %v1212_v53  ;;  %v11859_v57 = vpop.eup %11858  ;;  %v13165_v53 = vpack.c.bf16 %v1509_v46, %v1505_v39 }
 0x3c6   :  { %11862 = vrcp.f32 %v1213_v50  ;;  %v1214_v4 = vadd.f32 1.0, %v11859_v57  ;;  %v1518_v50 = vld [vmem:[#allocation6 + $0x138] sm:$0xff]  ;;  %v1513_v57 = vld [vmem:[#allocation6 + $0x110] sm:$0xff] }
 0x3c8   :  { %11864 = vrcp.f32 %v1214_v4  ;;  %v1526_v4 = vld [vmem:[#allocation6 + $0x178] sm:$0xff] }
 0x3cf   :  { %v11861_v58 = vpop.eup %11860 }
 0x3d0   :  { %v1223_v61 = vmul.f32 %v11861_v58, %v11857_v51  ;;  %v11863_v1 = vpop.eup %11862  ;;  %v13169_v51 = vpack.c.bf16 %v1518_v50, %v1514_v54  ;;  %v1517_v58 = vld [vmem:[#allocation6 + $0x130] sm:$0xff] }
 0x3d1   :  { %v1222_v13 = vmul.f32 %v11863_v1, %v13042_v40  ;;  %v1482_v40 = vld [vmem:[#allocation6 + $0x18] sm:$0xff] }
 0x3d2   :  { %v11865_v9 = vpop.eup %11864  ;;  %v13145_v34 = vpack.c.bf16 %v1486_v26, %v1482_v40  ;;  %v1522_v1 = vld [vmem:[#allocation6 + $0x158] sm:$0xff] }
 0x3d3   :  { %v13120_v17 = vadd.f32 %v1223_v61, %v1222_v13  ;;  %v13171_v61 = vpack.c.bf16 %v1517_v58, %v1513_v57  ;;  %v13175_v13 = vpack.c.bf16 %v1526_v4, %v1522_v1  ;;  %v1530_v26 = vld [vmem:[#allocation6 + $0x198] sm:$0xff] }
 0x3d4   :  { %9597 = vmatprep.subr.bf16.mxu1 %v13145_v34  ;;  %v13180_v55 = vpack.c.bf16 %v1534_v41, %v1530_v26 }
 0x3d5   :  { %11866 = vtanh.f32 %v13120_v17 }
 0x3df   :  { %v11867_v18 = vpop.eup %11866 }
 0x3e0   :  { %v13123_v19 = vmul.f32 %v11867_v18, %v11865_v9  ;;  %v1521_v9 = vld [vmem:[#allocation6 + $0x150] sm:$0xff] }
 0x3e1   :  { %v1525_v18 = vld [vmem:[#allocation6 + $0x170] sm:$0xff] }
 0x3e2   :  { %1365 = vmatmul.mubr.f32.vlgmr.msra.gmra.mrb[6].mxu0 %v13123_v19  ;;  %1436 = vmatmul.mubr.f32.vlgmr.msra.gmra.mrb[6].mxu1 %v13123_v19  ;;  %v13177_v40 = vpack.c.bf16 %v1525_v18, %v1521_v9 }
 0x3e3   :  { %9567 = vmatpush1.bf16.msra.mxu0 %v13068_v23  ;;  %1607 = vmatprep.mubr.f32.mxu0 %v12553_v0 }
 0x3e4   :  { %9569 = vmatprep.subr.bf16.mxu0 %v13072_v38  ;;  %1678 = vmatprep.mubr.f32.mxu1 %v12553_v0 }
 0x3e5   :  { %9599 = vmatpush1.bf16.msra.mxu1 %v13147_v48 }
 0x3e6   :  { %9601 = vmatprep.subr.bf16.mxu1 %v13151_v62 }
 0x3e7   :  { %9571 = vmatpush1.bf16.msra.mxu0 %v13074_v47 }
 0x3e8   :  { %9573 = vmatprep.subr.bf16.mxu0 %v13078_v59 }
 0x3e9   :  { %9603 = vmatpush1.bf16.msra.mxu1 %v13153_v33 }
 0x3ea   :  { %9605 = vmatprep.subr.bf16.mxu1 %v13157_v45 }
 0x3eb   :  { %9575 = vmatpush1.bf16.msra.mxu0 %v13080_v52 }
 0x3ec   :  { %9577 = vmatprep.subr.bf16.mxu0 %v13084_v60 }
 0x3ed   :  { %9607 = vmatpush1.bf16.msra.mxu1 %v13159_v15 }
 0x3ee   :  { %9609 = vmatprep.subr.bf16.mxu1 %v13163_v31 }
 0x3ef   :  { %9579 = vmatpush1.bf16.msra.mxu0 %v13086_v2 }
 0x3f0   :  { %9581 = vmatprep.subr.bf16.mxu0 %v13090_v16 }
 0x3f1   :  { %9611 = vmatpush1.bf16.msra.mxu1 %v13165_v53 }
 0x3f2   :  { %9613 = vmatprep.subr.bf16.mxu1 %v13169_v51 }
 0x3f3   :  { %9583 = vmatpush1.bf16.msra.mxu0 %v13092_v12 }
 0x3f4   :  { %9585 = vmatprep.subr.bf16.mxu0 %v13096_v25 }
 0x3f5   :  { %9615 = vmatpush1.bf16.msra.mxu1 %v13171_v61 }
 0x3f6   :  { %9617 = vmatprep.subr.bf16.mxu1 %v13175_v13 }
 0x3f7   :  { %9587 = vmatpush1.bf16.msra.mxu0 %v13098_v35 }
 0x3f8   :  { %9589 = vmatprep.subr.bf16.mxu0 %v13101_v49 }
 0x3f9   :  { %9619 = vmatpush1.bf16.msra.mxu1 %v13177_v40 }
 0x3fa   :  { %9621 = vmatprep.subr.bf16.mxu1 %v13180_v55 }
 0x3fb   :  { %9591 = vmatpush1.bf16.msra.mxu0 %v13104_v63 }
 0x3fc   :  { %9593 = vmatprep.subr.bf16.mxu0 %v13107_v21 }
 0x3fd   :  { %9623 = vmatpush1.bf16.msra.mxu1 %v13183_v36 }
 0x3fe   :  { %9625 = vmatprep.subr.bf16.mxu1 %v13186_v44 }
 0x3ff   :  { %9595 = vmatpush1.bf16.msra.mxu0 %v13110_v28 }
 0x400   :  { %9629 = vmatprep.subr.bf16.mxu0 %v13066_v14 }
 0x401   :  { %9627 = vmatpush1.bf16.msra.mxu1 %v13189_v22 }
 0x402   :  { %9661 = vmatprep.subr.bf16.mxu1 %v13145_v34 }
 0x4b5   :  { %v1366_v30 = vpop.f32.mrb[6].mxu0  ;;  %v1437_v39 = vpop.f32.mrb[6].mxu1 }
 0x4b6   :  { %v11588_v46 = vadd.f32 %v1366_v30, %v12978_v10  ;;  %v1368_v54 = vpop.f32.mrb[7].mxu0  ;;  %v1439_v50 = vpop.f32.mrb[7].mxu1  ;;  %v11604_v4 = vadd.f32 %v1437_v39, %v12990_v37 }
 0x4b7   :  { %v11589_v57 = vadd.f32 %v1368_v54, %v12981_v11  ;;  %v11605_v9 = vadd.f32 %v1439_v50, %v12993_v43 }
 0x4b8   :  { %v9136_v58 = vmul.f32 -1.442695, %v11588_v46  ;;  %v9138_v18 = vmul.f32 -1.442695, %v11604_v4 }
 0x4b9   :  { %v9137_v1 = vmul.f32 -1.442695, %v11589_v57 }
 0x4ba   :  { %11868 = vpow2.f32 %v9136_v58 }
 0x4bb   :  { %11870 = vpow2.f32 %v9137_v1 }
 0x4bc   :  { %11872 = vtanh.f32 %v11605_v9 }
 0x4bd   :  { %11874 = vpow2.f32 %v9138_v18 }
 0x4c4   :  { %v11869_v26 = vpop.eup %11868 }
 0x4c5   :  { %v1455_v41 = vadd.f32 1.0, %v11869_v26  ;;  %v11871_v42 = vpop.eup %11870 }
 0x4c6   :  { %v1456_v56 = vadd.f32 1.0, %v11871_v42  ;;  %v11873_v24 = vpop.eup %11872 }
 0x4c7   :  { %11876 = vrcp.f32 %v1455_v41  ;;  %v11875_v27 = vpop.eup %11874 }
 0x4c8   :  { %11878 = vrcp.f32 %v1456_v56  ;;  %v1457_v46 = vadd.f32 1.0, %v11875_v27 }
 0x4ca   :  { %11880 = vrcp.f32 %v1457_v46 }
 0x4d1   :  { %v11877_v5 = vpop.eup %11876 }
 0x4d2   :  { %v1466_v6 = vmul.f32 %v11877_v5, %v11873_v24  ;;  %v11879_v30 = vpop.eup %11878 }
 0x4d3   :  { %v1465_v54 = vmul.f32 %v11879_v30, %v13120_v17 }
 0x4d4   :  { %v11881_v50 = vpop.eup %11880 }
 0x4d5   :  { %v13199_v39 = vadd.f32 %v1466_v6, %v1465_v54 }
 0x4d7   :  { %11882 = vtanh.f32 %v13199_v39 }
 0x4e1   :  { %v11883_v57 = vpop.eup %11882 }
 0x4e2   :  { %v13202_v58 = vmul.f32 %v11883_v57, %v11881_v50 }
 0x4e4   :  { %1608 = vmatmul.mubr.f32.vlgmr.msra.gmra.mrb[8].mxu0 %v13202_v58  ;;  %1679 = vmatmul.mubr.f32.vlgmr.msra.gmra.mrb[8].mxu1 %v13202_v58 }
 0x4e5   :  { %9631 = vmatpush1.bf16.msra.mxu0 %v13068_v23  ;;  %9663 = vmatpush1.bf16.msra.mxu1 %v13147_v48 }
 0x4e6   :  { %9633 = vmatprep.subr.bf16.mxu0 %v13072_v38  ;;  %9665 = vmatprep.subr.bf16.mxu1 %v13151_v62 }
 0x4e7   :  { %1850 = vmatprep.mubr.f32.mxu0 %v12553_v0  ;;  %1921 = vmatprep.mubr.f32.mxu1 %v12553_v0 }
 0x4e9   :  { %9635 = vmatpush1.bf16.msra.mxu0 %v13074_v47  ;;  %9667 = vmatpush1.bf16.msra.mxu1 %v13153_v33 }
 0x4ea   :  { %9637 = vmatprep.subr.bf16.mxu0 %v13078_v59  ;;  %9669 = vmatprep.subr.bf16.mxu1 %v13157_v45 }
 0x4ed   :  { %9639 = vmatpush1.bf16.msra.mxu0 %v13080_v52  ;;  %9671 = vmatpush1.bf16.msra.mxu1 %v13159_v15 }
 0x4ee   :  { %9641 = vmatprep.subr.bf16.mxu0 %v13084_v60  ;;  %9673 = vmatprep.subr.bf16.mxu1 %v13163_v31 }
 0x4f1   :  { %9643 = vmatpush1.bf16.msra.mxu0 %v13086_v2  ;;  %9675 = vmatpush1.bf16.msra.mxu1 %v13165_v53 }
 0x4f2   :  { %9645 = vmatprep.subr.bf16.mxu0 %v13090_v16  ;;  %9677 = vmatprep.subr.bf16.mxu1 %v13169_v51 }
 0x4f5   :  { %9647 = vmatpush1.bf16.msra.mxu0 %v13092_v12  ;;  %9679 = vmatpush1.bf16.msra.mxu1 %v13171_v61 }
 0x4f6   :  { %9649 = vmatprep.subr.bf16.mxu0 %v13096_v25  ;;  %9681 = vmatprep.subr.bf16.mxu1 %v13175_v13 }
 0x4f9   :  { %9651 = vmatpush1.bf16.msra.mxu0 %v13098_v35  ;;  %9683 = vmatpush1.bf16.msra.mxu1 %v13177_v40 }
 0x4fa   :  { %9653 = vmatprep.subr.bf16.mxu0 %v13101_v49  ;;  %9685 = vmatprep.subr.bf16.mxu1 %v13180_v55 }
 0x4fd   :  { %9655 = vmatpush1.bf16.msra.mxu0 %v13104_v63  ;;  %9687 = vmatpush1.bf16.msra.mxu1 %v13183_v36 }
 0x4fe   :  { %9657 = vmatprep.subr.bf16.mxu0 %v13107_v21  ;;  %9689 = vmatprep.subr.bf16.mxu1 %v13186_v44 }
 0x501   :  { %9659 = vmatpush1.bf16.msra.mxu0 %v13110_v28  ;;  %9691 = vmatpush1.bf16.msra.mxu1 %v13189_v22 }
 0x502   :  { %9693 = vmatprep.subr.bf16.mxu0 %v13066_v14  ;;  %9725 = vmatprep.subr.bf16.mxu1 %v13145_v34 }
 0x5b7   :  { %v1609_v17 = vpop.f32.mrb[8].mxu0  ;;  %v1680_v1 = vpop.f32.mrb[8].mxu1 }
 0x5b8   :  { %v11590_v4 = vadd.f32 %v1609_v17, %v12978_v10  ;;  %v1611_v9 = vpop.f32.mrb[9].mxu0  ;;  %v1682_v18 = vpop.f32.mrb[9].mxu1  ;;  %v11606_v56 = vadd.f32 %v1680_v1, %v12990_v37 }
 0x5b9   :  { %v11591_v26 = vadd.f32 %v1611_v9, %v12981_v11  ;;  %v11607_v24 = vadd.f32 %v1682_v18, %v12993_v43 }
 0x5ba   :  { %v9139_v41 = vmul.f32 -1.442695, %v11590_v4  ;;  %v9141_v27 = vmul.f32 -1.442695, %v11606_v56 }
 0x5bb   :  { %v9140_v42 = vmul.f32 -1.442695, %v11591_v26 }
 0x5bc   :  { %11884 = vpow2.f32 %v9139_v41 }
 0x5bd   :  { %11886 = vpow2.f32 %v9140_v42 }
 0x5be   :  { %11888 = vtanh.f32 %v11607_v24 }
 0x5bf   :  { %11890 = vpow2.f32 %v9141_v27 }
 0x5c6   :  { %v11885_v14 = vpop.eup %11884 }
 0x5c7   :  { %v1698_v5 = vadd.f32 1.0, %v11885_v14  ;;  %v11887_v6 = vpop.eup %11886 }
 0x5c8   :  { %v1699_v30 = vadd.f32 1.0, %v11887_v6  ;;  %v11889_v46 = vpop.eup %11888 }
 0x5c9   :  { %11892 = vrcp.f32 %v1698_v5  ;;  %v11891_v54 = vpop.eup %11890 }
 0x5ca   :  { %11894 = vrcp.f32 %v1699_v30  ;;  %v1700_v4 = vadd.f32 1.0, %v11891_v54 }
 0x5cc   :  { %11896 = vrcp.f32 %v1700_v4  ;;  %v2237_v4 = vld [vmem:[#allocation6 + $0xe8] sm:$0xff] }
 0x5d3   :  { %v11893_v50 = vpop.eup %11892 }
 0x5d4   :  { %v1709_v57 = vmul.f32 %v11893_v50, %v11889_v46  ;;  %v11895_v17 = vpop.eup %11894  ;;  %v2228_v50 = vld [vmem:[#allocation6 + $0xa0] sm:$0xff] }
 0x5d5   :  { %v1708_v9 = vmul.f32 %v11895_v17, %v13199_v39  ;;  %v2233_v17 = vld [vmem:[#allocation6 + $0xc8] sm:$0xff] }
 0x5d6   :  { %v11897_v18 = vpop.eup %11896 }
 0x5d7   :  { %v13245_v1 = vadd.f32 %v1709_v57, %v1708_v9  ;;  %v9768_v9 = vpack.c.bf16 %v2237_v4, %v2233_v17 }
 0x5d9   :  { %11898 = vtanh.f32 %v13245_v1 }
 0x5e3   :  { %v11899_v26 = vpop.eup %11898 }
 0x5e4   :  { %v13248_v41 = vmul.f32 %v11899_v26, %v11897_v18  ;;  %v2236_v18 = vld [vmem:[#allocation6 + $0xe0] sm:$0xff] }
 0x5e6   :  { %1851 = vmatmul.mubr.f32.vlgmr.msra.gmra.mrb[10].mxu0 %v13248_v41  ;;  %1922 = vmatmul.mubr.f32.vlgmr.msra.gmra.mrb[10].mxu1 %v13248_v41 }
 0x5e7   :  { %9695 = vmatpush1.bf16.msra.mxu0 %v13068_v23  ;;  %9727 = vmatpush1.bf16.msra.mxu1 %v13147_v48 }
 0x5e8   :  { %9697 = vmatprep.subr.bf16.mxu0 %v13072_v38  ;;  %9729 = vmatprep.subr.bf16.mxu1 %v13151_v62 }
 0x5e9   :  { %2093 = vmatprep.mubr.f32.mxu0 %v12553_v0  ;;  %2164 = vmatprep.mubr.f32.mxu1 %v12553_v0 }
 0x5eb   :  { %9699 = vmatpush1.bf16.msra.mxu0 %v13074_v47  ;;  %9731 = vmatpush1.bf16.msra.mxu1 %v13153_v33 }
 0x5ec   :  { %9701 = vmatprep.subr.bf16.mxu0 %v13078_v59  ;;  %9733 = vmatprep.subr.bf16.mxu1 %v13157_v45 }
 0x5ef   :  { %9703 = vmatpush1.bf16.msra.mxu0 %v13080_v52  ;;  %9735 = vmatpush1.bf16.msra.mxu1 %v13159_v15 }
 0x5f0   :  { %9705 = vmatprep.subr.bf16.mxu0 %v13084_v60  ;;  %9737 = vmatprep.subr.bf16.mxu1 %v13163_v31 }
 0x5f3   :  { %9707 = vmatpush1.bf16.msra.mxu0 %v13086_v2  ;;  %9739 = vmatpush1.bf16.msra.mxu1 %v13165_v53 }
 0x5f4   :  { %9709 = vmatprep.subr.bf16.mxu0 %v13090_v16  ;;  %9741 = vmatprep.subr.bf16.mxu1 %v13169_v51 }
 0x5f7   :  { %9711 = vmatpush1.bf16.msra.mxu0 %v13092_v12  ;;  %9743 = vmatpush1.bf16.msra.mxu1 %v13171_v61 }
 0x5f8   :  { %9713 = vmatprep.subr.bf16.mxu0 %v13096_v25  ;;  %9745 = vmatprep.subr.bf16.mxu1 %v13175_v13 }
 0x5fb   :  { %9715 = vmatpush1.bf16.msra.mxu0 %v13098_v35  ;;  %9747 = vmatpush1.bf16.msra.mxu1 %v13177_v40 }
 0x5fc   :  { %9717 = vmatprep.subr.bf16.mxu0 %v13101_v49  ;;  %9749 = vmatprep.subr.bf16.mxu1 %v13180_v55 }
 0x5ff   :  { %9719 = vmatpush1.bf16.msra.mxu0 %v13104_v63  ;;  %9751 = vmatpush1.bf16.msra.mxu1 %v13183_v36 }
 0x600   :  { %9721 = vmatprep.subr.bf16.mxu0 %v13107_v21  ;;  %9753 = vmatprep.subr.bf16.mxu1 %v13186_v44 }
 0x603   :  { %9723 = vmatpush1.bf16.msra.mxu0 %v13110_v28  ;;  %9755 = vmatpush1.bf16.msra.mxu1 %v13189_v22 }
 0x604   :  { %9789 = vmatprep.subr.bf16.mxu1 %v13145_v34 }
 0x6b9   :  { %v1852_v23 = vpop.f32.mrb[10].mxu0  ;;  %v1923_v38 = vpop.f32.mrb[10].mxu1 }
 0x6ba   :  { %v11592_v47 = vadd.f32 %v1852_v23, %v12978_v10  ;;  %v1854_v59 = vpop.f32.mrb[11].mxu0  ;;  %v1925_v52 = vpop.f32.mrb[11].mxu1  ;;  %v11608_v12 = vadd.f32 %v1923_v38, %v12990_v37  ;;  %v2241_v23 = vld [vmem:[#allocation6 + $0x108] sm:$0xff] }
 0x6bb   :  { %v11593_v60 = vadd.f32 %v1854_v59, %v12981_v11  ;;  %v11609_v25 = vadd.f32 %v1925_v52, %v12993_v43  ;;  %v2245_v38 = vld [vmem:[#allocation6 + $0x128] sm:$0xff]  ;;  %v2240_v59 = vld [vmem:[#allocation6 + $0x100] sm:$0xff] }
 0x6bc   :  { %v9142_v2 = vmul.f32 -1.442695, %v11592_v47  ;;  %v9144_v35 = vmul.f32 -1.442695, %v11608_v12  ;;  %v9772_v47 = vpack.c.bf16 %v2245_v38, %v2241_v23  ;;  %v2244_v52 = vld [vmem:[#allocation6 + $0x120] sm:$0xff] }
 0x6bd   :  { %v9143_v16 = vmul.f32 -1.442695, %v11593_v60  ;;  %v9774_v60 = vpack.c.bf16 %v2244_v52, %v2240_v59 }
 0x6be   :  { %11900 = vpow2.f32 %v9142_v2  ;;  %v2249_v2 = vld [vmem:[#allocation6 + $0x148] sm:$0xff] }
 0x6bf   :  { %11902 = vpow2.f32 %v9143_v16  ;;  %v2253_v16 = vld [vmem:[#allocation6 + $0x168] sm:$0xff] }
 0x6c0   :  { %11904 = vtanh.f32 %v11609_v25  ;;  %v9776_v12 = vpack.c.bf16 %v2253_v16, %v2249_v2  ;;  %v2248_v25 = vld [vmem:[#allocation6 + $0x140] sm:$0xff]  ;;  %v2454_v16 = vld [vmem:[#allocation8 + $0x10] sm:$0xff] }
 0x6c1   :  { %11906 = vpow2.f32 %v9144_v35  ;;  %v2252_v35 = vld [vmem:[#allocation6 + $0x160] sm:$0xff] }
 0x6c2   :  { %v2456_v2 = vld [vmem:[#allocation8 + $0x20] sm:$0xff] }
 0x6c8   :  { %v11901_v49 = vpop.eup %11900 }
 0x6c9   :  { %v1941_v63 = vadd.f32 1.0, %v11901_v49  ;;  %v11903_v21 = vpop.eup %11902  ;;  %v9778_v49 = vpack.c.bf16 %v2252_v35, %v2248_v25  ;;  %v2461_v25 = vld [vmem:[#allocation8 + $0x48] sm:$0xff] }
 0x6ca   :  { %v1942_v28 = vadd.f32 1.0, %v11903_v21  ;;  %v11905_v34 = vpop.eup %11904  ;;  %v2261_v21 = vld [vmem:[#allocation6 + $0x1a8] sm:$0xff] }
 0x6cb   :  { %11908 = vrcp.f32 %v1941_v63  ;;  %v11907_v39 = vpop.eup %11906  ;;  %v2257_v63 = vld [vmem:[#allocation6 + $0x188] sm:$0xff] }
 0x6cc   :  { %11910 = vrcp.f32 %v1942_v28  ;;  %v1943_v27 = vadd.f32 1.0, %v11907_v39  ;;  %v2256_v28 = vld [vmem:[#allocation6 + $0x180] sm:$0xff]  ;;  %v2465_v35 = vld [vmem:[#allocation8 + $0x68] sm:$0xff] }
 0x6cd   :  { %v2260_v39 = vld [vmem:[#allocation6 + $0x1a0] sm:$0xff] }
 0x6ce   :  { %11912 = vrcp.f32 %v1943_v27 }
 0x6d5   :  { %v11909_v42 = vpop.eup %11908 }
 0x6d6   :  { %v1952_v56 = vmul.f32 %v11909_v42, %v11905_v34  ;;  %v11911_v24 = vpop.eup %11910  ;;  %v9780_v34 = vpack.c.bf16 %v2261_v21, %v2257_v63  ;;  %v2265_v42 = vld [vmem:[#allocation6 + $0x1c8] sm:$0xff]  ;;  %v2467_v63 = vld [vmem:[#allocation8 + $0x78] sm:$0xff] }
 0x6d7   :  { %v1951_v14 = vmul.f32 %v11911_v24, %v13245_v1  ;;  %v2232_v1 = vld [vmem:[#allocation6 + $0xc0] sm:$0xff]  ;;  %v9782_v24 = vpack.c.bf16 %v2260_v39, %v2256_v28 }
 0x6d8   :  { %v11913_v6 = vpop.eup %11912  ;;  %v9770_v26 = vpack.c.bf16 %v2236_v18, %v2232_v1 }
 0x6d9   :  { %v13290_v5 = vadd.f32 %v1952_v56, %v1951_v14  ;;  %v2269_v56 = vld [vmem:[#allocation6 + $0x1e8] sm:$0xff]  ;;  %v2264_v14 = vld [vmem:[#allocation6 + $0x1c0] sm:$0xff] }
 0x6da   :  { %v9784_v27 = vpack.c.bf16 %v2269_v56, %v2265_v42  ;;  %v2460_v42 = vld [vmem:[#allocation8 + $0x40] sm:$0xff] }
 0x6db   :  { %11914 = vtanh.f32 %v13290_v5  ;;  %v2464_v56 = vld [vmem:[#allocation8 + $0x60] sm:$0xff] }
 0x6e5   :  { %v11915_v30 = vpop.eup %11914 }
 0x6e6   :  { %v13293_v46 = vmul.f32 %v11915_v30, %v11913_v6  ;;  %v2268_v6 = vld [vmem:[#allocation6 + $0x1e0] sm:$0xff]  ;;  %v2453_v30 = vld [vmem:[#allocation8 + $0x8] sm:$0xff] }
 0x6e8   :  { %2094 = vmatmul.mubr.f32.vlgmr.msra.gmra.mrb[12].mxu0 %v13293_v46  ;;  %2165 = vmatmul.mubr.f32.vlgmr.msra.gmra.mrb[12].mxu1 %v13293_v46 }
 0x6e9   :  { %9791 = vmatpush1.bf16.msra.mxu1 %v13147_v48  ;;  %2336 = vmatprep.mubr.f32.mxu0 %v12553_v0  ;;  %v2209_v48 = vld [vmem:[#allocation6 + $0x8] sm:$0xff] }
 0x6ea   :  { %9793 = vmatprep.subr.bf16.mxu1 %v13151_v62  ;;  %2407 = vmatprep.mubr.f32.mxu1 %v12553_v0  ;;  %v2213_v62 = vld [vmem:[#allocation6 + $0x28] sm:$0xff] }
 0x6ed   :  { %9795 = vmatpush1.bf16.msra.mxu1 %v13153_v33  ;;  %v9756_v33 = vpack.c.bf16 %v2213_v62, %v2209_v48  ;;  %v2457_v48 = vld [vmem:[#allocation8 + $0x28] sm:$0xff]  ;;  %v2455_v62 = vld [vmem:[#allocation8 + $0x18] sm:$0xff] }
 0x6ee   :  { %9797 = vmatprep.subr.bf16.mxu1 %v13157_v45  ;;  %v2208_v45 = vld [vmem:[#allocation6] sm:$0xff] }
 0x6ef   :  { %9757 = vmatprep.subr.bf16.mxu0 %v9756_v33  ;;  %v2459_v33 = vld [vmem:[#allocation8 + $0x38] sm:$0xff] }
 0x6f1   :  { %9799 = vmatpush1.bf16.msra.mxu1 %v13159_v15  ;;  %v2212_v15 = vld [vmem:[#allocation6 + $0x20] sm:$0xff] }
 0x6f2   :  { %9801 = vmatprep.subr.bf16.mxu1 %v13163_v31  ;;  %v9758_v31 = vpack.c.bf16 %v2212_v15, %v2208_v45  ;;  %v9852_v45 = vpack.c.bf16 %v2459_v33, %v2455_v62  ;;  %v9786_v15 = vpack.c.bf16 %v2268_v6, %v2264_v14  ;;  %v2462_v14 = vld [vmem:[#allocation8 + $0x50] sm:$0xff]  ;;  %v2471_v62 = vld [vmem:[#allocation8 + $0x98] sm:$0xff] }
 0x6f3   :  { %v2466_v6 = vld [vmem:[#allocation8 + $0x70] sm:$0xff]  ;;  %v2475_v33 = vld [vmem:[#allocation8 + $0xb8] sm:$0xff] }
 0x6f4   :  { %9759 = vmatpush1.bf16.msra.mxu0 %v9758_v31  ;;  %v9820_v31 = vpack.c.bf16 %v2457_v48, %v2453_v30  ;;  %v2469_v30 = vld [vmem:[#allocation8 + $0x88] sm:$0xff] }
 0x6f5   :  { %9803 = vmatpush1.bf16.msra.mxu1 %v13165_v53  ;;  %v2217_v53 = vld [vmem:[#allocation6 + $0x48] sm:$0xff] }
 0x6f6   :  { %9805 = vmatprep.subr.bf16.mxu1 %v13169_v51  ;;  %v2221_v51 = vld [vmem:[#allocation6 + $0x68] sm:$0xff] }
 0x6f7   :  { %v2473_v48 = vld [vmem:[#allocation8 + $0xa8] sm:$0xff] }
 0x6f9   :  { %9807 = vmatpush1.bf16.msra.mxu1 %v13171_v61  ;;  %v9760_v61 = vpack.c.bf16 %v2221_v51, %v2217_v53 }
 0x6fa   :  { %9809 = vmatprep.subr.bf16.mxu1 %v13175_v13  ;;  %v2216_v13 = vld [vmem:[#allocation6 + $0x40] sm:$0xff] }
 0x6fb   :  { %9761 = vmatprep.subr.bf16.mxu0 %v9760_v61 }
 0x6fd   :  { %9811 = vmatpush1.bf16.msra.mxu1 %v13177_v40  ;;  %v2220_v40 = vld [vmem:[#allocation6 + $0x60] sm:$0xff] }
 0x6fe   :  { %9813 = vmatprep.subr.bf16.mxu1 %v13180_v55  ;;  %v9762_v55 = vpack.c.bf16 %v2220_v40, %v2216_v13 }
 0x700   :  { %9763 = vmatpush1.bf16.msra.mxu0 %v9762_v55 }
 0x701   :  { %9815 = vmatpush1.bf16.msra.mxu1 %v13183_v36  ;;  %v2225_v36 = vld [vmem:[#allocation6 + $0x88] sm:$0xff] }
 0x702   :  { %9817 = vmatprep.subr.bf16.mxu1 %v13186_v44  ;;  %v2229_v44 = vld [vmem:[#allocation6 + $0xa8] sm:$0xff] }
 0x703   :  { %v9764_v54 = vpack.c.bf16 %v2229_v44, %v2225_v36 }
 0x705   :  { %9819 = vmatpush1.bf16.msra.mxu1 %v13189_v22  ;;  %v2224_v22 = vld [vmem:[#allocation6 + $0x80] sm:$0xff]  ;;  %9765 = vmatprep.subr.bf16.mxu0 %v9764_v54 }
 0x706   :  { %v9766_v57 = vpack.c.bf16 %v2228_v50, %v2224_v22  ;;  %9853 = vmatprep.subr.bf16.mxu1 %v9852_v45  ;;  %v9826_v45 = vpack.c.bf16 %v2464_v56, %v2460_v42  ;;  %v2492_v56 = vld [vmem:[#allocation8 + $0x140] sm:$0xff] }
 0x708   :  { %9767 = vmatpush1.bf16.msra.mxu0 %v9766_v57 }
 0x709   :  { %9769 = vmatprep.subr.bf16.mxu0 %v9768_v9 }
 0x70c   :  { %9771 = vmatpush1.bf16.msra.mxu0 %v9770_v26 }
 0x70d   :  { %9773 = vmatprep.subr.bf16.mxu0 %v9772_v47 }
 0x710   :  { %9775 = vmatpush1.bf16.msra.mxu0 %v9774_v60  ;;  %v2452_v60 = vld [vmem:[#allocation8] sm:$0xff] }
 0x711   :  { %9777 = vmatprep.subr.bf16.mxu0 %v9776_v12  ;;  %v2458_v12 = vld [vmem:[#allocation8 + $0x30] sm:$0xff] }
 0x712   :  { %v9854_v39 = vpack.c.bf16 %v2458_v12, %v2454_v16  ;;  %v2488_v16 = vld [vmem:[#allocation8 + $0x120] sm:$0xff] }
 0x714   :  { %9779 = vmatpush1.bf16.msra.mxu0 %v9778_v49  ;;  %v2463_v49 = vld [vmem:[#allocation8 + $0x58] sm:$0xff] }
 0x715   :  { %9781 = vmatprep.subr.bf16.mxu0 %v9780_v34  ;;  %v9822_v34 = vpack.c.bf16 %v2456_v2, %v2452_v60  ;;  %v2484_v2 = vld [vmem:[#allocation8 + $0x100] sm:$0xff] }
 0x718   :  { %9783 = vmatpush1.bf16.msra.mxu0 %v9782_v24  ;;  %v9824_v24 = vpack.c.bf16 %v2465_v35, %v2461_v25  ;;  %v2486_v35 = vld [vmem:[#allocation8 + $0x110] sm:$0xff] }
 0x719   :  { %9785 = vmatprep.subr.bf16.mxu0 %v9784_v27  ;;  %v9856_v27 = vpack.c.bf16 %v2467_v63, %v2463_v49  ;;  %v2490_v49 = vld [vmem:[#allocation8 + $0x130] sm:$0xff]  ;;  %v2493_v63 = vld [vmem:[#allocation8 + $0x148] sm:$0xff] }
 0x71a   :  { %v9870_v42 = vpack.c.bf16 %v2490_v49, %v2486_v35  ;;  %v2811_v35 = vld [vmem:[#allocation9 + $0x58] sm:$0xff] }
 0x71c   :  { %9787 = vmatpush1.bf16.msra.mxu0 %v9786_v15  ;;  %v9858_v15 = vpack.c.bf16 %v2466_v6, %v2462_v14  ;;  %v2494_v6 = vld [vmem:[#allocation8 + $0x150] sm:$0xff] }
 0x71d   :  { %9821 = vmatprep.subr.bf16.mxu0 %v9820_v31  ;;  %v2468_v31 = vld [vmem:[#allocation8 + $0x80] sm:$0xff] }
 0x7bb   :  { %v2095_v53 = vpop.f32.mrb[12].mxu0  ;;  %v2166_v51 = vpop.f32.mrb[12].mxu1 }
 0x7bc   :  { %v11594_v61 = vadd.f32 %v2095_v53, %v12978_v10  ;;  %v2097_v13 = vpop.f32.mrb[13].mxu0  ;;  %v2168_v40 = vpop.f32.mrb[13].mxu1  ;;  %v11610_v54 = vadd.f32 %v2166_v51, %v12990_v37  ;;  %v2472_v53 = vld [vmem:[#allocation8 + $0xa0] sm:$0xff]  ;;  %v9828_v51 = vpack.c.bf16 %v2473_v48, %v2469_v30  ;;  %v2498_v30 = vld [vmem:[#allocation8 + $0x170] sm:$0xff]  ;;  %v2501_v48 = vld [vmem:[#allocation8 + $0x188] sm:$0xff] }
 0x7bd   :  { %v11595_v55 = vadd.f32 %v2097_v13, %v12981_v11  ;;  %v11611_v22 = vadd.f32 %v2168_v40, %v12993_v43  ;;  %v2470_v13 = vld [vmem:[#allocation8 + $0x90] sm:$0xff] }
 0x7be   :  { %v9145_v36 = vmul.f32 -1.442695, %v11594_v61  ;;  %v9147_v50 = vmul.f32 -1.442695, %v11610_v54  ;;  %v9860_v61 = vpack.c.bf16 %v2475_v33, %v2471_v62  ;;  %v2474_v40 = vld [vmem:[#allocation8 + $0xb0] sm:$0xff]  ;;  %v2483_v54 = vld [vmem:[#allocation8 + $0xf8] sm:$0xff] }
 0x7bf   :  { %v9146_v44 = vmul.f32 -1.442695, %v11595_v55  ;;  %v2477_v55 = vld [vmem:[#allocation8 + $0xc8] sm:$0xff]  ;;  %v2503_v33 = vld [vmem:[#allocation8 + $0x198] sm:$0xff] }
 0x7c0   :  { %11916 = vpow2.f32 %v9145_v36  ;;  %v2481_v36 = vld [vmem:[#allocation8 + $0xe8] sm:$0xff] }
 0x7c1   :  { %11918 = vpow2.f32 %v9146_v44  ;;  %v2479_v44 = vld [vmem:[#allocation8 + $0xd8] sm:$0xff]  ;;  %v2505_v62 = vld [vmem:[#allocation8 + $0x1a8] sm:$0xff] }
 0x7c2   :  { %11920 = vtanh.f32 %v11611_v22  ;;  %v9830_v22 = vpack.c.bf16 %v2472_v53, %v2468_v31  ;;  %v9874_v31 = vpack.c.bf16 %v2498_v30, %v2494_v6  ;;  %v2500_v53 = vld [vmem:[#allocation8 + $0x180] sm:$0xff]  ;;  %v2819_v6 = vld [vmem:[#allocation9 + $0x98] sm:$0xff] }
 0x7c3   :  { %11922 = vpow2.f32 %v9147_v50  ;;  %v9862_v50 = vpack.c.bf16 %v2474_v40, %v2470_v13  ;;  %v2502_v40 = vld [vmem:[#allocation8 + $0x190] sm:$0xff] }
 0x7ca   :  { %v11917_v57 = vpop.eup %11916 }
 0x7cb   :  { %v2184_v17 = vadd.f32 1.0, %v11917_v57  ;;  %v11919_v4 = vpop.eup %11918  ;;  %v2476_v57 = vld [vmem:[#allocation8 + $0xc0] sm:$0xff] }
 0x7cc   :  { %v2185_v9 = vadd.f32 1.0, %v11919_v4  ;;  %v11921_v1 = vpop.eup %11920  ;;  %v9832_v4 = vpack.c.bf16 %v2481_v36, %v2477_v55  ;;  %v2506_v55 = vld [vmem:[#allocation8 + $0x1b0] sm:$0xff]  ;;  %v2509_v36 = vld [vmem:[#allocation8 + $0x1c8] sm:$0xff] }
 0x7cd   :  { %11924 = vrcp.f32 %v2184_v17  ;;  %v11923_v18 = vpop.eup %11922  ;;  %v2480_v17 = vld [vmem:[#allocation8 + $0xe0] sm:$0xff] }
 0x7ce   :  { %11926 = vrcp.f32 %v2185_v9  ;;  %v2186_v47 = vadd.f32 1.0, %v11923_v18  ;;  %v9864_v9 = vpack.c.bf16 %v2483_v54, %v2479_v44  ;;  %v2482_v18 = vld [vmem:[#allocation8 + $0xf0] sm:$0xff]  ;;  %v2513_v44 = vld [vmem:[#allocation8 + $0x1e8] sm:$0xff]  ;;  %v2511_v54 = vld [vmem:[#allocation8 + $0x1d8] sm:$0xff] }
 0x7d0   :  { %11928 = vrcp.f32 %v2186_v47  ;;  %v2491_v47 = vld [vmem:[#allocation8 + $0x138] sm:$0xff] }
 0x7d7   :  { %v11925_v26 = vpop.eup %11924 }
 0x7d8   :  { %v2195_v23 = vmul.f32 %v11925_v26, %v11921_v1  ;;  %v11927_v38 = vpop.eup %11926  ;;  %v2478_v1 = vld [vmem:[#allocation8 + $0xd0] sm:$0xff]  ;;  %v2485_v26 = vld [vmem:[#allocation8 + $0x108] sm:$0xff] }
 0x7d9   :  { %v2194_v59 = vmul.f32 %v11927_v38, %v13290_v5  ;;  %v2487_v38 = vld [vmem:[#allocation8 + $0x118] sm:$0xff]  ;;  %v9866_v60 = vpack.c.bf16 %v2482_v18, %v2478_v1  ;;  %v2512_v1 = vld [vmem:[#allocation8 + $0x1e0] sm:$0xff]  ;;  %v2510_v18 = vld [vmem:[#allocation8 + $0x1d0] sm:$0xff] }
 0x7da   :  { %v11929_v21 = vpop.eup %11928  ;;  %v9868_v25 = vpack.c.bf16 %v2491_v47, %v2487_v38  ;;  %v2800_v47 = vld [vmem:[#allocation9] sm:$0xff] }
 0x7db   :  { %v13319_v52 = vadd.f32 %v2195_v23, %v2194_v59  ;;  %v2489_v23 = vld [vmem:[#allocation8 + $0x128] sm:$0xff]  ;;  %v9834_v59 = vpack.c.bf16 %v2480_v17, %v2476_v57  ;;  %v9878_v57 = vpack.c.bf16 %v2506_v55, %v2502_v40  ;;  %v2508_v17 = vld [vmem:[#allocation8 + $0x1c0] sm:$0xff]  ;;  %v2827_v40 = vld [vmem:[#allocation9 + $0xd8] sm:$0xff] }
 0x7dc   :  { %v9836_v12 = vpack.c.bf16 %v2489_v23, %v2485_v26  ;;  %v2514_v26 = vld [vmem:[#allocation8 + $0x1f0] sm:$0xff]  ;;  %v9850_v23 = vpack.c.bf16 %v2512_v1, %v2508_v17  ;;  %v2837_v1 = vld [vmem:[#allocation9 + $0x128] sm:$0xff] }
 0x7dd   :  { %11930 = vtanh.f32 %v13319_v52  ;;  %v9882_v38 = vpack.c.bf16 %v2514_v26, %v2510_v18  ;;  %v2830_v17 = vld [vmem:[#allocation9 + $0xf0] sm:$0xff]  ;;  %v2835_v18 = vld [vmem:[#allocation9 + $0x118] sm:$0xff] }
 0x7e7   :  { %v11931_v28 = vpop.eup %11930 }
 0x7e8   :  { %v13322_v5 = vmul.f32 %v11931_v28, %v11929_v21  ;;  %v2497_v21 = vld [vmem:[#allocation8 + $0x168] sm:$0xff]  ;;  %v2495_v28 = vld [vmem:[#allocation8 + $0x158] sm:$0xff] }
 0x7ea   :  { %2337 = vmatmul.mubr.f32.vlgmr.msra.gmra.mrb[14].mxu0 %v13322_v5  ;;  %2408 = vmatmul.mubr.f32.vlgmr.msra.gmra.mrb[14].mxu1 %v13322_v5 }
 0x7eb   :  { %9823 = vmatpush1.bf16.msra.mxu0 %v9822_v34  ;;  %9855 = vmatpush1.bf16.msra.mxu1 %v9854_v39  ;;  %v2499_v34 = vld [vmem:[#allocation8 + $0x178] sm:$0xff]  ;;  %v9838_v39 = vpack.c.bf16 %v2488_v16, %v2484_v2  ;;  %v2802_v2 = vld [vmem:[#allocation9 + $0x10] sm:$0xff] }
 0x7ec   :  { %9825 = vmatprep.subr.bf16.mxu0 %v9824_v24  ;;  %9857 = vmatprep.subr.bf16.mxu1 %v9856_v27  ;;  %v2496_v24 = vld [vmem:[#allocation8 + $0x160] sm:$0xff]  ;;  %v9840_v27 = vpack.c.bf16 %v2497_v21, %v2493_v63  ;;  %v9872_v14 = vpack.c.bf16 %v2499_v34, %v2495_v28  ;;  %v2806_v16 = vld [vmem:[#allocation9 + $0x30] sm:$0xff]  ;;  %v2815_v63 = vld [vmem:[#allocation9 + $0x78] sm:$0xff] }
 0x7ed   :  { %2602 = vmatprep.mubr.f32.mxu0 %v12553_v0  ;;  %2715 = vmatprep.mubr.f32.mxu1 %v12553_v0  ;;  %v2808_v21 = vld [vmem:[#allocation9 + $0x40] sm:$0xff]  ;;  %v13370_v34 = vpack.c.bf16 %v2815_v63, %v2811_v35 }
 0x7ee   :  { %v2812_v28 = vld [vmem:[#allocation9 + $0x60] sm:$0xff] }
 0x7ef   :  { %9827 = vmatpush1.bf16.msra.mxu0 %v9826_v45  ;;  %9859 = vmatpush1.bf16.msra.mxu1 %v9858_v15  ;;  %v2507_v45 = vld [vmem:[#allocation8 + $0x1b8] sm:$0xff]  ;;  %v9842_v15 = vpack.c.bf16 %v2496_v24, %v2492_v56  ;;  %v2814_v56 = vld [vmem:[#allocation9 + $0x70] sm:$0xff] }
 0x7f0   :  { %9829 = vmatprep.subr.bf16.mxu0 %v9828_v51  ;;  %9861 = vmatprep.subr.bf16.mxu1 %v9860_v61  ;;  %v2504_v51 = vld [vmem:[#allocation8 + $0x1a0] sm:$0xff]  ;;  %v9844_v61 = vpack.c.bf16 %v2505_v62, %v2501_v48  ;;  %v9876_v13 = vpack.c.bf16 %v2507_v45, %v2503_v33  ;;  %v2823_v48 = vld [vmem:[#allocation9 + $0xb8] sm:$0xff] }
 0x7f1   :  { %v2816_v62 = vld [vmem:[#allocation9 + $0x80] sm:$0xff]  ;;  %v13382_v45 = vpack.c.bf16 %v2823_v48, %v2819_v6  ;;  %v2853_v6 = vld [vmem:[#allocation9 + $0x1a8] sm:$0xff] }
 0x7f2   :  { %v2820_v33 = vld [vmem:[#allocation9 + $0xa0] sm:$0xff] }
 0x7f3   :  { %9831 = vmatpush1.bf16.msra.mxu0 %v9830_v22  ;;  %9863 = vmatpush1.bf16.msra.mxu1 %v9862_v50  ;;  %v2515_v22 = vld [vmem:[#allocation8 + $0x1f8] sm:$0xff]  ;;  %v9846_v50 = vpack.c.bf16 %v2504_v51, %v2500_v53  ;;  %v2822_v53 = vld [vmem:[#allocation9 + $0xb0] sm:$0xff] }
 0x7f4   :  { %9833 = vmatprep.subr.bf16.mxu0 %v9832_v4  ;;  %9865 = vmatprep.subr.bf16.mxu1 %v9864_v9  ;;  %v9848_v4 = vpack.c.bf16 %v2513_v44, %v2509_v36  ;;  %v9880_v9 = vpack.c.bf16 %v2515_v22, %v2511_v54  ;;  %v2831_v36 = vld [vmem:[#allocation9 + $0xf8] sm:$0xff]  ;;  %v2824_v44 = vld [vmem:[#allocation9 + $0xc0] sm:$0xff] }
 0x7f5   :  { %v2828_v54 = vld [vmem:[#allocation9 + $0xe0] sm:$0xff]  ;;  %v13394_v22 = vpack.c.bf16 %v2831_v36, %v2827_v40  ;;  %v2850_v40 = vld [vmem:[#allocation9 + $0x190] sm:$0xff] }
 0x7f6   :  { %v2854_v36 = vld [vmem:[#allocation9 + $0x1b0] sm:$0xff] }
 0x7f7   :  { %9835 = vmatpush1.bf16.msra.mxu0 %v9834_v59  ;;  %9867 = vmatpush1.bf16.msra.mxu1 %v9866_v60 }
 0x7f8   :  { %9837 = vmatprep.subr.bf16.mxu0 %v9836_v12  ;;  %9869 = vmatprep.subr.bf16.mxu1 %v9868_v25  ;;  %v2809_v12 = vld [vmem:[#allocation9 + $0x48] sm:$0xff] }
 0x7f9   :  { %v2813_v25 = vld [vmem:[#allocation9 + $0x68] sm:$0xff] }
 0x7fa   :  { %v13368_v49 = vpack.c.bf16 %v2813_v25, %v2809_v12  ;;  %v2843_v12 = vld [vmem:[#allocation9 + $0x158] sm:$0xff] }
 0x7fb   :  { %9839 = vmatpush1.bf16.msra.mxu0 %v9838_v39  ;;  %9871 = vmatpush1.bf16.msra.mxu1 %v9870_v42  ;;  %v13372_v39 = vpack.c.bf16 %v2812_v28, %v2808_v21  ;;  %v2810_v42 = vld [vmem:[#allocation9 + $0x50] sm:$0xff]  ;;  %v2847_v25 = vld [vmem:[#allocation9 + $0x178] sm:$0xff]  ;;  %v2840_v21 = vld [vmem:[#allocation9 + $0x140] sm:$0xff] }
 0x7fc   :  { %9841 = vmatprep.subr.bf16.mxu0 %v9840_v27  ;;  %9873 = vmatprep.subr.bf16.mxu1 %v9872_v14  ;;  %v13375_v24 = vpack.c.bf16 %v2814_v56, %v2810_v42  ;;  %v2817_v27 = vld [vmem:[#allocation9 + $0x88] sm:$0xff]  ;;  %v13417_v63 = vpack.c.bf16 %v2847_v25, %v2843_v12  ;;  %v2844_v28 = vld [vmem:[#allocation9 + $0x160] sm:$0xff]  ;;  %v2842_v42 = vld [vmem:[#allocation9 + $0x150] sm:$0xff] }
 0x7fd   :  { %v2821_v14 = vld [vmem:[#allocation9 + $0xa8] sm:$0xff]  ;;  %v13420_v56 = vpack.c.bf16 %v2844_v28, %v2840_v21 }
 0x7fe   :  { %v13380_v30 = vpack.c.bf16 %v2821_v14, %v2817_v27  ;;  %v2846_v27 = vld [vmem:[#allocation9 + $0x170] sm:$0xff]  ;;  %v2849_v14 = vld [vmem:[#allocation9 + $0x188] sm:$0xff] }
 0x7ff   :  { %9843 = vmatpush1.bf16.msra.mxu0 %v9842_v15  ;;  %9875 = vmatpush1.bf16.msra.mxu1 %v9874_v31  ;;  %v13384_v15 = vpack.c.bf16 %v2820_v33, %v2816_v62  ;;  %v2818_v31 = vld [vmem:[#allocation9 + $0x90] sm:$0xff]  ;;  %v13424_v48 = vpack.c.bf16 %v2846_v27, %v2842_v42  ;;  %v13426_v62 = vpack.c.bf16 %v2853_v6, %v2849_v14  ;;  %v2851_v33 = vld [vmem:[#allocation9 + $0x198] sm:$0xff] }
 0x800   :  { %9845 = vmatprep.subr.bf16.mxu0 %v9844_v61  ;;  %9877 = vmatprep.subr.bf16.mxu1 %v9876_v13  ;;  %v13387_v51 = vpack.c.bf16 %v2822_v53, %v2818_v31  ;;  %v2825_v61 = vld [vmem:[#allocation9 + $0xc8] sm:$0xff]  ;;  %v2855_v31 = vld [vmem:[#allocation9 + $0x1b8] sm:$0xff]  ;;  %v2848_v53 = vld [vmem:[#allocation9 + $0x180] sm:$0xff] }
 0x801   :  { %v2829_v13 = vld [vmem:[#allocation9 + $0xe8] sm:$0xff] }
 0x802   :  { %v13392_v55 = vpack.c.bf16 %v2829_v13, %v2825_v61  ;;  %v13428_v61 = vpack.c.bf16 %v2855_v31, %v2851_v33  ;;  %v2852_v13 = vld [vmem:[#allocation9 + $0x1a0] sm:$0xff] }
 0x803   :  { %9847 = vmatpush1.bf16.msra.mxu0 %v9846_v50  ;;  %9879 = vmatpush1.bf16.msra.mxu1 %v9878_v57  ;;  %v13396_v50 = vpack.c.bf16 %v2828_v54, %v2824_v44  ;;  %v2826_v57 = vld [vmem:[#allocation9 + $0xd0] sm:$0xff]  ;;  %v13431_v44 = vpack.c.bf16 %v2852_v13, %v2848_v53  ;;  %v13435_v54 = vpack.c.bf16 %v2854_v36, %v2850_v40 }
 0x804   :  { %9849 = vmatprep.subr.bf16.mxu0 %v9848_v4  ;;  %9881 = vmatprep.subr.bf16.mxu1 %v9880_v9  ;;  %v13399_v4 = vpack.c.bf16 %v2830_v17, %v2826_v57  ;;  %v2833_v9 = vld [vmem:[#allocation9 + $0x108] sm:$0xff] }
 0x805   :  { %v13404_v26 = vpack.c.bf16 %v2837_v1, %v2833_v9  ;;  %v2857_v57 = vld [vmem:[#allocation9 + $0x1c8] sm:$0xff]  ;;  %v2859_v9 = vld [vmem:[#allocation9 + $0x1d8] sm:$0xff] }
 0x806   :  { %v2861_v17 = vld [vmem:[#allocation9 + $0x1e8] sm:$0xff] }
 0x807   :  { %9851 = vmatpush1.bf16.msra.mxu0 %v9850_v23  ;;  %9883 = vmatpush1.bf16.msra.mxu1 %v9882_v38  ;;  %v2839_v23 = vld [vmem:[#allocation9 + $0x138] sm:$0xff]  ;;  %v2832_v38 = vld [vmem:[#allocation9 + $0x100] sm:$0xff]  ;;  %v13440_v1 = vpack.c.bf16 %v2861_v17, %v2857_v57 }
 0x80a   :  { %2603 = vmatmul.mubr.f32.vlgmr.msra.gmra.mrb[16].mxu0 %v13000_v20  ;;  %2716 = vmatmul.mubr.f32.vlgmr.msra.gmra.mrb[18].mxu1 %v13000_v20  ;;  %v2801_v20 = vld [vmem:[#allocation9 + $0x8] sm:$0xff] }
 0x80b   :  { %2608 = vmatprep.mubr.f32.mxu0 %v12553_v0  ;;  %2721 = vmatprep.mubr.f32.mxu1 %v12553_v0 }
 0x80e   :  { %2609 = vmatmul.mubr.f32.gmra.mrb[18].mxu0 %v13045_v8  ;;  %2722 = vmatmul.mubr.f32.gmra.mrb[20].mxu1 %v13045_v8  ;;  %v2805_v8 = vld [vmem:[#allocation9 + $0x28] sm:$0xff] }
 0x80f   :  { %2614 = vmatprep.mubr.f32.mxu0 %v12553_v0  ;;  %2727 = vmatprep.mubr.f32.mxu1 %v12553_v0 }
 0x812   :  { %2615 = vmatmul.mubr.f32.gmra.mrb[20].mxu0 %v13123_v19  ;;  %2728 = vmatmul.mubr.f32.gmra.mrb[22].mxu1 %v13123_v19  ;;  %v2803_v19 = vld [vmem:[#allocation9 + $0x18] sm:$0xff] }
 0x813   :  { %2620 = vmatprep.mubr.f32.mxu0 %v12553_v0  ;;  %2733 = vmatprep.mubr.f32.mxu1 %v12553_v0 }
 0x816   :  { %2621 = vmatmul.mubr.f32.gmra.mrb[22].mxu0 %v13202_v58  ;;  %2734 = vmatmul.mubr.f32.gmra.mrb[24].mxu1 %v13202_v58  ;;  %v13356_v58 = vpack.c.bf16 %v2805_v8, %v2801_v20  ;;  %v2836_v20 = vld [vmem:[#allocation9 + $0x120] sm:$0xff]  ;;  %v13406_v8 = vpack.c.bf16 %v2839_v23, %v2835_v18  ;;  %v2863_v18 = vld [vmem:[#allocation9 + $0x1f8] sm:$0xff] }
 0x817   :  { %2626 = vmatprep.mubr.f32.mxu0 %v12553_v0  ;;  %2739 = vmatprep.mubr.f32.mxu1 %v12553_v0  ;;  %v2856_v23 = vld [vmem:[#allocation9 + $0x1c0] sm:$0xff] }
 0x818   :  { %9885 = vmatprep.subr.bf16.mxu0 %v13356_v58 }
 0x81a   :  { %2627 = vmatmul.mubr.f32.gmra.mrb[24].mxu0 %v13248_v41  ;;  %2740 = vmatmul.mubr.f32.gmra.mrb[26].mxu1 %v13248_v41  ;;  %v2807_v41 = vld [vmem:[#allocation9 + $0x38] sm:$0xff] }
 0x81b   :  { %2632 = vmatprep.mubr.f32.mxu0 %v12553_v0  ;;  %2745 = vmatprep.mubr.f32.mxu1 %v12553_v0  ;;  %v13358_v59 = vpack.c.bf16 %v2807_v41, %v2803_v19  ;;  %v13408_v19 = vpack.c.bf16 %v2836_v20, %v2832_v38  ;;  %v2834_v41 = vld [vmem:[#allocation9 + $0x110] sm:$0xff]  ;;  %v2860_v38 = vld [vmem:[#allocation9 + $0x1e0] sm:$0xff]  ;;  %v13442_v20 = vpack.c.bf16 %v2863_v18, %v2859_v9 }
 0x81d   :  { %9917 = vmatprep.subr.bf16.mxu1 %v13358_v59 }
 0x81e   :  { %2633 = vmatmul.mubr.f32.gmra.mrb[26].mxu0 %v13293_v46  ;;  %2746 = vmatmul.mubr.f32.gmra.mrb[28].mxu1 %v13293_v46  ;;  %v2804_v46 = vld [vmem:[#allocation9 + $0x20] sm:$0xff] }
 0x81f   :  { %2638 = vmatprep.mubr.f32.mxu0 %v12553_v0  ;;  %2751 = vmatprep.mubr.f32.mxu1 %v12553_v0  ;;  %v13360_v60 = vpack.c.bf16 %v2804_v46, %v2800_v47  ;;  %v2838_v47 = vld [vmem:[#allocation9 + $0x130] sm:$0xff]  ;;  %v2841_v46 = vld [vmem:[#allocation9 + $0x148] sm:$0xff] }
 0x821   :  { %9887 = vmatpush1.bf16.msra.mxu0 %v13360_v60 }
 0x822   :  { %2639 = vmatmul.mubr.f32.gmra.mrb[28].mxu0 %v13322_v5  ;;  %2752 = vmatmul.mubr.f32.gmra.mrb[30].mxu1 %v13322_v5  ;;  %v13363_v5 = vpack.c.bf16 %v2806_v16, %v2802_v2  ;;  %v13411_v2 = vpack.c.bf16 %v2838_v47, %v2834_v41  ;;  %v2845_v16 = vld [vmem:[#allocation9 + $0x168] sm:$0xff]  ;;  %v13444_v41 = vpack.c.bf16 %v2860_v38, %v2856_v23  ;;  %v2858_v47 = vld [vmem:[#allocation9 + $0x1d0] sm:$0xff] }
 0x823   :  { %2644 = vmatprep.mubr.f32.mxu0 %v12553_v0  ;;  %2757 = vmatprep.mubr.f32.mxu1 %v12553_v0  ;;  %v13415_v35 = vpack.c.bf16 %v2845_v16, %v2841_v46  ;;  %v2862_v46 = vld [vmem:[#allocation9 + $0x1f0] sm:$0xff] }
 0x824   :  { %9919 = vmatpush1.bf16.msra.mxu1 %v13363_v5  ;;  %9889 = vmatprep.subr.bf16.mxu0 %v13368_v49  ;;  %v13447_v16 = vpack.c.bf16 %v2862_v46, %v2858_v47 }
 0x825   :  { %9921 = vmatprep.subr.bf16.mxu1 %v13370_v34  ;;  %9891 = vmatpush1.bf16.msra.mxu0 %v13372_v39 }
 0x826   :  { %9893 = vmatprep.subr.bf16.mxu0 %v13380_v30 }
 0x828   :  { %9923 = vmatpush1.bf16.msra.mxu1 %v13375_v24 }
 0x829   :  { %9925 = vmatprep.subr.bf16.mxu1 %v13382_v45  ;;  %9895 = vmatpush1.bf16.msra.mxu0 %v13384_v15 }
 0x82a   :  { %9897 = vmatprep.subr.bf16.mxu0 %v13392_v55 }
 0x82c   :  { %9927 = vmatpush1.bf16.msra.mxu1 %v13387_v51 }
 0x82d   :  { %9929 = vmatprep.subr.bf16.mxu1 %v13394_v22  ;;  %9899 = vmatpush1.bf16.msra.mxu0 %v13396_v50 }
 0x82e   :  { %9901 = vmatprep.subr.bf16.mxu0 %v13404_v26 }
 0x830   :  { %9931 = vmatpush1.bf16.msra.mxu1 %v13399_v4 }
 0x831   :  { %9933 = vmatprep.subr.bf16.mxu1 %v13406_v8  ;;  %9903 = vmatpush1.bf16.msra.mxu0 %v13408_v19 }
 0x832   :  { %9905 = vmatprep.subr.bf16.mxu0 %v13415_v35 }
 0x834   :  { %9935 = vmatpush1.bf16.msra.mxu1 %v13411_v2 }
 0x835   :  { %9937 = vmatprep.subr.bf16.mxu1 %v13417_v63  ;;  %9907 = vmatpush1.bf16.msra.mxu0 %v13420_v56 }
 0x836   :  { %9909 = vmatprep.subr.bf16.mxu0 %v13426_v62 }
 0x838   :  { %9939 = vmatpush1.bf16.msra.mxu1 %v13424_v48 }
 0x839   :  { %9941 = vmatprep.subr.bf16.mxu1 %v13428_v61  ;;  %9911 = vmatpush1.bf16.msra.mxu0 %v13431_v44 }
 0x83a   :  { %9913 = vmatprep.subr.bf16.mxu0 %v13440_v1 }
 0x83c   :  { %9943 = vmatpush1.bf16.msra.mxu1 %v13435_v54 }
 0x83d   :  { %9945 = vmatprep.subr.bf16.mxu1 %v13442_v20  ;;  %9915 = vmatpush1.bf16.msra.mxu0 %v13444_v41 }
 0x83e   :  { %9949 = vmatprep.subr.bf16.mxu0 %v13356_v58 }
 0x840   :  { %9947 = vmatpush1.bf16.msra.mxu1 %v13447_v16 }
 0x841   :  { %9981 = vmatprep.subr.bf16.mxu1 %v13358_v59 }
 0x8bd   :  { %v2338_v12 = vpop.f32.mrb[14].mxu0  ;;  %v2409_v25 = vpop.f32.mrb[14].mxu1 }
 0x8be   :  { %v11596_v21 = vadd.f32 %v2338_v12, %v12978_v10  ;;  %v2340_v28 = vpop.f32.mrb[15].mxu0  ;;  %v2411_v42 = vpop.f32.mrb[15].mxu1  ;;  %v11612_v33 = vadd.f32 %v2409_v25, %v12990_v37 }
 0x8bf   :  { %v11597_v27 = vadd.f32 %v2340_v28, %v12981_v11  ;;  %v11613_v31 = vadd.f32 %v2411_v42, %v12993_v43 }
 0x8c0   :  { %v9148_v14 = vmul.f32 -1.442695, %v11596_v21  ;;  %v9150_v53 = vmul.f32 -1.442695, %v11612_v33 }
 0x8c1   :  { %v9149_v6 = vmul.f32 -1.442695, %v11597_v27 }
 0x8c2   :  { %11932 = vpow2.f32 %v9148_v14 }
 0x8c3   :  { %11934 = vpow2.f32 %v9149_v6 }
 0x8c4   :  { %11936 = vtanh.f32 %v11613_v31 }
 0x8c5   :  { %11938 = vpow2.f32 %v9150_v53 }
 0x8cc   :  { %v11933_v13 = vpop.eup %11932 }
 0x8cd   :  { %v2427_v40 = vadd.f32 1.0, %v11933_v13  ;;  %v11935_v36 = vpop.eup %11934 }
 0x8ce   :  { %v2428_v10 = vadd.f32 1.0, %v11935_v36  ;;  %v11937_v57 = vpop.eup %11936 }
 0x8cf   :  { %11940 = vrcp.f32 %v2427_v40  ;;  %v11939_v17 = vpop.eup %11938 }
 0x8d0   :  { %11942 = vrcp.f32 %v2428_v10  ;;  %v2429_v23 = vadd.f32 1.0, %v11939_v17 }
 0x8d2   :  { %11944 = vrcp.f32 %v2429_v23 }
 0x8d9   :  { %v11941_v11 = vpop.eup %11940 }
 0x8da   :  { %v2438_v9 = vmul.f32 %v11941_v11, %v11937_v57  ;;  %v11943_v18 = vpop.eup %11942 }
 0x8db   :  { %v2437_v38 = vmul.f32 %v11943_v18, %v13319_v52  ;;  %v2516_v52 = vld [vmem:[%s14889_s7] sm:$0xf] }
 0x8dc   :  { %v11945_v43 = vpop.eup %11944  ;;  %v13501_v12 = vrot.slane %v2516_v52, %v12970_v3  ;;  %v13504_v25 = vrot.slane %v2516_v52, %v12975_v7  ;;  %v13509_v53 = vrot.slane %v2516_v52, %v12985_v29  ;;  %v13512_v13 = vrot.slane %v2516_v52, %v12987_v32 }
 0x8dd   :  { %v2439_v37 = vadd.f32 %v2438_v9, %v2437_v38 }
 0x8df   :  { %11946 = vtanh.f32 %v2439_v37 }
 0x8e9   :  { %v11947_v47 = vpop.eup %11946 }
 0x8ea   :  { %v2441_v46 = vmul.f32 %v11947_v47, %v11945_v43 }
 0x8ec   :  { %2645 = vmatmul.mubr.f32.gmra.mrb[30].mxu0 %v2441_v46  ;;  %2758 = vmatmul.mubr.f32.gmra.mrb[32].mxu1 %v2441_v46 }
 0x8ed   :  { %2928 = vmatprep.mubr.f32.mxu0 %v12553_v0  ;;  %2999 = vmatprep.mubr.f32.mxu1 %v12553_v0 }
 0x8f0   :  { %2929 = vmatmul.mubr.f32.vlgmr.msra.gmra.mrb[16].mxu0 %v12553_v0  ;;  %3000 = vmatmul.mubr.f32.vlgmr.msra.gmra.mrb[18].mxu1 %v12553_v0 }
 0x8f1   :  { %9951 = vmatpush1.bf16.msra.mxu0 %v13360_v60  ;;  %9983 = vmatpush1.bf16.msra.mxu1 %v13363_v5 }
 0x8f2   :  { %9953 = vmatprep.subr.bf16.mxu0 %v13368_v49  ;;  %9985 = vmatprep.subr.bf16.mxu1 %v13370_v34 }
 0x8f3   :  { %3102 = vmatprep.mubr.f32.mxu0 %v12553_v0  ;;  %3173 = vmatprep.mubr.f32.mxu1 %v12553_v0 }
 0x8f5   :  { %9955 = vmatpush1.bf16.msra.mxu0 %v13372_v39  ;;  %9987 = vmatpush1.bf16.msra.mxu1 %v13375_v24 }
 0x8f6   :  { %9957 = vmatprep.subr.bf16.mxu0 %v13380_v30  ;;  %9989 = vmatprep.subr.bf16.mxu1 %v13382_v45 }
 0x8f9   :  { %9959 = vmatpush1.bf16.msra.mxu0 %v13384_v15  ;;  %9991 = vmatpush1.bf16.msra.mxu1 %v13387_v51 }
 0x8fa   :  { %9961 = vmatprep.subr.bf16.mxu0 %v13392_v55  ;;  %9993 = vmatprep.subr.bf16.mxu1 %v13394_v22 }
 0x8fd   :  { %9963 = vmatpush1.bf16.msra.mxu0 %v13396_v50  ;;  %9995 = vmatpush1.bf16.msra.mxu1 %v13399_v4 }
 0x8fe   :  { %9965 = vmatprep.subr.bf16.mxu0 %v13404_v26  ;;  %9997 = vmatprep.subr.bf16.mxu1 %v13406_v8 }
 0x901   :  { %9967 = vmatpush1.bf16.msra.mxu0 %v13408_v19  ;;  %9999 = vmatpush1.bf16.msra.mxu1 %v13411_v2 }
 0x902   :  { %9969 = vmatprep.subr.bf16.mxu0 %v13415_v35  ;;  %10001 = vmatprep.subr.bf16.mxu1 %v13417_v63 }
 0x905   :  { %9971 = vmatpush1.bf16.msra.mxu0 %v13420_v56  ;;  %10003 = vmatpush1.bf16.msra.mxu1 %v13424_v48 }
 0x906   :  { %9973 = vmatprep.subr.bf16.mxu0 %v13426_v62  ;;  %10005 = vmatprep.subr.bf16.mxu1 %v13428_v61 }
 0x909   :  { %9975 = vmatpush1.bf16.msra.mxu0 %v13431_v44  ;;  %10007 = vmatpush1.bf16.msra.mxu1 %v13435_v54 }
 0x90a   :  { %9977 = vmatprep.subr.bf16.mxu0 %v13440_v1  ;;  %10009 = vmatprep.subr.bf16.mxu1 %v13442_v20 }
 0x90d   :  { %9979 = vmatpush1.bf16.msra.mxu0 %v13444_v41  ;;  %10011 = vmatpush1.bf16.msra.mxu1 %v13447_v16 }
 0x90e   :  { %10013 = vmatprep.subr.bf16.mxu0 %v13356_v58  ;;  %10045 = vmatprep.subr.bf16.mxu1 %v13358_v59 }
 0x9c3   :  { %v2930_v21 = vpop.f32.mrb[16].mxu0  ;;  %v3001_v28 = vpop.f32.mrb[18].mxu1 }
 0x9c4   :  { %v11614_v42 = vadd.f32 %v2930_v21, %v13501_v12  ;;  %v2932_v27 = vpop.f32.mrb[17].mxu0  ;;  %v3003_v14 = vpop.f32.mrb[19].mxu1  ;;  %v11630_v40 = vadd.f32 %v3001_v28, %v13509_v53 }
 0x9c5   :  { %v11615_v6 = vadd.f32 %v2932_v27, %v13504_v25  ;;  %v11631_v36 = vadd.f32 %v3003_v14, %v13512_v13 }
 0x9c6   :  { %v9151_v33 = vmul.f32 -1.442695, %v11614_v42  ;;  %v9153_v10 = vmul.f32 -1.442695, %v11630_v40 }
 0x9c7   :  { %v9152_v31 = vmul.f32 -1.442695, %v11615_v6 }
 0x9c8   :  { %11948 = vpow2.f32 %v9151_v33 }
 0x9c9   :  { %11950 = vpow2.f32 %v9152_v31 }
 0x9ca   :  { %11952 = vtanh.f32 %v11631_v36 }
 0x9cb   :  { %11954 = vpow2.f32 %v9153_v10 }
 0x9d2   :  { %v11949_v57 = vpop.eup %11948 }
 0x9d3   :  { %v3019_v17 = vadd.f32 1.0, %v11949_v57  ;;  %v11951_v11 = vpop.eup %11950 }
 0x9d4   :  { %v3020_v9 = vadd.f32 1.0, %v11951_v11  ;;  %v11953_v18 = vpop.eup %11952 }
 0x9d5   :  { %11956 = vrcp.f32 %v3019_v17  ;;  %v11955_v23 = vpop.eup %11954 }
 0x9d6   :  { %11958 = vrcp.f32 %v3020_v9  ;;  %v3021_v47 = vadd.f32 1.0, %v11955_v23 }
 0x9d8   :  { %11960 = vrcp.f32 %v3021_v47 }
 0x9df   :  { %v11957_v38 = vpop.eup %11956 }
 0x9e0   :  { %v3030_v37 = vmul.f32 %v11957_v38, %v11953_v18  ;;  %v11959_v43 = vpop.eup %11958 }
 0x9e1   :  { %v3029_v46 = vmul.f32 0.0, %v11959_v43 }
 0x9e2   :  { %v11961_v21 = vpop.eup %11960 }
 0x9e3   :  { %v13516_v52 = vadd.f32 %v3030_v37, %v3029_v46 }
 0x9e5   :  { %11962 = vtanh.f32 %v13516_v52 }
 0x9ef   :  { %v11963_v28 = vpop.eup %11962 }
 0x9f0   :  { %v3033_v42 = vmul.f32 %v11963_v28, %v11961_v21 }
 0x9f2   :  { %3103 = vmatmul.mubr.f32.vlgmr.msra.gmra.mrb[18].mxu0 %v3033_v42  ;;  %3174 = vmatmul.mubr.f32.vlgmr.msra.gmra.mrb[20].mxu1 %v3033_v42 }
 0x9f3   :  { %10015 = vmatpush1.bf16.msra.mxu0 %v13360_v60  ;;  %10047 = vmatpush1.bf16.msra.mxu1 %v13363_v5 }
 0x9f4   :  { %10017 = vmatprep.subr.bf16.mxu0 %v13368_v49  ;;  %10049 = vmatprep.subr.bf16.mxu1 %v13370_v34 }
 0x9f5   :  { %3276 = vmatprep.mubr.f32.mxu0 %v12553_v0  ;;  %3347 = vmatprep.mubr.f32.mxu1 %v12553_v0 }
 0x9f7   :  { %10019 = vmatpush1.bf16.msra.mxu0 %v13372_v39  ;;  %10051 = vmatpush1.bf16.msra.mxu1 %v13375_v24 }
 0x9f8   :  { %10021 = vmatprep.subr.bf16.mxu0 %v13380_v30  ;;  %10053 = vmatprep.subr.bf16.mxu1 %v13382_v45 }
 0x9fb   :  { %10023 = vmatpush1.bf16.msra.mxu0 %v13384_v15  ;;  %10055 = vmatpush1.bf16.msra.mxu1 %v13387_v51 }
 0x9fc   :  { %10025 = vmatprep.subr.bf16.mxu0 %v13392_v55  ;;  %10057 = vmatprep.subr.bf16.mxu1 %v13394_v22 }
 0x9ff   :  { %10027 = vmatpush1.bf16.msra.mxu0 %v13396_v50  ;;  %10059 = vmatpush1.bf16.msra.mxu1 %v13399_v4 }
 0xa00   :  { %10029 = vmatprep.subr.bf16.mxu0 %v13404_v26  ;;  %10061 = vmatprep.subr.bf16.mxu1 %v13406_v8 }
 0xa03   :  { %10031 = vmatpush1.bf16.msra.mxu0 %v13408_v19  ;;  %10063 = vmatpush1.bf16.msra.mxu1 %v13411_v2 }
 0xa04   :  { %10033 = vmatprep.subr.bf16.mxu0 %v13415_v35  ;;  %10065 = vmatprep.subr.bf16.mxu1 %v13417_v63 }
 0xa07   :  { %10035 = vmatpush1.bf16.msra.mxu0 %v13420_v56  ;;  %10067 = vmatpush1.bf16.msra.mxu1 %v13424_v48 }
 0xa08   :  { %10037 = vmatprep.subr.bf16.mxu0 %v13426_v62  ;;  %10069 = vmatprep.subr.bf16.mxu1 %v13428_v61 }
 0xa0b   :  { %10039 = vmatpush1.bf16.msra.mxu0 %v13431_v44  ;;  %10071 = vmatpush1.bf16.msra.mxu1 %v13435_v54 }
 0xa0c   :  { %10041 = vmatprep.subr.bf16.mxu0 %v13440_v1  ;;  %10073 = vmatprep.subr.bf16.mxu1 %v13442_v20 }
 0xa0f   :  { %10043 = vmatpush1.bf16.msra.mxu0 %v13444_v41  ;;  %10075 = vmatpush1.bf16.msra.mxu1 %v13447_v16 }
 0xa10   :  { %10077 = vmatprep.subr.bf16.mxu0 %v13356_v58  ;;  %10109 = vmatprep.subr.bf16.mxu1 %v13358_v59 }
 0xac5   :  { %v3104_v27 = vpop.f32.mrb[18].mxu0  ;;  %v3175_v14 = vpop.f32.mrb[20].mxu1 }
 0xac6   :  { %v11616_v6 = vadd.f32 %v3104_v27, %v13501_v12  ;;  %v3106_v33 = vpop.f32.mrb[19].mxu0  ;;  %v3177_v31 = vpop.f32.mrb[21].mxu1  ;;  %v11632_v57 = vadd.f32 %v3175_v14, %v13509_v53 }
 0xac7   :  { %v11617_v40 = vadd.f32 %v3106_v33, %v13504_v25  ;;  %v11633_v17 = vadd.f32 %v3177_v31, %v13512_v13 }
 0xac8   :  { %v9154_v36 = vmul.f32 -1.442695, %v11616_v6  ;;  %v9156_v11 = vmul.f32 -1.442695, %v11632_v57 }
 0xac9   :  { %v9155_v10 = vmul.f32 -1.442695, %v11617_v40 }
 0xaca   :  { %11964 = vpow2.f32 %v9154_v36 }
 0xacb   :  { %11966 = vpow2.f32 %v9155_v10 }
 0xacc   :  { %11968 = vtanh.f32 %v11633_v17 }
 0xacd   :  { %11970 = vpow2.f32 %v9156_v11 }
 0xad4   :  { %v11965_v9 = vpop.eup %11964 }
 0xad5   :  { %v3193_v18 = vadd.f32 1.0, %v11965_v9  ;;  %v11967_v23 = vpop.eup %11966 }
 0xad6   :  { %v3194_v38 = vadd.f32 1.0, %v11967_v23  ;;  %v11969_v37 = vpop.eup %11968 }
 0xad7   :  { %11972 = vrcp.f32 %v3193_v18  ;;  %v11971_v43 = vpop.eup %11970 }
 0xad8   :  { %11974 = vrcp.f32 %v3194_v38  ;;  %v3195_v28 = vadd.f32 1.0, %v11971_v43 }
 0xada   :  { %11976 = vrcp.f32 %v3195_v28 }
 0xae1   :  { %v11973_v47 = vpop.eup %11972 }
 0xae2   :  { %v3204_v46 = vmul.f32 %v11973_v47, %v11969_v37  ;;  %v11975_v21 = vpop.eup %11974 }
 0xae3   :  { %v3203_v42 = vmul.f32 %v11975_v21, %v13516_v52 }
 0xae4   :  { %v11977_v14 = vpop.eup %11976 }
 0xae5   :  { %v13558_v27 = vadd.f32 %v3204_v46, %v3203_v42 }
 0xae7   :  { %11978 = vtanh.f32 %v13558_v27 }
 0xaf1   :  { %v11979_v6 = vpop.eup %11978 }
 0xaf2   :  { %v3207_v33 = vmul.f32 %v11979_v6, %v11977_v14 }
 0xaf4   :  { %3277 = vmatmul.mubr.f32.vlgmr.msra.gmra.mrb[20].mxu0 %v3207_v33  ;;  %3348 = vmatmul.mubr.f32.vlgmr.msra.gmra.mrb[22].mxu1 %v3207_v33 }
 0xaf5   :  { %10079 = vmatpush1.bf16.msra.mxu0 %v13360_v60  ;;  %10111 = vmatpush1.bf16.msra.mxu1 %v13363_v5 }
 0xaf6   :  { %10081 = vmatprep.subr.bf16.mxu0 %v13368_v49  ;;  %10113 = vmatprep.subr.bf16.mxu1 %v13370_v34 }
 0xaf7   :  { %3450 = vmatprep.mubr.f32.mxu0 %v12553_v0  ;;  %3521 = vmatprep.mubr.f32.mxu1 %v12553_v0 }
 0xaf9   :  { %10083 = vmatpush1.bf16.msra.mxu0 %v13372_v39  ;;  %10115 = vmatpush1.bf16.msra.mxu1 %v13375_v24 }
 0xafa   :  { %10085 = vmatprep.subr.bf16.mxu0 %v13380_v30  ;;  %10117 = vmatprep.subr.bf16.mxu1 %v13382_v45 }
 0xafd   :  { %10087 = vmatpush1.bf16.msra.mxu0 %v13384_v15  ;;  %10119 = vmatpush1.bf16.msra.mxu1 %v13387_v51 }
 0xafe   :  { %10089 = vmatprep.subr.bf16.mxu0 %v13392_v55  ;;  %10121 = vmatprep.subr.bf16.mxu1 %v13394_v22 }
 0xb01   :  { %10091 = vmatpush1.bf16.msra.mxu0 %v13396_v50  ;;  %10123 = vmatpush1.bf16.msra.mxu1 %v13399_v4 }
 0xb02   :  { %10093 = vmatprep.subr.bf16.mxu0 %v13404_v26  ;;  %10125 = vmatprep.subr.bf16.mxu1 %v13406_v8 }
 0xb05   :  { %10095 = vmatpush1.bf16.msra.mxu0 %v13408_v19  ;;  %10127 = vmatpush1.bf16.msra.mxu1 %v13411_v2 }
 0xb06   :  { %10097 = vmatprep.subr.bf16.mxu0 %v13415_v35  ;;  %10129 = vmatprep.subr.bf16.mxu1 %v13417_v63 }
 0xb09   :  { %10099 = vmatpush1.bf16.msra.mxu0 %v13420_v56  ;;  %10131 = vmatpush1.bf16.msra.mxu1 %v13424_v48 }
 0xb0a   :  { %10101 = vmatprep.subr.bf16.mxu0 %v13426_v62  ;;  %10133 = vmatprep.subr.bf16.mxu1 %v13428_v61 }
 0xb0d   :  { %10103 = vmatpush1.bf16.msra.mxu0 %v13431_v44  ;;  %10135 = vmatpush1.bf16.msra.mxu1 %v13435_v54 }
 0xb0e   :  { %10105 = vmatprep.subr.bf16.mxu0 %v13440_v1  ;;  %10137 = vmatprep.subr.bf16.mxu1 %v13442_v20 }
 0xb11   :  { %10107 = vmatpush1.bf16.msra.mxu0 %v13444_v41  ;;  %10139 = vmatpush1.bf16.msra.mxu1 %v13447_v16 }
 0xb12   :  { %10141 = vmatprep.subr.bf16.mxu0 %v13356_v58  ;;  %10173 = vmatprep.subr.bf16.mxu1 %v13358_v59 }
 0xbc7   :  { %v3278_v52 = vpop.f32.mrb[20].mxu0  ;;  %v3349_v31 = vpop.f32.mrb[22].mxu1 }
 0xbc8   :  { %v11618_v40 = vadd.f32 %v3278_v52, %v13501_v12  ;;  %v3280_v36 = vpop.f32.mrb[21].mxu0  ;;  %v3351_v10 = vpop.f32.mrb[23].mxu1  ;;  %v11634_v9 = vadd.f32 %v3349_v31, %v13509_v53 }
 0xbc9   :  { %v11619_v57 = vadd.f32 %v3280_v36, %v13504_v25  ;;  %v11635_v18 = vadd.f32 %v3351_v10, %v13512_v13 }
 0xbca   :  { %v9157_v17 = vmul.f32 -1.442695, %v11618_v40  ;;  %v9159_v23 = vmul.f32 -1.442695, %v11634_v9 }
 0xbcb   :  { %v9158_v11 = vmul.f32 -1.442695, %v11619_v57 }
 0xbcc   :  { %11980 = vpow2.f32 %v9157_v17 }
 0xbcd   :  { %11982 = vpow2.f32 %v9158_v11 }
 0xbce   :  { %11984 = vtanh.f32 %v11635_v18 }
 0xbcf   :  { %11986 = vpow2.f32 %v9159_v23 }
 0xbd6   :  { %v11981_v38 = vpop.eup %11980 }
 0xbd7   :  { %v3367_v37 = vadd.f32 1.0, %v11981_v38  ;;  %v11983_v43 = vpop.eup %11982 }
 0xbd8   :  { %v3368_v47 = vadd.f32 1.0, %v11983_v43  ;;  %v11985_v46 = vpop.eup %11984 }
 0xbd9   :  { %11988 = vrcp.f32 %v3367_v37  ;;  %v11987_v21 = vpop.eup %11986 }
 0xbda   :  { %11990 = vrcp.f32 %v3368_v47  ;;  %v3369_v6 = vadd.f32 1.0, %v11987_v21 }
 0xbdc   :  { %11992 = vrcp.f32 %v3369_v6 }
 0xbe3   :  { %v11989_v28 = vpop.eup %11988 }
 0xbe4   :  { %v3378_v42 = vmul.f32 %v11989_v28, %v11985_v46  ;;  %v11991_v14 = vpop.eup %11990 }
 0xbe5   :  { %v3377_v33 = vmul.f32 %v11991_v14, %v13558_v27 }
 0xbe6   :  { %v11993_v31 = vpop.eup %11992 }
 0xbe7   :  { %v13600_v52 = vadd.f32 %v3378_v42, %v3377_v33 }
 0xbe9   :  { %11994 = vtanh.f32 %v13600_v52 }
 0xbf3   :  { %v11995_v40 = vpop.eup %11994 }
 0xbf4   :  { %v3381_v36 = vmul.f32 %v11995_v40, %v11993_v31 }
 0xbf6   :  { %3451 = vmatmul.mubr.f32.vlgmr.msra.gmra.mrb[22].mxu0 %v3381_v36  ;;  %3522 = vmatmul.mubr.f32.vlgmr.msra.gmra.mrb[24].mxu1 %v3381_v36 }
 0xbf7   :  { %10143 = vmatpush1.bf16.msra.mxu0 %v13360_v60  ;;  %10175 = vmatpush1.bf16.msra.mxu1 %v13363_v5 }
 0xbf8   :  { %10145 = vmatprep.subr.bf16.mxu0 %v13368_v49  ;;  %10177 = vmatprep.subr.bf16.mxu1 %v13370_v34 }
 0xbf9   :  { %3624 = vmatprep.mubr.f32.mxu0 %v12553_v0  ;;  %3695 = vmatprep.mubr.f32.mxu1 %v12553_v0 }
 0xbfb   :  { %10147 = vmatpush1.bf16.msra.mxu0 %v13372_v39  ;;  %10179 = vmatpush1.bf16.msra.mxu1 %v13375_v24 }
 0xbfc   :  { %10149 = vmatprep.subr.bf16.mxu0 %v13380_v30  ;;  %10181 = vmatprep.subr.bf16.mxu1 %v13382_v45 }
 0xbff   :  { %10151 = vmatpush1.bf16.msra.mxu0 %v13384_v15  ;;  %10183 = vmatpush1.bf16.msra.mxu1 %v13387_v51 }
 0xc00   :  { %10153 = vmatprep.subr.bf16.mxu0 %v13392_v55  ;;  %10185 = vmatprep.subr.bf16.mxu1 %v13394_v22 }
 0xc03   :  { %10155 = vmatpush1.bf16.msra.mxu0 %v13396_v50  ;;  %10187 = vmatpush1.bf16.msra.mxu1 %v13399_v4 }
 0xc04   :  { %10157 = vmatprep.subr.bf16.mxu0 %v13404_v26  ;;  %10189 = vmatprep.subr.bf16.mxu1 %v13406_v8 }
 0xc07   :  { %10159 = vmatpush1.bf16.msra.mxu0 %v13408_v19  ;;  %10191 = vmatpush1.bf16.msra.mxu1 %v13411_v2 }
 0xc08   :  { %10161 = vmatprep.subr.bf16.mxu0 %v13415_v35  ;;  %10193 = vmatprep.subr.bf16.mxu1 %v13417_v63 }
 0xc0b   :  { %10163 = vmatpush1.bf16.msra.mxu0 %v13420_v56  ;;  %10195 = vmatpush1.bf16.msra.mxu1 %v13424_v48 }
 0xc0c   :  { %10165 = vmatprep.subr.bf16.mxu0 %v13426_v62  ;;  %10197 = vmatprep.subr.bf16.mxu1 %v13428_v61 }
 0xc0f   :  { %10167 = vmatpush1.bf16.msra.mxu0 %v13431_v44  ;;  %10199 = vmatpush1.bf16.msra.mxu1 %v13435_v54 }
 0xc10   :  { %10169 = vmatprep.subr.bf16.mxu0 %v13440_v1  ;;  %10201 = vmatprep.subr.bf16.mxu1 %v13442_v20 }
 0xc13   :  { %10171 = vmatpush1.bf16.msra.mxu0 %v13444_v41  ;;  %10203 = vmatpush1.bf16.msra.mxu1 %v13447_v16 }
 0xc14   :  { %10205 = vmatprep.subr.bf16.mxu0 %v13356_v58  ;;  %10237 = vmatprep.subr.bf16.mxu1 %v13358_v59 }
 0xcc9   :  { %v3452_v27 = vpop.f32.mrb[22].mxu0  ;;  %v3523_v10 = vpop.f32.mrb[24].mxu1 }
 0xcca   :  { %v11620_v57 = vadd.f32 %v3452_v27, %v13501_v12  ;;  %v3454_v17 = vpop.f32.mrb[23].mxu0  ;;  %v3525_v11 = vpop.f32.mrb[25].mxu1  ;;  %v11636_v38 = vadd.f32 %v3523_v10, %v13509_v53 }
 0xccb   :  { %v11621_v9 = vadd.f32 %v3454_v17, %v13504_v25  ;;  %v11637_v37 = vadd.f32 %v3525_v11, %v13512_v13 }
 0xccc   :  { %v9160_v18 = vmul.f32 -1.442695, %v11620_v57  ;;  %v9162_v43 = vmul.f32 -1.442695, %v11636_v38 }
 0xccd   :  { %v9161_v23 = vmul.f32 -1.442695, %v11621_v9 }
 0xcce   :  { %11996 = vpow2.f32 %v9160_v18 }
 0xccf   :  { %11998 = vpow2.f32 %v9161_v23 }
 0xcd0   :  { %12000 = vtanh.f32 %v11637_v37 }
 0xcd1   :  { %12002 = vpow2.f32 %v9162_v43 }
 0xcd8   :  { %v11997_v47 = vpop.eup %11996 }
 0xcd9   :  { %v3541_v46 = vadd.f32 1.0, %v11997_v47  ;;  %v11999_v21 = vpop.eup %11998 }
 0xcda   :  { %v3542_v28 = vadd.f32 1.0, %v11999_v21  ;;  %v12001_v42 = vpop.eup %12000 }
 0xcdb   :  { %12004 = vrcp.f32 %v3541_v46  ;;  %v12003_v14 = vpop.eup %12002 }
 0xcdc   :  { %12006 = vrcp.f32 %v3542_v28  ;;  %v3543_v40 = vadd.f32 1.0, %v12003_v14 }
 0xcde   :  { %12008 = vrcp.f32 %v3543_v40 }
 0xce5   :  { %v12005_v6 = vpop.eup %12004 }
 0xce6   :  { %v3552_v33 = vmul.f32 %v12005_v6, %v12001_v42  ;;  %v12007_v31 = vpop.eup %12006 }
 0xce7   :  { %v3551_v36 = vmul.f32 %v12007_v31, %v13600_v52 }
 0xce8   :  { %v12009_v10 = vpop.eup %12008 }
 0xce9   :  { %v13642_v27 = vadd.f32 %v3552_v33, %v3551_v36 }
 0xceb   :  { %12010 = vtanh.f32 %v13642_v27 }
 0xcf5   :  { %v12011_v57 = vpop.eup %12010 }
 0xcf6   :  { %v3555_v17 = vmul.f32 %v12011_v57, %v12009_v10 }
 0xcf8   :  { %3625 = vmatmul.mubr.f32.vlgmr.msra.gmra.mrb[24].mxu0 %v3555_v17  ;;  %3696 = vmatmul.mubr.f32.vlgmr.msra.gmra.mrb[26].mxu1 %v3555_v17 }
 0xcf9   :  { %10207 = vmatpush1.bf16.msra.mxu0 %v13360_v60  ;;  %10239 = vmatpush1.bf16.msra.mxu1 %v13363_v5 }
 0xcfa   :  { %10209 = vmatprep.subr.bf16.mxu0 %v13368_v49  ;;  %10241 = vmatprep.subr.bf16.mxu1 %v13370_v34 }
 0xcfb   :  { %3798 = vmatprep.mubr.f32.mxu0 %v12553_v0  ;;  %3869 = vmatprep.mubr.f32.mxu1 %v12553_v0 }
 0xcfd   :  { %10211 = vmatpush1.bf16.msra.mxu0 %v13372_v39  ;;  %10243 = vmatpush1.bf16.msra.mxu1 %v13375_v24 }
 0xcfe   :  { %10213 = vmatprep.subr.bf16.mxu0 %v13380_v30  ;;  %10245 = vmatprep.subr.bf16.mxu1 %v13382_v45 }
 0xd01   :  { %10215 = vmatpush1.bf16.msra.mxu0 %v13384_v15  ;;  %10247 = vmatpush1.bf16.msra.mxu1 %v13387_v51 }
 0xd02   :  { %10217 = vmatprep.subr.bf16.mxu0 %v13392_v55  ;;  %10249 = vmatprep.subr.bf16.mxu1 %v13394_v22 }
 0xd05   :  { %10219 = vmatpush1.bf16.msra.mxu0 %v13396_v50  ;;  %10251 = vmatpush1.bf16.msra.mxu1 %v13399_v4 }
 0xd06   :  { %10221 = vmatprep.subr.bf16.mxu0 %v13404_v26  ;;  %10253 = vmatprep.subr.bf16.mxu1 %v13406_v8 }
 0xd09   :  { %10223 = vmatpush1.bf16.msra.mxu0 %v13408_v19  ;;  %10255 = vmatpush1.bf16.msra.mxu1 %v13411_v2 }
 0xd0a   :  { %10225 = vmatprep.subr.bf16.mxu0 %v13415_v35  ;;  %10257 = vmatprep.subr.bf16.mxu1 %v13417_v63 }
 0xd0d   :  { %10227 = vmatpush1.bf16.msra.mxu0 %v13420_v56  ;;  %10259 = vmatpush1.bf16.msra.mxu1 %v13424_v48 }
 0xd0e   :  { %10229 = vmatprep.subr.bf16.mxu0 %v13426_v62  ;;  %10261 = vmatprep.subr.bf16.mxu1 %v13428_v61 }
 0xd11   :  { %10231 = vmatpush1.bf16.msra.mxu0 %v13431_v44  ;;  %10263 = vmatpush1.bf16.msra.mxu1 %v13435_v54 }
 0xd12   :  { %10233 = vmatprep.subr.bf16.mxu0 %v13440_v1  ;;  %10265 = vmatprep.subr.bf16.mxu1 %v13442_v20 }
 0xd15   :  { %10235 = vmatpush1.bf16.msra.mxu0 %v13444_v41  ;;  %10267 = vmatpush1.bf16.msra.mxu1 %v13447_v16 }
 0xd16   :  { %10269 = vmatprep.subr.bf16.mxu0 %v13356_v58  ;;  %10301 = vmatprep.subr.bf16.mxu1 %v13358_v59 }
 0xdcb   :  { %v3626_v52 = vpop.f32.mrb[24].mxu0  ;;  %v3697_v11 = vpop.f32.mrb[26].mxu1 }
 0xdcc   :  { %v11622_v9 = vadd.f32 %v3626_v52, %v13501_v12  ;;  %v3628_v18 = vpop.f32.mrb[25].mxu0  ;;  %v3699_v23 = vpop.f32.mrb[27].mxu1  ;;  %v11638_v47 = vadd.f32 %v3697_v11, %v13509_v53 }
 0xdcd   :  { %v11623_v38 = vadd.f32 %v3628_v18, %v13504_v25  ;;  %v11639_v46 = vadd.f32 %v3699_v23, %v13512_v13 }
 0xdce   :  { %v9163_v37 = vmul.f32 -1.442695, %v11622_v9  ;;  %v9165_v21 = vmul.f32 -1.442695, %v11638_v47 }
 0xdcf   :  { %v9164_v43 = vmul.f32 -1.442695, %v11623_v38 }
 0xdd0   :  { %12012 = vpow2.f32 %v9163_v37 }
 0xdd1   :  { %12014 = vpow2.f32 %v9164_v43 }
 0xdd2   :  { %12016 = vtanh.f32 %v11639_v46 }
 0xdd3   :  { %12018 = vpow2.f32 %v9165_v21 }
 0xdda   :  { %v12013_v28 = vpop.eup %12012 }
 0xddb   :  { %v3715_v42 = vadd.f32 1.0, %v12013_v28  ;;  %v12015_v14 = vpop.eup %12014 }
 0xddc   :  { %v3716_v6 = vadd.f32 1.0, %v12015_v14  ;;  %v12017_v33 = vpop.eup %12016 }
 0xddd   :  { %12020 = vrcp.f32 %v3715_v42  ;;  %v12019_v31 = vpop.eup %12018 }
 0xdde   :  { %12022 = vrcp.f32 %v3716_v6  ;;  %v3717_v57 = vadd.f32 1.0, %v12019_v31 }
 0xde0   :  { %12024 = vrcp.f32 %v3717_v57 }
 0xde7   :  { %v12021_v40 = vpop.eup %12020 }
 0xde8   :  { %v3726_v36 = vmul.f32 %v12021_v40, %v12017_v33  ;;  %v12023_v10 = vpop.eup %12022 }
 0xde9   :  { %v3725_v17 = vmul.f32 %v12023_v10, %v13642_v27 }
 0xdea   :  { %v12025_v11 = vpop.eup %12024 }
 0xdeb   :  { %v13684_v52 = vadd.f32 %v3726_v36, %v3725_v17 }
 0xded   :  { %12026 = vtanh.f32 %v13684_v52 }
 0xdf7   :  { %v12027_v9 = vpop.eup %12026 }
 0xdf8   :  { %v3729_v18 = vmul.f32 %v12027_v9, %v12025_v11 }
 0xdfa   :  { %3799 = vmatmul.mubr.f32.vlgmr.msra.gmra.mrb[26].mxu0 %v3729_v18  ;;  %3870 = vmatmul.mubr.f32.vlgmr.msra.gmra.mrb[28].mxu1 %v3729_v18 }
 0xdfb   :  { %10271 = vmatpush1.bf16.msra.mxu0 %v13360_v60  ;;  %10303 = vmatpush1.bf16.msra.mxu1 %v13363_v5 }
 0xdfc   :  { %10273 = vmatprep.subr.bf16.mxu0 %v13368_v49  ;;  %10305 = vmatprep.subr.bf16.mxu1 %v13370_v34 }
 0xdfd   :  { %3972 = vmatprep.mubr.f32.mxu0 %v12553_v0  ;;  %4043 = vmatprep.mubr.f32.mxu1 %v12553_v0 }
 0xdff   :  { %10275 = vmatpush1.bf16.msra.mxu0 %v13372_v39  ;;  %10307 = vmatpush1.bf16.msra.mxu1 %v13375_v24 }
 0xe00   :  { %10277 = vmatprep.subr.bf16.mxu0 %v13380_v30  ;;  %10309 = vmatprep.subr.bf16.mxu1 %v13382_v45 }
 0xe03   :  { %10279 = vmatpush1.bf16.msra.mxu0 %v13384_v15  ;;  %10311 = vmatpush1.bf16.msra.mxu1 %v13387_v51 }
 0xe04   :  { %10281 = vmatprep.subr.bf16.mxu0 %v13392_v55  ;;  %10313 = vmatprep.subr.bf16.mxu1 %v13394_v22 }
 0xe07   :  { %10283 = vmatpush1.bf16.msra.mxu0 %v13396_v50  ;;  %10315 = vmatpush1.bf16.msra.mxu1 %v13399_v4 }
 0xe08   :  { %10285 = vmatprep.subr.bf16.mxu0 %v13404_v26  ;;  %10317 = vmatprep.subr.bf16.mxu1 %v13406_v8 }
 0xe0b   :  { %10287 = vmatpush1.bf16.msra.mxu0 %v13408_v19  ;;  %10319 = vmatpush1.bf16.msra.mxu1 %v13411_v2 }
 0xe0c   :  { %10289 = vmatprep.subr.bf16.mxu0 %v13415_v35  ;;  %10321 = vmatprep.subr.bf16.mxu1 %v13417_v63 }
 0xe0f   :  { %10291 = vmatpush1.bf16.msra.mxu0 %v13420_v56  ;;  %10323 = vmatpush1.bf16.msra.mxu1 %v13424_v48 }
 0xe10   :  { %10293 = vmatprep.subr.bf16.mxu0 %v13426_v62  ;;  %10325 = vmatprep.subr.bf16.mxu1 %v13428_v61 }
 0xe13   :  { %10295 = vmatpush1.bf16.msra.mxu0 %v13431_v44  ;;  %10327 = vmatpush1.bf16.msra.mxu1 %v13435_v54 }
 0xe14   :  { %10297 = vmatprep.subr.bf16.mxu0 %v13440_v1  ;;  %10329 = vmatprep.subr.bf16.mxu1 %v13442_v20 }
 0xe17   :  { %10299 = vmatpush1.bf16.msra.mxu0 %v13444_v41  ;;  %10331 = vmatpush1.bf16.msra.mxu1 %v13447_v16 }
 0xe18   :  { %10333 = vmatprep.subr.bf16.mxu0 %v13356_v58  ;;  %10365 = vmatprep.subr.bf16.mxu1 %v13358_v59 }
 0xecd   :  { %v3800_v27 = vpop.f32.mrb[26].mxu0  ;;  %v3871_v23 = vpop.f32.mrb[28].mxu1 }
 0xece   :  { %v11624_v38 = vadd.f32 %v3800_v27, %v13501_v12  ;;  %v3802_v37 = vpop.f32.mrb[27].mxu0  ;;  %v3873_v43 = vpop.f32.mrb[29].mxu1  ;;  %v11640_v28 = vadd.f32 %v3871_v23, %v13509_v53 }
 0xecf   :  { %v11625_v47 = vadd.f32 %v3802_v37, %v13504_v25  ;;  %v11641_v42 = vadd.f32 %v3873_v43, %v13512_v13  ;;  %v4256_v37 = vld [vmem:[#allocation11 + $0x20] sm:$0xff] }
 0xed0   :  { %v9166_v46 = vmul.f32 -1.442695, %v11624_v38  ;;  %v9168_v14 = vmul.f32 -1.442695, %v11640_v28  ;;  %v4252_v38 = vld [vmem:[#allocation11] sm:$0xff] }
 0xed1   :  { %v9167_v21 = vmul.f32 -1.442695, %v11625_v47  ;;  %v10398_v47 = vpack.c.bf16 %v4256_v37, %v4252_v38  ;;  %v4293_v37 = vld [vmem:[#allocation11 + $0x148] sm:$0xff] }
 0xed2   :  { %12028 = vpow2.f32 %v9166_v46  ;;  %v4254_v46 = vld [vmem:[#allocation11 + $0x10] sm:$0xff] }
 0xed3   :  { %12030 = vpow2.f32 %v9167_v21  ;;  %v4258_v21 = vld [vmem:[#allocation11 + $0x30] sm:$0xff] }
 0xed4   :  { %12032 = vtanh.f32 %v11641_v42  ;;  %v10430_v28 = vpack.c.bf16 %v4258_v21, %v4254_v46  ;;  %v4261_v42 = vld [vmem:[#allocation11 + $0x48] sm:$0xff]  ;;  %v4299_v21 = vld [vmem:[#allocation11 + $0x178] sm:$0xff] }
 0xed5   :  { %12034 = vpow2.f32 %v9168_v14  ;;  %v4265_v14 = vld [vmem:[#allocation11 + $0x68] sm:$0xff] }
 0xedc   :  { %v12029_v58 = vpop.eup %12028 }
 0xedd   :  { %v3889_v6 = vadd.f32 1.0, %v12029_v58  ;;  %v12031_v59 = vpop.eup %12030  ;;  %v4263_v58 = vld [vmem:[#allocation11 + $0x58] sm:$0xff] }
 0xede   :  { %v3890_v33 = vadd.f32 1.0, %v12031_v59  ;;  %v12033_v31 = vpop.eup %12032  ;;  %v4267_v59 = vld [vmem:[#allocation11 + $0x78] sm:$0xff] }
 0xedf   :  { %12036 = vrcp.f32 %v3889_v6  ;;  %v12035_v40 = vpop.eup %12034  ;;  %v10400_v6 = vpack.c.bf16 %v4265_v14, %v4261_v42  ;;  %v4296_v42 = vld [vmem:[#allocation11 + $0x160] sm:$0xff] }
 0xee0   :  { %12038 = vrcp.f32 %v3890_v33  ;;  %v3891_v17 = vadd.f32 1.0, %v12035_v40  ;;  %v4260_v33 = vld [vmem:[#allocation11 + $0x40] sm:$0xff]  ;;  %v10432_v40 = vpack.c.bf16 %v4267_v59, %v4263_v58  ;;  %v4298_v59 = vld [vmem:[#allocation11 + $0x170] sm:$0xff] }
 0xee2   :  { %12040 = vrcp.f32 %v3891_v17 }
 0xee9   :  { %v12037_v36 = vpop.eup %12036 }
 0xeea   :  { %v3900_v10 = vmul.f32 %v12037_v36, %v12033_v31  ;;  %v12039_v57 = vpop.eup %12038  ;;  %v4264_v31 = vld [vmem:[#allocation11 + $0x60] sm:$0xff] }
 0xeeb   :  { %v3899_v11 = vmul.f32 %v12039_v57, %v13684_v52  ;;  %v4259_v52 = vld [vmem:[#allocation11 + $0x38] sm:$0xff]  ;;  %v10402_v36 = vpack.c.bf16 %v4264_v31, %v4260_v33  ;;  %v4266_v57 = vld [vmem:[#allocation11 + $0x70] sm:$0xff]  ;;  %v4301_v33 = vld [vmem:[#allocation11 + $0x188] sm:$0xff] }
 0xeec   :  { %v12041_v18 = vpop.eup %12040 }
 0xeed   :  { %v13726_v9 = vadd.f32 %v3900_v10, %v3899_v11  ;;  %v4262_v10 = vld [vmem:[#allocation11 + $0x50] sm:$0xff]  ;;  %v4269_v11 = vld [vmem:[#allocation11 + $0x88] sm:$0xff] }
 0xeee   :  { %v10434_v17 = vpack.c.bf16 %v4266_v57, %v4262_v10  ;;  %v4307_v10 = vld [vmem:[#allocation11 + $0x1b8] sm:$0xff] }
 0xeef   :  { %12042 = vtanh.f32 %v13726_v9 }
 0xef9   :  { %v12043_v27 = vpop.eup %12042 }
 0xefa   :  { %v3903_v23 = vmul.f32 %v12043_v27, %v12041_v18  ;;  %v4271_v18 = vld [vmem:[#allocation11 + $0x98] sm:$0xff] }
 0xefc   :  { %3973 = vmatmul.mubr.f32.vlgmr.msra.gmra.mrb[28].mxu0 %v3903_v23  ;;  %4044 = vmatmul.mubr.f32.vlgmr.msra.gmra.mrb[30].mxu1 %v3903_v23  ;;  %v4275_v23 = vld [vmem:[#allocation11 + $0xb8] sm:$0xff] }
 0xefd   :  { %10335 = vmatpush1.bf16.msra.mxu0 %v13360_v60  ;;  %10367 = vmatpush1.bf16.msra.mxu1 %v13363_v5 }
 0xefe   :  { %10337 = vmatprep.subr.bf16.mxu0 %v13368_v49  ;;  %10369 = vmatprep.subr.bf16.mxu1 %v13370_v34 }
 0xeff   :  { %4146 = vmatprep.mubr.f32.mxu0 %v12553_v0  ;;  %4217 = vmatprep.mubr.f32.mxu1 %v12553_v0 }
 0xf01   :  { %10339 = vmatpush1.bf16.msra.mxu0 %v13372_v39  ;;  %10371 = vmatpush1.bf16.msra.mxu1 %v13375_v24 }
 0xf02   :  { %10341 = vmatprep.subr.bf16.mxu0 %v13380_v30  ;;  %10373 = vmatprep.subr.bf16.mxu1 %v13382_v45 }
 0xf05   :  { %10343 = vmatpush1.bf16.msra.mxu0 %v13384_v15  ;;  %10375 = vmatpush1.bf16.msra.mxu1 %v13387_v51 }
 0xf06   :  { %10345 = vmatprep.subr.bf16.mxu0 %v13392_v55  ;;  %10377 = vmatprep.subr.bf16.mxu1 %v13394_v22 }
 0xf09   :  { %10347 = vmatpush1.bf16.msra.mxu0 %v13396_v50  ;;  %10379 = vmatpush1.bf16.msra.mxu1 %v13399_v4 }
 0xf0a   :  { %10349 = vmatprep.subr.bf16.mxu0 %v13404_v26  ;;  %10381 = vmatprep.subr.bf16.mxu1 %v13406_v8 }
 0xf0d   :  { %10351 = vmatpush1.bf16.msra.mxu0 %v13408_v19  ;;  %10383 = vmatpush1.bf16.msra.mxu1 %v13411_v2 }
 0xf0e   :  { %10353 = vmatprep.subr.bf16.mxu0 %v13415_v35  ;;  %10385 = vmatprep.subr.bf16.mxu1 %v13417_v63 }
 0xf11   :  { %10355 = vmatpush1.bf16.msra.mxu0 %v13420_v56  ;;  %10387 = vmatpush1.bf16.msra.mxu1 %v13424_v48 }
 0xf12   :  { %10357 = vmatprep.subr.bf16.mxu0 %v13426_v62  ;;  %10389 = vmatprep.subr.bf16.mxu1 %v13428_v61 }
 0xf15   :  { %10359 = vmatpush1.bf16.msra.mxu0 %v13431_v44  ;;  %10391 = vmatpush1.bf16.msra.mxu1 %v13435_v54 }
 0xf16   :  { %10361 = vmatprep.subr.bf16.mxu0 %v13440_v1  ;;  %10393 = vmatprep.subr.bf16.mxu1 %v13442_v20  ;;  %v4253_v1 = vld [vmem:[#allocation11 + $0x8] sm:$0xff] }
 0xf17   :  { %v4257_v20 = vld [vmem:[#allocation11 + $0x28] sm:$0xff] }
 0xf19   :  { %10363 = vmatpush1.bf16.msra.mxu0 %v13444_v41  ;;  %10395 = vmatpush1.bf16.msra.mxu1 %v13447_v16  ;;  %v4255_v41 = vld [vmem:[#allocation11 + $0x18] sm:$0xff]  ;;  %v10396_v16 = vpack.c.bf16 %v4257_v20, %v4253_v1  ;;  %v4288_v1 = vld [vmem:[#allocation11 + $0x120] sm:$0xff] }
 0xf1a   :  { %v10428_v43 = vpack.c.bf16 %v4259_v52, %v4255_v41  ;;  %v4290_v52 = vld [vmem:[#allocation11 + $0x130] sm:$0xff] }
 0xf1b   :  { %10397 = vmatprep.subr.bf16.mxu0 %v10396_v16  ;;  %v4286_v16 = vld [vmem:[#allocation11 + $0x110] sm:$0xff] }
 0xf1c   :  { %10429 = vmatprep.subr.bf16.mxu1 %v10428_v43  ;;  %v10446_v38 = vpack.c.bf16 %v4290_v52, %v4286_v16  ;;  %v4297_v43 = vld [vmem:[#allocation11 + $0x168] sm:$0xff] }
 0xf1d   :  { %v10416_v46 = vpack.c.bf16 %v4297_v43, %v4293_v37 }
 0xfcf   :  { %v3974_v60 = vpop.f32.mrb[28].mxu0  ;;  %v4045_v5 = vpop.f32.mrb[30].mxu1 }
 0xfd0   :  { %v11626_v49 = vadd.f32 %v3974_v60, %v13501_v12  ;;  %v3976_v34 = vpop.f32.mrb[29].mxu0  ;;  %v4047_v39 = vpop.f32.mrb[31].mxu1  ;;  %v11642_v15 = vadd.f32 %v4045_v5, %v13509_v53  ;;  %v4268_v60 = vld [vmem:[#allocation11 + $0x80] sm:$0xff] }
 0xfd1   :  { %v11627_v24 = vadd.f32 %v3976_v34, %v13504_v25  ;;  %v11643_v51 = vadd.f32 %v4047_v39, %v13512_v13  ;;  %v4272_v5 = vld [vmem:[#allocation11 + $0xa0] sm:$0xff]  ;;  %v4270_v39 = vld [vmem:[#allocation11 + $0x90] sm:$0xff] }
 0xfd2   :  { %v9169_v30 = vmul.f32 -1.442695, %v11626_v49  ;;  %v9171_v55 = vmul.f32 -1.442695, %v11642_v15  ;;  %v10436_v49 = vpack.c.bf16 %v4275_v23, %v4271_v18  ;;  %v10406_v34 = vpack.c.bf16 %v4272_v5, %v4268_v60  ;;  %v4281_v15 = vld [vmem:[#allocation11 + $0xe8] sm:$0xff]  ;;  %v4302_v18 = vld [vmem:[#allocation11 + $0x190] sm:$0xff] }
 0xfd3   :  { %v9170_v45 = vmul.f32 -1.442695, %v11627_v24  ;;  %v4274_v24 = vld [vmem:[#allocation11 + $0xb0] sm:$0xff]  ;;  %v4309_v60 = vld [vmem:[#allocation11 + $0x1c8] sm:$0xff] }
 0xfd4   :  { %12044 = vpow2.f32 %v9169_v30  ;;  %v10438_v30 = vpack.c.bf16 %v4274_v24, %v4270_v39  ;;  %v4306_v23 = vld [vmem:[#allocation11 + $0x1b0] sm:$0xff]  ;;  %v4313_v5 = vld [vmem:[#allocation11 + $0x1e8] sm:$0xff]  ;;  %v4311_v39 = vld [vmem:[#allocation11 + $0x1d8] sm:$0xff] }
 0xfd5   :  { %12046 = vpow2.f32 %v9170_v45  ;;  %v4277_v45 = vld [vmem:[#allocation11 + $0xc8] sm:$0xff]  ;;  %v4315_v24 = vld [vmem:[#allocation11 + $0x1f8] sm:$0xff] }
 0xfd6   :  { %12048 = vtanh.f32 %v11643_v51  ;;  %v4279_v51 = vld [vmem:[#allocation11 + $0xd8] sm:$0xff] }
 0xfd7   :  { %12050 = vpow2.f32 %v9171_v55  ;;  %v10408_v55 = vpack.c.bf16 %v4281_v15, %v4277_v45  ;;  %v10456_v45 = vpack.c.bf16 %v4315_v24, %v4311_v39  ;;  %v4312_v15 = vld [vmem:[#allocation11 + $0x1e0] sm:$0xff]  ;;  %v4784_v39 = vld [vmem:[#allocation12 + $0x48] sm:$0xff] }
 0xfd8   :  { %v4788_v24 = vld [vmem:[#allocation12 + $0x68] sm:$0xff] }
 0xfde   :  { %v12045_v22 = vpop.eup %12044 }
 0xfdf   :  { %v4063_v50 = vadd.f32 1.0, %v12045_v22  ;;  %v12047_v4 = vpop.eup %12046  ;;  %v4283_v22 = vld [vmem:[#allocation11 + $0xf8] sm:$0xff] }
 0xfe0   :  { %v4064_v26 = vadd.f32 1.0, %v12047_v4  ;;  %v12049_v8 = vpop.eup %12048  ;;  %v4280_v4 = vld [vmem:[#allocation11 + $0xe0] sm:$0xff] }
 0xfe1   :  { %12052 = vrcp.f32 %v4063_v50  ;;  %v12051_v19 = vpop.eup %12050  ;;  %v4276_v50 = vld [vmem:[#allocation11 + $0xc0] sm:$0xff] }
 0xfe2   :  { %12054 = vrcp.f32 %v4064_v26  ;;  %v4065_v56 = vadd.f32 1.0, %v12051_v19  ;;  %v10440_v26 = vpack.c.bf16 %v4283_v22, %v4279_v51  ;;  %v4278_v19 = vld [vmem:[#allocation11 + $0xd0] sm:$0xff] }
 0xfe3   :  { %v4310_v51 = vld [vmem:[#allocation11 + $0x1d0] sm:$0xff] }
 0xfe4   :  { %12056 = vrcp.f32 %v4065_v56  ;;  %v4289_v56 = vld [vmem:[#allocation11 + $0x128] sm:$0xff] }
 0xfeb   :  { %v12053_v2 = vpop.eup %12052 }
 0xfec   :  { %v4074_v35 = vmul.f32 %v12053_v2, %v12049_v8  ;;  %v12055_v63 = vpop.eup %12054  ;;  %v10410_v8 = vpack.c.bf16 %v4280_v4, %v4276_v50  ;;  %v4282_v2 = vld [vmem:[#allocation11 + $0xf0] sm:$0xff] }
 0xfed   :  { %v4073_v48 = vmul.f32 %v12055_v63, %v13726_v9  ;;  %v4273_v9 = vld [vmem:[#allocation11 + $0xa8] sm:$0xff] }
 0xfee   :  { %v12057_v61 = vpop.eup %12056  ;;  %v10404_v27 = vpack.c.bf16 %v4273_v9, %v4269_v11  ;;  %v4285_v63 = vld [vmem:[#allocation11 + $0x108] sm:$0xff]  ;;  %v4300_v11 = vld [vmem:[#allocation11 + $0x180] sm:$0xff] }
 0xfef   :  { %v13766_v62 = vadd.f32 %v4074_v35, %v4073_v48  ;;  %v10442_v35 = vpack.c.bf16 %v4282_v2, %v4278_v19  ;;  %v4287_v48 = vld [vmem:[#allocation11 + $0x118] sm:$0xff]  ;;  %v4304_v9 = vld [vmem:[#allocation11 + $0x1a0] sm:$0xff] }
 0xff1   :  { %12058 = vtanh.f32 %v13766_v62 }
 0xffb   :  { %v12059_v44 = vpop.eup %12058 }
 0xffc   :  { %v4077_v54 = vmul.f32 %v12059_v44, %v12057_v61  ;;  %v10412_v61 = vpack.c.bf16 %v4289_v56, %v4285_v63  ;;  %v4291_v44 = vld [vmem:[#allocation11 + $0x138] sm:$0xff] }
 0xffd   :  { %v10444_v20 = vpack.c.bf16 %v4291_v44, %v4287_v48 }
 0xffe   :  { %4147 = vmatmul.mubr.f32.vlgmr.msra.gmra.mrb[30].mxu0 %v4077_v54  ;;  %4218 = vmatmul.mubr.f32.vlgmr.msra.gmra.mrb[32].mxu1 %v4077_v54  ;;  %v4284_v54 = vld [vmem:[#allocation11 + $0x100] sm:$0xff] }
 0xfff   :  { %4402 = vmatprep.mubr.f32.mxu0 %v12553_v0  ;;  %4473 = vmatprep.mubr.f32.mxu1 %v12553_v0  ;;  %v10414_v41 = vpack.c.bf16 %v4288_v1, %v4284_v54 }
0x1000   :  { %10399 = vmatpush1.bf16.msra.mxu0 %v10398_v47  ;;  %10431 = vmatpush1.bf16.msra.mxu1 %v10430_v28  ;;  %v4295_v47 = vld [vmem:[#allocation11 + $0x158] sm:$0xff]  ;;  %v4292_v28 = vld [vmem:[#allocation11 + $0x140] sm:$0xff] }
0x1001   :  { %10401 = vmatprep.subr.bf16.mxu0 %v10400_v6  ;;  %10433 = vmatprep.subr.bf16.mxu1 %v10432_v40  ;;  %v10448_v14 = vpack.c.bf16 %v4299_v21, %v4295_v47  ;;  %v10418_v58 = vpack.c.bf16 %v4296_v42, %v4292_v28  ;;  %v4294_v6 = vld [vmem:[#allocation11 + $0x150] sm:$0xff]  ;;  %v4305_v40 = vld [vmem:[#allocation11 + $0x1a8] sm:$0xff]  ;;  %v4316_v21 = vld [vmem:[%s14892_s10] sm:$0xf] }
0x1002   :  { %v10450_v31 = vpack.c.bf16 %v4298_v59, %v4294_v6  ;;  %v10420_v57 = vpack.c.bf16 %v4305_v40, %v4301_v33  ;;  %v4325_v28 = vrot.slane %v4316_v21, %v12975_v7  ;;  %v4321_v42 = vrot.slane %v4316_v21, %v12970_v3  ;;  %v4780_v6 = vld [vmem:[#allocation12 + $0x28] sm:$0xff]  ;;  %v4782_v40 = vld [vmem:[#allocation12 + $0x38] sm:$0xff] }
0x1004   :  { %10403 = vmatpush1.bf16.msra.mxu0 %v10402_v36  ;;  %10435 = vmatpush1.bf16.msra.mxu1 %v10434_v17  ;;  %v4303_v36 = vld [vmem:[#allocation11 + $0x198] sm:$0xff] }
0x1005   :  { %10405 = vmatprep.subr.bf16.mxu0 %v10404_v27  ;;  %10437 = vmatprep.subr.bf16.mxu1 %v10436_v49  ;;  %v10452_v17 = vpack.c.bf16 %v4307_v10, %v4303_v36  ;;  %v10422_v27 = vpack.c.bf16 %v4304_v9, %v4300_v11  ;;  %v10454_v49 = vpack.c.bf16 %v4306_v23, %v4302_v18  ;;  %v4775_v36 = vld [vmem:[#allocation12] sm:$0xff]  ;;  %v4777_v11 = vld [vmem:[#allocation12 + $0x10] sm:$0xff] }
0x1006   :  { %v4781_v9 = vld [vmem:[#allocation12 + $0x30] sm:$0xff] }
0x1008   :  { %10407 = vmatpush1.bf16.msra.mxu0 %v10406_v34  ;;  %10439 = vmatpush1.bf16.msra.mxu1 %v10438_v30  ;;  %v10424_v34 = vpack.c.bf16 %v4313_v5, %v4309_v60  ;;  %v4308_v30 = vld [vmem:[#allocation11 + $0x1c0] sm:$0xff] }
0x1009   :  { %10409 = vmatprep.subr.bf16.mxu0 %v10408_v55  ;;  %10441 = vmatprep.subr.bf16.mxu1 %v10440_v26  ;;  %v4314_v55 = vld [vmem:[#allocation11 + $0x1f0] sm:$0xff]  ;;  %v10426_v22 = vpack.c.bf16 %v4312_v15, %v4308_v30  ;;  %v4786_v15 = vld [vmem:[#allocation12 + $0x58] sm:$0xff] }
0x100a   :  { %v10458_v50 = vpack.c.bf16 %v4314_v55, %v4310_v51  ;;  %v4790_v51 = vld [vmem:[#allocation12 + $0x78] sm:$0xff]  ;;  %v4783_v55 = vld [vmem:[#allocation12 + $0x40] sm:$0xff] }
0x100c   :  { %10411 = vmatpush1.bf16.msra.mxu0 %v10410_v8  ;;  %10443 = vmatpush1.bf16.msra.mxu1 %v10442_v35 }
0x100d   :  { %10413 = vmatprep.subr.bf16.mxu0 %v10412_v61  ;;  %10445 = vmatprep.subr.bf16.mxu1 %v10444_v20 }
0x1010   :  { %10415 = vmatpush1.bf16.msra.mxu0 %v10414_v41  ;;  %10447 = vmatpush1.bf16.msra.mxu1 %v10446_v38 }
0x1011   :  { %10417 = vmatprep.subr.bf16.mxu0 %v10416_v46  ;;  %10449 = vmatprep.subr.bf16.mxu1 %v10448_v14  ;;  %v4329_v14 = vrot.slane %v4316_v21, %v12985_v29 }
0x1014   :  { %10419 = vmatpush1.bf16.msra.mxu0 %v10418_v58  ;;  %10451 = vmatpush1.bf16.msra.mxu1 %v10450_v31  ;;  %v4776_v58 = vld [vmem:[#allocation12 + $0x8] sm:$0xff]  ;;  %v4778_v31 = vld [vmem:[#allocation12 + $0x18] sm:$0xff] }
0x1015   :  { %10421 = vmatprep.subr.bf16.mxu0 %v10420_v57  ;;  %10453 = vmatprep.subr.bf16.mxu1 %v10452_v17  ;;  %v4779_v17 = vld [vmem:[#allocation12 + $0x20] sm:$0xff]  ;;  %v13785_v23 = vpack.c.bf16 %v4780_v6, %v4776_v58  ;;  %v4812_v58 = vld [vmem:[#allocation12 + $0x128] sm:$0xff] }
0x1016   :  { %v13789_v30 = vpack.c.bf16 %v4779_v17, %v4775_v36  ;;  %v4811_v36 = vld [vmem:[#allocation12 + $0x120] sm:$0xff] }
0x1017   :  { %v4484_v17 = vld [vmem:[#allocation4 + $0x20] sm:$0xff] }
0x1018   :  { %10423 = vmatpush1.bf16.msra.mxu0 %v10422_v27  ;;  %10455 = vmatpush1.bf16.msra.mxu1 %v10454_v49  ;;  %v4480_v49 = vld [vmem:[#allocation4] sm:$0xff] }
0x1019   :  { %10425 = vmatprep.subr.bf16.mxu0 %v10424_v34  ;;  %10457 = vmatprep.subr.bf16.mxu1 %v10456_v45  ;;  %v13787_v34 = vpack.c.bf16 %v4782_v40, %v4778_v31  ;;  %v13791_v45 = vpack.c.bf16 %v4781_v9, %v4777_v11  ;;  %v4814_v31 = vld [vmem:[#allocation12 + $0x138] sm:$0xff]  ;;  %v4807_v40 = vld [vmem:[#allocation12 + $0x100] sm:$0xff] }
0x101c   :  { %10427 = vmatpush1.bf16.msra.mxu0 %v10426_v22  ;;  %10459 = vmatpush1.bf16.msra.mxu1 %v10458_v50  ;;  %v4787_v22 = vld [vmem:[#allocation12 + $0x60] sm:$0xff]  ;;  %v4785_v50 = vld [vmem:[#allocation12 + $0x50] sm:$0xff] }
0x10d1   :  { %v4148_v4 = vpop.f32.mrb[30].mxu0  ;;  %v4219_v26 = vpop.f32.mrb[32].mxu1 }
0x10d2   :  { %v11628_v8 = vadd.f32 %v4148_v4, %v13501_v12  ;;  %v4150_v19 = vpop.f32.mrb[31].mxu0  ;;  %v4221_v2 = vpop.f32.mrb[33].mxu1  ;;  %v11644_v48 = vadd.f32 %v4219_v26, %v13509_v53  ;;  %v4789_v4 = vld [vmem:[#allocation12 + $0x70] sm:$0xff]  ;;  %v4481_v26 = vld [vmem:[#allocation4 + $0x8] sm:$0xff] }
0x10d3   :  { %v11629_v35 = vadd.f32 %v4150_v19, %v13504_v25  ;;  %v11645_v61 = vadd.f32 %v4221_v2, %v13512_v13  ;;  %v13799_v19 = vpack.c.bf16 %v4790_v51, %v4786_v15  ;;  %v4792_v2 = vld [vmem:[#allocation12 + $0x88] sm:$0xff]  ;;  %v4819_v15 = vld [vmem:[#allocation12 + $0x160] sm:$0xff]  ;;  %v4817_v51 = vld [vmem:[#allocation12 + $0x150] sm:$0xff] }
0x10d4   :  { %v9172_v63 = vmul.f32 -1.442695, %v11628_v8  ;;  %v9174_v44 = vmul.f32 -1.442695, %v11644_v48  ;;  %v13797_v8 = vpack.c.bf16 %v4788_v24, %v4784_v39  ;;  %v4794_v48 = vld [vmem:[#allocation12 + $0x98] sm:$0xff]  ;;  %v4815_v24 = vld [vmem:[#allocation12 + $0x140] sm:$0xff] }
0x10d5   :  { %v9173_v56 = vmul.f32 -1.442695, %v11629_v35  ;;  %v4796_v35 = vld [vmem:[#allocation12 + $0xa8] sm:$0xff]  ;;  %v4822_v39 = vld [vmem:[#allocation12 + $0x178] sm:$0xff] }
0x10d6   :  { %12060 = vpow2.f32 %v9172_v63  ;;  %v13803_v63 = vpack.c.bf16 %v4787_v22, %v4783_v55  ;;  %v4821_v55 = vld [vmem:[#allocation12 + $0x170] sm:$0xff]  ;;  %v4485_v22 = vld [vmem:[#allocation4 + $0x28] sm:$0xff] }
0x10d7   :  { %12062 = vpow2.f32 %v9173_v56  ;;  %v13805_v56 = vpack.c.bf16 %v4789_v4, %v4785_v50 }
0x10d8   :  { %12064 = vtanh.f32 %v11645_v61  ;;  %v4798_v61 = vld [vmem:[#allocation12 + $0xb8] sm:$0xff] }
0x10d9   :  { %12066 = vpow2.f32 %v9174_v44  ;;  %v4791_v44 = vld [vmem:[#allocation12 + $0x80] sm:$0xff] }
0x10e0   :  { %v12061_v54 = vpop.eup %12060 }
0x10e1   :  { %v4237_v1 = vadd.f32 1.0, %v12061_v54  ;;  %v12063_v20 = vpop.eup %12062  ;;  %v4795_v54 = vld [vmem:[#allocation12 + $0xa0] sm:$0xff] }
0x10e2   :  { %v4238_v12 = vadd.f32 1.0, %v12063_v20  ;;  %v12065_v41 = vpop.eup %12064  ;;  %v4797_v20 = vld [vmem:[#allocation12 + $0xb0] sm:$0xff] }
0x10e3   :  { %12068 = vrcp.f32 %v4237_v1  ;;  %v12067_v16 = vpop.eup %12066  ;;  %v4793_v1 = vld [vmem:[#allocation12 + $0x90] sm:$0xff] }
0x10e4   :  { %12070 = vrcp.f32 %v4238_v12  ;;  %v4239_v37 = vadd.f32 1.0, %v12067_v16  ;;  %v4482_v12 = vld [vmem:[#allocation4 + $0x10] sm:$0xff]  ;;  %v13815_v16 = vpack.c.bf16 %v4798_v61, %v4794_v48  ;;  %v13869_v48 = vpack.c.bf16 %v4821_v55, %v4817_v51  ;;  %v4826_v61 = vld [vmem:[#allocation12 + $0x198] sm:$0xff] }
0x10e6   :  { %12072 = vrcp.f32 %v4239_v37  ;;  %v13821_v37 = vpack.c.bf16 %v4797_v20, %v4793_v1  ;;  %v4827_v1 = vld [vmem:[#allocation12 + $0x1a0] sm:$0xff]  ;;  %v4825_v20 = vld [vmem:[#allocation12 + $0x190] sm:$0xff] }
0x10ed   :  { %v12069_v25 = vpop.eup %12068 }
0x10ee   :  { %v4248_v52 = vmul.f32 %v12069_v25, %v12065_v41  ;;  %v12071_v38 = vpop.eup %12070  ;;  %v13813_v41 = vpack.c.bf16 %v4796_v35, %v4792_v2  ;;  %v4800_v25 = vld [vmem:[#allocation12 + $0xc8] sm:$0xff]  ;;  %v13867_v35 = vpack.c.bf16 %v4819_v15, %v4815_v24 }
0x10ef   :  { %v4247_v43 = vmul.f32 %v12071_v38, %v13766_v62  ;;  %v4333_v62 = vrot.slane %v4316_v21, %v12987_v32  ;;  %v13819_v38 = vpack.c.bf16 %v4795_v54, %v4791_v44  ;;  %v4805_v21 = vld [vmem:[#allocation12 + $0xf0] sm:$0xff]  ;;  %v4828_v2 = vld [vmem:[#allocation12 + $0x1a8] sm:$0xff]  ;;  %v4830_v44 = vld [vmem:[#allocation12 + $0x1b8] sm:$0xff] }
0x10f0   :  { %v12073_v13 = vpop.eup %12072  ;;  %v4823_v54 = vld [vmem:[#allocation12 + $0x180] sm:$0xff] }
0x10f1   :  { %v4249_v53 = vadd.f32 %v4248_v52, %v4247_v43  ;;  %v4804_v52 = vld [vmem:[#allocation12 + $0xe8] sm:$0xff]  ;;  %v4802_v43 = vld [vmem:[#allocation12 + $0xd8] sm:$0xff] }
0x10f3   :  { %12074 = vtanh.f32 %v4249_v53  ;;  %v4806_v53 = vld [vmem:[#allocation12 + $0xf8] sm:$0xff] }
0x10fd   :  { %v12075_v47 = vpop.eup %12074 }
0x10fe   :  { %v4251_v46 = vmul.f32 %v12075_v47, %v12073_v13  ;;  %v4799_v13 = vld [vmem:[#allocation12 + $0xc0] sm:$0xff] }
0x10ff   :  { %v4803_v47 = vld [vmem:[#allocation12 + $0xe0] sm:$0xff] }
0x1100   :  { %4403 = vmatmul.mubr.f32.vlgmr.msra.gmra.mrb[32].mxu0 %v4251_v46  ;;  %4474 = vmatmul.mubr.f32.vlgmr.msra.gmra.mrb[34].mxu1 %v4251_v46  ;;  %v4801_v46 = vld [vmem:[#allocation12 + $0xd0] sm:$0xff]  ;;  %v13835_v6 = vpack.c.bf16 %v4803_v47, %v4799_v13  ;;  %v4836_v13 = vld [vmem:[#allocation12 + $0x1e8] sm:$0xff]  ;;  %v13883_v47 = vpack.c.bf16 %v4827_v1, %v4823_v54 }
0x1101   :  { %4577 = vmatprep.mubr.f32.mxu0 %v12553_v0  ;;  %4690 = vmatprep.mubr.f32.mxu1 %v12553_v0 }
0x11d3   :  { %v4404_v59 = vpop.f32.mrb[32].mxu0  ;;  %v4475_v33 = vpop.f32.mrb[34].mxu1 }
0x11d4   :  { %v4406_v10 = vpop.f32.mrb[33].mxu0  ;;  %v4477_v57 = vpop.f32.mrb[35].mxu1  ;;  %v4405_v60 = vadd.f32 %v4404_v59, %v4321_v42  ;;  %v4476_v5 = vadd.f32 %v4475_v33, %v4329_v14  ;;  %v13831_v42 = vpack.c.bf16 %v4806_v53, %v4802_v43  ;;  %v4808_v14 = vld [vmem:[#allocation12 + $0x108] sm:$0xff]  ;;  %v13837_v59 = vpack.c.bf16 %v4805_v21, %v4801_v46  ;;  %v4810_v33 = vld [vmem:[#allocation12 + $0x118] sm:$0xff] }
0x11d5   :  { %v4407_v18 = vadd.f32 %v4406_v10, %v4325_v28  ;;  %v4478_v27 = vadd.f32 %v4477_v57, %v4333_v62  ;;  %v4483_v28 = vld [vmem:[#allocation4 + $0x18] sm:$0xff]  ;;  %v13829_v62 = vpack.c.bf16 %v4804_v52, %v4800_v25  ;;  %v4809_v10 = vld [vmem:[#allocation12 + $0x110] sm:$0xff]  ;;  %v13845_v11 = vpack.c.bf16 %v4812_v58, %v4808_v14  ;;  %v4832_v53 = vld [vmem:[#allocation12 + $0x1c8] sm:$0xff] }
0x11d6   :  { %v4813_v57 = vld [vmem:[#allocation12 + $0x130] sm:$0xff]  ;;  %v13847_v9 = vpack.c.bf16 %v4814_v31, %v4810_v33  ;;  %v13879_v43 = vpack.c.bf16 %v4830_v44, %v4826_v61  ;;  %v4834_v21 = vld [vmem:[#allocation12 + $0x1d8] sm:$0xff]  ;;  %v4831_v14 = vld [vmem:[#allocation12 + $0x1c0] sm:$0xff] }
0x11d7   :  { %4513 = vmatprep.subr.mxu0 %v4407_v18  ;;  %4626 = vmatprep.subr.mxu1 %v4478_v27  ;;  %v4816_v18 = vld [vmem:[#allocation12 + $0x148] sm:$0xff]  ;;  %v4486_v25 = vld [vmem:[#allocation4 + $0x30] sm:$0xff]  ;;  %v4835_v58 = vld [vmem:[#allocation12 + $0x1e0] sm:$0xff] }
0x11d8   :  { %4514 = vmatpush1.msra.mxu0 %v4405_v60  ;;  %4627 = vmatpush1.msra.mxu1 %v4476_v5  ;;  %v4820_v27 = vld [vmem:[#allocation12 + $0x168] sm:$0xff]  ;;  %v13851_v60 = vpack.c.bf16 %v4811_v36, %v4807_v40  ;;  %v13853_v5 = vpack.c.bf16 %v4813_v57, %v4809_v10  ;;  %v4833_v33 = vld [vmem:[#allocation12 + $0x1d0] sm:$0xff]  ;;  %v4487_v40 = vld [vmem:[#allocation4 + $0x38] sm:$0xff]  ;;  %v13893_v36 = vpack.c.bf16 %v4836_v13, %v4832_v53 }
0x11d9   :  { %9175 = vmatmul.mubr.msk.f32.vlgmr.msra.gmra.mrb[34].mxu0 %vm4488_vm2, %v4480_v49  ;;  %9183 = vmatmul.mubr.msk.f32.vlgmr.msra.gmra.mrb[36].mxu1 %vm4488_vm2, %v4480_v49  ;;  %v4818_v49 = vld [vmem:[#allocation12 + $0x158] sm:$0xff]  ;;  %v13861_v50 = vpack.c.bf16 %v4820_v27, %v4816_v18  ;;  %v4837_v31 = vld [vmem:[#allocation12 + $0x1f0] sm:$0xff]  ;;  %v13899_v57 = vpack.c.bf16 %v4835_v58, %v4831_v14 }
0x11da   :  { %10461 = vmatprep.subr.bf16.mxu0 %v13785_v23  ;;  %10493 = vmatprep.subr.bf16.mxu1 %v13787_v34  ;;  %v13863_v4 = vpack.c.bf16 %v4822_v39, %v4818_v49 }
0x11db   :  { %10463 = vmatpush1.bf16.msra.mxu0 %v13789_v30  ;;  %10495 = vmatpush1.bf16.msra.mxu1 %v13791_v45 }
0x11dc   :  { %4583 = vmatprep.mubr.f32.mxu0 %v12553_v0  ;;  %4696 = vmatprep.mubr.f32.mxu1 %v12553_v0 }
0x11dd   :  { %9176 = vmatmul.mubr.msk.f32.gmra.mrb[36].mxu0 %vm4488_vm2, %v4481_v26  ;;  %9184 = vmatmul.mubr.msk.f32.gmra.mrb[38].mxu1 %vm4488_vm2, %v4481_v26  ;;  %v4824_v26 = vld [vmem:[#allocation12 + $0x188] sm:$0xff] }
0x11de   :  { %10465 = vmatprep.subr.bf16.mxu0 %v13797_v8  ;;  %10497 = vmatprep.subr.bf16.mxu1 %v13799_v19  ;;  %v13877_v52 = vpack.c.bf16 %v4828_v2, %v4824_v26 }
0x11df   :  { %10467 = vmatpush1.bf16.msra.mxu0 %v13803_v63  ;;  %10499 = vmatpush1.bf16.msra.mxu1 %v13805_v56 }
0x11e0   :  { %4589 = vmatprep.mubr.f32.mxu0 %v12553_v0  ;;  %4702 = vmatprep.mubr.f32.mxu1 %v12553_v0 }
0x11e1   :  { %9177 = vmatmul.mubr.msk.f32.gmra.mrb[38].mxu0 %vm4488_vm2, %v4482_v12  ;;  %9185 = vmatmul.mubr.msk.f32.gmra.mrb[40].mxu1 %vm4488_vm2, %v4482_v12  ;;  %v4829_v12 = vld [vmem:[#allocation12 + $0x1b0] sm:$0xff] }
0x11e2   :  { %10469 = vmatprep.subr.bf16.mxu0 %v13813_v41  ;;  %10501 = vmatprep.subr.bf16.mxu1 %v13815_v16  ;;  %v13885_v46 = vpack.c.bf16 %v4829_v12, %v4825_v20 }
0x11e3   :  { %10471 = vmatpush1.bf16.msra.mxu0 %v13819_v38  ;;  %10503 = vmatpush1.bf16.msra.mxu1 %v13821_v37 }
0x11e4   :  { %4595 = vmatprep.mubr.f32.mxu0 %v12553_v0  ;;  %4708 = vmatprep.mubr.f32.mxu1 %v12553_v0 }
0x11e5   :  { %9178 = vmatmul.mubr.msk.f32.gmra.mrb[40].mxu0 %vm4488_vm2, %v4483_v28  ;;  %9186 = vmatmul.mubr.msk.f32.gmra.mrb[42].mxu1 %vm4488_vm2, %v4483_v28  ;;  %v4838_v28 = vld [vmem:[#allocation12 + $0x1f8] sm:$0xff] }
0x11e6   :  { %10473 = vmatprep.subr.bf16.mxu0 %v13829_v62  ;;  %10505 = vmatprep.subr.bf16.mxu1 %v13831_v42  ;;  %v13895_v10 = vpack.c.bf16 %v4838_v28, %v4834_v21 }
0x11e7   :  { %10475 = vmatpush1.bf16.msra.mxu0 %v13835_v6  ;;  %10507 = vmatpush1.bf16.msra.mxu1 %v13837_v59 }
0x11e8   :  { %4601 = vmatprep.mubr.f32.mxu0 %v12553_v0  ;;  %4714 = vmatprep.mubr.f32.mxu1 %v12553_v0 }
0x11e9   :  { %9179 = vmatmul.mubr.msk.f32.gmra.mrb[42].mxu0 %vm4488_vm2, %v4484_v17  ;;  %9187 = vmatmul.mubr.msk.f32.gmra.mrb[44].mxu1 %vm4488_vm2, %v4484_v17  ;;  %v13901_v17 = vpack.c.bf16 %v4837_v31, %v4833_v33 }
0x11ea   :  { %10477 = vmatprep.subr.bf16.mxu0 %v13845_v11  ;;  %10509 = vmatprep.subr.bf16.mxu1 %v13847_v9 }
0x11eb   :  { %10479 = vmatpush1.bf16.msra.mxu0 %v13851_v60  ;;  %10511 = vmatpush1.bf16.msra.mxu1 %v13853_v5 }
0x11ec   :  { %4607 = vmatprep.mubr.f32.mxu0 %v12553_v0  ;;  %4720 = vmatprep.mubr.f32.mxu1 %v12553_v0 }
0x11ed   :  { %9180 = vmatmul.mubr.msk.f32.gmra.mrb[44].mxu0 %vm4488_vm2, %v4485_v22  ;;  %9188 = vmatmul.mubr.msk.f32.gmra.mrb[46].mxu1 %vm4488_vm2, %v4485_v22 }
0x11ee   :  { %10481 = vmatprep.subr.bf16.mxu0 %v13861_v50  ;;  %10513 = vmatprep.subr.bf16.mxu1 %v13863_v4 }
0x11ef   :  { %10483 = vmatpush1.bf16.msra.mxu0 %v13867_v35  ;;  %10515 = vmatpush1.bf16.msra.mxu1 %v13869_v48 }
0x11f0   :  { %4613 = vmatprep.mubr.f32.mxu0 %v12553_v0  ;;  %4726 = vmatprep.mubr.f32.mxu1 %v12553_v0 }
0x11f1   :  { %9181 = vmatmul.mubr.msk.f32.gmra.mrb[46].mxu0 %vm4488_vm2, %v4486_v25  ;;  %9189 = vmatmul.mubr.msk.f32.gmra.mrb[48].mxu1 %vm4488_vm2, %v4486_v25 }
0x11f2   :  { %10485 = vmatprep.subr.bf16.mxu0 %v13877_v52  ;;  %10517 = vmatprep.subr.bf16.mxu1 %v13879_v43 }
0x11f3   :  { %10487 = vmatpush1.bf16.msra.mxu0 %v13883_v47  ;;  %10519 = vmatpush1.bf16.msra.mxu1 %v13885_v46 }
0x11f4   :  { %4619 = vmatprep.mubr.f32.mxu0 %v12553_v0  ;;  %4732 = vmatprep.mubr.f32.mxu1 %v12553_v0 }
0x11f5   :  { %9182 = vmatmul.mubr.msk.f32.gmra.mrb[48].mxu0 %vm4488_vm2, %v4487_v40  ;;  %9190 = vmatmul.mubr.msk.f32.gmra.mrb[50].mxu1 %vm4488_vm2, %v4487_v40 }
0x11f6   :  { %10489 = vmatprep.subr.bf16.mxu0 %v13893_v36  ;;  %10521 = vmatprep.subr.bf16.mxu1 %v13895_v10 }
0x11f7   :  { %10491 = vmatpush1.bf16.msra.mxu0 %v13899_v57  ;;  %10523 = vmatpush1.bf16.msra.mxu1 %v13901_v17 }
0x11f8   :  { %4903 = vmatprep.mubr.f32.mxu0 %v12553_v0  ;;  %4974 = vmatprep.mubr.f32.mxu1 %v12553_v0 }
0x11f9   :  { %10525 = vmatprep.subr.bf16.mxu0 %v13785_v23  ;;  %10557 = vmatprep.subr.bf16.mxu1 %v13787_v34 }
0x11fa   :  { %4904 = vmatmul.mubr.f32.vlgmr.msra.gmra.mrb[34].mxu0 %v12553_v0  ;;  %4975 = vmatmul.mubr.f32.vlgmr.msra.gmra.mrb[36].mxu1 %v12553_v0 }
0x11fb   :  { %10527 = vmatpush1.bf16.msra.mxu0 %v13789_v30  ;;  %10559 = vmatpush1.bf16.msra.mxu1 %v13791_v45 }
0x11fc   :  { %10529 = vmatprep.subr.bf16.mxu0 %v13797_v8  ;;  %10561 = vmatprep.subr.bf16.mxu1 %v13799_v19 }
0x11fd   :  { %5142 = vmatprep.mubr.f32.mxu0 %v12553_v0  ;;  %5213 = vmatprep.mubr.f32.mxu1 %v12553_v0 }
0x11ff   :  { %10531 = vmatpush1.bf16.msra.mxu0 %v13803_v63  ;;  %10563 = vmatpush1.bf16.msra.mxu1 %v13805_v56 }
0x1200   :  { %10533 = vmatprep.subr.bf16.mxu0 %v13813_v41  ;;  %10565 = vmatprep.subr.bf16.mxu1 %v13815_v16 }
0x1203   :  { %10535 = vmatpush1.bf16.msra.mxu0 %v13819_v38  ;;  %10567 = vmatpush1.bf16.msra.mxu1 %v13821_v37 }
0x1204   :  { %10537 = vmatprep.subr.bf16.mxu0 %v13829_v62  ;;  %10569 = vmatprep.subr.bf16.mxu1 %v13831_v42 }
0x1207   :  { %10539 = vmatpush1.bf16.msra.mxu0 %v13835_v6  ;;  %10571 = vmatpush1.bf16.msra.mxu1 %v13837_v59 }
0x1208   :  { %10541 = vmatprep.subr.bf16.mxu0 %v13845_v11  ;;  %10573 = vmatprep.subr.bf16.mxu1 %v13847_v9 }
0x120b   :  { %10543 = vmatpush1.bf16.msra.mxu0 %v13851_v60  ;;  %10575 = vmatpush1.bf16.msra.mxu1 %v13853_v5 }
0x120c   :  { %10545 = vmatprep.subr.bf16.mxu0 %v13861_v50  ;;  %10577 = vmatprep.subr.bf16.mxu1 %v13863_v4 }
0x120f   :  { %10547 = vmatpush1.bf16.msra.mxu0 %v13867_v35  ;;  %10579 = vmatpush1.bf16.msra.mxu1 %v13869_v48 }
0x1210   :  { %10549 = vmatprep.subr.bf16.mxu0 %v13877_v52  ;;  %10581 = vmatprep.subr.bf16.mxu1 %v13879_v43 }
0x1213   :  { %10551 = vmatpush1.bf16.msra.mxu0 %v13883_v47  ;;  %10583 = vmatpush1.bf16.msra.mxu1 %v13885_v46 }
0x1214   :  { %10553 = vmatprep.subr.bf16.mxu0 %v13893_v36  ;;  %10585 = vmatprep.subr.bf16.mxu1 %v13895_v10 }
0x1217   :  { %10555 = vmatpush1.bf16.msra.mxu0 %v13899_v57  ;;  %10587 = vmatpush1.bf16.msra.mxu1 %v13901_v17 }
0x1218   :  { %10589 = vmatprep.subr.bf16.mxu0 %v13785_v23  ;;  %10621 = vmatprep.subr.bf16.mxu1 %v13787_v34 }
0x12cd   :  { %v4905_v18 = vpop.f32.mrb[34].mxu0  ;;  %v4976_v27 = vpop.f32.mrb[36].mxu1 }
0x12ce   :  { %v9191_v49 = vmul.f32 -1.442695, %v4905_v18  ;;  %v4907_v39 = vpop.f32.mrb[35].mxu0  ;;  %v4978_v24 = vpop.f32.mrb[37].mxu1  ;;  %v9193_v51 = vmul.f32 -1.442695, %v4976_v27 }
0x12cf   :  { %v9192_v15 = vmul.f32 -1.442695, %v4907_v39 }
0x12d0   :  { %12076 = vpow2.f32 %v9191_v49 }
0x12d1   :  { %12078 = vpow2.f32 %v9192_v15 }
0x12d2   :  { %12080 = vtanh.f32 %v4978_v24 }
0x12d3   :  { %12082 = vpow2.f32 %v9193_v51 }
0x12da   :  { %v12077_v55 = vpop.eup %12076 }
0x12db   :  { %v4994_v22 = vadd.f32 1.0, %v12077_v55  ;;  %v12079_v26 = vpop.eup %12078 }
0x12dc   :  { %v4995_v2 = vadd.f32 1.0, %v12079_v26  ;;  %v12081_v61 = vpop.eup %12080 }
0x12dd   :  { %12084 = vrcp.f32 %v4994_v22  ;;  %v12083_v44 = vpop.eup %12082 }
0x12de   :  { %12086 = vrcp.f32 %v4995_v2  ;;  %v4996_v12 = vadd.f32 1.0, %v12083_v44 }
0x12e0   :  { %12088 = vrcp.f32 %v4996_v12  ;;  %v5733_v12 = vld [vmem:[#allocation12 + $0x10] sm:$0xff] }
0x12e7   :  { %v12085_v54 = vpop.eup %12084 }
0x12e8   :  { %v5005_v1 = vmul.f32 %v12085_v54, %v12081_v61  ;;  %v12087_v20 = vpop.eup %12086 }
0x12e9   :  { %v5004_v25 = vmul.f32 0.0, %v12087_v20 }
0x12ea   :  { %v12089_v13 = vpop.eup %12088 }
0x12eb   :  { %v13951_v53 = vadd.f32 %v5005_v1, %v5004_v25  ;;  %v5737_v25 = vld [vmem:[#allocation12 + $0x30] sm:$0xff] }
0x12ed   :  { %12090 = vtanh.f32 %v13951_v53 }
0x12f7   :  { %v12091_v21 = vpop.eup %12090 }
0x12f8   :  { %v13954_v28 = vmul.f32 %v12091_v21, %v12089_v13  ;;  %v5740_v13 = vld [vmem:[#allocation12 + $0x48] sm:$0xff] }
0x12f9   :  { %v5744_v21 = vld [vmem:[#allocation12 + $0x68] sm:$0xff] }
0x12fa   :  { %5143 = vmatmul.mubr.f32.vlgmr.msra.gmra.mrb[36].mxu0 %v13954_v28  ;;  %5214 = vmatmul.mubr.f32.vlgmr.msra.gmra.mrb[38].mxu1 %v13954_v28 }
0x12fb   :  { %10591 = vmatpush1.bf16.msra.mxu0 %v13789_v30  ;;  %10623 = vmatpush1.bf16.msra.mxu1 %v13791_v45 }
0x12fc   :  { %10593 = vmatprep.subr.bf16.mxu0 %v13797_v8  ;;  %10625 = vmatprep.subr.bf16.mxu1 %v13799_v19 }
0x12fd   :  { %5381 = vmatprep.mubr.f32.mxu0 %v12553_v0  ;;  %5452 = vmatprep.mubr.f32.mxu1 %v12553_v0 }
0x12ff   :  { %10595 = vmatpush1.bf16.msra.mxu0 %v13803_v63  ;;  %10627 = vmatpush1.bf16.msra.mxu1 %v13805_v56 }
0x1300   :  { %10597 = vmatprep.subr.bf16.mxu0 %v13813_v41  ;;  %10629 = vmatprep.subr.bf16.mxu1 %v13815_v16 }
0x1303   :  { %10599 = vmatpush1.bf16.msra.mxu0 %v13819_v38  ;;  %10631 = vmatpush1.bf16.msra.mxu1 %v13821_v37 }
0x1304   :  { %10601 = vmatprep.subr.bf16.mxu0 %v13829_v62  ;;  %10633 = vmatprep.subr.bf16.mxu1 %v13831_v42 }
0x1307   :  { %10603 = vmatpush1.bf16.msra.mxu0 %v13835_v6  ;;  %10635 = vmatpush1.bf16.msra.mxu1 %v13837_v59 }
0x1308   :  { %10605 = vmatprep.subr.bf16.mxu0 %v13845_v11  ;;  %10637 = vmatprep.subr.bf16.mxu1 %v13847_v9 }
0x130b   :  { %10607 = vmatpush1.bf16.msra.mxu0 %v13851_v60  ;;  %10639 = vmatpush1.bf16.msra.mxu1 %v13853_v5 }
0x130c   :  { %10609 = vmatprep.subr.bf16.mxu0 %v13861_v50  ;;  %10641 = vmatprep.subr.bf16.mxu1 %v13863_v4 }
0x130f   :  { %10611 = vmatpush1.bf16.msra.mxu0 %v13867_v35  ;;  %10643 = vmatpush1.bf16.msra.mxu1 %v13869_v48 }
0x1310   :  { %10613 = vmatprep.subr.bf16.mxu0 %v13877_v52  ;;  %10645 = vmatprep.subr.bf16.mxu1 %v13879_v43 }
0x1313   :  { %10615 = vmatpush1.bf16.msra.mxu0 %v13883_v47  ;;  %10647 = vmatpush1.bf16.msra.mxu1 %v13885_v46 }
0x1314   :  { %10617 = vmatprep.subr.bf16.mxu0 %v13893_v36  ;;  %10649 = vmatprep.subr.bf16.mxu1 %v13895_v10 }
0x1317   :  { %10619 = vmatpush1.bf16.msra.mxu0 %v13899_v57  ;;  %10651 = vmatpush1.bf16.msra.mxu1 %v13901_v17 }
0x1318   :  { %10653 = vmatprep.subr.bf16.mxu0 %v13785_v23  ;;  %10685 = vmatprep.subr.bf16.mxu1 %v13787_v34 }
0x13cd   :  { %v5144_v14 = vpop.f32.mrb[36].mxu0  ;;  %v5215_v58 = vpop.f32.mrb[38].mxu1 }
0x13ce   :  { %v9194_v33 = vmul.f32 -1.442695, %v5144_v14  ;;  %v5146_v31 = vpop.f32.mrb[37].mxu0  ;;  %v5217_v40 = vpop.f32.mrb[39].mxu1  ;;  %v9196_v27 = vmul.f32 -1.442695, %v5215_v58  ;;  %v14054_v58 = vpack.c.bf16 %v5744_v21, %v5740_v13 }
0x13cf   :  { %v9195_v18 = vmul.f32 -1.442695, %v5146_v31  ;;  %v5742_v14 = vld [vmem:[#allocation12 + $0x58] sm:$0xff]  ;;  %v5739_v31 = vld [vmem:[#allocation12 + $0x40] sm:$0xff] }
0x13d0   :  { %12092 = vpow2.f32 %v9194_v33  ;;  %v5746_v33 = vld [vmem:[#allocation12 + $0x78] sm:$0xff] }
0x13d1   :  { %12094 = vpow2.f32 %v9195_v18  ;;  %v14056_v18 = vpack.c.bf16 %v5746_v33, %v5742_v14  ;;  %v5778_v21 = vld [vmem:[#allocation12 + $0x178] sm:$0xff]  ;;  %v5771_v14 = vld [vmem:[#allocation12 + $0x140] sm:$0xff] }
0x13d2   :  { %12096 = vtanh.f32 %v5217_v40  ;;  %v5743_v40 = vld [vmem:[#allocation12 + $0x60] sm:$0xff] }
0x13d3   :  { %12098 = vpow2.f32 %v9196_v27  ;;  %v14058_v27 = vpack.c.bf16 %v5743_v40, %v5739_v31  ;;  %v5775_v33 = vld [vmem:[#allocation12 + $0x160] sm:$0xff] }
0x13d4   :  { %v14106_v40 = vpack.c.bf16 %v5775_v33, %v5771_v14 }
0x13da   :  { %v12093_v49 = vpop.eup %12092 }
0x13db   :  { %v5233_v39 = vadd.f32 1.0, %v12093_v49  ;;  %v12095_v24 = vpop.eup %12094  ;;  %v5741_v49 = vld [vmem:[#allocation12 + $0x50] sm:$0xff] }
0x13dc   :  { %v5234_v15 = vadd.f32 1.0, %v12095_v24  ;;  %v12097_v23 = vpop.eup %12096 }
0x13dd   :  { %12100 = vrcp.f32 %v5233_v39  ;;  %v12099_v51 = vpop.eup %12098  ;;  %v5745_v39 = vld [vmem:[#allocation12 + $0x70] sm:$0xff] }
0x13de   :  { %12102 = vrcp.f32 %v5234_v15  ;;  %v5235_v26 = vadd.f32 1.0, %v12099_v51  ;;  %v14061_v24 = vpack.c.bf16 %v5745_v39, %v5741_v49  ;;  %v5748_v15 = vld [vmem:[#allocation12 + $0x88] sm:$0xff]  ;;  %v5750_v51 = vld [vmem:[#allocation12 + $0x98] sm:$0xff]  ;;  %v5773_v49 = vld [vmem:[#allocation12 + $0x150] sm:$0xff] }
0x13df   :  { %v5777_v39 = vld [vmem:[#allocation12 + $0x170] sm:$0xff] }
0x13e0   :  { %12104 = vrcp.f32 %v5235_v26  ;;  %v5751_v26 = vld [vmem:[#allocation12 + $0xa0] sm:$0xff] }
0x13e7   :  { %v12101_v34 = vpop.eup %12100 }
0x13e8   :  { %v5244_v55 = vmul.f32 %v12101_v34, %v12097_v23  ;;  %v12103_v22 = vpop.eup %12102  ;;  %v5752_v23 = vld [vmem:[#allocation12 + $0xa8] sm:$0xff] }
0x13e9   :  { %v5243_v2 = vmul.f32 %v12103_v22, %v13951_v53  ;;  %v14049_v53 = vpack.c.bf16 %v5737_v25, %v5733_v12  ;;  %v14066_v34 = vpack.c.bf16 %v5752_v23, %v5748_v15  ;;  %v5747_v22 = vld [vmem:[#allocation12 + $0x80] sm:$0xff]  ;;  %v5776_v12 = vld [vmem:[#allocation12 + $0x168] sm:$0xff]  ;;  %v5774_v25 = vld [vmem:[#allocation12 + $0x158] sm:$0xff]  ;;  %v14109_v23 = vpack.c.bf16 %v5777_v39, %v5773_v49 }
0x13ea   :  { %v12105_v44 = vpop.eup %12104  ;;  %v14104_v31 = vpack.c.bf16 %v5778_v21, %v5774_v25  ;;  %v5780_v15 = vld [vmem:[#allocation12 + $0x188] sm:$0xff] }
0x13eb   :  { %v13993_v61 = vadd.f32 %v5244_v55, %v5243_v2  ;;  %v5754_v55 = vld [vmem:[#allocation12 + $0xb8] sm:$0xff] }
0x13ec   :  { %v14068_v2 = vpack.c.bf16 %v5754_v55, %v5750_v51  ;;  %v5784_v51 = vld [vmem:[#allocation12 + $0x1a8] sm:$0xff]  ;;  %v5782_v55 = vld [vmem:[#allocation12 + $0x198] sm:$0xff] }
0x13ed   :  { %12106 = vtanh.f32 %v13993_v61 }
0x13f7   :  { %v12107_v54 = vpop.eup %12106 }
0x13f8   :  { %v13996_v1 = vmul.f32 %v12107_v54, %v12105_v44  ;;  %v5749_v44 = vld [vmem:[#allocation12 + $0x90] sm:$0xff] }
0x13f9   :  { %v5753_v54 = vld [vmem:[#allocation12 + $0xb0] sm:$0xff] }
0x13fa   :  { %5382 = vmatmul.mubr.f32.vlgmr.msra.gmra.mrb[38].mxu0 %v13996_v1  ;;  %5453 = vmatmul.mubr.f32.vlgmr.msra.gmra.mrb[40].mxu1 %v13996_v1 }
0x13fb   :  { %10655 = vmatpush1.bf16.msra.mxu0 %v13789_v30  ;;  %10687 = vmatpush1.bf16.msra.mxu1 %v13791_v45 }
0x13fc   :  { %10657 = vmatprep.subr.bf16.mxu0 %v13797_v8  ;;  %10689 = vmatprep.subr.bf16.mxu1 %v13799_v19 }
0x13fd   :  { %5620 = vmatprep.mubr.f32.mxu0 %v12553_v0  ;;  %5691 = vmatprep.mubr.f32.mxu1 %v12553_v0 }
0x13ff   :  { %10659 = vmatpush1.bf16.msra.mxu0 %v13803_v63  ;;  %10691 = vmatpush1.bf16.msra.mxu1 %v13805_v56 }
0x1400   :  { %10661 = vmatprep.subr.bf16.mxu0 %v13813_v41  ;;  %10693 = vmatprep.subr.bf16.mxu1 %v13815_v16 }
0x1403   :  { %10663 = vmatpush1.bf16.msra.mxu0 %v13819_v38  ;;  %10695 = vmatpush1.bf16.msra.mxu1 %v13821_v37 }
0x1404   :  { %10665 = vmatprep.subr.bf16.mxu0 %v13829_v62  ;;  %10697 = vmatprep.subr.bf16.mxu1 %v13831_v42 }
0x1407   :  { %10667 = vmatpush1.bf16.msra.mxu0 %v13835_v6  ;;  %10699 = vmatpush1.bf16.msra.mxu1 %v13837_v59 }
0x1408   :  { %10669 = vmatprep.subr.bf16.mxu0 %v13845_v11  ;;  %10701 = vmatprep.subr.bf16.mxu1 %v13847_v9 }
0x140b   :  { %10671 = vmatpush1.bf16.msra.mxu0 %v13851_v60  ;;  %10703 = vmatpush1.bf16.msra.mxu1 %v13853_v5 }
0x140c   :  { %10673 = vmatprep.subr.bf16.mxu0 %v13861_v50  ;;  %10705 = vmatprep.subr.bf16.mxu1 %v13863_v4 }
0x140f   :  { %10675 = vmatpush1.bf16.msra.mxu0 %v13867_v35  ;;  %10707 = vmatpush1.bf16.msra.mxu1 %v13869_v48 }
0x1410   :  { %10677 = vmatprep.subr.bf16.mxu0 %v13877_v52  ;;  %10709 = vmatprep.subr.bf16.mxu1 %v13879_v43  ;;  %v5732_v52 = vld [vmem:[#allocation12 + $0x8] sm:$0xff] }
0x1411   :  { %v5736_v43 = vld [vmem:[#allocation12 + $0x28] sm:$0xff] }
0x1413   :  { %10679 = vmatpush1.bf16.msra.mxu0 %v13883_v47  ;;  %10711 = vmatpush1.bf16.msra.mxu1 %v13885_v46  ;;  %v5734_v47 = vld [vmem:[#allocation12 + $0x18] sm:$0xff]  ;;  %v14042_v46 = vpack.c.bf16 %v5736_v43, %v5732_v52 }
0x1414   :  { %10681 = vmatprep.subr.bf16.mxu0 %v13893_v36  ;;  %10713 = vmatprep.subr.bf16.mxu1 %v13895_v10  ;;  %v5738_v36 = vld [vmem:[#allocation12 + $0x38] sm:$0xff]  ;;  %v5731_v10 = vld [vmem:[#allocation12] sm:$0xff] }
0x1417   :  { %10683 = vmatpush1.bf16.msra.mxu0 %v13899_v57  ;;  %10715 = vmatpush1.bf16.msra.mxu1 %v13901_v17  ;;  %v5735_v57 = vld [vmem:[#allocation12 + $0x20] sm:$0xff]  ;;  %v14044_v17 = vpack.c.bf16 %v5738_v36, %v5734_v47  ;;  %v5765_v47 = vld [vmem:[#allocation12 + $0x110] sm:$0xff] }
0x1418   :  { %v14046_v20 = vpack.c.bf16 %v5735_v57, %v5731_v10  ;;  %10717 = vmatprep.subr.bf16.mxu0 %v14042_v46  ;;  %v5769_v36 = vld [vmem:[#allocation12 + $0x130] sm:$0xff]  ;;  %v5772_v57 = vld [vmem:[#allocation12 + $0x148] sm:$0xff] }
0x1419   :  { %10749 = vmatprep.subr.bf16.mxu1 %v14044_v17  ;;  %v14097_v10 = vpack.c.bf16 %v5769_v36, %v5765_v47  ;;  %v14102_v13 = vpack.c.bf16 %v5776_v12, %v5772_v57  ;;  %v5793_v47 = vld [vmem:[#allocation12 + $0x1f0] sm:$0xff] }
0x14cd   :  { %v5383_v30 = vpop.f32.mrb[38].mxu0  ;;  %v5454_v45 = vpop.f32.mrb[40].mxu1 }
0x14ce   :  { %v9197_v8 = vmul.f32 -1.442695, %v5383_v30  ;;  %v5385_v19 = vpop.f32.mrb[39].mxu0  ;;  %v5456_v63 = vpop.f32.mrb[41].mxu1  ;;  %v9199_v41 = vmul.f32 -1.442695, %v5454_v45  ;;  %v14073_v30 = vpack.c.bf16 %v5753_v54, %v5749_v44 }
0x14cf   :  { %v9198_v56 = vmul.f32 -1.442695, %v5385_v19  ;;  %v5756_v45 = vld [vmem:[#allocation12 + $0xc8] sm:$0xff]  ;;  %v5758_v19 = vld [vmem:[#allocation12 + $0xd8] sm:$0xff]  ;;  %v5779_v54 = vld [vmem:[#allocation12 + $0x180] sm:$0xff] }
0x14d0   :  { %12108 = vpow2.f32 %v9197_v8  ;;  %v5760_v8 = vld [vmem:[#allocation12 + $0xe8] sm:$0xff] }
0x14d1   :  { %12110 = vpow2.f32 %v9198_v56  ;;  %v5762_v56 = vld [vmem:[#allocation12 + $0xf8] sm:$0xff] }
0x14d2   :  { %12112 = vtanh.f32 %v5456_v63  ;;  %v14078_v63 = vpack.c.bf16 %v5760_v8, %v5756_v45  ;;  %v5783_v45 = vld [vmem:[#allocation12 + $0x1a0] sm:$0xff]  ;;  %v5781_v8 = vld [vmem:[#allocation12 + $0x190] sm:$0xff] }
0x14d3   :  { %12114 = vpow2.f32 %v9199_v41  ;;  %v5755_v41 = vld [vmem:[#allocation12 + $0xc0] sm:$0xff] }
0x14da   :  { %v12109_v16 = vpop.eup %12108 }
0x14db   :  { %v5472_v38 = vadd.f32 1.0, %v12109_v16  ;;  %v12111_v37 = vpop.eup %12110  ;;  %v5759_v16 = vld [vmem:[#allocation12 + $0xe0] sm:$0xff] }
0x14dc   :  { %v5473_v62 = vadd.f32 1.0, %v12111_v37  ;;  %v12113_v42 = vpop.eup %12112  ;;  %v14082_v37 = vpack.c.bf16 %v5759_v16, %v5755_v41  ;;  %v5788_v41 = vld [vmem:[#allocation12 + $0x1c8] sm:$0xff] }
0x14dd   :  { %12116 = vrcp.f32 %v5472_v38  ;;  %v12115_v6 = vpop.eup %12114  ;;  %v14080_v38 = vpack.c.bf16 %v5762_v56, %v5758_v19  ;;  %v14118_v19 = vpack.c.bf16 %v5783_v45, %v5779_v54  ;;  %v5785_v56 = vld [vmem:[#allocation12 + $0x1b0] sm:$0xff]  ;;  %v5792_v16 = vld [vmem:[#allocation12 + $0x1e8] sm:$0xff] }
0x14de   :  { %12118 = vrcp.f32 %v5473_v62  ;;  %v5474_v60 = vadd.f32 1.0, %v12115_v6  ;;  %v5757_v62 = vld [vmem:[#allocation12 + $0xd0] sm:$0xff] }
0x14e0   :  { %12120 = vrcp.f32 %v5474_v60 }
0x14e7   :  { %v12117_v59 = vpop.eup %12116 }
0x14e8   :  { %v5483_v11 = vmul.f32 %v12117_v59, %v12113_v42  ;;  %v12119_v9 = vpop.eup %12118  ;;  %v5761_v42 = vld [vmem:[#allocation12 + $0xf0] sm:$0xff]  ;;  %v5764_v59 = vld [vmem:[#allocation12 + $0x108] sm:$0xff] }
0x14e9   :  { %v5482_v5 = vmul.f32 %v12119_v9, %v13993_v61  ;;  %v14070_v61 = vpack.c.bf16 %v5751_v26, %v5747_v22  ;;  %v14085_v6 = vpack.c.bf16 %v5761_v42, %v5757_v62  ;;  %v5766_v9 = vld [vmem:[#allocation12 + $0x118] sm:$0xff]  ;;  %v14113_v26 = vpack.c.bf16 %v5784_v51, %v5780_v15 }
0x14ea   :  { %v12121_v4 = vpop.eup %12120  ;;  %v5786_v22 = vld [vmem:[#allocation12 + $0x1b8] sm:$0xff]  ;;  %v14122_v62 = vpack.c.bf16 %v5785_v56, %v5781_v8  ;;  %v14124_v42 = vpack.c.bf16 %v5792_v16, %v5788_v41 }
0x14eb   :  { %v14033_v50 = vadd.f32 %v5483_v11, %v5482_v5  ;;  %v5768_v11 = vld [vmem:[#allocation12 + $0x128] sm:$0xff]  ;;  %v5770_v5 = vld [vmem:[#allocation12 + $0x138] sm:$0xff]  ;;  %v14115_v44 = vpack.c.bf16 %v5786_v22, %v5782_v55 }
0x14ec   :  { %v14090_v60 = vpack.c.bf16 %v5768_v11, %v5764_v59  ;;  %v14092_v52 = vpack.c.bf16 %v5770_v5, %v5766_v9  ;;  %v5790_v59 = vld [vmem:[#allocation12 + $0x1d8] sm:$0xff]  ;;  %v5787_v9 = vld [vmem:[#allocation12 + $0x1c0] sm:$0xff] }
0x14ed   :  { %12122 = vtanh.f32 %v14033_v50  ;;  %v5794_v11 = vld [vmem:[#allocation12 + $0x1f8] sm:$0xff] }
0x14ee   :  { %v14126_v5 = vpack.c.bf16 %v5794_v11, %v5790_v59 }
0x14f7   :  { %v12123_v35 = vpop.eup %12122 }
0x14f8   :  { %v14036_v48 = vmul.f32 %v12123_v35, %v12121_v4  ;;  %v5763_v4 = vld [vmem:[#allocation12 + $0x100] sm:$0xff] }
0x14f9   :  { %v5767_v35 = vld [vmem:[#allocation12 + $0x120] sm:$0xff] }
0x14fa   :  { %5621 = vmatmul.mubr.f32.vlgmr.msra.gmra.mrb[40].mxu0 %v14036_v48  ;;  %5692 = vmatmul.mubr.f32.vlgmr.msra.gmra.mrb[42].mxu1 %v14036_v48  ;;  %v14094_v43 = vpack.c.bf16 %v5767_v35, %v5763_v4  ;;  %v5791_v4 = vld [vmem:[#allocation12 + $0x1e0] sm:$0xff]  ;;  %v5789_v35 = vld [vmem:[#allocation12 + $0x1d0] sm:$0xff] }
0x14fb   :  { %5859 = vmatprep.mubr.f32.mxu0 %v12553_v0  ;;  %5930 = vmatprep.mubr.f32.mxu1 %v12553_v0  ;;  %v14129_v36 = vpack.c.bf16 %v5791_v4, %v5787_v9  ;;  %v14133_v57 = vpack.c.bf16 %v5793_v47, %v5789_v35 }
0x14fc   :  { %10719 = vmatpush1.bf16.msra.mxu0 %v14046_v20  ;;  %10751 = vmatpush1.bf16.msra.mxu1 %v14049_v53 }
0x14fd   :  { %10721 = vmatprep.subr.bf16.mxu0 %v14054_v58  ;;  %10753 = vmatprep.subr.bf16.mxu1 %v14056_v18 }
0x1500   :  { %10723 = vmatpush1.bf16.msra.mxu0 %v14058_v27  ;;  %10755 = vmatpush1.bf16.msra.mxu1 %v14061_v24 }
0x1501   :  { %10725 = vmatprep.subr.bf16.mxu0 %v14066_v34  ;;  %10757 = vmatprep.subr.bf16.mxu1 %v14068_v2 }
0x1504   :  { %10727 = vmatpush1.bf16.msra.mxu0 %v14070_v61  ;;  %10759 = vmatpush1.bf16.msra.mxu1 %v14073_v30 }
0x1505   :  { %10729 = vmatprep.subr.bf16.mxu0 %v14078_v63  ;;  %10761 = vmatprep.subr.bf16.mxu1 %v14080_v38 }
0x1508   :  { %10731 = vmatpush1.bf16.msra.mxu0 %v14082_v37  ;;  %10763 = vmatpush1.bf16.msra.mxu1 %v14085_v6 }
0x1509   :  { %10733 = vmatprep.subr.bf16.mxu0 %v14090_v60  ;;  %10765 = vmatprep.subr.bf16.mxu1 %v14092_v52 }
0x150c   :  { %10735 = vmatpush1.bf16.msra.mxu0 %v14094_v43  ;;  %10767 = vmatpush1.bf16.msra.mxu1 %v14097_v10 }
0x150d   :  { %10737 = vmatprep.subr.bf16.mxu0 %v14102_v13  ;;  %10769 = vmatprep.subr.bf16.mxu1 %v14104_v31 }
0x1510   :  { %10739 = vmatpush1.bf16.msra.mxu0 %v14106_v40  ;;  %10771 = vmatpush1.bf16.msra.mxu1 %v14109_v23 }
0x1511   :  { %10741 = vmatprep.subr.bf16.mxu0 %v14113_v26  ;;  %10773 = vmatprep.subr.bf16.mxu1 %v14115_v44 }
0x1514   :  { %10743 = vmatpush1.bf16.msra.mxu0 %v14118_v19  ;;  %10775 = vmatpush1.bf16.msra.mxu1 %v14122_v62 }
0x1515   :  { %10745 = vmatprep.subr.bf16.mxu0 %v14124_v42  ;;  %10777 = vmatprep.subr.bf16.mxu1 %v14126_v5 }
0x1518   :  { %10747 = vmatpush1.bf16.msra.mxu0 %v14129_v36  ;;  %10779 = vmatpush1.bf16.msra.mxu1 %v14133_v57 }
0x1519   :  { %10781 = vmatprep.subr.bf16.mxu0 %v14042_v46  ;;  %10813 = vmatprep.subr.bf16.mxu1 %v14044_v17 }
0x15cd   :  { %v5622_v12 = vpop.f32.mrb[40].mxu0  ;;  %v5693_v25 = vpop.f32.mrb[42].mxu1 }
0x15ce   :  { %v9200_v21 = vmul.f32 -1.442695, %v5622_v12  ;;  %v5624_v14 = vpop.f32.mrb[41].mxu0  ;;  %v5695_v33 = vpop.f32.mrb[43].mxu1  ;;  %v9202_v39 = vmul.f32 -1.442695, %v5693_v25 }
0x15cf   :  { %v9201_v49 = vmul.f32 -1.442695, %v5624_v14 }
0x15d0   :  { %12124 = vpow2.f32 %v9200_v21 }
0x15d1   :  { %12126 = vpow2.f32 %v9201_v49 }
0x15d2   :  { %12128 = vtanh.f32 %v5695_v33 }
0x15d3   :  { %12130 = vpow2.f32 %v9202_v39 }
0x15da   :  { %v12125_v15 = vpop.eup %12124 }
0x15db   :  { %v5711_v51 = vadd.f32 1.0, %v12125_v15  ;;  %v12127_v55 = vpop.eup %12126 }
0x15dc   :  { %v5712_v22 = vadd.f32 1.0, %v12127_v55  ;;  %v12129_v54 = vpop.eup %12128 }
0x15dd   :  { %12132 = vrcp.f32 %v5711_v51  ;;  %v12131_v45 = vpop.eup %12130 }
0x15de   :  { %12134 = vrcp.f32 %v5712_v22  ;;  %v5713_v16 = vadd.f32 1.0, %v12131_v45 }
0x15e0   :  { %12136 = vrcp.f32 %v5713_v16 }
0x15e7   :  { %v12133_v8 = vpop.eup %12132 }
0x15e8   :  { %v5722_v56 = vmul.f32 %v12133_v8, %v12129_v54  ;;  %v12135_v41 = vpop.eup %12134 }
0x15e9   :  { %v5721_v59 = vmul.f32 %v12135_v41, %v14033_v50 }
0x15ea   :  { %v12137_v9 = vpop.eup %12136 }
0x15eb   :  { %v14141_v11 = vadd.f32 %v5722_v56, %v5721_v59 }
0x15ed   :  { %12138 = vtanh.f32 %v14141_v11 }
0x15f7   :  { %v12139_v4 = vpop.eup %12138 }
0x15f8   :  { %v14144_v35 = vmul.f32 %v12139_v4, %v12137_v9 }
0x15fa   :  { %5860 = vmatmul.mubr.f32.vlgmr.msra.gmra.mrb[42].mxu0 %v14144_v35  ;;  %5931 = vmatmul.mubr.f32.vlgmr.msra.gmra.mrb[44].mxu1 %v14144_v35 }
0x15fb   :  { %10783 = vmatpush1.bf16.msra.mxu0 %v14046_v20  ;;  %10815 = vmatpush1.bf16.msra.mxu1 %v14049_v53 }
0x15fc   :  { %10785 = vmatprep.subr.bf16.mxu0 %v14054_v58  ;;  %10817 = vmatprep.subr.bf16.mxu1 %v14056_v18 }
0x15fd   :  { %6098 = vmatprep.mubr.f32.mxu0 %v12553_v0  ;;  %6169 = vmatprep.mubr.f32.mxu1 %v12553_v0 }
0x15ff   :  { %10787 = vmatpush1.bf16.msra.mxu0 %v14058_v27  ;;  %10819 = vmatpush1.bf16.msra.mxu1 %v14061_v24 }
0x1600   :  { %10789 = vmatprep.subr.bf16.mxu0 %v14066_v34  ;;  %10821 = vmatprep.subr.bf16.mxu1 %v14068_v2 }
0x1603   :  { %10791 = vmatpush1.bf16.msra.mxu0 %v14070_v61  ;;  %10823 = vmatpush1.bf16.msra.mxu1 %v14073_v30 }
0x1604   :  { %10793 = vmatprep.subr.bf16.mxu0 %v14078_v63  ;;  %10825 = vmatprep.subr.bf16.mxu1 %v14080_v38 }
0x1607   :  { %10795 = vmatpush1.bf16.msra.mxu0 %v14082_v37  ;;  %10827 = vmatpush1.bf16.msra.mxu1 %v14085_v6 }
0x1608   :  { %10797 = vmatprep.subr.bf16.mxu0 %v14090_v60  ;;  %10829 = vmatprep.subr.bf16.mxu1 %v14092_v52 }
0x160b   :  { %10799 = vmatpush1.bf16.msra.mxu0 %v14094_v43  ;;  %10831 = vmatpush1.bf16.msra.mxu1 %v14097_v10 }
0x160c   :  { %10801 = vmatprep.subr.bf16.mxu0 %v14102_v13  ;;  %10833 = vmatprep.subr.bf16.mxu1 %v14104_v31 }
0x160f   :  { %10803 = vmatpush1.bf16.msra.mxu0 %v14106_v40  ;;  %10835 = vmatpush1.bf16.msra.mxu1 %v14109_v23 }
0x1610   :  { %10805 = vmatprep.subr.bf16.mxu0 %v14113_v26  ;;  %10837 = vmatprep.subr.bf16.mxu1 %v14115_v44 }
0x1613   :  { %10807 = vmatpush1.bf16.msra.mxu0 %v14118_v19  ;;  %10839 = vmatpush1.bf16.msra.mxu1 %v14122_v62 }
0x1614   :  { %10809 = vmatprep.subr.bf16.mxu0 %v14124_v42  ;;  %10841 = vmatprep.subr.bf16.mxu1 %v14126_v5 }
0x1617   :  { %10811 = vmatpush1.bf16.msra.mxu0 %v14129_v36  ;;  %10843 = vmatpush1.bf16.msra.mxu1 %v14133_v57 }
0x1618   :  { %10845 = vmatprep.subr.bf16.mxu0 %v14042_v46  ;;  %10877 = vmatprep.subr.bf16.mxu1 %v14044_v17 }
0x16cd   :  { %v5861_v50 = vpop.f32.mrb[42].mxu0  ;;  %v5932_v47 = vpop.f32.mrb[44].mxu1 }
0x16ce   :  { %v9203_v12 = vmul.f32 -1.442695, %v5861_v50  ;;  %v5863_v25 = vpop.f32.mrb[43].mxu0  ;;  %v5934_v21 = vpop.f32.mrb[45].mxu1  ;;  %v9205_v33 = vmul.f32 -1.442695, %v5932_v47 }
0x16cf   :  { %v9204_v14 = vmul.f32 -1.442695, %v5863_v25 }
0x16d0   :  { %12140 = vpow2.f32 %v9203_v12 }
0x16d1   :  { %12142 = vpow2.f32 %v9204_v14 }
0x16d2   :  { %12144 = vtanh.f32 %v5934_v21 }
0x16d3   :  { %12146 = vpow2.f32 %v9205_v33 }
0x16da   :  { %v12141_v49 = vpop.eup %12140 }
0x16db   :  { %v5950_v39 = vadd.f32 1.0, %v12141_v49  ;;  %v12143_v15 = vpop.eup %12142 }
0x16dc   :  { %v5951_v51 = vadd.f32 1.0, %v12143_v15  ;;  %v12145_v55 = vpop.eup %12144 }
0x16dd   :  { %12148 = vrcp.f32 %v5950_v39  ;;  %v12147_v22 = vpop.eup %12146 }
0x16de   :  { %12150 = vrcp.f32 %v5951_v51  ;;  %v5952_v56 = vadd.f32 1.0, %v12147_v22 }
0x16e0   :  { %12152 = vrcp.f32 %v5952_v56 }
0x16e7   :  { %v12149_v54 = vpop.eup %12148 }
0x16e8   :  { %v5961_v45 = vmul.f32 %v12149_v54, %v12145_v55  ;;  %v12151_v8 = vpop.eup %12150 }
0x16e9   :  { %v5960_v41 = vmul.f32 %v12151_v8, %v14141_v11 }
0x16ea   :  { %v12153_v59 = vpop.eup %12152 }
0x16eb   :  { %v14183_v16 = vadd.f32 %v5961_v45, %v5960_v41 }
0x16ed   :  { %12154 = vtanh.f32 %v14183_v16 }
0x16f7   :  { %v12155_v9 = vpop.eup %12154 }
0x16f8   :  { %v14186_v4 = vmul.f32 %v12155_v9, %v12153_v59  ;;  %v6702_v9 = vld [vmem:[#allocation14 + $0x58] sm:$0xff] }
0x16fa   :  { %6099 = vmatmul.mubr.f32.vlgmr.msra.gmra.mrb[44].mxu0 %v14186_v4  ;;  %6170 = vmatmul.mubr.f32.vlgmr.msra.gmra.mrb[46].mxu1 %v14186_v4 }
0x16fb   :  { %10847 = vmatpush1.bf16.msra.mxu0 %v14046_v20  ;;  %10879 = vmatpush1.bf16.msra.mxu1 %v14049_v53 }
0x16fc   :  { %10849 = vmatprep.subr.bf16.mxu0 %v14054_v58  ;;  %10881 = vmatprep.subr.bf16.mxu1 %v14056_v18 }
0x16fd   :  { %6337 = vmatprep.mubr.f32.mxu0 %v12553_v0  ;;  %6408 = vmatprep.mubr.f32.mxu1 %v12553_v0 }
0x16ff   :  { %10851 = vmatpush1.bf16.msra.mxu0 %v14058_v27  ;;  %10883 = vmatpush1.bf16.msra.mxu1 %v14061_v24 }
0x1700   :  { %10853 = vmatprep.subr.bf16.mxu0 %v14066_v34  ;;  %10885 = vmatprep.subr.bf16.mxu1 %v14068_v2 }
0x1703   :  { %10855 = vmatpush1.bf16.msra.mxu0 %v14070_v61  ;;  %10887 = vmatpush1.bf16.msra.mxu1 %v14073_v30 }
0x1704   :  { %10857 = vmatprep.subr.bf16.mxu0 %v14078_v63  ;;  %10889 = vmatprep.subr.bf16.mxu1 %v14080_v38 }
0x1707   :  { %10859 = vmatpush1.bf16.msra.mxu0 %v14082_v37  ;;  %10891 = vmatpush1.bf16.msra.mxu1 %v14085_v6 }
0x1708   :  { %10861 = vmatprep.subr.bf16.mxu0 %v14090_v60  ;;  %10893 = vmatprep.subr.bf16.mxu1 %v14092_v52 }
0x170b   :  { %10863 = vmatpush1.bf16.msra.mxu0 %v14094_v43  ;;  %10895 = vmatpush1.bf16.msra.mxu1 %v14097_v10 }
0x170c   :  { %10865 = vmatprep.subr.bf16.mxu0 %v14102_v13  ;;  %10897 = vmatprep.subr.bf16.mxu1 %v14104_v31 }
0x170f   :  { %10867 = vmatpush1.bf16.msra.mxu0 %v14106_v40  ;;  %10899 = vmatpush1.bf16.msra.mxu1 %v14109_v23 }
0x1710   :  { %10869 = vmatprep.subr.bf16.mxu0 %v14113_v26  ;;  %10901 = vmatprep.subr.bf16.mxu1 %v14115_v44 }
0x1713   :  { %10871 = vmatpush1.bf16.msra.mxu0 %v14118_v19  ;;  %10903 = vmatpush1.bf16.msra.mxu1 %v14122_v62 }
0x1714   :  { %10873 = vmatprep.subr.bf16.mxu0 %v14124_v42  ;;  %10905 = vmatprep.subr.bf16.mxu1 %v14126_v5 }
0x1717   :  { %10875 = vmatpush1.bf16.msra.mxu0 %v14129_v36  ;;  %10907 = vmatpush1.bf16.msra.mxu1 %v14133_v57 }
0x1718   :  { %10909 = vmatprep.subr.bf16.mxu0 %v14042_v46  ;;  %10941 = vmatprep.subr.bf16.mxu1 %v14044_v17 }
0x17cd   :  { %v6100_v11 = vpop.f32.mrb[44].mxu0  ;;  %v6171_v50 = vpop.f32.mrb[46].mxu1 }
0x17ce   :  { %v9206_v47 = vmul.f32 -1.442695, %v6100_v11  ;;  %v6102_v12 = vpop.f32.mrb[45].mxu0  ;;  %v6173_v25 = vpop.f32.mrb[47].mxu1  ;;  %v9208_v14 = vmul.f32 -1.442695, %v6171_v50 }
0x17cf   :  { %v9207_v21 = vmul.f32 -1.442695, %v6102_v12  ;;  %v6706_v11 = vld [vmem:[#allocation14 + $0x78] sm:$0xff] }
0x17d0   :  { %12156 = vpow2.f32 %v9206_v47 }
0x17d1   :  { %12158 = vpow2.f32 %v9207_v21  ;;  %v6699_v21 = vld [vmem:[#allocation14 + $0x40] sm:$0xff] }
0x17d2   :  { %12160 = vtanh.f32 %v6173_v25 }
0x17d3   :  { %12162 = vpow2.f32 %v9208_v14  ;;  %v6703_v14 = vld [vmem:[#allocation14 + $0x60] sm:$0xff] }
0x17da   :  { %v12157_v33 = vpop.eup %12156 }
0x17db   :  { %v6189_v49 = vadd.f32 1.0, %v12157_v33  ;;  %v12159_v39 = vpop.eup %12158 }
0x17dc   :  { %v6190_v15 = vadd.f32 1.0, %v12159_v39  ;;  %v12161_v46 = vpop.eup %12160  ;;  %v11008_v39 = vpack.c.bf16 %v6706_v11, %v6702_v9  ;;  %v6738_v9 = vld [vmem:[#allocation14 + $0x178] sm:$0xff] }
0x17dd   :  { %12164 = vrcp.f32 %v6189_v49  ;;  %v12163_v51 = vpop.eup %12162 }
0x17de   :  { %12166 = vrcp.f32 %v6190_v15  ;;  %v6191_v54 = vadd.f32 1.0, %v12163_v51  ;;  %v6701_v15 = vld [vmem:[#allocation14 + $0x50] sm:$0xff]  ;;  %v6708_v51 = vld [vmem:[#allocation14 + $0x88] sm:$0xff] }
0x17e0   :  { %12168 = vrcp.f32 %v6191_v54  ;;  %v10978_v54 = vpack.c.bf16 %v6703_v14, %v6699_v21  ;;  %v6733_v14 = vld [vmem:[#allocation14 + $0x150] sm:$0xff] }
0x17e7   :  { %v12165_v17 = vpop.eup %12164 }
0x17e8   :  { %v6200_v55 = vmul.f32 %v12165_v17, %v12161_v46  ;;  %v12167_v22 = vpop.eup %12166  ;;  %v6705_v46 = vld [vmem:[#allocation14 + $0x70] sm:$0xff]  ;;  %v6712_v17 = vld [vmem:[#allocation14 + $0xa8] sm:$0xff] }
0x17e9   :  { %v6199_v45 = vmul.f32 %v12167_v22, %v14183_v16  ;;  %v6704_v16 = vld [vmem:[#allocation14 + $0x68] sm:$0xff]  ;;  %v6714_v22 = vld [vmem:[#allocation14 + $0xb8] sm:$0xff] }
0x17ea   :  { %v12169_v56 = vpop.eup %12168 }
0x17eb   :  { %v14225_v8 = vadd.f32 %v6200_v55, %v6199_v45  ;;  %v6710_v55 = vld [vmem:[#allocation14 + $0x98] sm:$0xff]  ;;  %v11010_v45 = vpack.c.bf16 %v6705_v46, %v6701_v15  ;;  %v6744_v15 = vld [vmem:[#allocation14 + $0x1a8] sm:$0xff] }
0x17ec   :  { %v6742_v46 = vld [vmem:[#allocation14 + $0x198] sm:$0xff] }
0x17ed   :  { %12170 = vtanh.f32 %v14225_v8 }
0x17f7   :  { %v12171_v41 = vpop.eup %12170 }
0x17f8   :  { %v14228_v59 = vmul.f32 %v12171_v41, %v12169_v56  ;;  %v6711_v56 = vld [vmem:[#allocation14 + $0xa0] sm:$0xff]  ;;  %v10980_v41 = vpack.c.bf16 %v6712_v17, %v6708_v51  ;;  %v6746_v51 = vld [vmem:[#allocation14 + $0x1b8] sm:$0xff] }
0x17fa   :  { %6338 = vmatmul.mubr.f32.vlgmr.msra.gmra.mrb[46].mxu0 %v14228_v59  ;;  %6409 = vmatmul.mubr.f32.vlgmr.msra.gmra.mrb[48].mxu1 %v14228_v59 }
0x17fb   :  { %10911 = vmatpush1.bf16.msra.mxu0 %v14046_v20  ;;  %10943 = vmatpush1.bf16.msra.mxu1 %v14049_v53  ;;  %v6692_v20 = vld [vmem:[#allocation14 + $0x8] sm:$0xff] }
0x17fc   :  { %10913 = vmatprep.subr.bf16.mxu0 %v14054_v58  ;;  %10945 = vmatprep.subr.bf16.mxu1 %v14056_v18  ;;  %v6696_v53 = vld [vmem:[#allocation14 + $0x28] sm:$0xff]  ;;  %v6694_v58 = vld [vmem:[#allocation14 + $0x18] sm:$0xff] }
0x17fd   :  { %6576 = vmatprep.mubr.f32.mxu0 %v12553_v0  ;;  %6647 = vmatprep.mubr.f32.mxu1 %v12553_v0  ;;  %v10972_v18 = vpack.c.bf16 %v6696_v53, %v6692_v20  ;;  %v11012_v20 = vpack.c.bf16 %v6714_v22, %v6710_v55  ;;  %v6709_v53 = vld [vmem:[#allocation14 + $0x90] sm:$0xff]  ;;  %v6739_v22 = vld [vmem:[#allocation14 + $0x180] sm:$0xff] }
0x17ff   :  { %10915 = vmatpush1.bf16.msra.mxu0 %v14058_v27  ;;  %10947 = vmatpush1.bf16.msra.mxu1 %v14061_v24  ;;  %v6698_v27 = vld [vmem:[#allocation14 + $0x38] sm:$0xff] }
0x1800   :  { %10917 = vmatprep.subr.bf16.mxu0 %v14066_v34  ;;  %10949 = vmatprep.subr.bf16.mxu1 %v14068_v2  ;;  %v11004_v24 = vpack.c.bf16 %v6698_v27, %v6694_v58  ;;  %v6713_v58 = vld [vmem:[#allocation14 + $0xb0] sm:$0xff]  ;;  %v6720_v27 = vld [vmem:[#allocation14 + $0xe8] sm:$0xff] }
0x1803   :  { %10919 = vmatpush1.bf16.msra.mxu0 %v14070_v61  ;;  %10951 = vmatpush1.bf16.msra.mxu1 %v14073_v30 }
0x1804   :  { %10921 = vmatprep.subr.bf16.mxu0 %v14078_v63  ;;  %10953 = vmatprep.subr.bf16.mxu1 %v14080_v38 }
0x1807   :  { %10923 = vmatpush1.bf16.msra.mxu0 %v14082_v37  ;;  %10955 = vmatpush1.bf16.msra.mxu1 %v14085_v6 }
0x1808   :  { %10925 = vmatprep.subr.bf16.mxu0 %v14090_v60  ;;  %10957 = vmatprep.subr.bf16.mxu1 %v14092_v52 }
0x180b   :  { %10927 = vmatpush1.bf16.msra.mxu0 %v14094_v43  ;;  %10959 = vmatpush1.bf16.msra.mxu1 %v14097_v10 }
0x180c   :  { %10929 = vmatprep.subr.bf16.mxu0 %v14102_v13  ;;  %10961 = vmatprep.subr.bf16.mxu1 %v14104_v31 }
0x180f   :  { %10931 = vmatpush1.bf16.msra.mxu0 %v14106_v40  ;;  %10963 = vmatpush1.bf16.msra.mxu1 %v14109_v23 }
0x1810   :  { %10933 = vmatprep.subr.bf16.mxu0 %v14113_v26  ;;  %10965 = vmatprep.subr.bf16.mxu1 %v14115_v44 }
0x1813   :  { %10935 = vmatpush1.bf16.msra.mxu0 %v14118_v19  ;;  %10967 = vmatpush1.bf16.msra.mxu1 %v14122_v62  ;;  %v6691_v62 = vld [vmem:[#allocation14] sm:$0xff] }
0x1814   :  { %10937 = vmatprep.subr.bf16.mxu0 %v14124_v42  ;;  %10969 = vmatprep.subr.bf16.mxu1 %v14126_v5  ;;  %v6695_v42 = vld [vmem:[#allocation14 + $0x20] sm:$0xff]  ;;  %v6693_v5 = vld [vmem:[#allocation14 + $0x10] sm:$0xff] }
0x1815   :  { %v10974_v12 = vpack.c.bf16 %v6695_v42, %v6691_v62  ;;  %v6725_v42 = vld [vmem:[#allocation14 + $0x110] sm:$0xff] }
0x1817   :  { %10939 = vmatpush1.bf16.msra.mxu0 %v14129_v36  ;;  %10971 = vmatpush1.bf16.msra.mxu1 %v14133_v57  ;;  %v6697_v36 = vld [vmem:[#allocation14 + $0x30] sm:$0xff]  ;;  %v6700_v57 = vld [vmem:[#allocation14 + $0x48] sm:$0xff] }
0x1818   :  { %10973 = vmatprep.subr.bf16.mxu0 %v10972_v18  ;;  %11005 = vmatprep.subr.bf16.mxu1 %v11004_v24  ;;  %v11006_v25 = vpack.c.bf16 %v6697_v36, %v6693_v5  ;;  %v10976_v49 = vpack.c.bf16 %v6704_v16, %v6700_v57  ;;  %v6716_v18 = vld [vmem:[#allocation14 + $0xc8] sm:$0xff]  ;;  %v6718_v24 = vld [vmem:[#allocation14 + $0xd8] sm:$0xff]  ;;  %v6729_v5 = vld [vmem:[#allocation14 + $0x130] sm:$0xff] }
0x1819   :  { %v6732_v36 = vld [vmem:[#allocation14 + $0x148] sm:$0xff]  ;;  %v6734_v16 = vld [vmem:[#allocation14 + $0x158] sm:$0xff] }
0x181a   :  { %v6736_v57 = vld [vmem:[#allocation14 + $0x168] sm:$0xff]  ;;  %v11024_v21 = vpack.c.bf16 %v6738_v9, %v6734_v16  ;;  %v7053_v16 = vld [vmem:[#allocation15 + $0x70] sm:$0xff] }
0x18cd   :  { %v6339_v34 = vpop.f32.mrb[46].mxu0  ;;  %v6410_v2 = vpop.f32.mrb[48].mxu1 }
0x18ce   :  { %v9209_v61 = vmul.f32 -1.442695, %v6339_v34  ;;  %v6341_v30 = vpop.f32.mrb[47].mxu0  ;;  %v6412_v63 = vpop.f32.mrb[49].mxu1  ;;  %v9211_v37 = vmul.f32 -1.442695, %v6410_v2 }
0x18cf   :  { %v9210_v38 = vmul.f32 -1.442695, %v6341_v30  ;;  %v6722_v34 = vld [vmem:[#allocation14 + $0xf8] sm:$0xff]  ;;  %v6715_v30 = vld [vmem:[#allocation14 + $0xc0] sm:$0xff] }
0x18d0   :  { %12172 = vpow2.f32 %v9209_v61  ;;  %v11014_v61 = vpack.c.bf16 %v6713_v58, %v6709_v53  ;;  %v6752_v53 = vld [vmem:[#allocation14 + $0x1e8] sm:$0xff]  ;;  %v6750_v58 = vld [vmem:[#allocation14 + $0x1d8] sm:$0xff] }
0x18d1   :  { %12174 = vpow2.f32 %v9210_v38  ;;  %v10984_v38 = vpack.c.bf16 %v6720_v27, %v6716_v18  ;;  %v6754_v18 = vld [vmem:[#allocation14 + $0x1f8] sm:$0xff] }
0x18d2   :  { %12176 = vtanh.f32 %v6412_v63  ;;  %v6719_v63 = vld [vmem:[#allocation14 + $0xe0] sm:$0xff] }
0x18d3   :  { %12178 = vpow2.f32 %v9211_v37  ;;  %v11016_v37 = vpack.c.bf16 %v6722_v34, %v6718_v24  ;;  %v6747_v34 = vld [vmem:[#allocation14 + $0x1c0] sm:$0xff] }
0x18da   :  { %v12173_v6 = vpop.eup %12172 }
0x18db   :  { %v6428_v60 = vadd.f32 1.0, %v12173_v6  ;;  %v12175_v52 = vpop.eup %12174  ;;  %v6717_v6 = vld [vmem:[#allocation14 + $0xd0] sm:$0xff] }
0x18dc   :  { %v6429_v43 = vadd.f32 1.0, %v12175_v52  ;;  %v12177_v10 = vpop.eup %12176  ;;  %v6724_v52 = vld [vmem:[#allocation14 + $0x108] sm:$0xff] }
0x18dd   :  { %12180 = vrcp.f32 %v6428_v60  ;;  %v12179_v13 = vpop.eup %12178  ;;  %v6721_v60 = vld [vmem:[#allocation14 + $0xf0] sm:$0xff] }
0x18de   :  { %12182 = vrcp.f32 %v6429_v43  ;;  %v6430_v26 = vadd.f32 1.0, %v12179_v13  ;;  %v6728_v43 = vld [vmem:[#allocation14 + $0x128] sm:$0xff]  ;;  %v6730_v13 = vld [vmem:[#allocation14 + $0x138] sm:$0xff] }
0x18e0   :  { %12184 = vrcp.f32 %v6430_v26  ;;  %v6727_v26 = vld [vmem:[#allocation14 + $0x120] sm:$0xff] }
0x18e7   :  { %v12181_v31 = vpop.eup %12180 }
0x18e8   :  { %v6439_v40 = vmul.f32 %v12181_v31, %v12177_v10  ;;  %v12183_v23 = vpop.eup %12182  ;;  %v6726_v10 = vld [vmem:[#allocation14 + $0x118] sm:$0xff]  ;;  %v10986_v31 = vpack.c.bf16 %v6719_v63, %v6715_v30  ;;  %v6751_v30 = vld [vmem:[#allocation14 + $0x1e0] sm:$0xff]  ;;  %v6749_v63 = vld [vmem:[#allocation14 + $0x1d0] sm:$0xff] }
0x18e9   :  { %v6438_v44 = vmul.f32 %v12183_v23, %v14225_v8  ;;  %v6707_v8 = vld [vmem:[#allocation14 + $0x80] sm:$0xff]  ;;  %v11020_v62 = vpack.c.bf16 %v6730_v13, %v6726_v10  ;;  %v7041_v10 = vld [vmem:[#allocation15 + $0x10] sm:$0xff] }
0x18ea   :  { %v12185_v50 = vpop.eup %12184  ;;  %v10982_v2 = vpack.c.bf16 %v6711_v56, %v6707_v8  ;;  %v6723_v23 = vld [vmem:[#allocation14 + $0x100] sm:$0xff]  ;;  %v11028_v8 = vpack.c.bf16 %v6746_v51, %v6742_v46  ;;  %v6741_v56 = vld [vmem:[#allocation14 + $0x190] sm:$0xff] }
0x18eb   :  { %v14265_v19 = vadd.f32 %v6439_v40, %v6438_v44  ;;  %v11018_v40 = vpack.c.bf16 %v6721_v60, %v6717_v6  ;;  %v10988_v44 = vpack.c.bf16 %v6728_v43, %v6724_v52  ;;  %v10990_v11 = vpack.c.bf16 %v6727_v26, %v6723_v23  ;;  %v7039_v60 = vld [vmem:[#allocation15] sm:$0xff]  ;;  %v7045_v13 = vld [vmem:[#allocation15 + $0x30] sm:$0xff]  ;;  %v7050_v23 = vld [vmem:[#allocation15 + $0x58] sm:$0xff] }
0x18ec   :  { %v7061_v46 = vld [vmem:[#allocation15 + $0xb0] sm:$0xff] }
0x18ed   :  { %12186 = vtanh.f32 %v14265_v19 }
0x18f7   :  { %v12187_v47 = vpop.eup %12186 }
0x18f8   :  { %v14268_v33 = vmul.f32 %v12187_v47, %v12185_v50  ;;  %v11022_v50 = vpack.c.bf16 %v6729_v5, %v6725_v42  ;;  %v6731_v47 = vld [vmem:[#allocation14 + $0x140] sm:$0xff] }
0x18f9   :  { %v7051_v42 = vld [vmem:[#allocation15 + $0x60] sm:$0xff] }
0x18fa   :  { %6577 = vmatmul.mubr.f32.vlgmr.msra.gmra.mrb[48].mxu0 %v14268_v33  ;;  %6648 = vmatmul.mubr.f32.vlgmr.msra.gmra.mrb[50].mxu1 %v14268_v33 }
0x18fb   :  { %10975 = vmatpush1.bf16.msra.mxu0 %v10974_v12  ;;  %11007 = vmatpush1.bf16.msra.mxu1 %v11006_v25  ;;  %v6735_v12 = vld [vmem:[#allocation14 + $0x160] sm:$0xff]  ;;  %v10992_v25 = vpack.c.bf16 %v6736_v57, %v6732_v36  ;;  %v7049_v57 = vld [vmem:[#allocation15 + $0x50] sm:$0xff] }
0x18fc   :  { %10977 = vmatprep.subr.bf16.mxu0 %v10976_v49  ;;  %11009 = vmatprep.subr.bf16.mxu1 %v11008_v39  ;;  %v6737_v49 = vld [vmem:[#allocation14 + $0x170] sm:$0xff]  ;;  %v6740_v39 = vld [vmem:[#allocation14 + $0x188] sm:$0xff]  ;;  %v10994_v17 = vpack.c.bf16 %v6735_v12, %v6731_v47  ;;  %v14321_v9 = vpack.c.bf16 %v7053_v16, %v7049_v57  ;;  %v7058_v47 = vld [vmem:[#allocation15 + $0x98] sm:$0xff] }
0x18fd   :  { %6841 = vmatprep.mubr.f32.mxu0 %v12553_v0  ;;  %6954 = vmatprep.mubr.f32.mxu1 %v12553_v0  ;;  %v11026_v55 = vpack.c.bf16 %v6737_v49, %v6733_v14  ;;  %v7059_v14 = vld [vmem:[#allocation15 + $0xa0] sm:$0xff]  ;;  %v7092_v57 = vld [vmem:[#allocation15 + $0x1a8] sm:$0xff] }
0x18ff   :  { %10979 = vmatpush1.bf16.msra.mxu0 %v10978_v54  ;;  %11011 = vmatpush1.bf16.msra.mxu1 %v11010_v45  ;;  %v6743_v54 = vld [vmem:[#allocation14 + $0x1a0] sm:$0xff]  ;;  %v10996_v45 = vpack.c.bf16 %v6744_v15, %v6740_v39  ;;  %v7057_v15 = vld [vmem:[#allocation15 + $0x90] sm:$0xff] }
0x1900   :  { %10981 = vmatprep.subr.bf16.mxu0 %v10980_v41  ;;  %11013 = vmatprep.subr.bf16.mxu1 %v11012_v20  ;;  %v6745_v41 = vld [vmem:[#allocation14 + $0x1b0] sm:$0xff]  ;;  %v6748_v20 = vld [vmem:[#allocation14 + $0x1c8] sm:$0xff]  ;;  %v10998_v27 = vpack.c.bf16 %v6743_v54, %v6739_v22  ;;  %v14333_v51 = vpack.c.bf16 %v7061_v46, %v7057_v15  ;;  %v7066_v22 = vld [vmem:[#allocation15 + $0xd8] sm:$0xff] }
0x1901   :  { %v11030_v24 = vpack.c.bf16 %v6745_v41, %v6741_v56  ;;  %v7067_v56 = vld [vmem:[#allocation15 + $0xe0] sm:$0xff]  ;;  %v7089_v15 = vld [vmem:[#allocation15 + $0x190] sm:$0xff] }
0x1902   :  { %v7093_v46 = vld [vmem:[#allocation15 + $0x1b0] sm:$0xff] }
0x1903   :  { %10983 = vmatpush1.bf16.msra.mxu0 %v10982_v2  ;;  %11015 = vmatpush1.bf16.msra.mxu1 %v11014_v61  ;;  %v11000_v2 = vpack.c.bf16 %v6752_v53, %v6748_v20  ;;  %v11032_v61 = vpack.c.bf16 %v6754_v18, %v6750_v58  ;;  %v7065_v53 = vld [vmem:[#allocation15 + $0xd0] sm:$0xff] }
0x1904   :  { %10985 = vmatprep.subr.bf16.mxu0 %v10984_v38  ;;  %11017 = vmatprep.subr.bf16.mxu1 %v11016_v37  ;;  %v6753_v38 = vld [vmem:[#allocation14 + $0x1f0] sm:$0xff]  ;;  %v11002_v37 = vpack.c.bf16 %v6751_v30, %v6747_v34  ;;  %v7074_v34 = vld [vmem:[#allocation15 + $0x118] sm:$0xff]  ;;  %v7071_v30 = vld [vmem:[#allocation15 + $0x100] sm:$0xff] }
0x1905   :  { %v11034_v6 = vpack.c.bf16 %v6753_v38, %v6749_v63  ;;  %v7069_v58 = vld [vmem:[#allocation15 + $0xf0] sm:$0xff]  ;;  %v7075_v63 = vld [vmem:[#allocation15 + $0x120] sm:$0xff] }
0x1906   :  { %v14345_v18 = vpack.c.bf16 %v7069_v58, %v7065_v53  ;;  %v7102_v53 = vld [vmem:[#allocation15 + $0x1f8] sm:$0xff]  ;;  %v7095_v58 = vld [vmem:[#allocation15 + $0x1c0] sm:$0xff] }
0x1907   :  { %10987 = vmatpush1.bf16.msra.mxu0 %v10986_v31  ;;  %11019 = vmatpush1.bf16.msra.mxu1 %v11018_v40  ;;  %v7048_v31 = vld [vmem:[#allocation15 + $0x48] sm:$0xff] }
0x1908   :  { %10989 = vmatprep.subr.bf16.mxu0 %v10988_v44  ;;  %11021 = vmatprep.subr.bf16.mxu1 %v11020_v62  ;;  %v7052_v40 = vld [vmem:[#allocation15 + $0x68] sm:$0xff]  ;;  %v7054_v44 = vld [vmem:[#allocation15 + $0x78] sm:$0xff]  ;;  %v7047_v62 = vld [vmem:[#allocation15 + $0x40] sm:$0xff] }
0x1909   :  { %v14314_v26 = vpack.c.bf16 %v7052_v40, %v7048_v31  ;;  %v14316_v5 = vpack.c.bf16 %v7054_v44, %v7050_v23  ;;  %v14318_v36 = vpack.c.bf16 %v7051_v42, %v7047_v62  ;;  %v7079_v31 = vld [vmem:[#allocation15 + $0x140] sm:$0xff]  ;;  %v7081_v23 = vld [vmem:[#allocation15 + $0x150] sm:$0xff]  ;;  %v7088_v42 = vld [vmem:[#allocation15 + $0x188] sm:$0xff] }
0x190a   :  { %v7083_v40 = vld [vmem:[#allocation15 + $0x160] sm:$0xff]  ;;  %v7085_v62 = vld [vmem:[#allocation15 + $0x170] sm:$0xff] }
0x190b   :  { %10991 = vmatpush1.bf16.msra.mxu0 %v10990_v11  ;;  %11023 = vmatpush1.bf16.msra.mxu1 %v11022_v50  ;;  %v7056_v11 = vld [vmem:[#allocation15 + $0x88] sm:$0xff]  ;;  %v14366_v44 = vpack.c.bf16 %v7083_v40, %v7079_v31  ;;  %v14370_v16 = vpack.c.bf16 %v7085_v62, %v7081_v23 }
0x190c   :  { %10993 = vmatprep.subr.bf16.mxu0 %v10992_v25  ;;  %11025 = vmatprep.subr.bf16.mxu1 %v11024_v21  ;;  %v7060_v50 = vld [vmem:[#allocation15 + $0xa8] sm:$0xff]  ;;  %v7062_v25 = vld [vmem:[#allocation15 + $0xb8] sm:$0xff]  ;;  %v7055_v21 = vld [vmem:[#allocation15 + $0x80] sm:$0xff] }
0x190d   :  { %v14326_v12 = vpack.c.bf16 %v7060_v50, %v7056_v11  ;;  %v14328_v49 = vpack.c.bf16 %v7062_v25, %v7058_v47  ;;  %v14330_v39 = vpack.c.bf16 %v7059_v14, %v7055_v21  ;;  %v14372_v11 = vpack.c.bf16 %v7092_v57, %v7088_v42  ;;  %v7090_v50 = vld [vmem:[#allocation15 + $0x198] sm:$0xff]  ;;  %v7087_v25 = vld [vmem:[#allocation15 + $0x180] sm:$0xff] }
0x190e   :  { %v7094_v47 = vld [vmem:[#allocation15 + $0x1b8] sm:$0xff]  ;;  %v7091_v14 = vld [vmem:[#allocation15 + $0x1a0] sm:$0xff] }
0x190f   :  { %10995 = vmatpush1.bf16.msra.mxu0 %v10994_v17  ;;  %11027 = vmatpush1.bf16.msra.mxu1 %v11026_v55  ;;  %v7064_v17 = vld [vmem:[#allocation15 + $0xc8] sm:$0xff]  ;;  %v14374_v21 = vpack.c.bf16 %v7094_v47, %v7090_v50 }
0x1910   :  { %10997 = vmatprep.subr.bf16.mxu0 %v10996_v45  ;;  %11029 = vmatprep.subr.bf16.mxu1 %v11028_v8  ;;  %v7068_v55 = vld [vmem:[#allocation15 + $0xe8] sm:$0xff]  ;;  %v7070_v45 = vld [vmem:[#allocation15 + $0xf8] sm:$0xff]  ;;  %v7063_v8 = vld [vmem:[#allocation15 + $0xc0] sm:$0xff] }
0x1911   :  { %v14338_v54 = vpack.c.bf16 %v7068_v55, %v7064_v17  ;;  %v14340_v41 = vpack.c.bf16 %v7070_v45, %v7066_v22  ;;  %v14342_v20 = vpack.c.bf16 %v7067_v56, %v7063_v8  ;;  %v14377_v17 = vpack.c.bf16 %v7091_v14, %v7087_v25  ;;  %v7096_v22 = vld [vmem:[#allocation15 + $0x1c8] sm:$0xff]  ;;  %v7098_v8 = vld [vmem:[#allocation15 + $0x1d8] sm:$0xff] }
0x1912   :  { %v14381_v55 = vpack.c.bf16 %v7093_v46, %v7089_v15  ;;  %v7100_v45 = vld [vmem:[#allocation15 + $0x1e8] sm:$0xff] }
0x1913   :  { %10999 = vmatpush1.bf16.msra.mxu0 %v10998_v27  ;;  %11031 = vmatpush1.bf16.msra.mxu1 %v11030_v24  ;;  %v7072_v27 = vld [vmem:[#allocation15 + $0x108] sm:$0xff]  ;;  %v14386_v56 = vpack.c.bf16 %v7100_v45, %v7096_v22 }
0x1914   :  { %11001 = vmatprep.subr.bf16.mxu0 %v11000_v2  ;;  %11033 = vmatprep.subr.bf16.mxu1 %v11032_v61  ;;  %v7076_v24 = vld [vmem:[#allocation15 + $0x128] sm:$0xff]  ;;  %v7078_v61 = vld [vmem:[#allocation15 + $0x138] sm:$0xff] }
0x1915   :  { %v14350_v2 = vpack.c.bf16 %v7076_v24, %v7072_v27  ;;  %v14352_v38 = vpack.c.bf16 %v7078_v61, %v7074_v34  ;;  %v7099_v27 = vld [vmem:[#allocation15 + $0x1e0] sm:$0xff]  ;;  %v14388_v24 = vpack.c.bf16 %v7102_v53, %v7098_v8  ;;  %v7097_v61 = vld [vmem:[#allocation15 + $0x1d0] sm:$0xff] }
0x1916   :  { %v14390_v34 = vpack.c.bf16 %v7099_v27, %v7095_v58 }
0x1917   :  { %11003 = vmatpush1.bf16.msra.mxu0 %v11002_v37  ;;  %11035 = vmatpush1.bf16.msra.mxu1 %v11034_v6  ;;  %v14354_v37 = vpack.c.bf16 %v7075_v63, %v7071_v30  ;;  %v7073_v6 = vld [vmem:[#allocation15 + $0x110] sm:$0xff] }
0x1918   :  { %v7101_v30 = vld [vmem:[#allocation15 + $0x1f0] sm:$0xff] }
0x1919   :  { %v14393_v63 = vpack.c.bf16 %v7101_v30, %v7097_v61 }
0x191a   :  { %6842 = vmatmul.mubr.f32.vlgmr.msra.gmra.mrb[50].mxu0 %v13954_v28  ;;  %6955 = vmatmul.mubr.f32.vlgmr.msra.gmra.mrb[52].mxu1 %v13954_v28  ;;  %v7040_v28 = vld [vmem:[#allocation15 + $0x8] sm:$0xff] }
0x191b   :  { %6847 = vmatprep.mubr.f32.mxu0 %v12553_v0  ;;  %6960 = vmatprep.mubr.f32.mxu1 %v12553_v0 }
0x191e   :  { %6848 = vmatmul.mubr.f32.gmra.mrb[52].mxu0 %v13996_v1  ;;  %6961 = vmatmul.mubr.f32.gmra.mrb[54].mxu1 %v13996_v1  ;;  %v7044_v1 = vld [vmem:[#allocation15 + $0x28] sm:$0xff] }
0x191f   :  { %6853 = vmatprep.mubr.f32.mxu0 %v12553_v0  ;;  %6966 = vmatprep.mubr.f32.mxu1 %v12553_v0 }
0x1922   :  { %6854 = vmatmul.mubr.f32.gmra.mrb[54].mxu0 %v14036_v48  ;;  %6967 = vmatmul.mubr.f32.gmra.mrb[56].mxu1 %v14036_v48  ;;  %v7042_v48 = vld [vmem:[#allocation15 + $0x18] sm:$0xff] }
0x1923   :  { %6859 = vmatprep.mubr.f32.mxu0 %v12553_v0  ;;  %6972 = vmatprep.mubr.f32.mxu1 %v12553_v0 }
0x1926   :  { %6860 = vmatmul.mubr.f32.gmra.mrb[56].mxu0 %v14144_v35  ;;  %6973 = vmatmul.mubr.f32.gmra.mrb[58].mxu1 %v14144_v35  ;;  %v14302_v35 = vpack.c.bf16 %v7044_v1, %v7040_v28  ;;  %v7077_v28 = vld [vmem:[#allocation15 + $0x130] sm:$0xff]  ;;  %v7080_v1 = vld [vmem:[#allocation15 + $0x148] sm:$0xff] }
0x1927   :  { %6865 = vmatprep.mubr.f32.mxu0 %v12553_v0  ;;  %6978 = vmatprep.mubr.f32.mxu1 %v12553_v0 }
0x1928   :  { %11037 = vmatprep.subr.bf16.mxu0 %v14302_v35 }
0x192a   :  { %6866 = vmatmul.mubr.f32.gmra.mrb[58].mxu0 %v14186_v4  ;;  %6979 = vmatmul.mubr.f32.gmra.mrb[60].mxu1 %v14186_v4  ;;  %v7046_v4 = vld [vmem:[#allocation15 + $0x38] sm:$0xff] }
0x192b   :  { %6871 = vmatprep.mubr.f32.mxu0 %v12553_v0  ;;  %6984 = vmatprep.mubr.f32.mxu1 %v12553_v0  ;;  %v14304_v52 = vpack.c.bf16 %v7046_v4, %v7042_v48  ;;  %v14357_v48 = vpack.c.bf16 %v7077_v28, %v7073_v6  ;;  %v7084_v4 = vld [vmem:[#allocation15 + $0x168] sm:$0xff] }
0x192d   :  { %11069 = vmatprep.subr.bf16.mxu1 %v14304_v52 }
0x192e   :  { %6872 = vmatmul.mubr.f32.gmra.mrb[60].mxu0 %v14228_v59  ;;  %6985 = vmatmul.mubr.f32.gmra.mrb[62].mxu1 %v14228_v59  ;;  %v7043_v59 = vld [vmem:[#allocation15 + $0x20] sm:$0xff] }
0x192f   :  { %6877 = vmatprep.mubr.f32.mxu0 %v12553_v0  ;;  %6990 = vmatprep.mubr.f32.mxu1 %v12553_v0  ;;  %v14306_v43 = vpack.c.bf16 %v7043_v59, %v7039_v60  ;;  %v7082_v60 = vld [vmem:[#allocation15 + $0x158] sm:$0xff] }
0x1930   :  { %v7086_v59 = vld [vmem:[#allocation15 + $0x178] sm:$0xff] }
0x1931   :  { %11039 = vmatpush1.bf16.msra.mxu0 %v14306_v43 }
0x1932   :  { %6878 = vmatmul.mubr.f32.gmra.mrb[62].mxu0 %v14268_v33  ;;  %6991 = vmatmul.mubr.f32.gmra.mrb[64].mxu1 %v14268_v33  ;;  %v14309_v33 = vpack.c.bf16 %v7045_v13, %v7041_v10  ;;  %v14361_v10 = vpack.c.bf16 %v7084_v4, %v7080_v1  ;;  %v14363_v13 = vpack.c.bf16 %v7086_v59, %v7082_v60 }
0x1933   :  { %6883 = vmatprep.mubr.f32.mxu0 %v12553_v0  ;;  %6996 = vmatprep.mubr.f32.mxu1 %v12553_v0 }
0x1934   :  { %11071 = vmatpush1.bf16.msra.mxu1 %v14309_v33  ;;  %11041 = vmatprep.subr.bf16.mxu0 %v14314_v26 }
0x1935   :  { %11073 = vmatprep.subr.bf16.mxu1 %v14316_v5  ;;  %11043 = vmatpush1.bf16.msra.mxu0 %v14318_v36 }
0x1936   :  { %11045 = vmatprep.subr.bf16.mxu0 %v14326_v12 }
0x1938   :  { %11075 = vmatpush1.bf16.msra.mxu1 %v14321_v9 }
0x1939   :  { %11077 = vmatprep.subr.bf16.mxu1 %v14328_v49  ;;  %11047 = vmatpush1.bf16.msra.mxu0 %v14330_v39 }
0x193a   :  { %11049 = vmatprep.subr.bf16.mxu0 %v14338_v54 }
0x193c   :  { %11079 = vmatpush1.bf16.msra.mxu1 %v14333_v51 }
0x193d   :  { %11081 = vmatprep.subr.bf16.mxu1 %v14340_v41  ;;  %11051 = vmatpush1.bf16.msra.mxu0 %v14342_v20 }
0x193e   :  { %11053 = vmatprep.subr.bf16.mxu0 %v14350_v2 }
0x1940   :  { %11083 = vmatpush1.bf16.msra.mxu1 %v14345_v18 }
0x1941   :  { %11085 = vmatprep.subr.bf16.mxu1 %v14352_v38  ;;  %11055 = vmatpush1.bf16.msra.mxu0 %v14354_v37 }
0x1942   :  { %11057 = vmatprep.subr.bf16.mxu0 %v14361_v10 }
0x1944   :  { %11087 = vmatpush1.bf16.msra.mxu1 %v14357_v48 }
0x1945   :  { %11089 = vmatprep.subr.bf16.mxu1 %v14363_v13  ;;  %11059 = vmatpush1.bf16.msra.mxu0 %v14366_v44 }
0x1946   :  { %11061 = vmatprep.subr.bf16.mxu0 %v14372_v11 }
0x1948   :  { %11091 = vmatpush1.bf16.msra.mxu1 %v14370_v16 }
0x1949   :  { %11093 = vmatprep.subr.bf16.mxu1 %v14374_v21  ;;  %11063 = vmatpush1.bf16.msra.mxu0 %v14377_v17 }
0x194a   :  { %11065 = vmatprep.subr.bf16.mxu0 %v14386_v56 }
0x194c   :  { %11095 = vmatpush1.bf16.msra.mxu1 %v14381_v55 }
0x194d   :  { %11097 = vmatprep.subr.bf16.mxu1 %v14388_v24  ;;  %11067 = vmatpush1.bf16.msra.mxu0 %v14390_v34 }
0x194e   :  { %11101 = vmatprep.subr.bf16.mxu0 %v14302_v35 }
0x1950   :  { %11099 = vmatpush1.bf16.msra.mxu1 %v14393_v63 }
0x1951   :  { %11133 = vmatprep.subr.bf16.mxu1 %v14304_v52 }
0x19cd   :  { %v6578_v6 = vpop.f32.mrb[48].mxu0  ;;  %v6649_v28 = vpop.f32.mrb[50].mxu1 }
0x19ce   :  { %v9212_v1 = vmul.f32 -1.442695, %v6578_v6  ;;  %v6580_v4 = vpop.f32.mrb[49].mxu0  ;;  %v6651_v60 = vpop.f32.mrb[51].mxu1  ;;  %v9214_v31 = vmul.f32 -1.442695, %v6649_v28 }
0x19cf   :  { %v9213_v59 = vmul.f32 -1.442695, %v6580_v4 }
0x19d0   :  { %12188 = vpow2.f32 %v9212_v1 }
0x19d1   :  { %12190 = vpow2.f32 %v9213_v59 }
0x19d2   :  { %12192 = vtanh.f32 %v6651_v60 }
0x19d3   :  { %12194 = vpow2.f32 %v9214_v31 }
0x19da   :  { %v12189_v40 = vpop.eup %12188 }
0x19db   :  { %v6667_v23 = vadd.f32 1.0, %v12189_v40  ;;  %v12191_v62 = vpop.eup %12190 }
0x19dc   :  { %v6668_v42 = vadd.f32 1.0, %v12191_v62  ;;  %v12193_v57 = vpop.eup %12192 }
0x19dd   :  { %12196 = vrcp.f32 %v6667_v23  ;;  %v12195_v50 = vpop.eup %12194 }
0x19de   :  { %12198 = vrcp.f32 %v6668_v42  ;;  %v6669_v15 = vadd.f32 1.0, %v12195_v50 }
0x19e0   :  { %12200 = vrcp.f32 %v6669_v15 }
0x19e7   :  { %v12197_v47 = vpop.eup %12196 }
0x19e8   :  { %v6678_v25 = vmul.f32 %v12197_v47, %v12193_v57  ;;  %v12199_v14 = vpop.eup %12198 }
0x19e9   :  { %v6677_v46 = vmul.f32 %v12199_v14, %v14265_v19  ;;  %v6755_v19 = vld [vmem:[%s14895_s13] sm:$0xf] }
0x19ea   :  { %v12201_v45 = vpop.eup %12200  ;;  %v14443_v58 = vrot.slane %v6755_v19, %v12970_v3  ;;  %v14446_v27 = vrot.slane %v6755_v19, %v12975_v7  ;;  %v14451_v31 = vrot.slane %v6755_v19, %v12985_v29  ;;  %v14454_v3 = vrot.slane %v6755_v19, %v12987_v32 }
0x19eb   :  { %v6679_v22 = vadd.f32 %v6678_v25, %v6677_v46 }
0x19ed   :  { %12202 = vtanh.f32 %v6679_v22 }
0x19f7   :  { %v12203_v8 = vpop.eup %12202 }
0x19f8   :  { %v6681_v53 = vmul.f32 %v12203_v8, %v12201_v45 }
0x19fa   :  { %6884 = vmatmul.mubr.f32.gmra.mrb[64].mxu0 %v6681_v53  ;;  %6997 = vmatmul.mubr.f32.gmra.mrb[66].mxu1 %v6681_v53 }
0x19fb   :  { %7167 = vmatprep.mubr.f32.mxu0 %v12553_v0  ;;  %7238 = vmatprep.mubr.f32.mxu1 %v12553_v0 }
0x19fe   :  { %7168 = vmatmul.mubr.f32.vlgmr.msra.gmra.mrb[50].mxu0 %v12553_v0  ;;  %7239 = vmatmul.mubr.f32.vlgmr.msra.gmra.mrb[52].mxu1 %v12553_v0 }
0x19ff   :  { %11103 = vmatpush1.bf16.msra.mxu0 %v14306_v43  ;;  %11135 = vmatpush1.bf16.msra.mxu1 %v14309_v33 }
0x1a00   :  { %11105 = vmatprep.subr.bf16.mxu0 %v14314_v26  ;;  %11137 = vmatprep.subr.bf16.mxu1 %v14316_v5 }
0x1a01   :  { %7406 = vmatprep.mubr.f32.mxu0 %v12553_v0  ;;  %7477 = vmatprep.mubr.f32.mxu1 %v12553_v0 }
0x1a03   :  { %11107 = vmatpush1.bf16.msra.mxu0 %v14318_v36  ;;  %11139 = vmatpush1.bf16.msra.mxu1 %v14321_v9 }
0x1a04   :  { %11109 = vmatprep.subr.bf16.mxu0 %v14326_v12  ;;  %11141 = vmatprep.subr.bf16.mxu1 %v14328_v49 }
0x1a07   :  { %11111 = vmatpush1.bf16.msra.mxu0 %v14330_v39  ;;  %11143 = vmatpush1.bf16.msra.mxu1 %v14333_v51 }
0x1a08   :  { %11113 = vmatprep.subr.bf16.mxu0 %v14338_v54  ;;  %11145 = vmatprep.subr.bf16.mxu1 %v14340_v41 }
0x1a0b   :  { %11115 = vmatpush1.bf16.msra.mxu0 %v14342_v20  ;;  %11147 = vmatpush1.bf16.msra.mxu1 %v14345_v18 }
0x1a0c   :  { %11117 = vmatprep.subr.bf16.mxu0 %v14350_v2  ;;  %11149 = vmatprep.subr.bf16.mxu1 %v14352_v38 }
0x1a0f   :  { %11119 = vmatpush1.bf16.msra.mxu0 %v14354_v37  ;;  %11151 = vmatpush1.bf16.msra.mxu1 %v14357_v48 }
0x1a10   :  { %11121 = vmatprep.subr.bf16.mxu0 %v14361_v10  ;;  %11153 = vmatprep.subr.bf16.mxu1 %v14363_v13 }
0x1a13   :  { %11123 = vmatpush1.bf16.msra.mxu0 %v14366_v44  ;;  %11155 = vmatpush1.bf16.msra.mxu1 %v14370_v16 }
0x1a14   :  { %11125 = vmatprep.subr.bf16.mxu0 %v14372_v11  ;;  %11157 = vmatprep.subr.bf16.mxu1 %v14374_v21 }
0x1a17   :  { %11127 = vmatpush1.bf16.msra.mxu0 %v14377_v17  ;;  %11159 = vmatpush1.bf16.msra.mxu1 %v14381_v55 }
0x1a18   :  { %11129 = vmatprep.subr.bf16.mxu0 %v14386_v56  ;;  %11161 = vmatprep.subr.bf16.mxu1 %v14388_v24 }
0x1a1b   :  { %11131 = vmatpush1.bf16.msra.mxu0 %v14390_v34  ;;  %11163 = vmatpush1.bf16.msra.mxu1 %v14393_v63 }
0x1a1c   :  { %11165 = vmatprep.subr.bf16.mxu0 %v14302_v35  ;;  %11197 = vmatprep.subr.bf16.mxu1 %v14304_v52 }
0x1ad1   :  { %v7169_v61 = vpop.f32.mrb[50].mxu0  ;;  %v7240_v30 = vpop.f32.mrb[52].mxu1 }
0x1ad2   :  { %v11646_v6 = vadd.f32 %v7169_v61, %v14443_v58  ;;  %v7171_v28 = vpop.f32.mrb[51].mxu0  ;;  %v7242_v1 = vpop.f32.mrb[53].mxu1  ;;  %v11662_v7 = vadd.f32 %v7240_v30, %v14451_v31 }
0x1ad3   :  { %v11647_v4 = vadd.f32 %v7171_v28, %v14446_v27  ;;  %v11663_v40 = vadd.f32 %v7242_v1, %v14454_v3 }
0x1ad4   :  { %v9215_v60 = vmul.f32 -1.442695, %v11646_v6  ;;  %v9217_v23 = vmul.f32 -1.442695, %v11662_v7 }
0x1ad5   :  { %v9216_v59 = vmul.f32 -1.442695, %v11647_v4 }
0x1ad6   :  { %12204 = vpow2.f32 %v9215_v60 }
0x1ad7   :  { %12206 = vpow2.f32 %v9216_v59 }
0x1ad8   :  { %12208 = vtanh.f32 %v11663_v40 }
0x1ad9   :  { %12210 = vpow2.f32 %v9217_v23 }
0x1ae0   :  { %v12205_v62 = vpop.eup %12204 }
0x1ae1   :  { %v7258_v42 = vadd.f32 1.0, %v12205_v62  ;;  %v12207_v57 = vpop.eup %12206 }
0x1ae2   :  { %v7259_v50 = vadd.f32 1.0, %v12207_v57  ;;  %v12209_v47 = vpop.eup %12208 }
0x1ae3   :  { %12212 = vrcp.f32 %v7258_v42  ;;  %v12211_v29 = vpop.eup %12210 }
0x1ae4   :  { %12214 = vrcp.f32 %v7259_v50  ;;  %v7260_v32 = vadd.f32 1.0, %v12211_v29 }
0x1ae6   :  { %12216 = vrcp.f32 %v7260_v32 }
0x1aed   :  { %v12213_v25 = vpop.eup %12212 }
0x1aee   :  { %v7269_v14 = vmul.f32 %v12213_v25, %v12209_v47  ;;  %v12215_v15 = vpop.eup %12214 }
0x1aef   :  { %v7268_v46 = vmul.f32 0.0, %v12215_v15 }
0x1af0   :  { %v12217_v45 = vpop.eup %12216 }
0x1af1   :  { %v14458_v22 = vadd.f32 %v7269_v14, %v7268_v46 }
0x1af3   :  { %12218 = vtanh.f32 %v14458_v22 }
0x1afd   :  { %v12219_v8 = vpop.eup %12218 }
0x1afe   :  { %v14461_v53 = vmul.f32 %v12219_v8, %v12217_v45  ;;  %v7995_v8 = vld [vmem:[#allocation15] sm:$0xff] }
0x1b00   :  { %7407 = vmatmul.mubr.f32.vlgmr.msra.gmra.mrb[52].mxu0 %v14461_v53  ;;  %7478 = vmatmul.mubr.f32.vlgmr.msra.gmra.mrb[54].mxu1 %v14461_v53 }
0x1b01   :  { %11167 = vmatpush1.bf16.msra.mxu0 %v14306_v43  ;;  %11199 = vmatpush1.bf16.msra.mxu1 %v14309_v33 }
0x1b02   :  { %11169 = vmatprep.subr.bf16.mxu0 %v14314_v26  ;;  %11201 = vmatprep.subr.bf16.mxu1 %v14316_v5 }
0x1b03   :  { %7645 = vmatprep.mubr.f32.mxu0 %v12553_v0  ;;  %7716 = vmatprep.mubr.f32.mxu1 %v12553_v0 }
0x1b05   :  { %11171 = vmatpush1.bf16.msra.mxu0 %v14318_v36  ;;  %11203 = vmatpush1.bf16.msra.mxu1 %v14321_v9 }
0x1b06   :  { %11173 = vmatprep.subr.bf16.mxu0 %v14326_v12  ;;  %11205 = vmatprep.subr.bf16.mxu1 %v14328_v49 }
0x1b09   :  { %11175 = vmatpush1.bf16.msra.mxu0 %v14330_v39  ;;  %11207 = vmatpush1.bf16.msra.mxu1 %v14333_v51 }
0x1b0a   :  { %11177 = vmatprep.subr.bf16.mxu0 %v14338_v54  ;;  %11209 = vmatprep.subr.bf16.mxu1 %v14340_v41 }
0x1b0d   :  { %11179 = vmatpush1.bf16.msra.mxu0 %v14342_v20  ;;  %11211 = vmatpush1.bf16.msra.mxu1 %v14345_v18 }
0x1b0e   :  { %11181 = vmatprep.subr.bf16.mxu0 %v14350_v2  ;;  %11213 = vmatprep.subr.bf16.mxu1 %v14352_v38 }
0x1b11   :  { %11183 = vmatpush1.bf16.msra.mxu0 %v14354_v37  ;;  %11215 = vmatpush1.bf16.msra.mxu1 %v14357_v48 }
0x1b12   :  { %11185 = vmatprep.subr.bf16.mxu0 %v14361_v10  ;;  %11217 = vmatprep.subr.bf16.mxu1 %v14363_v13 }
0x1b15   :  { %11187 = vmatpush1.bf16.msra.mxu0 %v14366_v44  ;;  %11219 = vmatpush1.bf16.msra.mxu1 %v14370_v16 }
0x1b16   :  { %11189 = vmatprep.subr.bf16.mxu0 %v14372_v11  ;;  %11221 = vmatprep.subr.bf16.mxu1 %v14374_v21 }
0x1b19   :  { %11191 = vmatpush1.bf16.msra.mxu0 %v14377_v17  ;;  %11223 = vmatpush1.bf16.msra.mxu1 %v14381_v55 }
0x1b1a   :  { %11193 = vmatprep.subr.bf16.mxu0 %v14386_v56  ;;  %11225 = vmatprep.subr.bf16.mxu1 %v14388_v24 }
0x1b1d   :  { %11195 = vmatpush1.bf16.msra.mxu0 %v14390_v34  ;;  %11227 = vmatpush1.bf16.msra.mxu1 %v14393_v63 }
0x1b1e   :  { %11229 = vmatprep.subr.bf16.mxu0 %v14302_v35  ;;  %11261 = vmatprep.subr.bf16.mxu1 %v14304_v52 }
0x1bd3   :  { %v7408_v19 = vpop.f32.mrb[52].mxu0  ;;  %v7479_v61 = vpop.f32.mrb[54].mxu1 }
0x1bd4   :  { %v11648_v30 = vadd.f32 %v7408_v19, %v14443_v58  ;;  %v7410_v6 = vpop.f32.mrb[53].mxu0  ;;  %v7481_v28 = vpop.f32.mrb[55].mxu1  ;;  %v11664_v59 = vadd.f32 %v7479_v61, %v14451_v31  ;;  %v7999_v19 = vld [vmem:[#allocation15 + $0x20] sm:$0xff] }
0x1bd5   :  { %v11649_v1 = vadd.f32 %v7410_v6, %v14446_v27  ;;  %v11665_v7 = vadd.f32 %v7481_v28, %v14454_v3  ;;  %v7997_v6 = vld [vmem:[#allocation15 + $0x10] sm:$0xff] }
0x1bd6   :  { %v9218_v4 = vmul.f32 -1.442695, %v11648_v30  ;;  %v9220_v40 = vmul.f32 -1.442695, %v11664_v59  ;;  %v14561_v30 = vpack.c.bf16 %v7999_v19, %v7995_v8  ;;  %v8001_v28 = vld [vmem:[#allocation15 + $0x30] sm:$0xff]  ;;  %v8006_v59 = vld [vmem:[#allocation15 + $0x58] sm:$0xff] }
0x1bd7   :  { %v9219_v60 = vmul.f32 -1.442695, %v11649_v1  ;;  %v14564_v1 = vpack.c.bf16 %v8001_v28, %v7997_v6  ;;  %v8036_v19 = vld [vmem:[#allocation15 + $0x148] sm:$0xff]  ;;  %v8038_v28 = vld [vmem:[#allocation15 + $0x158] sm:$0xff] }
0x1bd8   :  { %12220 = vpow2.f32 %v9218_v4  ;;  %v8004_v4 = vld [vmem:[#allocation15 + $0x48] sm:$0xff] }
0x1bd9   :  { %12222 = vpow2.f32 %v9219_v60  ;;  %v8008_v60 = vld [vmem:[#allocation15 + $0x68] sm:$0xff] }
0x1bda   :  { %12224 = vtanh.f32 %v11665_v7  ;;  %v14569_v7 = vpack.c.bf16 %v8008_v60, %v8004_v4  ;;  %v8040_v6 = vld [vmem:[#allocation15 + $0x168] sm:$0xff]  ;;  %v8042_v60 = vld [vmem:[#allocation15 + $0x178] sm:$0xff] }
0x1bdb   :  { %12226 = vpow2.f32 %v9220_v40  ;;  %v8010_v40 = vld [vmem:[#allocation15 + $0x78] sm:$0xff]  ;;  %v14617_v4 = vpack.c.bf16 %v8040_v6, %v8036_v19 }
0x1be2   :  { %v12221_v35 = vpop.eup %12220 }
0x1be3   :  { %v7497_v23 = vadd.f32 1.0, %v12221_v35  ;;  %v12223_v52 = vpop.eup %12222  ;;  %v8003_v35 = vld [vmem:[#allocation15 + $0x40] sm:$0xff] }
0x1be4   :  { %v7498_v62 = vadd.f32 1.0, %v12223_v52  ;;  %v12225_v42 = vpop.eup %12224  ;;  %v14571_v52 = vpack.c.bf16 %v8010_v40, %v8006_v59  ;;  %v8035_v59 = vld [vmem:[#allocation15 + $0x140] sm:$0xff] }
0x1be5   :  { %12228 = vrcp.f32 %v7497_v23  ;;  %v12227_v57 = vpop.eup %12226  ;;  %v8007_v23 = vld [vmem:[#allocation15 + $0x60] sm:$0xff] }
0x1be6   :  { %12230 = vrcp.f32 %v7498_v62  ;;  %v7499_v25 = vadd.f32 1.0, %v12227_v57  ;;  %v14573_v62 = vpack.c.bf16 %v8007_v23, %v8003_v35  ;;  %v8009_v57 = vld [vmem:[#allocation15 + $0x70] sm:$0xff]  ;;  %v8039_v40 = vld [vmem:[#allocation15 + $0x160] sm:$0xff]  ;;  %v14619_v35 = vpack.c.bf16 %v8042_v60, %v8038_v28 }
0x1be7   :  { %v14621_v23 = vpack.c.bf16 %v8039_v40, %v8035_v59 }
0x1be8   :  { %12232 = vrcp.f32 %v7499_v25  ;;  %v8014_v25 = vld [vmem:[#allocation15 + $0x98] sm:$0xff] }
0x1bef   :  { %v12229_v50 = vpop.eup %12228 }
0x1bf0   :  { %v7508_v47 = vmul.f32 %v12229_v50, %v12225_v42  ;;  %v12231_v29 = vpop.eup %12230  ;;  %v8005_v42 = vld [vmem:[#allocation15 + $0x50] sm:$0xff] }
0x1bf1   :  { %v7507_v14 = vmul.f32 %v12231_v29, %v14458_v22  ;;  %v8002_v22 = vld [vmem:[#allocation15 + $0x38] sm:$0xff]  ;;  %v14576_v50 = vpack.c.bf16 %v8009_v57, %v8005_v42  ;;  %v8016_v29 = vld [vmem:[#allocation15 + $0xa8] sm:$0xff]  ;;  %v8037_v42 = vld [vmem:[#allocation15 + $0x150] sm:$0xff] }
0x1bf2   :  { %v12233_v32 = vpop.eup %12232  ;;  %v8041_v57 = vld [vmem:[#allocation15 + $0x170] sm:$0xff] }
0x1bf3   :  { %v14504_v15 = vadd.f32 %v7508_v47, %v7507_v14  ;;  %v8012_v47 = vld [vmem:[#allocation15 + $0x88] sm:$0xff] }
0x1bf4   :  { %v14581_v14 = vpack.c.bf16 %v8016_v29, %v8012_v47  ;;  %v8044_v47 = vld [vmem:[#allocation15 + $0x188] sm:$0xff]  ;;  %v14624_v29 = vpack.c.bf16 %v8041_v57, %v8037_v42 }
0x1bf5   :  { %12234 = vtanh.f32 %v14504_v15 }
0x1bff   :  { %v12235_v46 = vpop.eup %12234 }
0x1c00   :  { %v14507_v45 = vmul.f32 %v12235_v46, %v12233_v32  ;;  %v8011_v32 = vld [vmem:[#allocation15 + $0x80] sm:$0xff] }
0x1c01   :  { %v8015_v46 = vld [vmem:[#allocation15 + $0xa0] sm:$0xff] }
0x1c02   :  { %7646 = vmatmul.mubr.f32.vlgmr.msra.gmra.mrb[54].mxu0 %v14507_v45  ;;  %7717 = vmatmul.mubr.f32.vlgmr.msra.gmra.mrb[56].mxu1 %v14507_v45 }
0x1c03   :  { %11231 = vmatpush1.bf16.msra.mxu0 %v14306_v43  ;;  %11263 = vmatpush1.bf16.msra.mxu1 %v14309_v33 }
0x1c04   :  { %11233 = vmatprep.subr.bf16.mxu0 %v14314_v26  ;;  %11265 = vmatprep.subr.bf16.mxu1 %v14316_v5 }
0x1c05   :  { %7884 = vmatprep.mubr.f32.mxu0 %v12553_v0  ;;  %7955 = vmatprep.mubr.f32.mxu1 %v12553_v0 }
0x1c07   :  { %11235 = vmatpush1.bf16.msra.mxu0 %v14318_v36  ;;  %11267 = vmatpush1.bf16.msra.mxu1 %v14321_v9 }
0x1c08   :  { %11237 = vmatprep.subr.bf16.mxu0 %v14326_v12  ;;  %11269 = vmatprep.subr.bf16.mxu1 %v14328_v49 }
0x1c0b   :  { %11239 = vmatpush1.bf16.msra.mxu0 %v14330_v39  ;;  %11271 = vmatpush1.bf16.msra.mxu1 %v14333_v51 }
0x1c0c   :  { %11241 = vmatprep.subr.bf16.mxu0 %v14338_v54  ;;  %11273 = vmatprep.subr.bf16.mxu1 %v14340_v41 }
0x1c0f   :  { %11243 = vmatpush1.bf16.msra.mxu0 %v14342_v20  ;;  %11275 = vmatpush1.bf16.msra.mxu1 %v14345_v18 }
0x1c10   :  { %11245 = vmatprep.subr.bf16.mxu0 %v14350_v2  ;;  %11277 = vmatprep.subr.bf16.mxu1 %v14352_v38 }
0x1c13   :  { %11247 = vmatpush1.bf16.msra.mxu0 %v14354_v37  ;;  %11279 = vmatpush1.bf16.msra.mxu1 %v14357_v48 }
0x1c14   :  { %11249 = vmatprep.subr.bf16.mxu0 %v14361_v10  ;;  %11281 = vmatprep.subr.bf16.mxu1 %v14363_v13 }
0x1c17   :  { %11251 = vmatpush1.bf16.msra.mxu0 %v14366_v44  ;;  %11283 = vmatpush1.bf16.msra.mxu1 %v14370_v16 }
0x1c18   :  { %11253 = vmatprep.subr.bf16.mxu0 %v14372_v11  ;;  %11285 = vmatprep.subr.bf16.mxu1 %v14374_v21 }
0x1c1b   :  { %11255 = vmatpush1.bf16.msra.mxu0 %v14377_v17  ;;  %11287 = vmatpush1.bf16.msra.mxu1 %v14381_v55 }
0x1c1c   :  { %11257 = vmatprep.subr.bf16.mxu0 %v14386_v56  ;;  %11289 = vmatprep.subr.bf16.mxu1 %v14388_v24  ;;  %v7996_v56 = vld [vmem:[#allocation15 + $0x8] sm:$0xff] }
0x1c1d   :  { %v8000_v24 = vld [vmem:[#allocation15 + $0x28] sm:$0xff] }
0x1c1f   :  { %11259 = vmatpush1.bf16.msra.mxu0 %v14390_v34  ;;  %11291 = vmatpush1.bf16.msra.mxu1 %v14393_v63  ;;  %v7998_v34 = vld [vmem:[#allocation15 + $0x18] sm:$0xff]  ;;  %v14557_v63 = vpack.c.bf16 %v8000_v24, %v7996_v56 }
0x1c20   :  { %v14559_v61 = vpack.c.bf16 %v8002_v22, %v7998_v34  ;;  %v8029_v34 = vld [vmem:[#allocation15 + $0x110] sm:$0xff] }
0x1c21   :  { %11293 = vmatprep.subr.bf16.mxu0 %v14557_v63  ;;  %v8033_v22 = vld [vmem:[#allocation15 + $0x130] sm:$0xff] }
0x1c22   :  { %11325 = vmatprep.subr.bf16.mxu1 %v14559_v61  ;;  %v14612_v8 = vpack.c.bf16 %v8033_v22, %v8029_v34  ;;  %v8057_v34 = vld [vmem:[#allocation15 + $0x1f0] sm:$0xff] }
0x1cd5   :  { %v7647_v43 = vpop.f32.mrb[54].mxu0  ;;  %v7718_v33 = vpop.f32.mrb[56].mxu1 }
0x1cd6   :  { %v11650_v26 = vadd.f32 %v7647_v43, %v14443_v58  ;;  %v7649_v5 = vpop.f32.mrb[55].mxu0  ;;  %v7720_v36 = vpop.f32.mrb[57].mxu1  ;;  %v11666_v39 = vadd.f32 %v7718_v33, %v14451_v31  ;;  %v14585_v33 = vpack.c.bf16 %v8015_v46, %v8011_v32  ;;  %v8050_v32 = vld [vmem:[#allocation15 + $0x1b8] sm:$0xff] }
0x1cd7   :  { %v11651_v9 = vadd.f32 %v7649_v5, %v14446_v27  ;;  %v11667_v51 = vadd.f32 %v7720_v36, %v14454_v3  ;;  %v8017_v5 = vld [vmem:[#allocation15 + $0xb0] sm:$0xff] }
0x1cd8   :  { %v9221_v12 = vmul.f32 -1.442695, %v11650_v26  ;;  %v9223_v54 = vmul.f32 -1.442695, %v11666_v39  ;;  %v8013_v26 = vld [vmem:[#allocation15 + $0x90] sm:$0xff] }
0x1cd9   :  { %v9222_v49 = vmul.f32 -1.442695, %v11651_v9  ;;  %v14588_v36 = vpack.c.bf16 %v8017_v5, %v8013_v26  ;;  %v8020_v9 = vld [vmem:[#allocation15 + $0xc8] sm:$0xff]  ;;  %v8043_v5 = vld [vmem:[#allocation15 + $0x180] sm:$0xff] }
0x1cda   :  { %12236 = vpow2.f32 %v9221_v12  ;;  %v8024_v12 = vld [vmem:[#allocation15 + $0xe8] sm:$0xff] }
0x1cdb   :  { %12238 = vpow2.f32 %v9222_v49  ;;  %v8022_v49 = vld [vmem:[#allocation15 + $0xd8] sm:$0xff]  ;;  %v14593_v39 = vpack.c.bf16 %v8024_v12, %v8020_v9  ;;  %v8047_v9 = vld [vmem:[#allocation15 + $0x1a0] sm:$0xff]  ;;  %v8045_v12 = vld [vmem:[#allocation15 + $0x190] sm:$0xff] }
0x1cdc   :  { %12240 = vtanh.f32 %v11667_v51  ;;  %v8026_v51 = vld [vmem:[#allocation15 + $0xf8] sm:$0xff] }
0x1cdd   :  { %12242 = vpow2.f32 %v9223_v54  ;;  %v8019_v54 = vld [vmem:[#allocation15 + $0xc0] sm:$0xff] }
0x1ce4   :  { %v12237_v41 = vpop.eup %12236 }
0x1ce5   :  { %v7736_v20 = vadd.f32 1.0, %v12237_v41  ;;  %v12239_v18 = vpop.eup %12238  ;;  %v8023_v41 = vld [vmem:[#allocation15 + $0xe0] sm:$0xff] }
0x1ce6   :  { %v7737_v2 = vadd.f32 1.0, %v12239_v18  ;;  %v12241_v38 = vpop.eup %12240  ;;  %v14597_v18 = vpack.c.bf16 %v8023_v41, %v8019_v54  ;;  %v8052_v54 = vld [vmem:[#allocation15 + $0x1c8] sm:$0xff] }
0x1ce7   :  { %12244 = vrcp.f32 %v7736_v20  ;;  %v12243_v37 = vpop.eup %12242  ;;  %v14595_v20 = vpack.c.bf16 %v8026_v51, %v8022_v49  ;;  %v14633_v49 = vpack.c.bf16 %v8047_v9, %v8043_v5  ;;  %v8049_v51 = vld [vmem:[#allocation15 + $0x1b0] sm:$0xff]  ;;  %v8056_v41 = vld [vmem:[#allocation15 + $0x1e8] sm:$0xff] }
0x1ce8   :  { %12246 = vrcp.f32 %v7737_v2  ;;  %v7738_v44 = vadd.f32 1.0, %v12243_v37  ;;  %v8021_v2 = vld [vmem:[#allocation15 + $0xd0] sm:$0xff] }
0x1cea   :  { %12248 = vrcp.f32 %v7738_v44 }
0x1cf1   :  { %v12245_v48 = vpop.eup %12244 }
0x1cf2   :  { %v7747_v10 = vmul.f32 %v12245_v48, %v12241_v38  ;;  %v12247_v13 = vpop.eup %12246  ;;  %v8025_v38 = vld [vmem:[#allocation15 + $0xf0] sm:$0xff]  ;;  %v8028_v48 = vld [vmem:[#allocation15 + $0x108] sm:$0xff] }
0x1cf3   :  { %v7746_v16 = vmul.f32 %v12247_v13, %v14504_v15  ;;  %v8018_v15 = vld [vmem:[#allocation15 + $0xb8] sm:$0xff]  ;;  %v14600_v37 = vpack.c.bf16 %v8025_v38, %v8021_v2  ;;  %v14637_v2 = vpack.c.bf16 %v8049_v51, %v8045_v12  ;;  %v14639_v38 = vpack.c.bf16 %v8056_v41, %v8052_v54 }
0x1cf4   :  { %v12249_v21 = vpop.eup %12248  ;;  %v14583_v43 = vpack.c.bf16 %v8018_v15, %v8014_v25  ;;  %v8030_v13 = vld [vmem:[#allocation15 + $0x118] sm:$0xff]  ;;  %v8048_v25 = vld [vmem:[#allocation15 + $0x1a8] sm:$0xff] }
0x1cf5   :  { %v14548_v11 = vadd.f32 %v7747_v10, %v7746_v16  ;;  %v8032_v10 = vld [vmem:[#allocation15 + $0x128] sm:$0xff]  ;;  %v8034_v16 = vld [vmem:[#allocation15 + $0x138] sm:$0xff]  ;;  %v14628_v46 = vpack.c.bf16 %v8048_v25, %v8044_v47 }
0x1cf6   :  { %v14605_v44 = vpack.c.bf16 %v8032_v10, %v8028_v48  ;;  %v14607_v56 = vpack.c.bf16 %v8034_v16, %v8030_v13  ;;  %v8046_v15 = vld [vmem:[#allocation15 + $0x198] sm:$0xff]  ;;  %v8051_v13 = vld [vmem:[#allocation15 + $0x1c0] sm:$0xff] }
0x1cf7   :  { %12250 = vtanh.f32 %v14548_v11  ;;  %v14630_v26 = vpack.c.bf16 %v8050_v32, %v8046_v15  ;;  %v8054_v48 = vld [vmem:[#allocation15 + $0x1d8] sm:$0xff] }
0x1cf8   :  { %v8058_v10 = vld [vmem:[#allocation15 + $0x1f8] sm:$0xff] }
0x1cf9   :  { %v14641_v16 = vpack.c.bf16 %v8058_v10, %v8054_v48 }
0x1d01   :  { %v12251_v17 = vpop.eup %12250 }
0x1d02   :  { %v14551_v55 = vmul.f32 %v12251_v17, %v12249_v21  ;;  %v8027_v21 = vld [vmem:[#allocation15 + $0x100] sm:$0xff] }
0x1d03   :  { %v8031_v17 = vld [vmem:[#allocation15 + $0x120] sm:$0xff] }
0x1d04   :  { %7885 = vmatmul.mubr.f32.vlgmr.msra.gmra.mrb[56].mxu0 %v14551_v55  ;;  %7956 = vmatmul.mubr.f32.vlgmr.msra.gmra.mrb[58].mxu1 %v14551_v55  ;;  %v14609_v24 = vpack.c.bf16 %v8031_v17, %v8027_v21  ;;  %v8055_v21 = vld [vmem:[#allocation15 + $0x1e0] sm:$0xff]  ;;  %v8053_v17 = vld [vmem:[#allocation15 + $0x1d0] sm:$0xff] }
0x1d05   :  { %8123 = vmatprep.mubr.f32.mxu0 %v12553_v0  ;;  %8194 = vmatprep.mubr.f32.mxu1 %v12553_v0  ;;  %v14644_v22 = vpack.c.bf16 %v8055_v21, %v8051_v13  ;;  %v14648_v19 = vpack.c.bf16 %v8057_v34, %v8053_v17 }
0x1d06   :  { %11295 = vmatpush1.bf16.msra.mxu0 %v14561_v30  ;;  %11327 = vmatpush1.bf16.msra.mxu1 %v14564_v1 }
0x1d07   :  { %11297 = vmatprep.subr.bf16.mxu0 %v14569_v7  ;;  %11329 = vmatprep.subr.bf16.mxu1 %v14571_v52 }
0x1d0a   :  { %11299 = vmatpush1.bf16.msra.mxu0 %v14573_v62  ;;  %11331 = vmatpush1.bf16.msra.mxu1 %v14576_v50 }
0x1d0b   :  { %11301 = vmatprep.subr.bf16.mxu0 %v14581_v14  ;;  %11333 = vmatprep.subr.bf16.mxu1 %v14583_v43 }
0x1d0e   :  { %11303 = vmatpush1.bf16.msra.mxu0 %v14585_v33  ;;  %11335 = vmatpush1.bf16.msra.mxu1 %v14588_v36 }
0x1d0f   :  { %11305 = vmatprep.subr.bf16.mxu0 %v14593_v39  ;;  %11337 = vmatprep.subr.bf16.mxu1 %v14595_v20 }
0x1d12   :  { %11307 = vmatpush1.bf16.msra.mxu0 %v14597_v18  ;;  %11339 = vmatpush1.bf16.msra.mxu1 %v14600_v37 }
0x1d13   :  { %11309 = vmatprep.subr.bf16.mxu0 %v14605_v44  ;;  %11341 = vmatprep.subr.bf16.mxu1 %v14607_v56 }
0x1d16   :  { %11311 = vmatpush1.bf16.msra.mxu0 %v14609_v24  ;;  %11343 = vmatpush1.bf16.msra.mxu1 %v14612_v8 }
0x1d17   :  { %11313 = vmatprep.subr.bf16.mxu0 %v14617_v4  ;;  %11345 = vmatprep.subr.bf16.mxu1 %v14619_v35 }
0x1d1a   :  { %11315 = vmatpush1.bf16.msra.mxu0 %v14621_v23  ;;  %11347 = vmatpush1.bf16.msra.mxu1 %v14624_v29 }
0x1d1b   :  { %11317 = vmatprep.subr.bf16.mxu0 %v14628_v46  ;;  %11349 = vmatprep.subr.bf16.mxu1 %v14630_v26 }
0x1d1e   :  { %11319 = vmatpush1.bf16.msra.mxu0 %v14633_v49  ;;  %11351 = vmatpush1.bf16.msra.mxu1 %v14637_v2 }
0x1d1f   :  { %11321 = vmatprep.subr.bf16.mxu0 %v14639_v38  ;;  %11353 = vmatprep.subr.bf16.mxu1 %v14641_v16 }
0x1d22   :  { %11323 = vmatpush1.bf16.msra.mxu0 %v14644_v22  ;;  %11355 = vmatpush1.bf16.msra.mxu1 %v14648_v19 }
0x1d23   :  { %11357 = vmatprep.subr.bf16.mxu0 %v14557_v63  ;;  %11389 = vmatprep.subr.bf16.mxu1 %v14559_v61 }
0x1dd7   :  { %v7886_v6 = vpop.f32.mrb[56].mxu0  ;;  %v7957_v28 = vpop.f32.mrb[58].mxu1 }
0x1dd8   :  { %v11652_v60 = vadd.f32 %v7886_v6, %v14443_v58  ;;  %v7888_v59 = vpop.f32.mrb[57].mxu0  ;;  %v7959_v40 = vpop.f32.mrb[59].mxu1  ;;  %v11668_v25 = vadd.f32 %v7957_v28, %v14451_v31 }
0x1dd9   :  { %v11653_v42 = vadd.f32 %v7888_v59, %v14446_v27  ;;  %v11669_v15 = vadd.f32 %v7959_v40, %v14454_v3 }
0x1dda   :  { %v9224_v57 = vmul.f32 -1.442695, %v11652_v60  ;;  %v9226_v32 = vmul.f32 -1.442695, %v11668_v25 }
0x1ddb   :  { %v9225_v47 = vmul.f32 -1.442695, %v11653_v42 }
0x1ddc   :  { %12252 = vpow2.f32 %v9224_v57 }
0x1ddd   :  { %12254 = vpow2.f32 %v9225_v47 }
0x1dde   :  { %12256 = vtanh.f32 %v11669_v15 }
0x1ddf   :  { %12258 = vpow2.f32 %v9226_v32 }
0x1de6   :  { %v12253_v5 = vpop.eup %12252 }
0x1de7   :  { %v7975_v9 = vadd.f32 1.0, %v12253_v5  ;;  %v12255_v12 = vpop.eup %12254 }
0x1de8   :  { %v7976_v51 = vadd.f32 1.0, %v12255_v12  ;;  %v12257_v54 = vpop.eup %12256 }
0x1de9   :  { %12260 = vrcp.f32 %v7975_v9  ;;  %v12259_v41 = vpop.eup %12258 }
0x1dea   :  { %12262 = vrcp.f32 %v7976_v51  ;;  %v7977_v21 = vadd.f32 1.0, %v12259_v41 }
0x1dec   :  { %12264 = vrcp.f32 %v7977_v21 }
0x1df3   :  { %v12261_v48 = vpop.eup %12260 }
0x1df4   :  { %v7986_v10 = vmul.f32 %v12261_v48, %v12257_v54  ;;  %v12263_v13 = vpop.eup %12262 }
0x1df5   :  { %v7985_v17 = vmul.f32 %v12263_v13, %v14548_v11 }
0x1df6   :  { %v12265_v6 = vpop.eup %12264 }
0x1df7   :  { %v14660_v34 = vadd.f32 %v7986_v10, %v7985_v17 }
0x1df9   :  { %12266 = vtanh.f32 %v14660_v34 }
0x1e03   :  { %v12267_v28 = vpop.eup %12266 }
0x1e04   :  { %v14663_v60 = vmul.f32 %v12267_v28, %v12265_v6 }
0x1e06   :  { %8124 = vmatmul.mubr.f32.vlgmr.msra.gmra.mrb[58].mxu0 %v14663_v60  ;;  %8195 = vmatmul.mubr.f32.vlgmr.msra.gmra.mrb[60].mxu1 %v14663_v60 }
0x1e07   :  { %11359 = vmatpush1.bf16.msra.mxu0 %v14561_v30  ;;  %11391 = vmatpush1.bf16.msra.mxu1 %v14564_v1 }
0x1e08   :  { %11361 = vmatprep.subr.bf16.mxu0 %v14569_v7  ;;  %11393 = vmatprep.subr.bf16.mxu1 %v14571_v52 }
0x1e09   :  { %8362 = vmatprep.mubr.f32.mxu0 %v12553_v0  ;;  %8433 = vmatprep.mubr.f32.mxu1 %v12553_v0 }
0x1e0b   :  { %11363 = vmatpush1.bf16.msra.mxu0 %v14573_v62  ;;  %11395 = vmatpush1.bf16.msra.mxu1 %v14576_v50 }
0x1e0c   :  { %11365 = vmatprep.subr.bf16.mxu0 %v14581_v14  ;;  %11397 = vmatprep.subr.bf16.mxu1 %v14583_v43 }
0x1e0f   :  { %11367 = vmatpush1.bf16.msra.mxu0 %v14585_v33  ;;  %11399 = vmatpush1.bf16.msra.mxu1 %v14588_v36 }
0x1e10   :  { %11369 = vmatprep.subr.bf16.mxu0 %v14593_v39  ;;  %11401 = vmatprep.subr.bf16.mxu1 %v14595_v20 }
0x1e13   :  { %11371 = vmatpush1.bf16.msra.mxu0 %v14597_v18  ;;  %11403 = vmatpush1.bf16.msra.mxu1 %v14600_v37 }
0x1e14   :  { %11373 = vmatprep.subr.bf16.mxu0 %v14605_v44  ;;  %11405 = vmatprep.subr.bf16.mxu1 %v14607_v56 }
0x1e17   :  { %11375 = vmatpush1.bf16.msra.mxu0 %v14609_v24  ;;  %11407 = vmatpush1.bf16.msra.mxu1 %v14612_v8 }
0x1e18   :  { %11377 = vmatprep.subr.bf16.mxu0 %v14617_v4  ;;  %11409 = vmatprep.subr.bf16.mxu1 %v14619_v35 }
0x1e1b   :  { %11379 = vmatpush1.bf16.msra.mxu0 %v14621_v23  ;;  %11411 = vmatpush1.bf16.msra.mxu1 %v14624_v29 }
0x1e1c   :  { %11381 = vmatprep.subr.bf16.mxu0 %v14628_v46  ;;  %11413 = vmatprep.subr.bf16.mxu1 %v14630_v26 }
0x1e1f   :  { %11383 = vmatpush1.bf16.msra.mxu0 %v14633_v49  ;;  %11415 = vmatpush1.bf16.msra.mxu1 %v14637_v2 }
0x1e20   :  { %11385 = vmatprep.subr.bf16.mxu0 %v14639_v38  ;;  %11417 = vmatprep.subr.bf16.mxu1 %v14641_v16 }
0x1e23   :  { %11387 = vmatpush1.bf16.msra.mxu0 %v14644_v22  ;;  %11419 = vmatpush1.bf16.msra.mxu1 %v14648_v19 }
0x1e24   :  { %11421 = vmatprep.subr.bf16.mxu0 %v14557_v63  ;;  %11453 = vmatprep.subr.bf16.mxu1 %v14559_v61 }
0x1ed9   :  { %v8125_v11 = vpop.f32.mrb[58].mxu0  ;;  %v8196_v59 = vpop.f32.mrb[60].mxu1 }
0x1eda   :  { %v11654_v40 = vadd.f32 %v8125_v11, %v14443_v58  ;;  %v8127_v42 = vpop.f32.mrb[59].mxu0  ;;  %v8198_v57 = vpop.f32.mrb[61].mxu1  ;;  %v11670_v32 = vadd.f32 %v8196_v59, %v14451_v31 }
0x1edb   :  { %v11655_v47 = vadd.f32 %v8127_v42, %v14446_v27  ;;  %v11671_v5 = vadd.f32 %v8198_v57, %v14454_v3 }
0x1edc   :  { %v9227_v25 = vmul.f32 -1.442695, %v11654_v40  ;;  %v9229_v9 = vmul.f32 -1.442695, %v11670_v32 }
0x1edd   :  { %v9228_v15 = vmul.f32 -1.442695, %v11655_v47 }
0x1ede   :  { %12268 = vpow2.f32 %v9227_v25 }
0x1edf   :  { %12270 = vpow2.f32 %v9228_v15 }
0x1ee0   :  { %12272 = vtanh.f32 %v11671_v5 }
0x1ee1   :  { %12274 = vpow2.f32 %v9229_v9 }
0x1ee8   :  { %v12269_v12 = vpop.eup %12268 }
0x1ee9   :  { %v8214_v51 = vadd.f32 1.0, %v12269_v12  ;;  %v12271_v54 = vpop.eup %12270 }
0x1eea   :  { %v8215_v41 = vadd.f32 1.0, %v12271_v54  ;;  %v12273_v48 = vpop.eup %12272 }
0x1eeb   :  { %12276 = vrcp.f32 %v8214_v51  ;;  %v12275_v10 = vpop.eup %12274 }
0x1eec   :  { %12278 = vrcp.f32 %v8215_v41  ;;  %v8216_v6 = vadd.f32 1.0, %v12275_v10 }
0x1eee   :  { %12280 = vrcp.f32 %v8216_v6 }
0x1ef5   :  { %v12277_v13 = vpop.eup %12276 }
0x1ef6   :  { %v8225_v21 = vmul.f32 %v12277_v13, %v12273_v48  ;;  %v12279_v17 = vpop.eup %12278 }
0x1ef7   :  { %v8224_v28 = vmul.f32 %v12279_v17, %v14660_v34 }
0x1ef8   :  { %v12281_v59 = vpop.eup %12280 }
0x1ef9   :  { %v14706_v11 = vadd.f32 %v8225_v21, %v8224_v28 }
0x1efb   :  { %12282 = vtanh.f32 %v14706_v11 }
0x1f05   :  { %v12283_v40 = vpop.eup %12282 }
0x1f06   :  { %v14709_v42 = vmul.f32 %v12283_v40, %v12281_v59 }
0x1f08   :  { %8363 = vmatmul.mubr.f32.vlgmr.msra.gmra.mrb[60].mxu0 %v14709_v42  ;;  %8434 = vmatmul.mubr.f32.vlgmr.msra.gmra.mrb[62].mxu1 %v14709_v42 }
0x1f09   :  { %11423 = vmatpush1.bf16.msra.mxu0 %v14561_v30  ;;  %11455 = vmatpush1.bf16.msra.mxu1 %v14564_v1 }
0x1f0a   :  { %11425 = vmatprep.subr.bf16.mxu0 %v14569_v7  ;;  %11457 = vmatprep.subr.bf16.mxu1 %v14571_v52 }
0x1f0b   :  { %8601 = vmatprep.mubr.f32.mxu0 %v12553_v0  ;;  %8672 = vmatprep.mubr.f32.mxu1 %v12553_v0 }
0x1f0d   :  { %11427 = vmatpush1.bf16.msra.mxu0 %v14573_v62  ;;  %11459 = vmatpush1.bf16.msra.mxu1 %v14576_v50 }
0x1f0e   :  { %11429 = vmatprep.subr.bf16.mxu0 %v14581_v14  ;;  %11461 = vmatprep.subr.bf16.mxu1 %v14583_v43 }
0x1f11   :  { %11431 = vmatpush1.bf16.msra.mxu0 %v14585_v33  ;;  %11463 = vmatpush1.bf16.msra.mxu1 %v14588_v36 }
0x1f12   :  { %11433 = vmatprep.subr.bf16.mxu0 %v14593_v39  ;;  %11465 = vmatprep.subr.bf16.mxu1 %v14595_v20 }
0x1f15   :  { %11435 = vmatpush1.bf16.msra.mxu0 %v14597_v18  ;;  %11467 = vmatpush1.bf16.msra.mxu1 %v14600_v37 }
0x1f16   :  { %11437 = vmatprep.subr.bf16.mxu0 %v14605_v44  ;;  %11469 = vmatprep.subr.bf16.mxu1 %v14607_v56 }
0x1f19   :  { %11439 = vmatpush1.bf16.msra.mxu0 %v14609_v24  ;;  %11471 = vmatpush1.bf16.msra.mxu1 %v14612_v8 }
0x1f1a   :  { %11441 = vmatprep.subr.bf16.mxu0 %v14617_v4  ;;  %11473 = vmatprep.subr.bf16.mxu1 %v14619_v35 }
0x1f1d   :  { %11443 = vmatpush1.bf16.msra.mxu0 %v14621_v23  ;;  %11475 = vmatpush1.bf16.msra.mxu1 %v14624_v29 }
0x1f1e   :  { %11445 = vmatprep.subr.bf16.mxu0 %v14628_v46  ;;  %11477 = vmatprep.subr.bf16.mxu1 %v14630_v26 }
0x1f21   :  { %11447 = vmatpush1.bf16.msra.mxu0 %v14633_v49  ;;  %11479 = vmatpush1.bf16.msra.mxu1 %v14637_v2 }
0x1f22   :  { %11449 = vmatprep.subr.bf16.mxu0 %v14639_v38  ;;  %11481 = vmatprep.subr.bf16.mxu1 %v14641_v16 }
0x1f25   :  { %11451 = vmatpush1.bf16.msra.mxu0 %v14644_v22  ;;  %11483 = vmatpush1.bf16.msra.mxu1 %v14648_v19 }
0x1f26   :  { %11485 = vmatprep.subr.bf16.mxu0 %v14557_v63  ;;  %11517 = vmatprep.subr.bf16.mxu1 %v14559_v61 }
0x1fdb   :  { %v8364_v34 = vpop.f32.mrb[60].mxu0  ;;  %v8435_v57 = vpop.f32.mrb[62].mxu1 }
0x1fdc   :  { %v11656_v47 = vadd.f32 %v8364_v34, %v14443_v58  ;;  %v8366_v25 = vpop.f32.mrb[61].mxu0  ;;  %v8437_v15 = vpop.f32.mrb[63].mxu1  ;;  %v11672_v12 = vadd.f32 %v8435_v57, %v14451_v31 }
0x1fdd   :  { %v11657_v32 = vadd.f32 %v8366_v25, %v14446_v27  ;;  %v11673_v51 = vadd.f32 %v8437_v15, %v14454_v3  ;;  %v8959_v25 = vld [vmem:[%s14896_s14 + $0x20] sm:$0xff]  ;;  %v8960_v15 = vld [vmem:[%s14896_s14 + $0x28] sm:$0xff] }
0x1fde   :  { %v9230_v5 = vmul.f32 -1.442695, %v11656_v47  ;;  %v9232_v54 = vmul.f32 -1.442695, %v11672_v12 }
0x1fdf   :  { %v9231_v9 = vmul.f32 -1.442695, %v11657_v32  ;;  %v11556_v32 = vpack.c.bf16 %v8960_v15, %v8959_v25 }
0x1fe0   :  { %12284 = vpow2.f32 %v9230_v5  ;;  %v8961_v5 = vld [vmem:[%s14896_s14 + $0x30] sm:$0xff] }
0x1fe1   :  { %12286 = vpow2.f32 %v9231_v9  ;;  %v8962_v9 = vld [vmem:[%s14896_s14 + $0x38] sm:$0xff] }
0x1fe2   :  { %12288 = vtanh.f32 %v11673_v51  ;;  %v11560_v12 = vpack.c.bf16 %v8962_v9, %v8961_v5  ;;  %v8963_v51 = vld [vmem:[%s14896_s14 + $0x40] sm:$0xff] }
0x1fe3   :  { %12290 = vpow2.f32 %v9232_v54 }
0x1fea   :  { %v12285_v63 = vpop.eup %12284 }
0x1feb   :  { %v8453_v41 = vadd.f32 1.0, %v12285_v63  ;;  %v12287_v61 = vpop.eup %12286  ;;  %v8965_v63 = vld [vmem:[%s14896_s14 + $0x50] sm:$0xff] }
0x1fec   :  { %v8454_v48 = vadd.f32 1.0, %v12287_v61  ;;  %v12289_v10 = vpop.eup %12288 }
0x1fed   :  { %12292 = vrcp.f32 %v8453_v41  ;;  %v12291_v13 = vpop.eup %12290  ;;  %v8966_v41 = vld [vmem:[%s14896_s14 + $0x58] sm:$0xff] }
0x1fee   :  { %12294 = vrcp.f32 %v8454_v48  ;;  %v8455_v28 = vadd.f32 1.0, %v12291_v13  ;;  %v11568_v61 = vpack.c.bf16 %v8966_v41, %v8965_v63  ;;  %v8967_v48 = vld [vmem:[%s14896_s14 + $0x60] sm:$0xff] }
0x1ff0   :  { %12296 = vrcp.f32 %v8455_v28 }
0x1ff7   :  { %v12293_v21 = vpop.eup %12292 }
0x1ff8   :  { %v8464_v17 = vmul.f32 %v12293_v21, %v12289_v10  ;;  %v12295_v6 = vpop.eup %12294  ;;  %v8968_v10 = vld [vmem:[%s14896_s14 + $0x68] sm:$0xff]  ;;  %v8969_v21 = vld [vmem:[%s14896_s14 + $0x70] sm:$0xff] }
0x1ff9   :  { %v8463_v59 = vmul.f32 %v12295_v6, %v14706_v11  ;;  %v11572_v13 = vpack.c.bf16 %v8968_v10, %v8967_v48 }
0x1ffa   :  { %v12297_v34 = vpop.eup %12296 }
0x1ffb   :  { %v14752_v40 = vadd.f32 %v8464_v17, %v8463_v59  ;;  %v8970_v17 = vld [vmem:[%s14896_s14 + $0x78] sm:$0xff] }
0x1ffc   :  { %v11576_v6 = vpack.c.bf16 %v8970_v17, %v8969_v21 }
0x1ffd   :  { %12298 = vtanh.f32 %v14752_v40 }
0x2007   :  { %v12299_v57 = vpop.eup %12298 }
0x2008   :  { %v14755_v47 = vmul.f32 %v12299_v57, %v12297_v34 }
0x200a   :  { %8602 = vmatmul.mubr.f32.vlgmr.msra.gmra.mrb[62].mxu0 %v14755_v47  ;;  %8673 = vmatmul.mubr.f32.vlgmr.msra.gmra.mrb[64].mxu1 %v14755_v47 }
0x200b   :  { %11487 = vmatpush1.bf16.msra.mxu0 %v14561_v30  ;;  %11519 = vmatpush1.bf16.msra.mxu1 %v14564_v1  ;;  %v8956_v30 = vld [vmem:[%s14896_s14 + $0x8] sm:$0xff] }
0x200c   :  { %11489 = vmatprep.subr.bf16.mxu0 %v14569_v7  ;;  %11521 = vmatprep.subr.bf16.mxu1 %v14571_v52 }
0x200d   :  { %8840 = vmatprep.mubr.f32.mxu0 %v12553_v0  ;;  %8911 = vmatprep.mubr.f32.mxu1 %v12553_v0  ;;  %v8955_v0 = vld [vmem:[%s14896_s14] sm:$0xff] }
0x200e   :  { %v11548_v1 = vpack.c.bf16 %v8956_v30, %v8955_v0 }
0x200f   :  { %11491 = vmatpush1.bf16.msra.mxu0 %v14573_v62  ;;  %11523 = vmatpush1.bf16.msra.mxu1 %v14576_v50 }
0x2010   :  { %11493 = vmatprep.subr.bf16.mxu0 %v14581_v14  ;;  %11525 = vmatprep.subr.bf16.mxu1 %v14583_v43 }
0x2013   :  { %11495 = vmatpush1.bf16.msra.mxu0 %v14585_v33  ;;  %11527 = vmatpush1.bf16.msra.mxu1 %v14588_v36 }
0x2014   :  { %11497 = vmatprep.subr.bf16.mxu0 %v14593_v39  ;;  %11529 = vmatprep.subr.bf16.mxu1 %v14595_v20 }
0x2017   :  { %11499 = vmatpush1.bf16.msra.mxu0 %v14597_v18  ;;  %11531 = vmatpush1.bf16.msra.mxu1 %v14600_v37 }
0x2018   :  { %11501 = vmatprep.subr.bf16.mxu0 %v14605_v44  ;;  %11533 = vmatprep.subr.bf16.mxu1 %v14607_v56 }
0x201b   :  { %11503 = vmatpush1.bf16.msra.mxu0 %v14609_v24  ;;  %11535 = vmatpush1.bf16.msra.mxu1 %v14612_v8 }
0x201c   :  { %11505 = vmatprep.subr.bf16.mxu0 %v14617_v4  ;;  %11537 = vmatprep.subr.bf16.mxu1 %v14619_v35 }
0x201f   :  { %11507 = vmatpush1.bf16.msra.mxu0 %v14621_v23  ;;  %11539 = vmatpush1.bf16.msra.mxu1 %v14624_v29 }
0x2020   :  { %11509 = vmatprep.subr.bf16.mxu0 %v14628_v46  ;;  %11541 = vmatprep.subr.bf16.mxu1 %v14630_v26 }
0x2023   :  { %11511 = vmatpush1.bf16.msra.mxu0 %v14633_v49  ;;  %11543 = vmatpush1.bf16.msra.mxu1 %v14637_v2  ;;  %v8957_v2 = vld [vmem:[%s14896_s14 + $0x10] sm:$0xff] }
0x2024   :  { %11513 = vmatprep.subr.bf16.mxu0 %v14639_v38  ;;  %11545 = vmatprep.subr.bf16.mxu1 %v14641_v16  ;;  %v8958_v38 = vld [vmem:[%s14896_s14 + $0x18] sm:$0xff] }
0x2025   :  { %v11552_v11 = vpack.c.bf16 %v8958_v38, %v8957_v2 }
0x2027   :  { %11515 = vmatpush1.bf16.msra.mxu0 %v14644_v22  ;;  %11547 = vmatpush1.bf16.msra.mxu1 %v14648_v19 }
0x2028   :  { %11549 = vmatprep.subr.bf16.mxu0 %v11548_v1 }
0x20dd   :  { %v8603_v7 = vpop.f32.mrb[62].mxu0  ;;  %v8674_v52 = vpop.f32.mrb[64].mxu1 }
0x20de   :  { %v11658_v62 = vadd.f32 %v8603_v7, %v14443_v58  ;;  %v8605_v50 = vpop.f32.mrb[63].mxu0  ;;  %v8676_v14 = vpop.f32.mrb[65].mxu1  ;;  %v11674_v39 = vadd.f32 %v8674_v52, %v14451_v31 }
0x20df   :  { %v11659_v43 = vadd.f32 %v8605_v50, %v14446_v27  ;;  %v11675_v20 = vadd.f32 %v8676_v14, %v14454_v3 }
0x20e0   :  { %v9233_v33 = vmul.f32 -1.442695, %v11658_v62  ;;  %v9235_v18 = vmul.f32 -1.442695, %v11674_v39 }
0x20e1   :  { %v9234_v36 = vmul.f32 -1.442695, %v11659_v43 }
0x20e2   :  { %12300 = vpow2.f32 %v9233_v33  ;;  %v9239_v33 = vld [vmem:[#allocation17] ss:$0 sm:$0xff] }
0x20e3   :  { %12302 = vpow2.f32 %v9234_v36 }
0x20e4   :  { %12304 = vtanh.f32 %v11675_v20 }
0x20e5   :  { %12306 = vpow2.f32 %v9235_v18 }
0x20ec   :  { %v12301_v37 = vpop.eup %12300 }
0x20ed   :  { %v8692_v44 = vadd.f32 1.0, %v12301_v37  ;;  %v12303_v56 = vpop.eup %12302 }
0x20ee   :  { %v8693_v24 = vadd.f32 1.0, %v12303_v56  ;;  %v12305_v8 = vpop.eup %12304 }
0x20ef   :  { %12308 = vrcp.f32 %v8692_v44  ;;  %v12307_v4 = vpop.eup %12306 }
0x20f0   :  { %12310 = vrcp.f32 %v8693_v24  ;;  %v8694_v46 = vadd.f32 1.0, %v12307_v4 }
0x20f2   :  { %12312 = vrcp.f32 %v8694_v46 }
0x20f9   :  { %v12309_v35 = vpop.eup %12308 }
0x20fa   :  { %v8703_v23 = vmul.f32 %v12309_v35, %v12305_v8  ;;  %v12311_v29 = vpop.eup %12310 }
0x20fb   :  { %v8702_v26 = vmul.f32 %v12311_v29, %v14752_v40 }
0x20fc   :  { %v12313_v16 = vpop.eup %12312 }
0x20fd   :  { %v14802_v49 = vadd.f32 %v8703_v23, %v8702_v26 }
0x20ff   :  { %12314 = vtanh.f32 %v14802_v49 }
0x2109   :  { %v12315_v22 = vpop.eup %12314 }
0x210a   :  { %v8706_v19 = vmul.f32 %v12315_v22, %v12313_v16 }
0x210c   :  { %8841 = vmatmul.mubr.f32.vlgmr.msra.gmra.mrb[64].mxu0 %v8706_v19  ;;  %8912 = vmatmul.mubr.f32.vlgmr.msra.gmra.mrb[66].mxu1 %v8706_v19 }
0x210d   :  { %11551 = vmatpush3.bf16.msra.mxu0 %v11548_v1  ;;  %9296 = vmatprep.mubr.f32.mxu0 %v14461_v53  ;;  %v8964_v53 = vld [vmem:[%s14896_s14 + $0x48] sm:$0xff] }
0x210e   :  { %11553 = vmatprep.subr.bf16.mxu0 %v11552_v11  ;;  %v11564_v54 = vpack.c.bf16 %v8964_v53, %v8963_v51 }
0x2111   :  { %11555 = vmatpush3.bf16.msra.mxu0 %v11552_v11 }
0x2112   :  { %11557 = vmatprep.subr.bf16.mxu0 %v11556_v32 }
0x2115   :  { %11559 = vmatpush3.bf16.msra.mxu0 %v11556_v32 }
0x2116   :  { %11561 = vmatprep.subr.bf16.mxu0 %v11560_v12 }
0x2119   :  { %11563 = vmatpush3.bf16.msra.mxu0 %v11560_v12 }
0x211a   :  { %11565 = vmatprep.subr.bf16.mxu0 %v11564_v54 }
0x211d   :  { %11567 = vmatpush3.bf16.msra.mxu0 %v11564_v54 }
0x211e   :  { %11569 = vmatprep.subr.bf16.mxu0 %v11568_v61 }
0x2121   :  { %11571 = vmatpush3.bf16.msra.mxu0 %v11568_v61 }
0x2122   :  { %11573 = vmatprep.subr.bf16.mxu0 %v11572_v13 }
0x2125   :  { %11575 = vmatpush3.bf16.msra.mxu0 %v11572_v13 }
0x2126   :  { %11577 = vmatprep.subr.bf16.mxu0 %v11576_v6 }
0x2129   :  { %11579 = vmatpush3.bf16.msra.mxu0 %v11576_v6 }
0x212c   :  { %9297 = vmatmul.mubr.f32.vlgmr.msra.gmra.mrb[66].mxu0 %v14507_v45 }
0x212d   :  { %9299 = vmatprep.mubr.f32.mxu0 %v14551_v55 }
0x2130   :  { %9300 = vmatmul.mubr.f32.gmra.mrb[68].mxu0 %v14663_v60 }
0x2131   :  { %9302 = vmatprep.mubr.f32.mxu0 %v14709_v42 }
0x2134   :  { %9303 = vmatmul.mubr.f32.gmra.mrb[70].mxu0 %v14755_v47 }
0x2135   :  { %9305 = vmatprep.mubr.f32.mxu0 %v8706_v19 }
0x21df   :  { %v8842_v28 = vpop.f32.mrb[64].mxu0  ;;  %v8913_v59 = vpop.f32.mrb[66].mxu1 }
0x21e0   :  { %v11660_v40 = vadd.f32 %v8842_v28, %v14443_v58  ;;  %v8844_v34 = vpop.f32.mrb[65].mxu0  ;;  %v8915_v57 = vpop.f32.mrb[67].mxu1  ;;  %v11676_v45 = vadd.f32 %v8913_v59, %v14451_v31 }
0x21e1   :  { %v11661_v0 = vadd.f32 %v8844_v34, %v14446_v27  ;;  %v11677_v55 = vadd.f32 %v8915_v57, %v14454_v3 }
0x21e2   :  { %v9236_v30 = vmul.f32 -1.442695, %v11660_v40  ;;  %v9238_v60 = vmul.f32 -1.442695, %v11676_v45 }
0x21e3   :  { %v9237_v1 = vmul.f32 -1.442695, %v11661_v0 }
0x21e4   :  { %12316 = vpow2.f32 %v9236_v30 }
0x21e5   :  { %12318 = vpow2.f32 %v9237_v1 }
0x21e6   :  { %12320 = vtanh.f32 %v11677_v55 }
0x21e7   :  { %12322 = vpow2.f32 %v9238_v60 }
0x21ee   :  { %v12317_v42 = vpop.eup %12316 }
0x21ef   :  { %v8931_v47 = vadd.f32 1.0, %v12317_v42  ;;  %v12319_v7 = vpop.eup %12318 }
0x21f0   :  { %v8932_v58 = vadd.f32 1.0, %v12319_v7  ;;  %v12321_v52 = vpop.eup %12320 }
0x21f1   :  { %12324 = vrcp.f32 %v8931_v47  ;;  %v12323_v62 = vpop.eup %12322 }
0x21f2   :  { %12326 = vrcp.f32 %v8932_v58  ;;  %v8933_v43 = vadd.f32 1.0, %v12323_v62 }
0x21f4   :  { %12328 = vrcp.f32 %v8933_v43 }
0x21fb   :  { %v12325_v27 = vpop.eup %12324 }
0x21fc   :  { %v8942_v50 = vmul.f32 %v12325_v27, %v12321_v52  ;;  %v12327_v14 = vpop.eup %12326 }
0x21fd   :  { %v8941_v31 = vmul.f32 %v12327_v14, %v14802_v49 }
0x21fe   :  { %v12329_v29 = vpop.eup %12328 }
0x21ff   :  { %v9298_v36 = vpop.f32.mrb[66].mxu0  ;;  %v8943_v3 = vadd.f32 %v8942_v50, %v8941_v31 }
0x2200   :  { %v9050_v39 = vadd.f32 %v9298_v36, %v9239_v33  ;;  %v9044_v20 = vpop.f32.mrb[67].mxu0 }
0x2201   :  { %v9045_v18 = vadd.f32 %v9239_v33, %v9044_v20  ;;  %12330 = vtanh.f32 %v8943_v3 }
0x2202   :  { %9084 = vst [vmem:[%s14904_s15 + $0x8] sm:$0xff] %v9050_v39 }
0x2203   :  { %9083 = vst [vmem:[%s14904_s15] sm:$0xff] %v9045_v18  ;;  %v9301_v37 = vpop.f32.mrb[68].mxu0 }
0x2204   :  { %v9060_v44 = vadd.f32 %v9301_v37, %v9239_v33  ;;  %v9054_v56 = vpop.f32.mrb[69].mxu0 }
0x2205   :  { %v9055_v24 = vadd.f32 %v9239_v33, %v9054_v56 }
0x2206   :  { %9086 = vst [vmem:[%s14904_s15 + $0x18] sm:$0xff] %v9060_v44 }
0x2207   :  { %9085 = vst [vmem:[%s14904_s15 + $0x10] sm:$0xff] %v9055_v24  ;;  %v9304_v8 = vpop.f32.mrb[70].mxu0 }
0x2208   :  { %v9070_v4 = vadd.f32 %v9304_v8, %v9239_v33  ;;  %v9064_v35 = vpop.f32.mrb[71].mxu0 }
0x2209   :  { %v9065_v23 = vadd.f32 %v9239_v33, %v9064_v35 }
0x220a   :  { %9088 = vst [vmem:[%s14904_s15 + $0x28] sm:$0xff] %v9070_v4 }
0x220b   :  { %9087 = vst [vmem:[%s14904_s15 + $0x20] sm:$0xff] %v9065_v23  ;;  %v12331_v46 = vpop.eup %12330 }
0x220c   :  { %v8945_v26 = vmul.f32 %v12331_v46, %v12329_v29 }
0x220e   :  { %9306 = vmatmul.mubr.f32.gmra.mrb[72].mxu0 %v8945_v26 }
0x22e1   :  { %v9307_v49 = vpop.f32.mrb[72].mxu0 }
0x22e2   :  { %v9080_v2 = vadd.f32 %v9307_v49, %v9239_v33  ;;  %v9074_v38 = vpop.f32.mrb[73].mxu0 }
0x22e3   :  { %v9075_v16 = vadd.f32 %v9239_v33, %v9074_v38 }
0x22e4   :  { %9090 = vst [vmem:[%s14904_s15 + $0x38] sm:$0xff] %v9080_v2 }
0x22e5   :  { %9089 = vst [vmem:[%s14904_s15 + $0x30] sm:$0xff] %v9075_v16 }
0x22e6   :  { %9095 = vsyncpa [#allocation5], 1 }
0x22e7   :  { %9096 = vsyncpa [#allocation7], 1 }
0x22e8   :  { %9097 = vsyncpa [#allocation10], 1 }
0x22e9   :  { %9098 = vsyncpa [#allocation13], 1 }
0x22ea   :  { %9099 = vsyncpa [#allocation16], 1 }

</bundles_post_ra>
